<compile_context>
chip_gen: v6e
topology: v6e:2x2x1
jax: 0.10.0
libtpu: 0.0.40
codegen_flags: <defaults>
</compile_context>

<pallas_src>
import functools
import math

import jax
import jax.numpy as jnp
from jax.experimental import pallas as pl
from jax.experimental.pallas import tpu as pltpu

# Static sizes implied by the module: Linear(8*120, 40) forces L_out3 = 120,
# hence L_in = 120 + 2 + 2 + 4 = 128.
C_IN, L_IN = 32, 128
C1, K1, L1 = 24, 5, 124
C2, K2, L2 = 16, 3, 122
C3, K3, L3 = 8, 3, 120
FEAT = 40
EPS = 1e-5


# ---------------------------------------------------------------------------
# Fused kernel: conv stack (folded BN scale) + shift + ReLU + Linear,
# processing a whole tb-sample block per grid step (no per-sample loop).
# ---------------------------------------------------------------------------
def _fused_kernel(tb,
                  x_ref, w1_ref, b1_ref,
                  w2_ref, b2_ref,
                  w3_ref, b3_ref,
                  wfc_ref, bfc_ref,
                  out_ref):
    x = x_ref[...]                                              # (tb, 32, 128) bf16

    def conv_bn_relu(h, w_ref, b_ref, K, l_out):
        # Block-level im2col: K lane-offset slices over the full (tb, C, L)
        # tile, concatenated along the channel (sublane) axis.
        p = jnp.concatenate([h[:, :, k:k + l_out] for k in range(K)], axis=1)
        # Batched MXU matmul (batch = tb samples), f32 accumulation.
        wb = jnp.broadcast_to(w_ref[...], (tb,) + w_ref.shape)  # hoisted broadcast
        a = jnp.einsum("bok,bkl->bol", wb, p,
                       preferred_element_type=jnp.float32)
        # BN scale is pre-folded into w; only shift + ReLU remain.
        return jnp.maximum(a + b_ref[...][None], 0.0)

    h1 = conv_bn_relu(x, w1_ref, b1_ref, K1, L1).astype(jnp.bfloat16)   # (tb,24,124)
    h2 = conv_bn_relu(h1, w2_ref, b2_ref, K2, L2).astype(jnp.bfloat16)  # (tb,16,122)
    h3 = conv_bn_relu(h2, w3_ref, b3_ref, K3, L3)                       # (tb, 8,120) f32

    # Fused Linear(960 -> 40). torch's channel-major flatten is folded into
    # wfc_r (C3, L3, FEAT): out[s,f] = sum_c h3[s,c,:] @ wfc_r[c,:,f] + bias.
    # (Per-channel middle-axis slice kept: only 8 small strided reads / step.)
    acc = jnp.zeros((tb, FEAT), jnp.float32)
    for c in range(C3):
        acc = acc + jnp.dot(h3[:, c, :], wfc_ref[c],
                            preferred_element_type=jnp.float32)
    out_ref[...] = acc + bfc_ref[...]


# ---------------------------------------------------------------------------
# Wrapper
# ---------------------------------------------------------------------------
@functools.partial(jax.jit, static_argnames=("tb",))
def bio_feature_extractor(x_ncl, p, tb=64):
    """x_ncl: (B, 32, 128) torch-style NCL input. Returns (B, 40)."""
    B = x_ncl.shape[0]
    tb = max(8, min(int(tb), max(B, 8)))
    tb = ((tb + 7) // 8) * 8                       # sublane-aligned block size
    B_pad = pl.cdiv(B, tb) * tb

    x = x_ncl.astype(jnp.bfloat16)                 # NCL layout kept; bf16 for MXU
    if B_pad != B:
        x = jnp.pad(x, ((0, B_pad - B), (0, 0), (0, 0)))

    kernel = functools.partial(_fused_kernel, tb)
    out = pl.pallas_call(
        kernel,
        out_shape=jax.ShapeDtypeStruct((B_pad, FEAT), jnp.float32),
        grid=(B_pad // tb,),
        in_specs=[
            pl.BlockSpec((tb, C_IN, L_IN), lambda b: (b, 0, 0)),     # x block
            pl.BlockSpec((C1, K1 * C_IN), lambda b: (0, 0)),         # w1 (scaled, im2col)
            pl.BlockSpec((C1, 1), lambda b: (0, 0)),                 # shift1
            pl.BlockSpec((C2, K2 * C1), lambda b: (0, 0)),           # w2
            pl.BlockSpec((C2, 1), lambda b: (0, 0)),                 # shift2
            pl.BlockSpec((C3, K3 * C2), lambda b: (0, 0)),           # w3
            pl.BlockSpec((C3, 1), lambda b: (0, 0)),                 # shift3
            pl.BlockSpec((C3, L3, FEAT), lambda b: (0, 0, 0)),       # fc weight
            pl.BlockSpec((1, FEAT), lambda b: (0, 0)),               # fc bias
        ],
        out_specs=pl.BlockSpec((tb, FEAT), lambda b: (b, 0)),
        compiler_params=pltpu.CompilerParams(
            dimension_semantics=("parallel",),
            vmem_limit_bytes=32 * 1024 * 1024),
    )(x, p["w1"], p["b1"], p["w2"], p["b2"], p["w3"], p["b3"],
      p["wfc_r"], p["bfc"])
    return out[:B]


# ---------------------------------------------------------------------------
# Deterministic parameter init (synthetic; matches torch shapes / semantics).
# Eval-mode BN: scale folded into conv weights, shift kept separate.
# ---------------------------------------------------------------------------
def init_params(key):
    keys = iter(jax.random.split(key, 24))

    def conv_bn(cin, cout, K):
        w = jax.random.normal(next(keys), (cout, cin, K), jnp.float32) \
            * (1.0 / math.sqrt(cin * K))                      # torch (Cout, Cin, K)
        bias = 0.05 * jax.random.normal(next(keys), (cout,), jnp.float32)
        gamma = 1.0 + 0.1 * jax.random.normal(next(keys), (cout,), jnp.float32)
        beta = 0.1 * jax.random.normal(next(keys), (cout,), jnp.float32)
        mean = 0.1 * jax.random.normal(next(keys), (cout,), jnp.float32)
        var = 0.5 + jax.random.uniform(next(keys), (cout,), jnp.float32)
        scale = gamma / jnp.sqrt(var + EPS)                   # eval-mode BN fold
        shift = beta + scale * (bias - mean)
        # im2col weight: w_i2c[o, k*cin + ci] = w[o, ci, k]; BN scale folded in.
        w_i2c = jnp.transpose(w, (0, 2, 1)).reshape(cout, K * cin)
        w_i2c = (w_i2c * scale[:, None]).astype(jnp.bfloat16)
        return w_i2c, shift[:, None].astype(jnp.float32)

    w1, b1 = conv_bn(C_IN, C1, K1)
    w2, b2 = conv_bn(C1, C2, K2)
    w3, b3 = conv_bn(C2, C3, K3)

    wfc = jax.random.normal(next(keys), (FEAT, C3 * L3), jnp.float32) \
        * (1.0 / math.sqrt(C3 * L3))                          # torch (40, 960)
    bfc = 0.05 * jax.random.normal(next(keys), (FEAT,), jnp.float32)
    # torch.flatten index = c*L3 + l  ->  wfc_r[c, l, f] = wfc[f, c*L3 + l]
    wfc_r = jnp.transpose(wfc.reshape(FEAT, C3, L3), (1, 2, 0))  # (8, 120, 40) f32

    return dict(w1=w1, b1=b1, w2=w2, b2=b2, w3=w3, b3=b3,
                wfc_r=wfc_r, bfc=bfc[None, :])


# ---------------------------------------------------------------------------
# Plain-JAX reference (same math incl. bf16 rounding points) for sanity check
# ---------------------------------------------------------------------------
def reference(x_ncl, p):
    f32 = lambda a: a.astype(jnp.float32)
    rnd = lambda a: f32(a.astype(jnp.bfloat16))     # mirror kernel bf16 rounding
    hi = jax.lax.Precision.HIGHEST
    x = rnd(x_ncl)                                  # (B, C_in, L_in)

    def layer(h, w_i2c, shift, K, lout):
        patches = jnp.concatenate([h[:, :, k:k + lout] for k in range(K)], axis=1)
        a = jnp.einsum("ok,bkl->bol", f32(w_i2c), patches, precision=hi)
        return jnp.maximum(a + shift[None], 0.0)

    h = layer(x, p["w1"], p["b1"], K1, L1)
    h = layer(rnd(h), p["w2"], p["b2"], K2, L2)
    h = layer(rnd(h), p["w3"], p["b3"], K3, L3)
    flat = h.reshape(h.shape[0], C3 * L3)           # (C, L) layout == torch flatten
    return jnp.dot(flat, p["wfc_r"].reshape(C3 * L3, FEAT), precision=hi) + p["bfc"]


if __name__ == "__main__":
    key = jax.random.PRNGKey(0)
    kx, kp = jax.random.split(key)
    B = 64                                                        # 2 grid steps of 32
    x = jax.random.normal(kx, (B, C_IN, L_IN), jnp.float32)       # torch NCL input
    params = init_params(kp)

    y = bio_feature_extractor(x, params, tb=32)                   # grid=(2,): v7x-friendly
    y = jax.block_until_ready(y)

    y_ref = reference(x, params)
    assert y.shape == (B, FEAT)
    assert bool(jnp.all(jnp.isfinite(y)))
    err = float(jnp.max(jnp.abs(y - y_ref)))
    assert jnp.allclose(y, y_ref, rtol=1e-2, atol=1e-2), f"max abs err {err}"
    print("KERNEL_OK")
</pallas_src>

<mosaic_0001>
module attributes {stable_mosaic.version = 11 : i64} {
  func.func @_fused_kernel(%arg0: i32, %arg1: memref<32x32x128xbf16, #tpu.memory_space<vmem>>, %arg2: memref<24x160xbf16, #tpu.memory_space<vmem>>, %arg3: memref<24x1xf32, #tpu.memory_space<vmem>>, %arg4: memref<16x72xbf16, #tpu.memory_space<vmem>>, %arg5: memref<16x1xf32, #tpu.memory_space<vmem>>, %arg6: memref<8x48xbf16, #tpu.memory_space<vmem>>, %arg7: memref<8x1xf32, #tpu.memory_space<vmem>>, %arg8: memref<8x120x40xf32, #tpu.memory_space<vmem>>, %arg9: memref<1x40xf32, #tpu.memory_space<vmem>>, %arg10: memref<32x40xf32, #tpu.memory_space<vmem>>) attributes {dimension_semantics = [#tpu.dimension_semantics<parallel>], iteration_bounds = array<i64: 2>, scalar_prefetch = 0 : i64, scratch_operands = 0 : i64, tpu.core_type = #tpu.core_type<tc>, window_params = [{transform_indices = @transform_0, window_bounds = array<i64: 32, 32, 128>}, {pipeline_mode = #tpu.pipeline_mode<synchronous>, transform_indices = @transform_1, window_bounds = array<i64: 24, 160>}, {pipeline_mode = #tpu.pipeline_mode<synchronous>, transform_indices = @transform_2, window_bounds = array<i64: 24, 1>}, {pipeline_mode = #tpu.pipeline_mode<synchronous>, transform_indices = @transform_3, window_bounds = array<i64: 16, 72>}, {pipeline_mode = #tpu.pipeline_mode<synchronous>, transform_indices = @transform_4, window_bounds = array<i64: 16, 1>}, {pipeline_mode = #tpu.pipeline_mode<synchronous>, transform_indices = @transform_5, window_bounds = array<i64: 8, 48>}, {pipeline_mode = #tpu.pipeline_mode<synchronous>, transform_indices = @transform_6, window_bounds = array<i64: 8, 1>}, {pipeline_mode = #tpu.pipeline_mode<synchronous>, transform_indices = @transform_7, window_bounds = array<i64: 8, 120, 40>}, {pipeline_mode = #tpu.pipeline_mode<synchronous>, transform_indices = @transform_8, window_bounds = array<i64: 1, 40>}, {transform_indices = @transform_9, window_bounds = array<i64: 32, 40>}]} {
    %c0 = arith.constant 0 : index
    %c0_0 = arith.constant 0 : index
    %c0_1 = arith.constant 0 : index
    %0 = vector.load %arg1[%c0, %c0_0, %c0_1] : memref<32x32x128xbf16, #tpu.memory_space<vmem>>, vector<32x32x128xbf16>
    %1 = vector.extract_strided_slice %0 {offsets = [0, 0, 0], sizes = [32, 32, 124], strides = [1, 1, 1]} : vector<32x32x128xbf16> to vector<32x32x124xbf16>
    %2 = vector.extract_strided_slice %0 {offsets = [0, 0, 1], sizes = [32, 32, 124], strides = [1, 1, 1]} : vector<32x32x128xbf16> to vector<32x32x124xbf16>
    %3 = vector.extract_strided_slice %0 {offsets = [0, 0, 2], sizes = [32, 32, 124], strides = [1, 1, 1]} : vector<32x32x128xbf16> to vector<32x32x124xbf16>
    %4 = vector.extract_strided_slice %0 {offsets = [0, 0, 3], sizes = [32, 32, 124], strides = [1, 1, 1]} : vector<32x32x128xbf16> to vector<32x32x124xbf16>
    %5 = vector.extract_strided_slice %0 {offsets = [0, 0, 4], sizes = [32, 32, 124], strides = [1, 1, 1]} : vector<32x32x128xbf16> to vector<32x32x124xbf16>
    %6 = tpu.concatenate %1, %2, %3, %4, %5 in 1 : vector<32x32x124xbf16>, vector<32x32x124xbf16>, vector<32x32x124xbf16>, vector<32x32x124xbf16>, vector<32x32x124xbf16> -> vector<32x160x124xbf16>
    %c0_2 = arith.constant 0 : index
    %c0_3 = arith.constant 0 : index
    %7 = vector.load %arg2[%c0_2, %c0_3] : memref<24x160xbf16, #tpu.memory_space<vmem>>, vector<24x160xbf16>
    %8 = vector.shape_cast %7 : vector<24x160xbf16> to vector<1x24x160xbf16>
    %9 = vector.broadcast %8 : vector<1x24x160xbf16> to vector<32x24x160xbf16>
    "tpu.trace_start"() <{level = 10 : i32, message = "bok,bkl->bol"}> : () -> ()
    %cst = arith.constant dense<0.000000e+00> : vector<32x24x124xf32>
    %10 = tpu.matmul %9, %6, %cst {dimension_numbers = #tpu.dot_dimension_numbers<[2], [1], [1], [2], [0, 0, 0, 1, 1, 2], [0], [0]>} : vector<32x24x160xbf16>, vector<32x160x124xbf16>, vector<32x24x124xf32> -> vector<32x24x124xf32>
    "tpu.trace_stop"() : () -> ()
    %c0_4 = arith.constant 0 : index
    %c0_5 = arith.constant 0 : index
    %11 = vector.load %arg3[%c0_4, %c0_5] : memref<24x1xf32, #tpu.memory_space<vmem>>, vector<24x1xf32>
    %12 = vector.shape_cast %11 : vector<24x1xf32> to vector<1x24x1xf32>
    %13 = vector.broadcast %12 : vector<1x24x1xf32> to vector<32x24x124xf32>
    %14 = arith.addf %10, %13 : vector<32x24x124xf32>
    %cst_6 = arith.constant 0.000000e+00 : f32
    %15 = vector.broadcast %cst_6 : f32 to vector<32x24x124xf32>
    %16 = arith.maximumf %14, %15 : vector<32x24x124xf32>
    %17 = arith.truncf %16 : vector<32x24x124xf32> to vector<32x24x124xbf16>
    %18 = vector.extract_strided_slice %17 {offsets = [0, 0, 0], sizes = [32, 24, 122], strides = [1, 1, 1]} : vector<32x24x124xbf16> to vector<32x24x122xbf16>
    %19 = vector.extract_strided_slice %17 {offsets = [0, 0, 1], sizes = [32, 24, 122], strides = [1, 1, 1]} : vector<32x24x124xbf16> to vector<32x24x122xbf16>
    %20 = vector.extract_strided_slice %17 {offsets = [0, 0, 2], sizes = [32, 24, 122], strides = [1, 1, 1]} : vector<32x24x124xbf16> to vector<32x24x122xbf16>
    %21 = tpu.concatenate %18, %19, %20 in 1 : vector<32x24x122xbf16>, vector<32x24x122xbf16>, vector<32x24x122xbf16> -> vector<32x72x122xbf16>
    %c0_7 = arith.constant 0 : index
    %c0_8 = arith.constant 0 : index
    %22 = vector.load %arg4[%c0_7, %c0_8] : memref<16x72xbf16, #tpu.memory_space<vmem>>, vector<16x72xbf16>
    %23 = vector.shape_cast %22 : vector<16x72xbf16> to vector<1x16x72xbf16>
    %24 = vector.broadcast %23 : vector<1x16x72xbf16> to vector<32x16x72xbf16>
    "tpu.trace_start"() <{level = 10 : i32, message = "bok,bkl->bol"}> : () -> ()
    %cst_9 = arith.constant dense<0.000000e+00> : vector<32x16x122xf32>
    %25 = tpu.matmul %24, %21, %cst_9 {dimension_numbers = #tpu.dot_dimension_numbers<[2], [1], [1], [2], [0, 0, 0, 1, 1, 2], [0], [0]>} : vector<32x16x72xbf16>, vector<32x72x122xbf16>, vector<32x16x122xf32> -> vector<32x16x122xf32>
    "tpu.trace_stop"() : () -> ()
    %c0_10 = arith.constant 0 : index
    %c0_11 = arith.constant 0 : index
    %26 = vector.load %arg5[%c0_10, %c0_11] : memref<16x1xf32, #tpu.memory_space<vmem>>, vector<16x1xf32>
    %27 = vector.shape_cast %26 : vector<16x1xf32> to vector<1x16x1xf32>
    %28 = vector.broadcast %27 : vector<1x16x1xf32> to vector<32x16x122xf32>
    %29 = arith.addf %25, %28 : vector<32x16x122xf32>
    %cst_12 = arith.constant 0.000000e+00 : f32
    %30 = vector.broadcast %cst_12 : f32 to vector<32x16x122xf32>
    %31 = arith.maximumf %29, %30 : vector<32x16x122xf32>
    %32 = arith.truncf %31 : vector<32x16x122xf32> to vector<32x16x122xbf16>
    %33 = vector.extract_strided_slice %32 {offsets = [0, 0, 0], sizes = [32, 16, 120], strides = [1, 1, 1]} : vector<32x16x122xbf16> to vector<32x16x120xbf16>
    %34 = vector.extract_strided_slice %32 {offsets = [0, 0, 1], sizes = [32, 16, 120], strides = [1, 1, 1]} : vector<32x16x122xbf16> to vector<32x16x120xbf16>
    %35 = vector.extract_strided_slice %32 {offsets = [0, 0, 2], sizes = [32, 16, 120], strides = [1, 1, 1]} : vector<32x16x122xbf16> to vector<32x16x120xbf16>
    %36 = tpu.concatenate %33, %34, %35 in 1 : vector<32x16x120xbf16>, vector<32x16x120xbf16>, vector<32x16x120xbf16> -> vector<32x48x120xbf16>
    %c0_13 = arith.constant 0 : index
    %c0_14 = arith.constant 0 : index
    %37 = vector.load %arg6[%c0_13, %c0_14] : memref<8x48xbf16, #tpu.memory_space<vmem>>, vector<8x48xbf16>
    %38 = vector.shape_cast %37 : vector<8x48xbf16> to vector<1x8x48xbf16>
    %39 = vector.broadcast %38 : vector<1x8x48xbf16> to vector<32x8x48xbf16>
    "tpu.trace_start"() <{level = 10 : i32, message = "bok,bkl->bol"}> : () -> ()
    %cst_15 = arith.constant dense<0.000000e+00> : vector<32x8x120xf32>
    %40 = tpu.matmul %39, %36, %cst_15 {dimension_numbers = #tpu.dot_dimension_numbers<[2], [1], [1], [2], [0, 0, 0, 1, 1, 2], [0], [0]>} : vector<32x8x48xbf16>, vector<32x48x120xbf16>, vector<32x8x120xf32> -> vector<32x8x120xf32>
    "tpu.trace_stop"() : () -> ()
    %c0_16 = arith.constant 0 : index
    %c0_17 = arith.constant 0 : index
    %41 = vector.load %arg7[%c0_16, %c0_17] : memref<8x1xf32, #tpu.memory_space<vmem>>, vector<8x1xf32>
    %42 = vector.shape_cast %41 : vector<8x1xf32> to vector<1x8x1xf32>
    %43 = vector.broadcast %42 : vector<1x8x1xf32> to vector<32x8x120xf32>
    %44 = arith.addf %40, %43 : vector<32x8x120xf32>
    %cst_18 = arith.constant 0.000000e+00 : f32
    %45 = vector.broadcast %cst_18 : f32 to vector<32x8x120xf32>
    %46 = arith.maximumf %44, %45 : vector<32x8x120xf32>
    %cst_19 = arith.constant 0.000000e+00 : f32
    %47 = vector.broadcast %cst_19 : f32 to vector<32x40xf32>
    %48 = vector.extract_strided_slice %46 {offsets = [0, 0, 0], sizes = [32, 1, 120], strides = [1, 1, 1]} : vector<32x8x120xf32> to vector<32x1x120xf32>
    %49 = vector.shape_cast %48 : vector<32x1x120xf32> to vector<32x120xf32>
    %c0_20 = arith.constant 0 : index
    %c0_21 = arith.constant 0 : index
    %c0_22 = arith.constant 0 : index
    %50 = vector.load %arg8[%c0_20, %c0_21, %c0_22] : memref<8x120x40xf32, #tpu.memory_space<vmem>>, vector<1x120x40xf32>
    %51 = vector.shape_cast %50 : vector<1x120x40xf32> to vector<120x40xf32>
    %cst_23 = arith.constant dense<0.000000e+00> : vector<32x40xf32>
    %52 = tpu.matmul %49, %51, %cst_23 {dimension_numbers = #tpu.dot_dimension_numbers<[1], [0], [0], [1], [0, 0, 1, 1], [], []>} : vector<32x120xf32>, vector<120x40xf32>, vector<32x40xf32> -> vector<32x40xf32>
    %53 = arith.addf %47, %52 : vector<32x40xf32>
    %54 = vector.extract_strided_slice %46 {offsets = [0, 1, 0], sizes = [32, 1, 120], strides = [1, 1, 1]} : vector<32x8x120xf32> to vector<32x1x120xf32>
    %55 = vector.shape_cast %54 : vector<32x1x120xf32> to vector<32x120xf32>
    %c1 = arith.constant 1 : index
    %c0_24 = arith.constant 0 : index
    %c0_25 = arith.constant 0 : index
    %56 = vector.load %arg8[%c1, %c0_24, %c0_25] : memref<8x120x40xf32, #tpu.memory_space<vmem>>, vector<1x120x40xf32>
    %57 = vector.shape_cast %56 : vector<1x120x40xf32> to vector<120x40xf32>
    %cst_26 = arith.constant dense<0.000000e+00> : vector<32x40xf32>
    %58 = tpu.matmul %55, %57, %cst_26 {dimension_numbers = #tpu.dot_dimension_numbers<[1], [0], [0], [1], [0, 0, 1, 1], [], []>} : vector<32x120xf32>, vector<120x40xf32>, vector<32x40xf32> -> vector<32x40xf32>
    %59 = arith.addf %53, %58 : vector<32x40xf32>
    %60 = vector.extract_strided_slice %46 {offsets = [0, 2, 0], sizes = [32, 1, 120], strides = [1, 1, 1]} : vector<32x8x120xf32> to vector<32x1x120xf32>
    %61 = vector.shape_cast %60 : vector<32x1x120xf32> to vector<32x120xf32>
    %c2 = arith.constant 2 : index
    %c0_27 = arith.constant 0 : index
    %c0_28 = arith.constant 0 : index
    %62 = vector.load %arg8[%c2, %c0_27, %c0_28] : memref<8x120x40xf32, #tpu.memory_space<vmem>>, vector<1x120x40xf32>
    %63 = vector.shape_cast %62 : vector<1x120x40xf32> to vector<120x40xf32>
    %cst_29 = arith.constant dense<0.000000e+00> : vector<32x40xf32>
    %64 = tpu.matmul %61, %63, %cst_29 {dimension_numbers = #tpu.dot_dimension_numbers<[1], [0], [0], [1], [0, 0, 1, 1], [], []>} : vector<32x120xf32>, vector<120x40xf32>, vector<32x40xf32> -> vector<32x40xf32>
    %65 = arith.addf %59, %64 : vector<32x40xf32>
    %66 = vector.extract_strided_slice %46 {offsets = [0, 3, 0], sizes = [32, 1, 120], strides = [1, 1, 1]} : vector<32x8x120xf32> to vector<32x1x120xf32>
    %67 = vector.shape_cast %66 : vector<32x1x120xf32> to vector<32x120xf32>
    %c3 = arith.constant 3 : index
    %c0_30 = arith.constant 0 : index
    %c0_31 = arith.constant 0 : index
    %68 = vector.load %arg8[%c3, %c0_30, %c0_31] : memref<8x120x40xf32, #tpu.memory_space<vmem>>, vector<1x120x40xf32>
    %69 = vector.shape_cast %68 : vector<1x120x40xf32> to vector<120x40xf32>
    %cst_32 = arith.constant dense<0.000000e+00> : vector<32x40xf32>
    %70 = tpu.matmul %67, %69, %cst_32 {dimension_numbers = #tpu.dot_dimension_numbers<[1], [0], [0], [1], [0, 0, 1, 1], [], []>} : vector<32x120xf32>, vector<120x40xf32>, vector<32x40xf32> -> vector<32x40xf32>
    %71 = arith.addf %65, %70 : vector<32x40xf32>
    %72 = vector.extract_strided_slice %46 {offsets = [0, 4, 0], sizes = [32, 1, 120], strides = [1, 1, 1]} : vector<32x8x120xf32> to vector<32x1x120xf32>
    %73 = vector.shape_cast %72 : vector<32x1x120xf32> to vector<32x120xf32>
    %c4 = arith.constant 4 : index
    %c0_33 = arith.constant 0 : index
    %c0_34 = arith.constant 0 : index
    %74 = vector.load %arg8[%c4, %c0_33, %c0_34] : memref<8x120x40xf32, #tpu.memory_space<vmem>>, vector<1x120x40xf32>
    %75 = vector.shape_cast %74 : vector<1x120x40xf32> to vector<120x40xf32>
    %cst_35 = arith.constant dense<0.000000e+00> : vector<32x40xf32>
    %76 = tpu.matmul %73, %75, %cst_35 {dimension_numbers = #tpu.dot_dimension_numbers<[1], [0], [0], [1], [0, 0, 1, 1], [], []>} : vector<32x120xf32>, vector<120x40xf32>, vector<32x40xf32> -> vector<32x40xf32>
    %77 = arith.addf %71, %76 : vector<32x40xf32>
    %78 = vector.extract_strided_slice %46 {offsets = [0, 5, 0], sizes = [32, 1, 120], strides = [1, 1, 1]} : vector<32x8x120xf32> to vector<32x1x120xf32>
    %79 = vector.shape_cast %78 : vector<32x1x120xf32> to vector<32x120xf32>
    %c5 = arith.constant 5 : index
    %c0_36 = arith.constant 0 : index
    %c0_37 = arith.constant 0 : index
    %80 = vector.load %arg8[%c5, %c0_36, %c0_37] : memref<8x120x40xf32, #tpu.memory_space<vmem>>, vector<1x120x40xf32>
    %81 = vector.shape_cast %80 : vector<1x120x40xf32> to vector<120x40xf32>
    %cst_38 = arith.constant dense<0.000000e+00> : vector<32x40xf32>
    %82 = tpu.matmul %79, %81, %cst_38 {dimension_numbers = #tpu.dot_dimension_numbers<[1], [0], [0], [1], [0, 0, 1, 1], [], []>} : vector<32x120xf32>, vector<120x40xf32>, vector<32x40xf32> -> vector<32x40xf32>
    %83 = arith.addf %77, %82 : vector<32x40xf32>
    %84 = vector.extract_strided_slice %46 {offsets = [0, 6, 0], sizes = [32, 1, 120], strides = [1, 1, 1]} : vector<32x8x120xf32> to vector<32x1x120xf32>
    %85 = vector.shape_cast %84 : vector<32x1x120xf32> to vector<32x120xf32>
    %c6 = arith.constant 6 : index
    %c0_39 = arith.constant 0 : index
    %c0_40 = arith.constant 0 : index
    %86 = vector.load %arg8[%c6, %c0_39, %c0_40] : memref<8x120x40xf32, #tpu.memory_space<vmem>>, vector<1x120x40xf32>
    %87 = vector.shape_cast %86 : vector<1x120x40xf32> to vector<120x40xf32>
    %cst_41 = arith.constant dense<0.000000e+00> : vector<32x40xf32>
    %88 = tpu.matmul %85, %87, %cst_41 {dimension_numbers = #tpu.dot_dimension_numbers<[1], [0], [0], [1], [0, 0, 1, 1], [], []>} : vector<32x120xf32>, vector<120x40xf32>, vector<32x40xf32> -> vector<32x40xf32>
    %89 = arith.addf %83, %88 : vector<32x40xf32>
    %90 = vector.extract_strided_slice %46 {offsets = [0, 7, 0], sizes = [32, 1, 120], strides = [1, 1, 1]} : vector<32x8x120xf32> to vector<32x1x120xf32>
    %91 = vector.shape_cast %90 : vector<32x1x120xf32> to vector<32x120xf32>
    %c7 = arith.constant 7 : index
    %c0_42 = arith.constant 0 : index
    %c0_43 = arith.constant 0 : index
    %92 = vector.load %arg8[%c7, %c0_42, %c0_43] : memref<8x120x40xf32, #tpu.memory_space<vmem>>, vector<1x120x40xf32>
    %93 = vector.shape_cast %92 : vector<1x120x40xf32> to vector<120x40xf32>
    %cst_44 = arith.constant dense<0.000000e+00> : vector<32x40xf32>
    %94 = tpu.matmul %91, %93, %cst_44 {dimension_numbers = #tpu.dot_dimension_numbers<[1], [0], [0], [1], [0, 0, 1, 1], [], []>} : vector<32x120xf32>, vector<120x40xf32>, vector<32x40xf32> -> vector<32x40xf32>
    %95 = arith.addf %89, %94 : vector<32x40xf32>
    %c0_45 = arith.constant 0 : index
    %c0_46 = arith.constant 0 : index
    %96 = vector.load %arg9[%c0_45, %c0_46] : memref<1x40xf32, #tpu.memory_space<vmem>>, vector<1x40xf32>
    %97 = vector.broadcast %96 : vector<1x40xf32> to vector<32x40xf32>
    %98 = arith.addf %95, %97 : vector<32x40xf32>
    %c0_47 = arith.constant 0 : index
    %c0_48 = arith.constant 0 : index
    %99 = vector.load %arg10[%c0_47, %c0_48] : memref<32x40xf32, #tpu.memory_space<vmem>>, vector<32x40xf32>
    tpu.vector_store %arg10[%c0_47, %c0_48], %98 {strides = array<i32>} : memref<32x40xf32, #tpu.memory_space<vmem>>, vector<32x40xf32>,
    return
  }
  func.func @transform_0(%arg0: i32) -> (i32, i32, i32) {
    %c0_i32 = arith.constant 0 : i32
    %c0_i32_0 = arith.constant 0 : i32
    %c0_i32_1 = arith.constant 0 : i32
    return %arg0, %c0_i32, %c0_i32_0 : i32, i32, i32
  }
  func.func @transform_1(%arg0: i32) -> (i32, i32) {
    %c0_i32 = arith.constant 0 : i32
    %c0_i32_0 = arith.constant 0 : i32
    %c0_i32_1 = arith.constant 0 : i32
    return %c0_i32, %c0_i32_0 : i32, i32
  }
  func.func @transform_2(%arg0: i32) -> (i32, i32) {
    %c0_i32 = arith.constant 0 : i32
    %c0_i32_0 = arith.constant 0 : i32
    %c0_i32_1 = arith.constant 0 : i32
    return %c0_i32, %c0_i32_0 : i32, i32
  }
  func.func @transform_3(%arg0: i32) -> (i32, i32) {
    %c0_i32 = arith.constant 0 : i32
    %c0_i32_0 = arith.constant 0 : i32
    %c0_i32_1 = arith.constant 0 : i32
    return %c0_i32, %c0_i32_0 : i32, i32
  }
  func.func @transform_4(%arg0: i32) -> (i32, i32) {
    %c0_i32 = arith.constant 0 : i32
    %c0_i32_0 = arith.constant 0 : i32
    %c0_i32_1 = arith.constant 0 : i32
    return %c0_i32, %c0_i32_0 : i32, i32
  }
  func.func @transform_5(%arg0: i32) -> (i32, i32) {
    %c0_i32 = arith.constant 0 : i32
    %c0_i32_0 = arith.constant 0 : i32
    %c0_i32_1 = arith.constant 0 : i32
    return %c0_i32, %c0_i32_0 : i32, i32
  }
  func.func @transform_6(%arg0: i32) -> (i32, i32) {
    %c0_i32 = arith.constant 0 : i32
    %c0_i32_0 = arith.constant 0 : i32
    %c0_i32_1 = arith.constant 0 : i32
    return %c0_i32, %c0_i32_0 : i32, i32
  }
  func.func @transform_7(%arg0: i32) -> (i32, i32, i32) {
    %c0_i32 = arith.constant 0 : i32
    %c0_i32_0 = arith.constant 0 : i32
    %c0_i32_1 = arith.constant 0 : i32
    %c0_i32_2 = arith.constant 0 : i32
    return %c0_i32, %c0_i32_0, %c0_i32_1 : i32, i32, i32
  }
  func.func @transform_8(%arg0: i32) -> (i32, i32) {
    %c0_i32 = arith.constant 0 : i32
    %c0_i32_0 = arith.constant 0 : i32
    %c0_i32_1 = arith.constant 0 : i32
    return %c0_i32, %c0_i32_0 : i32, i32
  }
  func.func @transform_9(%arg0: i32) -> (i32, i32) {
    %c0_i32 = arith.constant 0 : i32
    %c0_i32_0 = arith.constant 0 : i32
    return %arg0, %c0_i32 : i32, i32
  }
}

</mosaic_0001>

<bundles_post_ra>
// kernel: bio_feature_extractor.1
= control target key start
LH: loop header
LB: loop body
LE: loop exit
PB: predicated region body
PF: predicated region fallthrough
CT: control target
= control target key end

     0   :  { %s10565_s30 = smov 0   ;;  %s15326_s0 = inlined_call_operand.vmem [shape: bf16[64,32,128], index: 0, kind: input, shape index: {}]   ;;  %s15327_s1 = inlined_call_operand.vmem [shape: bf16[24,160], index: 1, kind: input, shape index: {}]   ;;  %s15328_s2 = inlined_call_operand.vmem [shape: f32[24,1], index: 2, kind: input, shape index: {}]   ;;  %s15329_s3 = inlined_call_operand.vmem [shape: bf16[16,72], index: 3, kind: input, shape index: {}]   ;;  %s15330_s4 = inlined_call_operand.vmem [shape: f32[16,1], index: 4, kind: input, shape index: {}]   ;;  %s15331_s5 = inlined_call_operand.vmem [shape: bf16[8,48], index: 5, kind: input, shape index: {}]   ;;  %s15332_s6 = inlined_call_operand.vmem [shape: f32[8,1], index: 6, kind: input, shape index: {}]   ;;  %s15333_s7 = inlined_call_operand.vmem [shape: f32[8,120,40], index: 7, kind: input, shape index: {}]   ;;  %s15334_s8 = inlined_call_operand.vmem [shape: f32[1,40], index: 8, kind: input, shape index: {}]   ;;  %s15335_s9 = inlined_call_operand.vmem [shape: f32[64,40], index: 9, kind: output, shape index: {}]  }
   0x1 LB: > { %s8498_s10 = sadd.s32 4294967295, %s10506_s30   ;;  %p8502_p0 = scmp.ge.s32.totalorder %s10506_s30, 1  ;;  %s10506_s30 = sphi %s10565_s30, %s19_s30  }
   0x2   : > { %p289_p1 = scmp.lt.s32.totalorder %s10506_s30, 3 }
   0x4   : > { %p290_p2 = pnand %p8502_p0, %p289_p1 }
   0x6   : > { %293 = sbr.rel (%p290_p2) target bundleno = 1926 (0x786), region = 56 }
   0xb   : > { %s8503_s11 = sshll.u32 %s8498_s10, 5  ;;  %v15336_v0 = vmov 0   ;;  %s10509_s16 = smov 125   ;;  %v10625_v5 = vld [vmem:[%s15327_s1 + $0x4] ss:$8 sps:$4 sm:$0xff]   ;;  %vm1656_vm0 = vcmask 261120  }
   0xc   : > { %p327_p3 = scmp.lt.s32.totalorder %s8503_s11, 63  ;;  %1663 = vmatprep.subr.bf16.mxu0 %v15336_v0  ;;  %1711 = vmatprep.subr.bf16.mxu1 %v15336_v0  ;;  %s10510_s17 = smov 126   ;;  %v10829_v40 = vld [vmem:[%s15327_s1] ss:$8 sps:$4 sm:$0xff]   ;;  %v1622_v43 = vld [vmem:[%s15327_s1 + $0x10] sm:$0xff]  ;;  %vm3423_vm1 = vcmask 1043456  }
   0xd   : > { %10389 = vset.pattern.permute.xlu0 %v15336_v0  ;;  %10390 = vset.pattern.permute.xlu1 %v15336_v0  ;;  %s10511_s18 = smov 127   ;;  %s10512_s19 = smov 124   ;;  %v10841_v45 = vcombine.high %v1622_v43, %v1622_v43  ;;  %v10858_v50 = vcombine.low %v1622_v43, %v1622_v43  ;;  %vm10514_vm2 = vmmov 0   ;;  %vm3988_vm3 = vcmask 588800  }
   0xe   : > { %s15468_s11 = smov (!%p327_p3, %s8503_s11), 63  ;;  %8576 = vmatprep.mubr.msk.bf16.mxu0 %vm1656_vm0, %v10625_v5  ;;  %8578 = vmatprep.mubr.msk.bf16.mxu1 %vm1656_vm0, %v10625_v5  ;;  %vm5727_vm4 = vcmask 392192   ;;  %vm7107_vm5 = vcmask 1041409   ;;  %vm7110_vm6 = vcmask 1042434   ;;  %vm7113_vm7 = vcmask 1043459   ;;  %s8506_s13 = sshll.u32 %s8498_s10, 2 }
   0xf   : > { %s8845_s12 = sshll.u32 %s15468_s11, 4  ;;  %vm7116_vm8 = vcmask 1044484   ;;  %vm7119_vm9 = vcmask 1045509   ;;  %vm7122_vm10 = vcmask 1046534   ;;  %vm7125_vm11 = vcmask 1047559   ;;  %p334_p4 = scmp.lt.s32.totalorder %s8506_s13, 7 }
  0x10   : > { %s10582_s15 = scalar_lea.vmem %s15326_s0, %s8845_s12  ;;  %vm7169_vm12 = vcmask 982016   ;;  %vm8437_vm13 = vcmask 326656  }
  0x11   : > { %v10585_v1 = vld [vmem:[%s10582_s15 + $0x8] sm:$0xff]   ;;  %v10588_v2 = vld [vmem:[%s10582_s15] sm:$0xff]   ;;  %v10593_v3 = vld [vmem:[%s10582_s15 + $0x18] sm:$0xff]   ;;  %s15470_s13 = smov (!%p334_p4, %s8506_s13), 7 }
  0x12   : > { %1238 = vrot.lane.b32.xlu0 %v10585_v1, %s10509_s16  ;;  %1236 = vrot.lane.b32.xlu1 %v10588_v2, %s10509_s16  ;;  %v10598_v4 = vld [vmem:[%s10582_s15 + $0x10] sm:$0xff]   ;;  %v10630_v6 = vld [vmem:[%s10582_s15 + $0x28] sm:$0xff]   ;;  %s8507_s10 = sshll.u32 %s15470_s13, 3 }
  0x13   : > { %v10637_v7 = vld [vmem:[%s10582_s15 + $0x38] sm:$0xff]   ;;  %v10644_v8 = vld [vmem:[%s10582_s15 + $0x20] sm:$0xff]   ;;  %v10647_v9 = vld [vmem:[%s10582_s15 + $0x30] sm:$0xff]   ;;  %s337_s23 = scalar_lea.vmem %s15335_s9, %s8507_s10 }
  0x14   : > { %v10680_v10 = vld [vmem:[%s10582_s15 + $0x48] sm:$0xff]   ;;  %v10685_v11 = vld [vmem:[%s10582_s15 + $0x58] sm:$0xff]   ;;  %v10690_v12 = vld [vmem:[%s10582_s15 + $0x40] sm:$0xff]  }
  0x15   : > { %v10695_v13 = vld [vmem:[%s10582_s15 + $0x50] sm:$0xff]   ;;  %v10724_v14 = vld [vmem:[%s10582_s15 + $0x68] sm:$0xff]   ;;  %v10729_v15 = vld [vmem:[%s10582_s15 + $0x78] sm:$0xff]  }
  0x16   : > { %1242 = vrot.lane.b32.xlu0 %v10593_v3, %s10509_s16  ;;  %1240 = vrot.lane.b32.xlu1 %v10598_v4, %s10509_s16  ;;  %v10734_v16 = vld [vmem:[%s10582_s15 + $0x60] sm:$0xff]   ;;  %v10739_v17 = vld [vmem:[%s10582_s15 + $0x70] sm:$0xff]  }
  0x17   : > { %v10772_v24 = vld [vmem:[%s10582_s15 + $0x88] sm:$0xff]   ;;  %v10778_v25 = vld [vmem:[%s10582_s15 + $0x98] sm:$0xff]   ;;  %v10784_v28 = vld [vmem:[%s10582_s15 + $0x80] sm:$0xff]  }
  0x18   : > { %v10790_v29 = vld [vmem:[%s10582_s15 + $0x90] sm:$0xff]   ;;  %v10847_v47 = vld [vmem:[%s10582_s15 + $0xa8] sm:$0xff]   ;;  %v10853_v48 = vld [vmem:[%s10582_s15 + $0xb8] sm:$0xff]  }
  0x19   : > { %v10864_v52 = vld [vmem:[%s10582_s15 + $0xa0] sm:$0xff]   ;;  %v10870_v53 = vld [vmem:[%s10582_s15 + $0xb0] sm:$0xff]  }
  0x1a   : > { %1046 = vrot.lane.b32.xlu0 %v10585_v1, %s10510_s17  ;;  %1050 = vrot.lane.b32.xlu1 %v10593_v3, %s10510_s17  ;;  %v11023_v43 = vld [vmem:[%s10582_s15 + $0xf0] sm:$0xff]  }
  0x1e   : > { %1044 = vrot.lane.b32.xlu0 %v10588_v2, %s10510_s17  ;;  %1048 = vrot.lane.b32.xlu1 %v10598_v4, %s10510_s17 }
  0x22   : > { %854 = vrot.lane.b32.xlu0 %v10585_v1, %s10511_s18  ;;  %858 = vrot.lane.b32.xlu1 %v10593_v3, %s10511_s18 }
  0x26   : > { %852 = vrot.lane.b32.xlu0 %v10588_v2, %s10511_s18  ;;  %856 = vrot.lane.b32.xlu1 %v10598_v4, %s10511_s18 }
  0x2a   : > { %1430 = vrot.lane.b32.xlu0 %v10585_v1, %s10512_s19  ;;  %1434 = vrot.lane.b32.xlu1 %v10593_v3, %s10512_s19 }
  0x2e   : > { %1428 = vrot.lane.b32.xlu0 %v10588_v2, %s10512_s19  ;;  %1432 = vrot.lane.b32.xlu1 %v10598_v4, %s10512_s19 }
  0x32   : > { %1246 = vrot.lane.b32.xlu0 %v10630_v6, %s10509_s16  ;;  %1250 = vrot.lane.b32.xlu1 %v10637_v7, %s10509_s16 }
  0x36   : > { %1244 = vrot.lane.b32.xlu0 %v10644_v8, %s10509_s16  ;;  %1248 = vrot.lane.b32.xlu1 %v10647_v9, %s10509_s16 }
  0x3a   : > { %1054 = vrot.lane.b32.xlu0 %v10630_v6, %s10510_s17  ;;  %1058 = vrot.lane.b32.xlu1 %v10637_v7, %s10510_s17 }
  0x3e   : > { %1052 = vrot.lane.b32.xlu0 %v10644_v8, %s10510_s17  ;;  %1056 = vrot.lane.b32.xlu1 %v10647_v9, %s10510_s17 }
  0x42   : > { %862 = vrot.lane.b32.xlu0 %v10630_v6, %s10511_s18  ;;  %866 = vrot.lane.b32.xlu1 %v10637_v7, %s10511_s18 }
  0x46   : > { %860 = vrot.lane.b32.xlu0 %v10644_v8, %s10511_s18  ;;  %864 = vrot.lane.b32.xlu1 %v10647_v9, %s10511_s18 }
  0x4a   : > { %1438 = vrot.lane.b32.xlu0 %v10630_v6, %s10512_s19  ;;  %1442 = vrot.lane.b32.xlu1 %v10637_v7, %s10512_s19 }
  0x4e   : > { %1436 = vrot.lane.b32.xlu0 %v10644_v8, %s10512_s19  ;;  %1440 = vrot.lane.b32.xlu1 %v10647_v9, %s10512_s19 }
  0x52   : > { %1254 = vrot.lane.b32.xlu0 %v10680_v10, %s10509_s16  ;;  %1258 = vrot.lane.b32.xlu1 %v10685_v11, %s10509_s16 }
  0x56   : > { %1252 = vrot.lane.b32.xlu0 %v10690_v12, %s10509_s16  ;;  %1256 = vrot.lane.b32.xlu1 %v10695_v13, %s10509_s16 }
  0x5a   : > { %1062 = vrot.lane.b32.xlu0 %v10680_v10, %s10510_s17  ;;  %1066 = vrot.lane.b32.xlu1 %v10685_v11, %s10510_s17 }
  0x5e   : > { %1060 = vrot.lane.b32.xlu0 %v10690_v12, %s10510_s17  ;;  %1064 = vrot.lane.b32.xlu1 %v10695_v13, %s10510_s17 }
  0x62   : > { %870 = vrot.lane.b32.xlu0 %v10680_v10, %s10511_s18  ;;  %874 = vrot.lane.b32.xlu1 %v10685_v11, %s10511_s18 }
  0x66   : > { %868 = vrot.lane.b32.xlu0 %v10690_v12, %s10511_s18  ;;  %872 = vrot.lane.b32.xlu1 %v10695_v13, %s10511_s18 }
  0x6a   : > { %1446 = vrot.lane.b32.xlu0 %v10680_v10, %s10512_s19  ;;  %1450 = vrot.lane.b32.xlu1 %v10685_v11, %s10512_s19 }
  0x6e   : > { %1444 = vrot.lane.b32.xlu0 %v10690_v12, %s10512_s19  ;;  %1448 = vrot.lane.b32.xlu1 %v10695_v13, %s10512_s19 }
  0x72   : > { %1262 = vrot.lane.b32.xlu0 %v10724_v14, %s10509_s16  ;;  %1266 = vrot.lane.b32.xlu1 %v10729_v15, %s10509_s16 }
  0x76   : > { %1260 = vrot.lane.b32.xlu0 %v10734_v16, %s10509_s16  ;;  %1264 = vrot.lane.b32.xlu1 %v10739_v17, %s10509_s16 }
  0x7a   : > { %1070 = vrot.lane.b32.xlu0 %v10724_v14, %s10510_s17  ;;  %1074 = vrot.lane.b32.xlu1 %v10729_v15, %s10510_s17 }
  0x7e   : > { %1068 = vrot.lane.b32.xlu0 %v10734_v16, %s10510_s17  ;;  %1072 = vrot.lane.b32.xlu1 %v10739_v17, %s10510_s17 }
  0x82   : > { %878 = vrot.lane.b32.xlu0 %v10724_v14, %s10511_s18  ;;  %882 = vrot.lane.b32.xlu1 %v10729_v15, %s10511_s18 }
  0x84   : > { %v1239_v18 = vpop.permute.xlu0 %1238  ;;  %v1237_v19 = vpop.permute.xlu1 %1236 }
  0x85   : > { %1664 = vmatpush1.bf16.msra.mxu0 %v1239_v18  ;;  %v10936_v18 = vld [vmem:[%s10582_s15 + $0xc0] sm:$0xff]  }
  0x86   : > { %876 = vrot.lane.b32.xlu0 %v10734_v16, %s10511_s18  ;;  %1665 = vmatprep.subr.bf16.mxu0 %v15336_v0 }
  0x87   : > { %880 = vrot.lane.b32.xlu1 %v10739_v17, %s10511_s18 }
  0x88   : > { %v1243_v20 = vpop.permute.xlu0 %1242  ;;  %v1241_v21 = vpop.permute.xlu1 %1240 }
  0x89   : > { %1666 = vmatpush1.bf16.msra.mxu0 %v1237_v19  ;;  %1712 = vmatpush1.bf16.msra.mxu1 %v1243_v20  ;;  %v10942_v19 = vld [vmem:[%s10582_s15 + $0xd0] sm:$0xff]  }
  0x8a   : > { %1454 = vrot.lane.b32.xlu0 %v10724_v14, %s10512_s19  ;;  %1713 = vmatprep.subr.bf16.mxu1 %v15336_v0 }
  0x8b   : > { %1458 = vrot.lane.b32.xlu1 %v10729_v15, %s10512_s19  ;;  %1667 = vmatprep.subr.bf16.mxu0 %v15336_v0 }
  0x8c   : > { %v1047_v22 = vpop.permute.xlu0 %1046  ;;  %v1051_v23 = vpop.permute.xlu1 %1050 }
  0x8d   : > { %1668 = vmatpush1.bf16.msra.mxu0 %v1047_v22  ;;  %1714 = vmatpush1.bf16.msra.mxu1 %v1241_v21 }
  0x8e   : > { %1452 = vrot.lane.b32.xlu0 %v10734_v16, %s10512_s19  ;;  %1669 = vmatprep.subr.bf16.mxu0 %v15336_v0 }
  0x8f   : > { %1456 = vrot.lane.b32.xlu1 %v10739_v17, %s10512_s19  ;;  %1715 = vmatprep.subr.bf16.mxu1 %v15336_v0 }
  0x90   : > { %v1045_v26 = vpop.permute.xlu0 %1044  ;;  %v1049_v27 = vpop.permute.xlu1 %1048 }
  0x91   : > { %1670 = vmatpush1.bf16.msra.mxu0 %v1045_v26  ;;  %1716 = vmatpush1.bf16.msra.mxu1 %v1051_v23 }
  0x92   : > { %1270 = vrot.lane.b32.xlu0 %v10772_v24, %s10509_s16  ;;  %1671 = vmatprep.subr.bf16.mxu0 %v15336_v0 }
  0x93   : > { %1274 = vrot.lane.b32.xlu1 %v10778_v25, %s10509_s16  ;;  %1717 = vmatprep.subr.bf16.mxu1 %v15336_v0 }
  0x94   : > { %v855_v30 = vpop.permute.xlu0 %854  ;;  %v859_v31 = vpop.permute.xlu1 %858 }
  0x95   : > { %1672 = vmatpush1.bf16.msra.mxu0 %v855_v30  ;;  %1718 = vmatpush1.bf16.msra.mxu1 %v1049_v27 }
  0x96   : > { %1268 = vrot.lane.b32.xlu0 %v10784_v28, %s10509_s16  ;;  %1673 = vmatprep.subr.bf16.mxu0 %v15336_v0 }
  0x97   : > { %1272 = vrot.lane.b32.xlu1 %v10790_v29, %s10509_s16  ;;  %1719 = vmatprep.subr.bf16.mxu1 %v15336_v0 }
  0x98   : > { %v853_v32 = vpop.permute.xlu0 %852  ;;  %v857_v33 = vpop.permute.xlu1 %856 }
  0x99   : > { %1674 = vmatpush1.bf16.msra.mxu0 %v853_v32  ;;  %1720 = vmatpush1.bf16.msra.mxu1 %v859_v31 }
  0x9a   : > { %1078 = vrot.lane.b32.xlu0 %v10772_v24, %s10510_s17  ;;  %1675 = vmatprep.subr.bf16.mxu0 %v15336_v0 }
  0x9b   : > { %1082 = vrot.lane.b32.xlu1 %v10778_v25, %s10510_s17  ;;  %1721 = vmatprep.subr.bf16.mxu1 %v15336_v0 }
  0x9c   : > { %v1431_v34 = vpop.permute.xlu0 %1430  ;;  %v1435_v35 = vpop.permute.xlu1 %1434 }
  0x9d   : > { %1676 = vmatpush1.bf16.msra.mxu0 %v10585_v1  ;;  %1722 = vmatpush1.bf16.msra.mxu1 %v857_v33 }
  0x9e   : > { %1076 = vrot.lane.b32.xlu0 %v10784_v28, %s10510_s17  ;;  %1677 = vmatprep.subr.bf16.mxu0 %v15336_v0 }
  0x9f   : > { %1080 = vrot.lane.b32.xlu1 %v10790_v29, %s10510_s17  ;;  %1723 = vmatprep.subr.bf16.mxu1 %v15336_v0 }
  0xa0   : > { %v1429_v36 = vpop.permute.xlu0 %1428  ;;  %v1433_v37 = vpop.permute.xlu1 %1432 }
  0xa1   : > { %1678 = vmatpush1.bf16.msra.mxu0 %v10588_v2  ;;  %1724 = vmatpush1.bf16.msra.mxu1 %v10593_v3 }
  0xa2   : > { %886 = vrot.lane.b32.xlu0 %v10772_v24, %s10511_s18  ;;  %1691 = vmatprep.subr.bf16.mxu0 %v15336_v0 }
  0xa3   : > { %890 = vrot.lane.b32.xlu1 %v10778_v25, %s10511_s18  ;;  %1725 = vmatprep.subr.bf16.mxu1 %v15336_v0 }
  0xa4   : > { %v1247_v38 = vpop.permute.xlu0 %1246  ;;  %v1251_v39 = vpop.permute.xlu1 %1250 }
  0xa5   : > { %1692 = vmatpush2.bf16.msra.mxu0 %v1431_v34  ;;  %1726 = vmatpush1.bf16.msra.mxu1 %v10598_v4 }
  0xa6   : > { %884 = vrot.lane.b32.xlu0 %v10784_v28, %s10511_s18  ;;  %1693 = vmatprep.subr.bf16.mxu0 %v15336_v0 }
  0xa7   : > { %888 = vrot.lane.b32.xlu1 %v10790_v29, %s10511_s18  ;;  %1739 = vmatprep.subr.bf16.mxu1 %v15336_v0 }
  0xa8   : > { %v1245_v41 = vpop.permute.xlu0 %1244  ;;  %v1249_v42 = vpop.permute.xlu1 %1248 }
  0xa9   : > { %1694 = vmatpush2.bf16.msra.mxu0 %v1429_v36  ;;  %1740 = vmatpush2.bf16.msra.mxu1 %v1435_v35 }
  0xaa   : > { %1462 = vrot.lane.b32.xlu0 %v10772_v24, %s10512_s19  ;;  %1741 = vmatprep.subr.bf16.mxu1 %v15336_v0 }
  0xab   : > { %1466 = vrot.lane.b32.xlu1 %v10778_v25, %s10512_s19  ;;  %1759 = vmatprep.subr.bf16.mxu0 %v15336_v0 }
  0xac   : > { %1696 = vmatmul.mubr.bf16.vlgmr.msra.gmra.mxu0 %v10829_v40  ;;  %v1055_v44 = vpop.permute.xlu0 %1054  ;;  %v1059_v46 = vpop.permute.xlu1 %1058 }
  0xad   : > { %1742 = vmatpush2.bf16.msra.mxu1 %v1433_v37  ;;  %1760 = vmatpush1.bf16.msra.mxu0 %v1247_v38  ;;  %v11001_v38 = vld [vmem:[%s10582_s15 + $0xe8] sm:$0xff]  }
  0xae   : > { %1460 = vrot.lane.b32.xlu0 %v10784_v28, %s10512_s19  ;;  %1761 = vmatprep.subr.bf16.mxu0 %v15336_v0 }
  0xaf   : > { %1464 = vrot.lane.b32.xlu1 %v10790_v29, %s10512_s19  ;;  %1807 = vmatprep.subr.bf16.mxu1 %v15336_v0 }
  0xb0   : > { %1744 = vmatmul.mubr.bf16.vlgmr.msra.gmra.mxu1 %v10829_v40  ;;  %v1053_v49 = vpop.permute.xlu0 %1052  ;;  %8577 = vmatprep.mubr.msk.bf16.mxu0 %vm1656_vm0, %v10841_v45  ;;  %v1057_v51 = vpop.permute.xlu1 %1056 }
  0xb1   : > { %1762 = vmatpush1.bf16.msra.mxu0 %v1245_v41  ;;  %1808 = vmatpush1.bf16.msra.mxu1 %v1251_v39  ;;  %v11007_v39 = vld [vmem:[%s10582_s15 + $0xf8] sm:$0xff]  }
  0xb2   : > { %1278 = vrot.lane.b32.xlu0 %v10847_v47, %s10509_s16  ;;  %1763 = vmatprep.subr.bf16.mxu0 %v15336_v0 }
  0xb3   : > { %1282 = vrot.lane.b32.xlu1 %v10853_v48, %s10509_s16  ;;  %1809 = vmatprep.subr.bf16.mxu1 %v15336_v0 }
  0xb4   : > { %v863_v54 = vpop.permute.xlu0 %862  ;;  %1704 = vmatmul.mubr.bf16.gmra.mxu0 %v10858_v50  ;;  %8579 = vmatprep.mubr.msk.bf16.mxu1 %vm1656_vm0, %v10841_v45  ;;  %v867_v55 = vpop.permute.xlu1 %866 }
  0xb5   : > { %1764 = vmatpush1.bf16.msra.mxu0 %v1055_v44  ;;  %1810 = vmatpush1.bf16.msra.mxu1 %v1249_v42  ;;  %v11017_v42 = vld [vmem:[%s10582_s15 + $0xe0] sm:$0xff]  }
  0xb6   : > { %1276 = vrot.lane.b32.xlu0 %v10864_v52, %s10509_s16  ;;  %1765 = vmatprep.subr.bf16.mxu0 %v15336_v0 }
  0xb7   : > { %1280 = vrot.lane.b32.xlu1 %v10870_v53, %s10509_s16  ;;  %1811 = vmatprep.subr.bf16.mxu1 %v15336_v0 }
  0xb8   : > { %v861_v56 = vpop.permute.xlu0 %860  ;;  %1752 = vmatmul.mubr.bf16.gmra.mxu1 %v10858_v50  ;;  %8580 = vmatprep.mubr.msk.bf16.mxu0 %vm1656_vm0, %v10625_v5  ;;  %v865_v57 = vpop.permute.xlu1 %864 }
  0xb9   : > { %1766 = vmatpush1.bf16.msra.mxu0 %v1053_v49  ;;  %1812 = vmatpush1.bf16.msra.mxu1 %v1059_v46 }
  0xba   : > { %1086 = vrot.lane.b32.xlu0 %v10847_v47, %s10510_s17  ;;  %1767 = vmatprep.subr.bf16.mxu0 %v15336_v0 }
  0xbb   : > { %1090 = vrot.lane.b32.xlu1 %v10853_v48, %s10510_s17  ;;  %1813 = vmatprep.subr.bf16.mxu1 %v15336_v0 }
  0xbc   : > { %v1439_v58 = vpop.permute.xlu0 %1438  ;;  %8582 = vmatprep.mubr.msk.bf16.mxu1 %vm1656_vm0, %v10625_v5  ;;  %v1443_v59 = vpop.permute.xlu1 %1442 }
  0xbd   : > { %1768 = vmatpush1.bf16.msra.mxu0 %v863_v54  ;;  %1814 = vmatpush1.bf16.msra.mxu1 %v1057_v51 }
  0xbe   : > { %1084 = vrot.lane.b32.xlu0 %v10864_v52, %s10510_s17  ;;  %1769 = vmatprep.subr.bf16.mxu0 %v15336_v0 }
  0xbf   : > { %1088 = vrot.lane.b32.xlu1 %v10870_v53, %s10510_s17  ;;  %1815 = vmatprep.subr.bf16.mxu1 %v15336_v0 }
  0xc0   : > { %v1437_v60 = vpop.permute.xlu0 %1436  ;;  %v1441_v61 = vpop.permute.xlu1 %1440 }
  0xc1   : > { %1770 = vmatpush1.bf16.msra.mxu0 %v861_v56  ;;  %1816 = vmatpush1.bf16.msra.mxu1 %v867_v55 }
  0xc2   : > { %894 = vrot.lane.b32.xlu0 %v10847_v47, %s10511_s18  ;;  %1771 = vmatprep.subr.bf16.mxu0 %v15336_v0 }
  0xc3   : > { %898 = vrot.lane.b32.xlu1 %v10853_v48, %s10511_s18  ;;  %1817 = vmatprep.subr.bf16.mxu1 %v15336_v0 }
  0xc4   : > { %v1255_v62 = vpop.permute.xlu0 %1254  ;;  %v1259_v63 = vpop.permute.xlu1 %1258 }
  0xc5   : > { %1772 = vmatpush1.bf16.msra.mxu0 %v10630_v6  ;;  %1818 = vmatpush1.bf16.msra.mxu1 %v865_v57  ;;  %v10924_v6 = vld [vmem:[%s10582_s15 + $0xc8] sm:$0xff]  }
  0xc6   : > { %892 = vrot.lane.b32.xlu0 %v10864_v52, %s10511_s18  ;;  %1773 = vmatprep.subr.bf16.mxu0 %v15336_v0 }
  0xc7   : > { %896 = vrot.lane.b32.xlu1 %v10870_v53, %s10511_s18  ;;  %1819 = vmatprep.subr.bf16.mxu1 %v15336_v0 }
  0xc8   : > { %v1253_v1 = vpop.permute.xlu0 %1252  ;;  %v1257_v2 = vpop.permute.xlu1 %1256 }
  0xc9   : > { %1774 = vmatpush1.bf16.msra.mxu0 %v10644_v8  ;;  %1820 = vmatpush1.bf16.msra.mxu1 %v10637_v7  ;;  %v10930_v7 = vld [vmem:[%s10582_s15 + $0xd8] sm:$0xff]  }
  0xca   : > { %1470 = vrot.lane.b32.xlu0 %v10847_v47, %s10512_s19  ;;  %1787 = vmatprep.subr.bf16.mxu0 %v15336_v0 }
  0xcb   : > { %1474 = vrot.lane.b32.xlu1 %v10853_v48, %s10512_s19  ;;  %1821 = vmatprep.subr.bf16.mxu1 %v15336_v0 }
  0xcc   : > { %v1063_v3 = vpop.permute.xlu0 %1062  ;;  %v1067_v4 = vpop.permute.xlu1 %1066 }
  0xcd   : > { %1788 = vmatpush2.bf16.msra.mxu0 %v1439_v58  ;;  %1822 = vmatpush1.bf16.msra.mxu1 %v10647_v9 }
  0xce   : > { %1468 = vrot.lane.b32.xlu0 %v10864_v52, %s10512_s19  ;;  %1789 = vmatprep.subr.bf16.mxu0 %v15336_v0 }
  0xcf   : > { %1472 = vrot.lane.b32.xlu1 %v10870_v53, %s10512_s19  ;;  %1835 = vmatprep.subr.bf16.mxu1 %v15336_v0 }
  0xd0   : > { %v1061_v8 = vpop.permute.xlu0 %1060  ;;  %v1065_v9 = vpop.permute.xlu1 %1064 }
  0xd1   : > { %1790 = vmatpush2.bf16.msra.mxu0 %v1437_v60  ;;  %1836 = vmatpush2.bf16.msra.mxu1 %v1443_v59 }
  0xd2   : > { %1286 = vrot.lane.b32.xlu0 %v10924_v6, %s10509_s16  ;;  %1837 = vmatprep.subr.bf16.mxu1 %v15336_v0 }
  0xd3   : > { %1290 = vrot.lane.b32.xlu1 %v10930_v7, %s10509_s16  ;;  %1855 = vmatprep.subr.bf16.mxu0 %v15336_v0 }
  0xd4   : > { %1792 = vmatmul.mubr.bf16.vlgmr.msra.gmra.mxu0 %v10829_v40  ;;  %v871_v20 = vpop.permute.xlu0 %870  ;;  %v875_v21 = vpop.permute.xlu1 %874 }
  0xd5   : > { %1838 = vmatpush2.bf16.msra.mxu1 %v1441_v61  ;;  %1856 = vmatpush1.bf16.msra.mxu0 %v1255_v62  ;;  %v10428_v61 = vld [vmem:[%s10582_s15 + $0x108] sm:$0xff]   ;;  %v10429_v62 = vld [vmem:[%s10582_s15 + $0x118] sm:$0xff]  }
  0xd6   : > { %1284 = vrot.lane.b32.xlu0 %v10936_v18, %s10509_s16  ;;  %1857 = vmatprep.subr.bf16.mxu0 %v15336_v0 }
  0xd7   : > { %1288 = vrot.lane.b32.xlu1 %v10942_v19, %s10509_s16  ;;  %1903 = vmatprep.subr.bf16.mxu1 %v15336_v0 }
  0xd8   : > { %1840 = vmatmul.mubr.bf16.vlgmr.msra.gmra.mxu1 %v10829_v40  ;;  %v869_v22 = vpop.permute.xlu0 %868  ;;  %8581 = vmatprep.mubr.msk.bf16.mxu0 %vm1656_vm0, %v10841_v45  ;;  %v873_v23 = vpop.permute.xlu1 %872 }
  0xd9   : > { %1858 = vmatpush1.bf16.msra.mxu0 %v1253_v1  ;;  %1904 = vmatpush1.bf16.msra.mxu1 %v1259_v63  ;;  %v10430_v1 = vld [vmem:[%s10582_s15 + $0x100] sm:$0xff]  }
  0xda   : > { %1094 = vrot.lane.b32.xlu0 %v10924_v6, %s10510_s17  ;;  %1859 = vmatprep.subr.bf16.mxu0 %v15336_v0 }
  0xdb   : > { %1098 = vrot.lane.b32.xlu1 %v10930_v7, %s10510_s17  ;;  %1905 = vmatprep.subr.bf16.mxu1 %v15336_v0 }
  0xdc   : > { %v1447_v26 = vpop.permute.xlu0 %1446  ;;  %1800 = vmatmul.mubr.bf16.gmra.mxu0 %v10858_v50  ;;  %8583 = vmatprep.mubr.msk.bf16.mxu1 %vm1656_vm0, %v10841_v45  ;;  %v1451_v27 = vpop.permute.xlu1 %1450 }
  0xdd   : > { %1860 = vmatpush1.bf16.msra.mxu0 %v1063_v3  ;;  %1906 = vmatpush1.bf16.msra.mxu1 %v1257_v2  ;;  %v10431_v2 = vld [vmem:[%s10582_s15 + $0x110] sm:$0xff]  }
  0xde   : > { %1092 = vrot.lane.b32.xlu0 %v10936_v18, %s10510_s17  ;;  %1861 = vmatprep.subr.bf16.mxu0 %v15336_v0 }
  0xdf   : > { %1096 = vrot.lane.b32.xlu1 %v10942_v19, %s10510_s17  ;;  %1907 = vmatprep.subr.bf16.mxu1 %v15336_v0 }
  0xe0   : > { %v1445_v30 = vpop.permute.xlu0 %1444  ;;  %1848 = vmatmul.mubr.bf16.gmra.mxu1 %v10858_v50  ;;  %8584 = vmatprep.mubr.msk.bf16.mxu0 %vm1656_vm0, %v10625_v5  ;;  %v1449_v31 = vpop.permute.xlu1 %1448 }
  0xe1   : > { %1862 = vmatpush1.bf16.msra.mxu0 %v1061_v8  ;;  %1908 = vmatpush1.bf16.msra.mxu1 %v1067_v4 }
  0xe2   : > { %902 = vrot.lane.b32.xlu0 %v10924_v6, %s10511_s18  ;;  %1863 = vmatprep.subr.bf16.mxu0 %v15336_v0 }
  0xe3   : > { %906 = vrot.lane.b32.xlu1 %v10930_v7, %s10511_s18  ;;  %1909 = vmatprep.subr.bf16.mxu1 %v15336_v0 }
  0xe4   : > { %v1263_v32 = vpop.permute.xlu0 %1262  ;;  %8586 = vmatprep.mubr.msk.bf16.mxu1 %vm1656_vm0, %v10625_v5  ;;  %v1267_v33 = vpop.permute.xlu1 %1266 }
  0xe5   : > { %1864 = vmatpush1.bf16.msra.mxu0 %v871_v20  ;;  %1910 = vmatpush1.bf16.msra.mxu1 %v1065_v9 }
  0xe6   : > { %900 = vrot.lane.b32.xlu0 %v10936_v18, %s10511_s18  ;;  %1865 = vmatprep.subr.bf16.mxu0 %v15336_v0 }
  0xe7   : > { %904 = vrot.lane.b32.xlu1 %v10942_v19, %s10511_s18  ;;  %1911 = vmatprep.subr.bf16.mxu1 %v15336_v0 }
  0xe8   : > { %v1261_v34 = vpop.permute.xlu0 %1260  ;;  %v10986_v35 = vpop.permute.xlu1 %1264 }
  0xe9   : > { %1866 = vmatpush1.bf16.msra.mxu0 %v869_v22  ;;  %1912 = vmatpush1.bf16.msra.mxu1 %v875_v21 }
  0xea   : > { %1478 = vrot.lane.b32.xlu0 %v10924_v6, %s10512_s19  ;;  %1867 = vmatprep.subr.bf16.mxu0 %v15336_v0 }
  0xeb   : > { %1482 = vrot.lane.b32.xlu1 %v10930_v7, %s10512_s19  ;;  %1913 = vmatprep.subr.bf16.mxu1 %v15336_v0 }
  0xec   : > { %v1071_v36 = vpop.permute.xlu0 %1070  ;;  %v10995_v37 = vpop.permute.xlu1 %1074 }
  0xed   : > { %1868 = vmatpush1.bf16.msra.mxu0 %v10680_v10  ;;  %1914 = vmatpush1.bf16.msra.mxu1 %v873_v23 }
  0xee   : > { %1476 = vrot.lane.b32.xlu0 %v10936_v18, %s10512_s19  ;;  %1869 = vmatprep.subr.bf16.mxu0 %v15336_v0 }
  0xef   : > { %1480 = vrot.lane.b32.xlu1 %v10942_v19, %s10512_s19  ;;  %1915 = vmatprep.subr.bf16.mxu1 %v15336_v0 }
  0xf0   : > { %v1069_v41 = vpop.permute.xlu0 %1068  ;;  %v11011_v10 = vpop.permute.xlu1 %1072 }
  0xf1   : > { %1870 = vmatpush1.bf16.msra.mxu0 %v10690_v12  ;;  %1916 = vmatpush1.bf16.msra.mxu1 %v10685_v11 }
  0xf2   : > { %1294 = vrot.lane.b32.xlu0 %v11001_v38, %s10509_s16  ;;  %1883 = vmatprep.subr.bf16.mxu0 %v15336_v0 }
  0xf3   : > { %1298 = vrot.lane.b32.xlu1 %v11007_v39, %s10509_s16  ;;  %1917 = vmatprep.subr.bf16.mxu1 %v15336_v0 }
  0xf4   : > { %v879_v44 = vpop.permute.xlu0 %878  ;;  %v11026_v11 = vpop.permute.xlu1 %882 }
  0xf5   : > { %1884 = vmatpush2.bf16.msra.mxu0 %v1447_v26  ;;  %1918 = vmatpush1.bf16.msra.mxu1 %v10695_v13 }
  0xf6   : > { %1292 = vrot.lane.b32.xlu0 %v11017_v42, %s10509_s16  ;;  %1885 = vmatprep.subr.bf16.mxu0 %v15336_v0 }
  0xf7   : > { %1296 = vrot.lane.b32.xlu1 %v11023_v43, %s10509_s16  ;;  %1931 = vmatprep.subr.bf16.mxu1 %v15336_v0 }
  0xf8   : > { %v877_v12 = vpop.permute.xlu0 %876 }
  0xf9   : > { %1886 = vmatpush2.bf16.msra.mxu0 %v1445_v30  ;;  %1932 = vmatpush2.bf16.msra.mxu1 %v1451_v27  ;;  %v11034_v46 = vpop.permute.xlu1 %880  ;;  %v10432_v30 = vld [vmem:[%s10582_s15 + $0x128] sm:$0xff]  }
  0xfa   : > { %1102 = vrot.lane.b32.xlu0 %v11001_v38, %s10510_s17  ;;  %1933 = vmatprep.subr.bf16.mxu1 %v15336_v0 }
  0xfb   : > { %1106 = vrot.lane.b32.xlu1 %v11007_v39, %s10510_s17  ;;  %1951 = vmatprep.subr.bf16.mxu0 %v15336_v0 }
  0xfc   : > { %1888 = vmatmul.mubr.bf16.vlgmr.msra.gmra.mxu0 %v10829_v40  ;;  %v11043_v13 = vpop.permute.xlu0 %1454 }
  0xfd   : > { %1934 = vmatpush2.bf16.msra.mxu1 %v1449_v31  ;;  %1952 = vmatpush1.bf16.msra.mxu0 %v1263_v32  ;;  %v11045_v49 = vpop.permute.xlu1 %1458  ;;  %v10433_v31 = vld [vmem:[%s10582_s15 + $0x138] sm:$0xff]  }
  0xfe   : > { %1100 = vrot.lane.b32.xlu0 %v11017_v42, %s10510_s17  ;;  %1953 = vmatprep.subr.bf16.mxu0 %v15336_v0 }
  0xff   : > { %1104 = vrot.lane.b32.xlu1 %v11023_v43, %s10510_s17  ;;  %1999 = vmatprep.subr.bf16.mxu1 %v15336_v0 }
 0x100   : > { %1936 = vmatmul.mubr.bf16.vlgmr.msra.gmra.mxu1 %v10829_v40  ;;  %v11054_v51 = vpop.permute.xlu0 %1452  ;;  %8585 = vmatprep.mubr.msk.bf16.mxu0 %vm1656_vm0, %v10841_v45 }
 0x101   : > { %1954 = vmatpush1.bf16.msra.mxu0 %v1261_v34  ;;  %2000 = vmatpush1.bf16.msra.mxu1 %v1267_v33  ;;  %v11058_v54 = vpop.permute.xlu1 %1456  ;;  %v11205_v33 = vld [vmem:[%s15327_s1 + $0x4] ss:$8 sps:$4 sm:$0xff]  }
 0x102   : > { %910 = vrot.lane.b32.xlu0 %v11001_v38, %s10511_s18  ;;  %1955 = vmatprep.subr.bf16.mxu0 %v15336_v0 }
 0x103   : > { %914 = vrot.lane.b32.xlu1 %v11007_v39, %s10511_s18  ;;  %2001 = vmatprep.subr.bf16.mxu1 %v15336_v0 }
 0x104   : > { %v11066_v55 = vpop.permute.xlu0 %1270  ;;  %1896 = vmatmul.mubr.bf16.gmra.mxu0 %v10858_v50  ;;  %8587 = vmatprep.mubr.msk.bf16.mxu1 %vm1656_vm0, %v10841_v45 }
 0x105   : > { %1956 = vmatpush1.bf16.msra.mxu0 %v1071_v36  ;;  %2002 = vmatpush1.bf16.msra.mxu1 %v10986_v35  ;;  %v11072_v56 = vpop.permute.xlu1 %1274  ;;  %v10434_v35 = vld [vmem:[%s10582_s15 + $0x120] sm:$0xff]   ;;  %v10435_v36 = vld [vmem:[%s10582_s15 + $0x130] sm:$0xff]  }
 0x106   : > { %908 = vrot.lane.b32.xlu0 %v11017_v42, %s10511_s18  ;;  %1957 = vmatprep.subr.bf16.mxu0 %v15336_v0 }
 0x107   : > { %912 = vrot.lane.b32.xlu1 %v11023_v43, %s10511_s18  ;;  %2003 = vmatprep.subr.bf16.mxu1 %v15336_v0 }
 0x108   : > { %v11080_v57 = vpop.permute.xlu0 %1268  ;;  %1944 = vmatmul.mubr.bf16.gmra.mxu1 %v10858_v50  ;;  %8588 = vmatprep.mubr.msk.bf16.mxu0 %vm1656_vm0, %v10625_v5 }
 0x109   : > { %1958 = vmatpush1.bf16.msra.mxu0 %v1069_v41  ;;  %2004 = vmatpush1.bf16.msra.mxu1 %v10995_v37  ;;  %v11086_v58 = vpop.permute.xlu1 %1272 }
 0x10a   : > { %1486 = vrot.lane.b32.xlu0 %v11001_v38, %s10512_s19  ;;  %1959 = vmatprep.subr.bf16.mxu0 %v15336_v0 }
 0x10b   : > { %1490 = vrot.lane.b32.xlu1 %v11007_v39, %s10512_s19  ;;  %2005 = vmatprep.subr.bf16.mxu1 %v15336_v0 }
 0x10c   : > { %v11094_v59 = vpop.permute.xlu0 %1078  ;;  %8590 = vmatprep.mubr.msk.bf16.mxu1 %vm1656_vm0, %v10625_v5 }
 0x10d   : > { %1960 = vmatpush1.bf16.msra.mxu0 %v879_v44  ;;  %2006 = vmatpush1.bf16.msra.mxu1 %v11011_v10  ;;  %v11099_v60 = vpop.permute.xlu1 %1082 }
 0x10e   : > { %1484 = vrot.lane.b32.xlu0 %v11017_v42, %s10512_s19  ;;  %1961 = vmatprep.subr.bf16.mxu0 %v15336_v0 }
 0x10f   : > { %1488 = vrot.lane.b32.xlu1 %v11023_v43, %s10512_s19  ;;  %2007 = vmatprep.subr.bf16.mxu1 %v15336_v0 }
 0x110   : > { %v11109_v5 = vpop.permute.xlu0 %1076 }
 0x111   : > { %1962 = vmatpush1.bf16.msra.mxu0 %v877_v12  ;;  %2008 = vmatpush1.bf16.msra.mxu1 %v11026_v11  ;;  %v11112_v63 = vpop.permute.xlu1 %1080 }
 0x112   : > { %1302 = vrot.lane.b32.xlu0 %v10428_v61, %s10509_s16  ;;  %1963 = vmatprep.subr.bf16.mxu0 %v15336_v0 }
 0x113   : > { %1306 = vrot.lane.b32.xlu1 %v10429_v62, %s10509_s16  ;;  %2009 = vmatprep.subr.bf16.mxu1 %v15336_v0 }
 0x114   : > { %v11120_v3 = vpop.permute.xlu0 %886 }
 0x115   : > { %1964 = vmatpush1.bf16.msra.mxu0 %v10724_v14  ;;  %2010 = vmatpush1.bf16.msra.mxu1 %v11034_v46  ;;  %v11124_v4 = vpop.permute.xlu1 %890 }
 0x116   : > { %1300 = vrot.lane.b32.xlu0 %v10430_v1, %s10509_s16  ;;  %1965 = vmatprep.subr.bf16.mxu0 %v15336_v0 }
 0x117   : > { %1304 = vrot.lane.b32.xlu1 %v10431_v2, %s10509_s16  ;;  %2011 = vmatprep.subr.bf16.mxu1 %v15336_v0 }
 0x118   : > { %v11130_v8 = vpop.permute.xlu0 %884 }
 0x119   : > { %1966 = vmatpush1.bf16.msra.mxu0 %v10734_v16  ;;  %2012 = vmatpush1.bf16.msra.mxu1 %v10729_v15  ;;  %v11134_v9 = vpop.permute.xlu1 %888 }
 0x11a   : > { %1110 = vrot.lane.b32.xlu0 %v10428_v61, %s10510_s17  ;;  %1979 = vmatprep.subr.bf16.mxu0 %v15336_v0 }
 0x11b   : > { %1114 = vrot.lane.b32.xlu1 %v10429_v62, %s10510_s17  ;;  %2013 = vmatprep.subr.bf16.mxu1 %v15336_v0 }
 0x11c   : > { %v11140_v14 = vpop.permute.xlu0 %1462 }
 0x11d   : > { %1980 = vmatpush2.bf16.msra.mxu0 %v11043_v13  ;;  %2014 = vmatpush1.bf16.msra.mxu1 %v10739_v17  ;;  %v11144_v20 = vpop.permute.xlu1 %1466 }
 0x11e   : > { %1108 = vrot.lane.b32.xlu0 %v10430_v1, %s10510_s17  ;;  %1981 = vmatprep.subr.bf16.mxu0 %v15336_v0 }
 0x11f   : > { %1112 = vrot.lane.b32.xlu1 %v10431_v2, %s10510_s17  ;;  %2027 = vmatprep.subr.bf16.mxu1 %v15336_v0 }
 0x120   : > { %v11150_v15 = vpop.permute.xlu0 %1460 }
 0x121   : > { %1982 = vmatpush2.bf16.msra.mxu0 %v11054_v51  ;;  %2028 = vmatpush2.bf16.msra.mxu1 %v11045_v49  ;;  %v11154_v16 = vpop.permute.xlu1 %1464 }
 0x122   : > { %918 = vrot.lane.b32.xlu0 %v10428_v61, %s10511_s18  ;;  %2029 = vmatprep.subr.bf16.mxu1 %v15336_v0 }
 0x123   : > { %922 = vrot.lane.b32.xlu1 %v10429_v62, %s10511_s18  ;;  %2047 = vmatprep.subr.bf16.mxu0 %v15336_v0 }
 0x124   : > { %1984 = vmatmul.mubr.bf16.vlgmr.msra.gmra.mxu0 %v10829_v40  ;;  %v11161_v17 = vpop.permute.xlu0 %1278 }
 0x125   : > { %2030 = vmatpush2.bf16.msra.mxu1 %v11058_v54  ;;  %2048 = vmatpush1.bf16.msra.mxu0 %v11066_v55  ;;  %v11165_v21 = vpop.permute.xlu1 %1282  ;;  %v11291_v54 = vld [vmem:[%s10582_s15 + $0x148] sm:$0xff]   ;;  %v11296_v55 = vld [vmem:[%s10582_s15 + $0x158] sm:$0xff]  }
 0x126   : > { %916 = vrot.lane.b32.xlu0 %v10430_v1, %s10511_s18  ;;  %2049 = vmatprep.subr.bf16.mxu0 %v15336_v0 }
 0x127   : > { %920 = vrot.lane.b32.xlu1 %v10431_v2, %s10511_s18  ;;  %2095 = vmatprep.subr.bf16.mxu1 %v15336_v0 }
 0x128   : > { %2032 = vmatmul.mubr.bf16.vlgmr.msra.gmra.mxu1 %v10829_v40  ;;  %v11172_v22 = vpop.permute.xlu0 %1276  ;;  %8589 = vmatprep.mubr.msk.bf16.mxu0 %vm1656_vm0, %v10841_v45 }
 0x129   : > { %2050 = vmatpush1.bf16.msra.mxu0 %v11080_v57  ;;  %2096 = vmatpush1.bf16.msra.mxu1 %v11072_v56  ;;  %v11178_v23 = vpop.permute.xlu1 %1280 }
 0x12a   : > { %1494 = vrot.lane.b32.xlu0 %v10428_v61, %s10512_s19  ;;  %2051 = vmatprep.subr.bf16.mxu0 %v15336_v0 }
 0x12b   : > { %1498 = vrot.lane.b32.xlu1 %v10429_v62, %s10512_s19  ;;  %2097 = vmatprep.subr.bf16.mxu1 %v15336_v0 }
 0x12c   : > { %v11184_v26 = vpop.permute.xlu0 %1086  ;;  %1992 = vmatmul.mubr.bf16.gmra.mxu0 %v10858_v50  ;;  %8591 = vmatprep.mubr.msk.bf16.mxu1 %vm1656_vm0, %v10841_v45 }
 0x12d   : > { %2052 = vmatpush1.bf16.msra.mxu0 %v11094_v59  ;;  %2098 = vmatpush1.bf16.msra.mxu1 %v11086_v58  ;;  %v11191_v27 = vpop.permute.xlu1 %1090  ;;  %v10438_v58 = vld [vmem:[%s10582_s15 + $0x140] sm:$0xff]   ;;  %v10439_v59 = vld [vmem:[%s10582_s15 + $0x150] sm:$0xff]  }
 0x12e   : > { %1492 = vrot.lane.b32.xlu0 %v10430_v1, %s10512_s19  ;;  %2053 = vmatprep.subr.bf16.mxu0 %v15336_v0 }
 0x12f   : > { %1496 = vrot.lane.b32.xlu1 %v10431_v2, %s10512_s19  ;;  %2099 = vmatprep.subr.bf16.mxu1 %v15336_v0 }
 0x130   : > { %v11199_v32 = vpop.permute.xlu0 %1084  ;;  %2040 = vmatmul.mubr.bf16.gmra.mxu1 %v10858_v50  ;;  %8592 = vmatprep.mubr.msk.bf16.mxu0 %vm1656_vm0, %v11205_v33 }
 0x131   : > { %2054 = vmatpush1.bf16.msra.mxu0 %v11109_v5  ;;  %2100 = vmatpush1.bf16.msra.mxu1 %v11099_v60  ;;  %v11211_v34 = vpop.permute.xlu1 %1088 }
 0x132   : > { %1310 = vrot.lane.b32.xlu0 %v10432_v30, %s10509_s16  ;;  %2055 = vmatprep.subr.bf16.mxu0 %v15336_v0 }
 0x133   : > { %1314 = vrot.lane.b32.xlu1 %v10433_v31, %s10509_s16  ;;  %2101 = vmatprep.subr.bf16.mxu1 %v15336_v0 }
 0x134   : > { %v11219_v37 = vpop.permute.xlu0 %894  ;;  %8594 = vmatprep.mubr.msk.bf16.mxu1 %vm1656_vm0, %v11205_v33 }
 0x135   : > { %2056 = vmatpush1.bf16.msra.mxu0 %v11120_v3  ;;  %2102 = vmatpush1.bf16.msra.mxu1 %v11112_v63  ;;  %v11225_v41 = vpop.permute.xlu1 %898 }
 0x136   : > { %1308 = vrot.lane.b32.xlu0 %v10434_v35, %s10509_s16  ;;  %2057 = vmatprep.subr.bf16.mxu0 %v15336_v0 }
 0x137   : > { %1312 = vrot.lane.b32.xlu1 %v10435_v36, %s10509_s16  ;;  %2103 = vmatprep.subr.bf16.mxu1 %v15336_v0 }
 0x138   : > { %v11231_v10 = vpop.permute.xlu0 %892 }
 0x139   : > { %2058 = vmatpush1.bf16.msra.mxu0 %v11130_v8  ;;  %2104 = vmatpush1.bf16.msra.mxu1 %v11124_v4  ;;  %v11235_v44 = vpop.permute.xlu1 %896 }
 0x13a   : > { %1118 = vrot.lane.b32.xlu0 %v10432_v30, %s10510_s17  ;;  %2059 = vmatprep.subr.bf16.mxu0 %v15336_v0 }
 0x13b   : > { %1122 = vrot.lane.b32.xlu1 %v10433_v31, %s10510_s17  ;;  %2105 = vmatprep.subr.bf16.mxu1 %v15336_v0 }
 0x13c   : > { %v11241_v11 = vpop.permute.xlu0 %1470 }
 0x13d   : > { %2060 = vmatpush1.bf16.msra.mxu0 %v10772_v24  ;;  %2106 = vmatpush1.bf16.msra.mxu1 %v11134_v9  ;;  %v11245_v12 = vpop.permute.xlu1 %1474 }
 0x13e   : > { %1116 = vrot.lane.b32.xlu0 %v10434_v35, %s10510_s17  ;;  %2061 = vmatprep.subr.bf16.mxu0 %v15336_v0 }
 0x13f   : > { %1120 = vrot.lane.b32.xlu1 %v10435_v36, %s10510_s17  ;;  %2107 = vmatprep.subr.bf16.mxu1 %v15336_v0 }
 0x140   : > { %v11251_v46 = vpop.permute.xlu0 %1468 }
 0x141   : > { %2062 = vmatpush1.bf16.msra.mxu0 %v10784_v28  ;;  %2108 = vmatpush1.bf16.msra.mxu1 %v10778_v25  ;;  %v11255_v13 = vpop.permute.xlu1 %1472 }
 0x142   : > { %926 = vrot.lane.b32.xlu0 %v10432_v30, %s10511_s18  ;;  %2075 = vmatprep.subr.bf16.mxu0 %v15336_v0 }
 0x143   : > { %930 = vrot.lane.b32.xlu1 %v10433_v31, %s10511_s18  ;;  %2109 = vmatprep.subr.bf16.mxu1 %v15336_v0 }
 0x144   : > { %v11261_v24 = vpop.permute.xlu0 %1286 }
 0x145   : > { %2076 = vmatpush2.bf16.msra.mxu0 %v11140_v14  ;;  %2110 = vmatpush1.bf16.msra.mxu1 %v10790_v29  ;;  %v11265_v49 = vpop.permute.xlu1 %1290 }
 0x146   : > { %924 = vrot.lane.b32.xlu0 %v10434_v35, %s10511_s18  ;;  %2077 = vmatprep.subr.bf16.mxu0 %v15336_v0 }
 0x147   : > { %928 = vrot.lane.b32.xlu1 %v10435_v36, %s10511_s18  ;;  %2123 = vmatprep.subr.bf16.mxu1 %v15336_v0 }
 0x148   : > { %v11271_v25 = vpop.permute.xlu0 %1284 }
 0x149   : > { %2078 = vmatpush2.bf16.msra.mxu0 %v11150_v15  ;;  %2124 = vmatpush2.bf16.msra.mxu1 %v11144_v20  ;;  %v11275_v28 = vpop.permute.xlu1 %1288  ;;  %v11400_v15 = vld [vmem:[%s10582_s15 + $0x168] sm:$0xff]  }
 0x14a   : > { %1502 = vrot.lane.b32.xlu0 %v10432_v30, %s10512_s19  ;;  %2125 = vmatprep.subr.bf16.mxu1 %v15336_v0  ;;  %v11427_v30 = vld [vmem:[%s10582_s15 + $0x170] sm:$0xff]  }
 0x14b   : > { %1506 = vrot.lane.b32.xlu1 %v10433_v31, %s10512_s19  ;;  %2143 = vmatprep.subr.bf16.mxu0 %v15336_v0 }
 0x14c   : > { %2080 = vmatmul.mubr.bf16.vlgmr.msra.gmra.mxu0 %v10829_v40  ;;  %v11282_v29 = vpop.permute.xlu0 %1094 }
 0x14d   : > { %2126 = vmatpush2.bf16.msra.mxu1 %v11154_v16  ;;  %2144 = vmatpush1.bf16.msra.mxu0 %v11161_v17  ;;  %v11286_v51 = vpop.permute.xlu1 %1098  ;;  %v11405_v16 = vld [vmem:[%s10582_s15 + $0x178] sm:$0xff]  }
 0x14e   : > { %1500 = vrot.lane.b32.xlu0 %v10434_v35, %s10512_s19  ;;  %2145 = vmatprep.subr.bf16.mxu0 %v15336_v0 }
 0x14f   : > { %1504 = vrot.lane.b32.xlu1 %v10435_v36, %s10512_s19  ;;  %2191 = vmatprep.subr.bf16.mxu1 %v15336_v0 }
 0x150   : > { %2128 = vmatmul.mubr.bf16.vlgmr.msra.gmra.mxu1 %v10829_v40  ;;  %v11299_v56 = vpop.permute.xlu0 %1092  ;;  %8593 = vmatprep.mubr.msk.bf16.mxu0 %vm1656_vm0, %v10841_v45 }
 0x151   : > { %2146 = vmatpush1.bf16.msra.mxu0 %v11172_v22  ;;  %2192 = vmatpush1.bf16.msra.mxu1 %v11165_v21  ;;  %v11305_v57 = vpop.permute.xlu1 %1096 }
 0x152   : > { %1318 = vrot.lane.b32.xlu0 %v11291_v54, %s10509_s16  ;;  %2147 = vmatprep.subr.bf16.mxu0 %v15336_v0 }
 0x153   : > { %1322 = vrot.lane.b32.xlu1 %v11296_v55, %s10509_s16  ;;  %2193 = vmatprep.subr.bf16.mxu1 %v15336_v0 }
 0x154   : > { %v11315_v60 = vpop.permute.xlu0 %902  ;;  %2088 = vmatmul.mubr.bf16.gmra.mxu0 %v10858_v50  ;;  %8595 = vmatprep.mubr.msk.bf16.mxu1 %vm1656_vm0, %v10841_v45 }
 0x155   : > { %2148 = vmatpush1.bf16.msra.mxu0 %v11184_v26  ;;  %2194 = vmatpush1.bf16.msra.mxu1 %v11178_v23  ;;  %v11322_v61 = vpop.permute.xlu1 %906 }
 0x156   : > { %1316 = vrot.lane.b32.xlu0 %v10438_v58, %s10509_s16  ;;  %2149 = vmatprep.subr.bf16.mxu0 %v15336_v0 }
 0x157   : > { %1320 = vrot.lane.b32.xlu1 %v10439_v59, %s10509_s16  ;;  %2195 = vmatprep.subr.bf16.mxu1 %v15336_v0 }
 0x158   : > { %v11328_v62 = vpop.permute.xlu0 %900  ;;  %2136 = vmatmul.mubr.bf16.gmra.mxu1 %v10858_v50  ;;  %8596 = vmatprep.mubr.msk.bf16.mxu0 %vm1656_vm0, %v11205_v33 }
 0x159   : > { %2150 = vmatpush1.bf16.msra.mxu0 %v11199_v32  ;;  %2196 = vmatpush1.bf16.msra.mxu1 %v11191_v27  ;;  %v11335_v5 = vpop.permute.xlu1 %904  ;;  %v11421_v27 = vld [vmem:[%s10582_s15 + $0x160] sm:$0xff]  }
 0x15a   : > { %1126 = vrot.lane.b32.xlu0 %v11291_v54, %s10510_s17  ;;  %2151 = vmatprep.subr.bf16.mxu0 %v15336_v0 }
 0x15b   : > { %1130 = vrot.lane.b32.xlu1 %v11296_v55, %s10510_s17  ;;  %2197 = vmatprep.subr.bf16.mxu1 %v15336_v0 }
 0x15c   : > { %v11343_v63 = vpop.permute.xlu0 %1478  ;;  %8598 = vmatprep.mubr.msk.bf16.mxu1 %vm1656_vm0, %v11205_v33 }
 0x15d   : > { %2152 = vmatpush1.bf16.msra.mxu0 %v11219_v37  ;;  %2198 = vmatpush1.bf16.msra.mxu1 %v11211_v34  ;;  %v11349_v1 = vpop.permute.xlu1 %1482 }
 0x15e   : > { %1124 = vrot.lane.b32.xlu0 %v10438_v58, %s10510_s17  ;;  %2153 = vmatprep.subr.bf16.mxu0 %v15336_v0 }
 0x15f   : > { %1128 = vrot.lane.b32.xlu1 %v10439_v59, %s10510_s17  ;;  %2199 = vmatprep.subr.bf16.mxu1 %v15336_v0 }
 0x160   : > { %v11355_v2 = vpop.permute.xlu0 %1476 }
 0x161   : > { %2154 = vmatpush1.bf16.msra.mxu0 %v11231_v10  ;;  %2200 = vmatpush1.bf16.msra.mxu1 %v11225_v41  ;;  %v11359_v3 = vpop.permute.xlu1 %1480 }
 0x162   : > { %934 = vrot.lane.b32.xlu0 %v11291_v54, %s10511_s18  ;;  %2155 = vmatprep.subr.bf16.mxu0 %v15336_v0 }
 0x163   : > { %938 = vrot.lane.b32.xlu1 %v11296_v55, %s10511_s18  ;;  %2201 = vmatprep.subr.bf16.mxu1 %v15336_v0 }
 0x164   : > { %v11367_v4 = vpop.permute.xlu0 %1294 }
 0x165   : > { %2156 = vmatpush1.bf16.msra.mxu0 %v10847_v47  ;;  %2202 = vmatpush1.bf16.msra.mxu1 %v11235_v44  ;;  %v11371_v8 = vpop.permute.xlu1 %1298 }
 0x166   : > { %932 = vrot.lane.b32.xlu0 %v10438_v58, %s10511_s18  ;;  %2157 = vmatprep.subr.bf16.mxu0 %v15336_v0 }
 0x167   : > { %936 = vrot.lane.b32.xlu1 %v10439_v59, %s10511_s18  ;;  %2203 = vmatprep.subr.bf16.mxu1 %v15336_v0 }
 0x168   : > { %v11377_v9 = vpop.permute.xlu0 %1292 }
 0x169   : > { %2158 = vmatpush1.bf16.msra.mxu0 %v10864_v52  ;;  %2204 = vmatpush1.bf16.msra.mxu1 %v10853_v48  ;;  %v11381_v47 = vpop.permute.xlu1 %1296 }
 0x16a   : > { %1510 = vrot.lane.b32.xlu0 %v11291_v54, %s10512_s19  ;;  %2171 = vmatprep.subr.bf16.mxu0 %v15336_v0 }
 0x16b   : > { %1514 = vrot.lane.b32.xlu1 %v11296_v55, %s10512_s19  ;;  %2205 = vmatprep.subr.bf16.mxu1 %v15336_v0 }
 0x16c   : > { %v11389_v14 = vpop.f32.mrf.mxu0  ;;  %v11391_v20 = vpop.permute.xlu0 %1102 }
 0x16d   : > { %2172 = vmatpush2.bf16.msra.mxu0 %v11241_v11  ;;  %2206 = vmatpush1.bf16.msra.mxu1 %v10870_v53  ;;  %v11395_v48 = vpop.permute.xlu1 %1106 }
 0x16e   : > { %1508 = vrot.lane.b32.xlu0 %v10438_v58, %s10512_s19  ;;  %v1699_v52 = vpop.f32.mrf.mxu0  ;;  %2173 = vmatprep.subr.bf16.mxu0 %v15336_v0  ;;  %v11529_v58 = vld [vmem:[%s10582_s15 + $0x188] sm:$0xff]  }
 0x16f   : > { %1512 = vrot.lane.b32.xlu1 %v10439_v59, %s10512_s19  ;;  %2219 = vmatprep.subr.bf16.mxu1 %v15336_v0 }
 0x170   : > { %v11407_v17 = vpop.f32.mrf.mxu0  ;;  %v11409_v53 = vpop.f32.mrf.mxu1 }
 0x171   : > { %2174 = vmatpush2.bf16.msra.mxu0 %v11251_v46  ;;  %2220 = vmatpush2.bf16.msra.mxu1 %v11245_v12  ;;  %v11413_v21 = vpop.permute.xlu0 %1100  ;;  %v11415_v22 = vpop.permute.xlu1 %1104 }
 0x172   : > { %1326 = vrot.lane.b32.xlu0 %v11400_v15, %s10509_s16  ;;  %v1702_v23 = vpop.f32.mrf.mxu0  ;;  %v1747_v26 = vpop.f32.mrf.mxu1  ;;  %2221 = vmatprep.subr.bf16.mxu1 %v15336_v0 }
 0x173   : > { %1330 = vrot.lane.b32.xlu1 %v11405_v16, %s10509_s16  ;;  %2239 = vmatprep.subr.bf16.mxu0 %v15336_v0 }
 0x174   : > { %v11429_v31 = vpop.f32.mrf.mxu1  ;;  %2176 = vmatmul.mubr.bf16.vlgmr.msra.gmra.mxu0 %v10829_v40  ;;  %v11432_v32 = vpop.f32.mrf.mxu0 }
 0x175   : > { %2222 = vmatpush2.bf16.msra.mxu1 %v11255_v13  ;;  %2240 = vmatpush1.bf16.msra.mxu0 %v11261_v24  ;;  %v11436_v34 = vpop.permute.xlu0 %910  ;;  %v11438_v35 = vpop.permute.xlu1 %914 }
 0x176   : > { %1324 = vrot.lane.b32.xlu0 %v11421_v27, %s10509_s16  ;;  %v1750_v36 = vpop.f32.mrf.mxu1  ;;  %2241 = vmatprep.subr.bf16.mxu0 %v15336_v0  ;;  %v1707_v37 = vpop.f32.mrf.mxu0 }
 0x177   : > { %1328 = vrot.lane.b32.xlu1 %v11427_v30, %s10509_s16  ;;  %2287 = vmatprep.subr.bf16.mxu1 %v15336_v0 }
 0x178   : > { %2224 = vmatmul.mubr.bf16.vlgmr.msra.gmra.mxu1 %v10829_v40  ;;  %v11447_v41 = vpop.f32.mrf.mxu1  ;;  %v1708_v10 = vpop.f32.mrf.mxu0  ;;  %8597 = vmatprep.mubr.msk.bf16.mxu0 %vm1656_vm0, %v10841_v45 }
 0x179   : > { %2242 = vmatpush1.bf16.msra.mxu0 %v11271_v25  ;;  %2288 = vmatpush1.bf16.msra.mxu1 %v11265_v49  ;;  %v11453_v44 = vpop.permute.xlu0 %908  ;;  %v11455_v11 = vpop.permute.xlu1 %912 }
 0x17a   : > { %1134 = vrot.lane.b32.xlu0 %v11400_v15, %s10510_s17  ;;  %2243 = vmatprep.subr.bf16.mxu0 %v15336_v0  ;;  %v1755_v40 = vpop.f32.mrf.mxu1  ;;  %v1709_v12 = vpop.f32.mrf.mxu0 }
 0x17b   : > { %1138 = vrot.lane.b32.xlu1 %v11405_v16, %s10510_s17  ;;  %2289 = vmatprep.subr.bf16.mxu1 %v15336_v0 }
 0x17c   : > { %v1756_v46 = vpop.f32.mrf.mxu1  ;;  %2184 = vmatmul.mubr.bf16.gmra.mxu0 %v10858_v50  ;;  %8599 = vmatprep.mubr.msk.bf16.mxu1 %vm1656_vm0, %v10841_v45 }
 0x17d   : > { %2244 = vmatpush1.bf16.msra.mxu0 %v11282_v29  ;;  %2290 = vmatpush1.bf16.msra.mxu1 %v11275_v28  ;;  %v11468_v13 = vpop.permute.xlu0 %1486  ;;  %v11470_v24 = vpop.permute.xlu1 %1490 }
 0x17e   : > { %1132 = vrot.lane.b32.xlu0 %v11421_v27, %s10510_s17  ;;  %2245 = vmatprep.subr.bf16.mxu0 %v15336_v0  ;;  %v1757_v49 = vpop.f32.mrf.mxu1 }
 0x17f   : > { %1136 = vrot.lane.b32.xlu1 %v11427_v30, %s10510_s17  ;;  %2291 = vmatprep.subr.bf16.mxu1 %v15336_v0 }
 0x180   : > { %2232 = vmatmul.mubr.bf16.gmra.mxu1 %v10858_v50  ;;  %8600 = vmatprep.mubr.msk.bf16.mxu0 %vm1656_vm0, %v11205_v33 }
 0x181   : > { %2246 = vmatpush1.bf16.msra.mxu0 %v11299_v56  ;;  %2292 = vmatpush1.bf16.msra.mxu1 %v11286_v51  ;;  %v11483_v25 = vpop.permute.xlu0 %1484  ;;  %v11485_v28 = vpop.permute.xlu1 %1488 }
 0x182   : > { %942 = vrot.lane.b32.xlu0 %v11400_v15, %s10511_s18  ;;  %2247 = vmatprep.subr.bf16.mxu0 %v15336_v0 }
 0x183   : > { %946 = vrot.lane.b32.xlu1 %v11405_v16, %s10511_s18  ;;  %2293 = vmatprep.subr.bf16.mxu1 %v15336_v0 }
 0x184   : > { %8602 = vmatprep.mubr.msk.bf16.mxu1 %vm1656_vm0, %v11205_v33 }
 0x185   : > { %2248 = vmatpush1.bf16.msra.mxu0 %v11315_v60  ;;  %2294 = vmatpush1.bf16.msra.mxu1 %v11305_v57  ;;  %v11497_v29 = vpop.permute.xlu0 %1302  ;;  %v11499_v51 = vpop.permute.xlu1 %1306 }
 0x186   : > { %940 = vrot.lane.b32.xlu0 %v11421_v27, %s10511_s18  ;;  %2249 = vmatprep.subr.bf16.mxu0 %v15336_v0 }
 0x187   : > { %944 = vrot.lane.b32.xlu1 %v11427_v30, %s10511_s18  ;;  %2295 = vmatprep.subr.bf16.mxu1 %v15336_v0 }
 0x189   : > { %2250 = vmatpush1.bf16.msra.mxu0 %v11328_v62  ;;  %2296 = vmatpush1.bf16.msra.mxu1 %v11322_v61  ;;  %v11509_v54 = vpop.permute.xlu0 %1300  ;;  %v11511_v55 = vpop.permute.xlu1 %1304  ;;  %v11547_v61 = vld [vmem:[%s10582_s15 + $0x180] sm:$0xff]   ;;  %v11553_v62 = vld [vmem:[%s10582_s15 + $0x190] sm:$0xff]  }
 0x18a   : > { %1518 = vrot.lane.b32.xlu0 %v11400_v15, %s10512_s19  ;;  %2251 = vmatprep.subr.bf16.mxu0 %v15336_v0 }
 0x18b   : > { %1522 = vrot.lane.b32.xlu1 %v11405_v16, %s10512_s19  ;;  %2297 = vmatprep.subr.bf16.mxu1 %v15336_v0 }
 0x18d   : > { %2252 = vmatpush1.bf16.msra.mxu0 %v10924_v6  ;;  %2298 = vmatpush1.bf16.msra.mxu1 %v11335_v5  ;;  %v11521_v56 = vpop.permute.xlu0 %1110  ;;  %v11523_v57 = vpop.permute.xlu1 %1114  ;;  %v11535_v6 = vld [vmem:[%s10582_s15 + $0x198] sm:$0xff]  }
 0x18e   : > { %1516 = vrot.lane.b32.xlu0 %v11421_v27, %s10512_s19  ;;  %2253 = vmatprep.subr.bf16.mxu0 %v15336_v0 }
 0x18f   : > { %1520 = vrot.lane.b32.xlu1 %v11427_v30, %s10512_s19  ;;  %2299 = vmatprep.subr.bf16.mxu1 %v15336_v0 }
 0x191   : > { %2254 = vmatpush1.bf16.msra.mxu0 %v10936_v18  ;;  %2300 = vmatpush1.bf16.msra.mxu1 %v10930_v7  ;;  %v11539_v59 = vpop.permute.xlu0 %1108  ;;  %v11541_v60 = vpop.permute.xlu1 %1112 }
 0x192   : > { %1334 = vrot.lane.b32.xlu0 %v11529_v58, %s10509_s16  ;;  %2267 = vmatprep.subr.bf16.mxu0 %v15336_v0 }
 0x193   : > { %1338 = vrot.lane.b32.xlu1 %v11535_v6, %s10509_s16  ;;  %2301 = vmatprep.subr.bf16.mxu1 %v15336_v0 }
 0x194   : > { %v11555_v18 = vpop.f32.mrf.mxu0 }
 0x195   : > { %15358 = vst [vmem:[#allocation2_spill] sm:$0xff] %v11555_v18  ;;  %2268 = vmatpush2.bf16.msra.mxu0 %v11343_v63  ;;  %2302 = vmatpush1.bf16.msra.mxu1 %v10942_v19  ;;  %v11559_v7 = vpop.permute.xlu0 %918  ;;  %v11561_v5 = vpop.permute.xlu1 %922 }
 0x196   : > { %1332 = vrot.lane.b32.xlu0 %v11547_v61, %s10509_s16  ;;  %v1795_v52 = vpop.f32.mrf.mxu0  ;;  %2269 = vmatprep.subr.bf16.mxu0 %v15336_v0 }
 0x197   : > { %1336 = vrot.lane.b32.xlu1 %v11553_v62, %s10509_s16  ;;  %2315 = vmatprep.subr.bf16.mxu1 %v15336_v0 }
 0x198   : > { %v11569_v15 = vpop.f32.mrf.mxu0  ;;  %v11571_v63 = vpop.f32.mrf.mxu1 }
 0x199   : > { %15359 = vst [vmem:[#allocation3_spill] sm:$0xff] %v11571_v63  ;;  %2270 = vmatpush2.bf16.msra.mxu0 %v11355_v2  ;;  %2316 = vmatpush2.bf16.msra.mxu1 %v11349_v1  ;;  %v11575_v19 = vpop.permute.xlu0 %916  ;;  %v11577_v16 = vpop.permute.xlu1 %920  ;;  %v11590_v1 = vld [vmem:[%s15327_s1] ss:$8 sps:$4 sm:$0xff]  }
 0x19a   : > { %1142 = vrot.lane.b32.xlu0 %v11529_v58, %s10510_s17  ;;  %v1798_v23 = vpop.f32.mrf.mxu0  ;;  %v1843_v26 = vpop.f32.mrf.mxu1  ;;  %2317 = vmatprep.subr.bf16.mxu1 %v15336_v0 }
 0x19b   : > { %1146 = vrot.lane.b32.xlu1 %v11535_v6, %s10510_s17  ;;  %2335 = vmatprep.subr.bf16.mxu0 %v15336_v0 }
 0x19c   : > { %v11585_v27 = vpop.f32.mrf.mxu1  ;;  %2272 = vmatmul.mubr.bf16.vlgmr.msra.gmra.mxu0 %v11590_v1  ;;  %v11593_v2 = vpop.f32.mrf.mxu0 }
 0x19d   : > { %2318 = vmatpush2.bf16.msra.mxu1 %v11359_v3  ;;  %2336 = vmatpush1.bf16.msra.mxu0 %v11367_v4  ;;  %v11597_v30 = vpop.permute.xlu0 %1494  ;;  %v11599_v36 = vpop.permute.xlu1 %1498 }
 0x19e   : > { %1140 = vrot.lane.b32.xlu0 %v11547_v61, %s10510_s17  ;;  %v1846_v37 = vpop.f32.mrf.mxu1  ;;  %2337 = vmatprep.subr.bf16.mxu0 %v15336_v0  ;;  %v1803_v10 = vpop.f32.mrf.mxu0 }
 0x19f   : > { %1144 = vrot.lane.b32.xlu1 %v11553_v62, %s10510_s17  ;;  %2383 = vmatprep.subr.bf16.mxu1 %v15336_v0 }
 0x1a0   : > { %2320 = vmatmul.mubr.bf16.vlgmr.msra.gmra.mxu1 %v11590_v1  ;;  %8601 = vmatprep.mubr.msk.bf16.mxu0 %vm1656_vm0, %v10841_v45  ;;  %v11610_v3 = vpop.f32.mrf.mxu1  ;;  %v1804_v4 = vpop.f32.mrf.mxu0 }
 0x1a1   : > { %2338 = vmatpush1.bf16.msra.mxu0 %v11377_v9  ;;  %2384 = vmatpush1.bf16.msra.mxu1 %v11371_v8  ;;  %v11614_v40 = vpop.permute.xlu0 %1492  ;;  %v11616_v12 = vpop.permute.xlu1 %1496 }
 0x1a2   : > { %950 = vrot.lane.b32.xlu0 %v11529_v58, %s10511_s18  ;;  %2339 = vmatprep.subr.bf16.mxu0 %v15336_v0  ;;  %v1851_v46 = vpop.f32.mrf.mxu1  ;;  %v1805_v49 = vpop.f32.mrf.mxu0 }
 0x1a3   : > { %954 = vrot.lane.b32.xlu1 %v11535_v6, %s10511_s18  ;;  %2385 = vmatprep.subr.bf16.mxu1 %v15336_v0 }
 0x1a4   : > { %2280 = vmatmul.mubr.bf16.gmra.mxu0 %v10858_v50  ;;  %8603 = vmatprep.mubr.msk.bf16.mxu1 %vm1656_vm0, %v10841_v45  ;;  %v1852_v8 = vpop.f32.mrf.mxu1 }
 0x1a5   : > { %2340 = vmatpush1.bf16.msra.mxu0 %v11391_v20  ;;  %2386 = vmatpush1.bf16.msra.mxu1 %v11381_v47  ;;  %v11629_v9 = vpop.permute.xlu0 %1310  ;;  %v11631_v52 = vpop.permute.xlu1 %1314 }
 0x1a6   : > { %948 = vrot.lane.b32.xlu0 %v11547_v61, %s10511_s18  ;;  %2341 = vmatprep.subr.bf16.mxu0 %v15336_v0  ;;  %v1853_v23 = vpop.f32.mrf.mxu1 }
 0x1a7   : > { %952 = vrot.lane.b32.xlu1 %v11553_v62, %s10511_s18  ;;  %2387 = vmatprep.subr.bf16.mxu1 %v15336_v0 }
 0x1a8   : > { %2328 = vmatmul.mubr.bf16.gmra.mxu1 %v10858_v50  ;;  %8604 = vmatprep.mubr.msk.bf16.mxu0 %vm1656_vm0, %v11205_v33 }
 0x1a9   : > { %2342 = vmatpush1.bf16.msra.mxu0 %v11413_v21  ;;  %2388 = vmatpush1.bf16.msra.mxu1 %v11395_v48  ;;  %v11644_v47 = vpop.permute.xlu0 %1308  ;;  %v11646_v20 = vpop.permute.xlu1 %1312 }
 0x1aa   : > { %1526 = vrot.lane.b32.xlu0 %v11529_v58, %s10512_s19  ;;  %2343 = vmatprep.subr.bf16.mxu0 %v15336_v0  ;;  %v11666_v58 = vld [vmem:[%s10582_s15 + $0x1a8] sm:$0xff]  }
 0x1ab   : > { %1530 = vrot.lane.b32.xlu1 %v11535_v6, %s10512_s19  ;;  %2389 = vmatprep.subr.bf16.mxu1 %v15336_v0 }
 0x1ac   : > { %8606 = vmatprep.mubr.msk.bf16.mxu1 %vm1656_vm0, %v11205_v33 }
 0x1ad   : > { %2344 = vmatpush1.bf16.msra.mxu0 %v11436_v34  ;;  %2390 = vmatpush1.bf16.msra.mxu1 %v11415_v22  ;;  %v11658_v48 = vpop.permute.xlu0 %1118  ;;  %v11660_v21 = vpop.permute.xlu1 %1122  ;;  %v11672_v34 = vld [vmem:[%s10582_s15 + $0x1b8] sm:$0xff]  }
 0x1ae   : > { %1524 = vrot.lane.b32.xlu0 %v11547_v61, %s10512_s19  ;;  %2345 = vmatprep.subr.bf16.mxu0 %v15336_v0  ;;  %v11684_v61 = vld [vmem:[%s10582_s15 + $0x1a0] sm:$0xff]  }
 0x1af   : > { %1528 = vrot.lane.b32.xlu1 %v11553_v62, %s10512_s19  ;;  %2391 = vmatprep.subr.bf16.mxu1 %v15336_v0  ;;  %v11690_v62 = vld [vmem:[%s10582_s15 + $0x1b0] sm:$0xff]  }
 0x1b1   : > { %2346 = vmatpush1.bf16.msra.mxu0 %v11453_v44  ;;  %2392 = vmatpush1.bf16.msra.mxu1 %v11438_v35  ;;  %v11676_v22 = vpop.permute.xlu0 %1116  ;;  %v11678_v6 = vpop.permute.xlu1 %1120 }
 0x1b2   : > { %1342 = vrot.lane.b32.xlu0 %v11666_v58, %s10509_s16  ;;  %2347 = vmatprep.subr.bf16.mxu0 %v15336_v0 }
 0x1b3   : > { %1346 = vrot.lane.b32.xlu1 %v11672_v34, %s10509_s16  ;;  %2393 = vmatprep.subr.bf16.mxu1 %v15336_v0 }
 0x1b5   : > { %2348 = vmatpush1.bf16.msra.mxu0 %v11001_v38  ;;  %2394 = vmatpush1.bf16.msra.mxu1 %v11455_v11  ;;  %v11694_v35 = vpop.permute.xlu0 %926  ;;  %v11696_v44 = vpop.permute.xlu1 %930 }
 0x1b6   : > { %1340 = vrot.lane.b32.xlu0 %v11684_v61, %s10509_s16  ;;  %2349 = vmatprep.subr.bf16.mxu0 %v15336_v0 }
 0x1b7   : > { %1344 = vrot.lane.b32.xlu1 %v11690_v62, %s10509_s16  ;;  %2395 = vmatprep.subr.bf16.mxu1 %v15336_v0 }
 0x1b9   : > { %2350 = vmatpush1.bf16.msra.mxu0 %v11017_v42  ;;  %2396 = vmatpush1.bf16.msra.mxu1 %v11007_v39  ;;  %v11706_v38 = vpop.permute.xlu0 %924  ;;  %v11708_v11 = vpop.permute.xlu1 %928 }
 0x1ba   : > { %1150 = vrot.lane.b32.xlu0 %v11666_v58, %s10510_s17  ;;  %2363 = vmatprep.subr.bf16.mxu0 %v15336_v0 }
 0x1bb   : > { %1154 = vrot.lane.b32.xlu1 %v11672_v34, %s10510_s17  ;;  %2397 = vmatprep.subr.bf16.mxu1 %v15336_v0 }
 0x1bc   : > { %v11716_v26 = vpop.f32.mrf.mxu0 }
 0x1bd   : > { %15360 = vst [vmem:[#allocation4_spill] sm:$0xff] %v11716_v26  ;;  %2364 = vmatpush2.bf16.msra.mxu0 %v11468_v13  ;;  %2398 = vmatpush1.bf16.msra.mxu1 %v11023_v43  ;;  %v11720_v39 = vpop.permute.xlu0 %1502  ;;  %v11722_v42 = vpop.permute.xlu1 %1506 }
 0x1be   : > { %1148 = vrot.lane.b32.xlu0 %v11684_v61, %s10510_s17  ;;  %v1891_v37 = vpop.f32.mrf.mxu0  ;;  %2365 = vmatprep.subr.bf16.mxu0 %v15336_v0 }
 0x1bf   : > { %1152 = vrot.lane.b32.xlu1 %v11690_v62, %s10510_s17  ;;  %2411 = vmatprep.subr.bf16.mxu1 %v15336_v0 }
 0x1c0   : > { %v11730_v10 = vpop.f32.mrf.mxu0  ;;  %v11732_v13 = vpop.f32.mrf.mxu1 }
 0x1c1   : > { %15361 = vst [vmem:[#allocation5_spill] sm:$0xff] %v11730_v10  ;;  %15362 = vst [vmem:[#allocation6_spill] sm:$0xff] %v11732_v13  ;;  %2366 = vmatpush2.bf16.msra.mxu0 %v11483_v25  ;;  %2412 = vmatpush2.bf16.msra.mxu1 %v11470_v24  ;;  %v11736_v43 = vpop.permute.xlu0 %1500  ;;  %v11738_v4 = vpop.permute.xlu1 %1504 }
 0x1c2   : > { %958 = vrot.lane.b32.xlu0 %v11666_v58, %s10511_s18  ;;  %v1894_v46 = vpop.f32.mrf.mxu0  ;;  %v1939_v49 = vpop.f32.mrf.mxu1  ;;  %2413 = vmatprep.subr.bf16.mxu1 %v15336_v0 }
 0x1c3   : > { %962 = vrot.lane.b32.xlu1 %v11672_v34, %s10511_s18  ;;  %2431 = vmatprep.subr.bf16.mxu0 %v15336_v0 }
 0x1c4   : > { %v11746_v8 = vpop.f32.mrf.mxu1  ;;  %2368 = vmatmul.mubr.bf16.vlgmr.msra.gmra.mxu0 %v11590_v1  ;;  %v11749_v24 = vpop.f32.mrf.mxu0 }
 0x1c5   : > { %15363 = vst [vmem:[#allocation7_spill] sm:$0xff] %v11746_v8  ;;  %15364 = vst [vmem:[#allocation8_spill] sm:$0xff] %v11749_v24  ;;  %2414 = vmatpush2.bf16.msra.mxu1 %v11485_v28  ;;  %2432 = vmatpush1.bf16.msra.mxu0 %v11497_v29  ;;  %v11753_v25 = vpop.permute.xlu0 %1318  ;;  %v11755_v23 = vpop.permute.xlu1 %1322 }
 0x1c6   : > { %956 = vrot.lane.b32.xlu0 %v11684_v61, %s10511_s18  ;;  %v1942_v37 = vpop.f32.mrf.mxu1  ;;  %2433 = vmatprep.subr.bf16.mxu0 %v15336_v0  ;;  %v1899_v46 = vpop.f32.mrf.mxu0 }
 0x1c7   : > { %960 = vrot.lane.b32.xlu1 %v11690_v62, %s10511_s18  ;;  %2479 = vmatprep.subr.bf16.mxu1 %v15336_v0 }
 0x1c8   : > { %2416 = vmatmul.mubr.bf16.vlgmr.msra.gmra.mxu1 %v11590_v1  ;;  %8605 = vmatprep.mubr.msk.bf16.mxu0 %vm1656_vm0, %v10841_v45  ;;  %v11766_v28 = vpop.f32.mrf.mxu1  ;;  %v1900_v29 = vpop.f32.mrf.mxu0 }
 0x1c9   : > { %15365 = vst [vmem:[#allocation9_spill] sm:$0xff] %v11766_v28  ;;  %2434 = vmatpush1.bf16.msra.mxu0 %v11509_v54  ;;  %2480 = vmatpush1.bf16.msra.mxu1 %v11499_v51  ;;  %v11770_v49 = vpop.permute.xlu0 %1316  ;;  %v11772_v37 = vpop.permute.xlu1 %1320  ;;  %v11820_v29 = vld [vmem:[%s10582_s15 + $0x1d0] sm:$0xff]  }
 0x1ca   : > { %1534 = vrot.lane.b32.xlu0 %v11666_v58, %s10512_s19  ;;  %2435 = vmatprep.subr.bf16.mxu0 %v15336_v0  ;;  %v1947_v46 = vpop.f32.mrf.mxu1  ;;  %v1901_v26 = vpop.f32.mrf.mxu0 }
 0x1cb   : > { %1538 = vrot.lane.b32.xlu1 %v11672_v34, %s10512_s19  ;;  %2481 = vmatprep.subr.bf16.mxu1 %v15336_v0  ;;  %v11793_v34 = vld [vmem:[%s10582_s15 + $0x1c8] sm:$0xff]  }
 0x1cc   : > { %2376 = vmatmul.mubr.bf16.gmra.mxu0 %v10858_v50  ;;  %8607 = vmatprep.mubr.msk.bf16.mxu1 %vm1656_vm0, %v10841_v45  ;;  %v1948_v51 = vpop.f32.mrf.mxu1 }
 0x1cd   : > { %2436 = vmatpush1.bf16.msra.mxu0 %v11521_v56  ;;  %2482 = vmatpush1.bf16.msra.mxu1 %v11511_v55  ;;  %v11785_v54 = vpop.permute.xlu0 %1126  ;;  %v11787_v58 = vpop.permute.xlu1 %1130  ;;  %v11799_v55 = vld [vmem:[%s10582_s15 + $0x1d8] sm:$0xff]   ;;  %v1623_v51 = vld [vmem:[%s15328_s2] sm:$0xff] }
 0x1ce   : > { %1532 = vrot.lane.b32.xlu0 %v11684_v61, %s10512_s19  ;;  %2437 = vmatprep.subr.bf16.mxu0 %v15336_v0  ;;  %v1949_v26 = vpop.f32.mrf.mxu1 }
 0x1cf   : > { %1536 = vrot.lane.b32.xlu1 %v11690_v62, %s10512_s19  ;;  %2483 = vmatprep.subr.bf16.mxu1 %v15336_v0  ;;  %v11814_v62 = vld [vmem:[%s10582_s15 + $0x1c0] sm:$0xff]  }
 0x1d0   : > { %2424 = vmatmul.mubr.bf16.gmra.mxu1 %v10858_v50  ;;  %8608 = vmatprep.mubr.msk.bf16.mxu0 %vm1656_vm0, %v11205_v33  ;;  %v10464_v26 = vld [vmem:[%s10582_s15 + $0x100] sm:$0xff]  }
 0x1d1   : > { %2438 = vmatpush1.bf16.msra.mxu0 %v11539_v59  ;;  %2484 = vmatpush1.bf16.msra.mxu1 %v11523_v57  ;;  %v11806_v56 = vpop.permute.xlu0 %1124  ;;  %v11808_v61 = vpop.permute.xlu1 %1128 }
 0x1d2   : > { %1350 = vrot.lane.b32.xlu0 %v11793_v34, %s10509_s16  ;;  %2439 = vmatprep.subr.bf16.mxu0 %v15336_v0 }
 0x1d3   : > { %1354 = vrot.lane.b32.xlu1 %v11799_v55, %s10509_s16  ;;  %2485 = vmatprep.subr.bf16.mxu1 %v15336_v0 }
 0x1d4   : > { %8610 = vmatprep.mubr.msk.bf16.mxu1 %vm1656_vm0, %v11205_v33 }
 0x1d5   : > { %2440 = vmatpush1.bf16.msra.mxu0 %v11559_v7  ;;  %2486 = vmatpush1.bf16.msra.mxu1 %v11541_v60  ;;  %v11826_v57 = vpop.permute.xlu0 %934  ;;  %v11828_v59 = vpop.permute.xlu1 %938  ;;  %v1625_v7 = vld [vmem:[%s15328_s2 + $0x10] sm:$0xff] }
 0x1d6   : > { %1348 = vrot.lane.b32.xlu0 %v11814_v62, %s10509_s16  ;;  %2441 = vmatprep.subr.bf16.mxu0 %v15336_v0 }
 0x1d7   : > { %1352 = vrot.lane.b32.xlu1 %v11820_v29, %s10509_s16  ;;  %2487 = vmatprep.subr.bf16.mxu1 %v15336_v0 }
 0x1d9   : > { %2442 = vmatpush1.bf16.msra.mxu0 %v11575_v19  ;;  %2488 = vmatpush1.bf16.msra.mxu1 %v11561_v5  ;;  %v11838_v33 = vpop.permute.xlu0 %932  ;;  %v11840_v60 = vpop.permute.xlu1 %936  ;;  %v10463_v5 = vld [vmem:[%s10582_s15 + $0x108] sm:$0xff]  }
 0x1da   : > { %1158 = vrot.lane.b32.xlu0 %v11793_v34, %s10510_s17  ;;  %2443 = vmatprep.subr.bf16.mxu0 %v15336_v0 }
 0x1db   : > { %1162 = vrot.lane.b32.xlu1 %v11799_v55, %s10510_s17  ;;  %2489 = vmatprep.subr.bf16.mxu1 %v15336_v0 }
 0x1dd   : > { %2444 = vmatpush1.bf16.msra.mxu0 %v10463_v5  ;;  %2490 = vmatpush1.bf16.msra.mxu1 %v11577_v16  ;;  %v11853_v19 = vpop.permute.xlu0 %1510  ;;  %v11855_v46 = vpop.permute.xlu1 %1514  ;;  %v10465_v16 = vld [vmem:[%s10582_s15 + $0x118] sm:$0xff]  }
 0x1de   : > { %1638 = vperm.xlu0 %10389, %v1625_v7   ;;  %2445 = vmatprep.subr.bf16.mxu0 %v15336_v0 }
 0x1df   : > { %1156 = vrot.lane.b32.xlu1 %v11814_v62, %s10510_s17  ;;  %2491 = vmatprep.subr.bf16.mxu1 %v15336_v0 }
 0x1e1   : > { %2446 = vmatpush1.bf16.msra.mxu0 %v10464_v26  ;;  %2492 = vmatpush1.bf16.msra.mxu1 %v10465_v16  ;;  %v11866_v5 = vpop.permute.xlu0 %1508  ;;  %v11868_v13 = vpop.permute.xlu1 %1512  ;;  %v1624_v26 = vld [vmem:[%s15328_s2 + $0x8] sm:$0xff]  ;;  %v10466_v16 = vld [vmem:[%s10582_s15 + $0x110] sm:$0xff]  }
 0x1e2   : > { %1628 = vperm.xlu0 %10389, %v1623_v51   ;;  %2459 = vmatprep.subr.bf16.mxu0 %v15336_v0 }
 0x1e3   : > { %1160 = vrot.lane.b32.xlu1 %v11820_v29, %s10510_s17  ;;  %2493 = vmatprep.subr.bf16.mxu1 %v15336_v0 }
 0x1e4   : > { %v11874_v7 = vpop.f32.mrf.mxu0 }
 0x1e5   : > { %15366 = vst [vmem:[#allocation10_spill] sm:$0xff] %v11874_v7  ;;  %2460 = vmatpush2.bf16.msra.mxu0 %v11597_v30  ;;  %2494 = vmatpush1.bf16.msra.mxu1 %v10466_v16  ;;  %v11881_v10 = vpop.permute.xlu0 %1326  ;;  %v11883_v51 = vpop.permute.xlu1 %1330 }
 0x1e6   : > { %v1987_v8 = vpop.f32.mrf.mxu0  ;;  %2461 = vmatprep.subr.bf16.mxu0 %v15336_v0  ;;  %2507 = vmatprep.subr.bf16.mxu1 %v15336_v0 }
 0x1e7   : > { %1633 = vperm.xlu1 %10390, %v1624_v26   ;;  %966 = vrot.lane.b32.xlu0 %v11793_v34, %s10511_s18 }
 0x1e8   : > { %v11889_v7 = vpop.f32.mrf.mxu0  ;;  %v11891_v24 = vpop.f32.mrf.mxu1 }
 0x1e9   : > { %15367 = vst [vmem:[#allocation11_spill] sm:$0xff] %v11889_v7  ;;  %15368 = vst [vmem:[#allocation12_spill] sm:$0xff] %v11891_v24  ;;  %2462 = vmatpush2.bf16.msra.mxu0 %v11614_v40  ;;  %2508 = vmatpush2.bf16.msra.mxu1 %v11599_v36  ;;  %v11895_v30 = vpop.permute.xlu0 %1324  ;;  %v11897_v16 = vpop.permute.xlu1 %1328 }
 0x1ea   : > { %v1990_v8 = vpop.f32.mrf.mxu0  ;;  %v2035_v28 = vpop.f32.mrf.mxu1  ;;  %2509 = vmatprep.subr.bf16.mxu1 %v15336_v0  ;;  %2527 = vmatprep.subr.bf16.mxu0 %v15336_v0 }
 0x1eb   : > { %970 = vrot.lane.b32.xlu1 %v11799_v55, %s10511_s18  ;;  %964 = vrot.lane.b32.xlu0 %v11814_v62, %s10511_s18 }
 0x1ec   : > { %v11905_v26 = vpop.f32.mrf.mxu1  ;;  %2464 = vmatmul.mubr.bf16.vlgmr.msra.gmra.mxu0 %v11590_v1  ;;  %v11908_v36 = vpop.f32.mrf.mxu0 }
 0x1ed   : > { %15369 = vst [vmem:[#allocation13_spill] sm:$0xff] %v11905_v26  ;;  %15370 = vst [vmem:[#allocation14_spill] sm:$0xff] %v11908_v36  ;;  %2510 = vmatpush2.bf16.msra.mxu1 %v11616_v12  ;;  %2528 = vmatpush1.bf16.msra.mxu0 %v11629_v9  ;;  %v11912_v40 = vpop.permute.xlu0 %1134  ;;  %v11914_v28 = vpop.permute.xlu1 %1138 }
 0x1ee   : > { %v2038_v8 = vpop.f32.mrf.mxu1  ;;  %2529 = vmatprep.subr.bf16.mxu0 %v15336_v0  ;;  %2575 = vmatprep.subr.bf16.mxu1 %v15336_v0  ;;  %v1995_v24 = vpop.f32.mrf.mxu0 }
 0x1ef   : > { %8609 = vmatprep.mubr.msk.bf16.mxu0 %vm1656_vm0, %v10841_v45  ;;  %968 = vrot.lane.b32.xlu1 %v11820_v29, %s10511_s18 }
 0x1f0   : > { %2512 = vmatmul.mubr.bf16.vlgmr.msra.gmra.mxu1 %v11590_v1  ;;  %v11923_v12 = vpop.f32.mrf.mxu1  ;;  %v1996_v9 = vpop.f32.mrf.mxu0  ;;  %1542 = vrot.lane.b32.xlu0 %v11793_v34, %s10512_s19 }
 0x1f1   : > { %15371 = vst [vmem:[#allocation15_spill] sm:$0xff] %v11923_v12  ;;  %2530 = vmatpush1.bf16.msra.mxu0 %v11644_v47  ;;  %2576 = vmatpush1.bf16.msra.mxu1 %v11631_v52  ;;  %v11929_v24 = vpop.permute.xlu0 %1132  ;;  %v11931_v8 = vpop.permute.xlu1 %1136  ;;  %v11943_v47 = vld [vmem:[%s10582_s15 + $0x1e8] sm:$0xff]  }
 0x1f2   : > { %2531 = vmatprep.subr.bf16.mxu0 %v15336_v0  ;;  %2577 = vmatprep.subr.bf16.mxu1 %v15336_v0  ;;  %v2043_v7 = vpop.f32.mrf.mxu1  ;;  %v1997_v26 = vpop.f32.mrf.mxu0 }
 0x1f3   : > { %8611 = vmatprep.mubr.msk.bf16.mxu1 %vm1656_vm0, %v10841_v45  ;;  %1546 = vrot.lane.b32.xlu1 %v11799_v55, %s10512_s19 }
 0x1f4   : > { %2472 = vmatmul.mubr.bf16.gmra.mxu0 %v10858_v50  ;;  %v2044_v52 = vpop.f32.mrf.mxu1  ;;  %1540 = vrot.lane.b32.xlu0 %v11814_v62, %s10512_s19  ;;  %v11956_v62 = vld [vmem:[%s15327_s1 + $0x4] ss:$8 sps:$4 sm:$0xff]  }
 0x1f5   : > { %2532 = vmatpush1.bf16.msra.mxu0 %v11658_v48  ;;  %2578 = vmatpush1.bf16.msra.mxu1 %v11646_v20  ;;  %v11947_v34 = vpop.permute.xlu0 %942  ;;  %v11949_v7 = vpop.permute.xlu1 %946  ;;  %v11963_v20 = vld [vmem:[%s10582_s15 + $0x1f8] sm:$0xff]   ;;  %v11969_v48 = vld [vmem:[%s10582_s15 + $0x1e0] sm:$0xff]   ;;  %v10468_v52 = vld [vmem:[%s10582_s15 + $0x128] sm:$0xff]  }
 0x1f6   : > { %2533 = vmatprep.subr.bf16.mxu0 %v15336_v0  ;;  %2579 = vmatprep.subr.bf16.mxu1 %v15336_v0  ;;  %v2045_v55 = vpop.f32.mrf.mxu1 }
 0x1f7   : > { %8612 = vmatprep.mubr.msk.bf16.mxu0 %vm1656_vm0, %v11956_v62  ;;  %1544 = vrot.lane.b32.xlu1 %v11820_v29, %s10512_s19  ;;  %v11984_v29 = vld [vmem:[%s10582_s15 + $0x1f0] sm:$0xff]   ;;  %v10469_v55 = vld [vmem:[%s10582_s15 + $0x120] sm:$0xff]  }
 0x1f8   : > { %2520 = vmatmul.mubr.bf16.gmra.mxu1 %v10858_v50  ;;  %1358 = vrot.lane.b32.xlu0 %v11943_v47, %s10509_s16 }
 0x1f9   : > { %2534 = vmatpush1.bf16.msra.mxu0 %v11676_v22  ;;  %2580 = vmatpush1.bf16.msra.mxu1 %v11660_v21  ;;  %v11973_v26 = vpop.permute.xlu0 %940  ;;  %v11975_v9 = vpop.permute.xlu1 %944 }
 0x1fa   : > { %2535 = vmatprep.subr.bf16.mxu0 %v15336_v0  ;;  %2581 = vmatprep.subr.bf16.mxu1 %v15336_v0 }
 0x1fb   : > { %8614 = vmatprep.mubr.msk.bf16.mxu1 %vm1656_vm0, %v11956_v62  ;;  %1362 = vrot.lane.b32.xlu1 %v11963_v20, %s10509_s16 }
 0x1fc   : > { %1356 = vrot.lane.b32.xlu0 %v11969_v48, %s10509_s16 }
 0x1fd   : > { %2536 = vmatpush1.bf16.msra.mxu0 %v11694_v35  ;;  %2582 = vmatpush1.bf16.msra.mxu1 %v11678_v6  ;;  %v11990_v21 = vpop.permute.xlu0 %1518  ;;  %v11992_v22 = vpop.permute.xlu1 %1522 }
 0x1fe   : > { %2537 = vmatprep.subr.bf16.mxu0 %v15336_v0  ;;  %2583 = vmatprep.subr.bf16.mxu1 %v15336_v0 }
 0x1ff   : > { %1360 = vrot.lane.b32.xlu1 %v11984_v29, %s10509_s16 }
 0x200   : > { %1166 = vrot.lane.b32.xlu0 %v11943_v47, %s10510_s17 }
 0x201   : > { %2538 = vmatpush1.bf16.msra.mxu0 %v11706_v38  ;;  %2584 = vmatpush1.bf16.msra.mxu1 %v11696_v44  ;;  %v12002_v6 = vpop.permute.xlu0 %1516  ;;  %v12004_v35 = vpop.permute.xlu1 %1520 }
 0x202   : > { %2539 = vmatprep.subr.bf16.mxu0 %v15336_v0  ;;  %2585 = vmatprep.subr.bf16.mxu1 %v15336_v0 }
 0x203   : > { %1170 = vrot.lane.b32.xlu1 %v11963_v20, %s10510_s17 }
 0x204   : > { %1164 = vrot.lane.b32.xlu0 %v11969_v48, %s10510_s17 }
 0x205   : > { %2540 = vmatpush1.bf16.msra.mxu0 %v10468_v52  ;;  %2586 = vmatpush1.bf16.msra.mxu1 %v11708_v11  ;;  %v12014_v44 = vpop.permute.xlu0 %1334  ;;  %v12016_v38 = vpop.permute.xlu1 %1338  ;;  %v10470_v52 = vld [vmem:[%s10582_s15 + $0x138] sm:$0xff]  }
 0x206   : > { %2541 = vmatprep.subr.bf16.mxu0 %v15336_v0  ;;  %2587 = vmatprep.subr.bf16.mxu1 %v15336_v0 }
 0x207   : > { %1168 = vrot.lane.b32.xlu1 %v11984_v29, %s10510_s17 }
 0x208   : > { %974 = vrot.lane.b32.xlu0 %v11943_v47, %s10511_s18 }
 0x209   : > { %2542 = vmatpush1.bf16.msra.mxu0 %v10469_v55  ;;  %2588 = vmatpush1.bf16.msra.mxu1 %v10470_v52  ;;  %v12026_v11 = vpop.permute.xlu0 %1332  ;;  %v12028_v36 = vpop.permute.xlu1 %1336  ;;  %v10471_v55 = vld [vmem:[%s10582_s15 + $0x130] sm:$0xff]  }
 0x20a   : > { %15372 = vst [vmem:[#allocation16_spill] sm:$0xff] %v12028_v36  ;;  %2555 = vmatprep.subr.bf16.mxu0 %v15336_v0  ;;  %2589 = vmatprep.subr.bf16.mxu1 %v15336_v0 }
 0x20b   : > { %978 = vrot.lane.b32.xlu1 %v11963_v20, %s10511_s18 }
 0x20c   : > { %v12034_v12 = vpop.f32.mrf.mxu0  ;;  %972 = vrot.lane.b32.xlu0 %v11969_v48, %s10511_s18 }
 0x20d   : > { %15373 = vst [vmem:[#allocation17_spill] sm:$0xff] %v12034_v12  ;;  %2556 = vmatpush2.bf16.msra.mxu0 %v11720_v39  ;;  %2590 = vmatpush1.bf16.msra.mxu1 %v10471_v55  ;;  %v12040_v52 = vpop.permute.xlu0 %1142  ;;  %v12042_v18 = vpop.permute.xlu1 %1146 }
 0x20e   : > { %15374 = vst [vmem:[#allocation18_spill] sm:$0xff] %v12042_v18  ;;  %v2083_v63 = vpop.f32.mrf.mxu0  ;;  %2557 = vmatprep.subr.bf16.mxu0 %v15336_v0  ;;  %2603 = vmatprep.subr.bf16.mxu1 %v15336_v0  ;;  %v15377_v18 = vmov 0  }
 0x20f   : > { %976 = vrot.lane.b32.xlu1 %v11984_v29, %s10511_s18 }
 0x210   : > { %v12048_v12 = vpop.f32.mrf.mxu0  ;;  %v12050_v36 = vpop.f32.mrf.mxu1  ;;  %1550 = vrot.lane.b32.xlu0 %v11943_v47, %s10512_s19 }
 0x211   : > { %15375 = vst [vmem:[#allocation19_spill] sm:$0xff] %v12048_v12  ;;  %15376 = vst [vmem:[#allocation20_spill] sm:$0xff] %v12050_v36  ;;  %2558 = vmatpush2.bf16.msra.mxu0 %v11736_v43  ;;  %2604 = vmatpush2.bf16.msra.mxu1 %v11722_v42  ;;  %v12056_v39 = vpop.permute.xlu0 %1140  ;;  %v12058_v63 = vpop.permute.xlu1 %1144 }
 0x212   : > { %v2086_v55 = vpop.f32.mrf.mxu0  ;;  %v2131_v0 = vpop.f32.mrf.mxu1  ;;  %2605 = vmatprep.subr.bf16.mxu1 %v15377_v18  ;;  %2623 = vmatprep.subr.bf16.mxu0 %v15377_v18 }
 0x213   : > { %1554 = vrot.lane.b32.xlu1 %v11963_v20, %s10512_s19 }
 0x214   : > { %v12064_v36 = vpop.f32.mrf.mxu1  ;;  %2560 = vmatmul.mubr.bf16.vlgmr.msra.gmra.mxu0 %v11590_v1  ;;  %v12067_v43 = vpop.f32.mrf.mxu0  ;;  %1548 = vrot.lane.b32.xlu0 %v11969_v48, %s10512_s19 }
 0x215   : > { %15378 = vst [vmem:[#allocation21_spill] sm:$0xff] %v12064_v36  ;;  %15379 = vst [vmem:[#allocation22_spill] sm:$0xff] %v12067_v43  ;;  %2606 = vmatpush2.bf16.msra.mxu1 %v11738_v4  ;;  %2624 = vmatpush1.bf16.msra.mxu0 %v11753_v25  ;;  %v12073_v0 = vpop.permute.xlu0 %950  ;;  %v12075_v42 = vpop.permute.xlu1 %954 }
 0x216   : > { %v2134_v47 = vpop.f32.mrf.mxu1  ;;  %2625 = vmatprep.subr.bf16.mxu0 %v15377_v18  ;;  %2671 = vmatprep.subr.bf16.mxu1 %v15377_v18  ;;  %v2091_v20 = vpop.f32.mrf.mxu0 }
 0x217   : > { %8613 = vmatprep.mubr.msk.bf16.mxu0 %vm1656_vm0, %v10841_v45  ;;  %1552 = vrot.lane.b32.xlu1 %v11984_v29, %s10512_s19 }
 0x218   : > { %2608 = vmatmul.mubr.bf16.vlgmr.msra.gmra.mxu1 %v11590_v1  ;;  %v12084_v4 = vpop.f32.mrf.mxu1  ;;  %v2092_v25 = vpop.f32.mrf.mxu0 }
 0x219   : > { %2626 = vmatpush1.bf16.msra.mxu0 %v11770_v49  ;;  %2672 = vmatpush1.bf16.msra.mxu1 %v11755_v23  ;;  %v12088_v48 = vpop.permute.xlu0 %948  ;;  %v12090_v55 = vpop.permute.xlu1 %952 }
 0x21a   : > { %2627 = vmatprep.subr.bf16.mxu0 %v15377_v18  ;;  %2673 = vmatprep.subr.bf16.mxu1 %v15377_v18  ;;  %v2139_v47 = vpop.f32.mrf.mxu1  ;;  %v2093_v20 = vpop.f32.mrf.mxu0 }
 0x21b   : > { %8615 = vmatprep.mubr.msk.bf16.mxu1 %vm1656_vm0, %v10841_v45 }
 0x21c   : > { %2568 = vmatmul.mubr.bf16.gmra.mxu0 %v10858_v50  ;;  %v2140_v29 = vpop.f32.mrf.mxu1 }
 0x21d   : > { %2628 = vmatpush1.bf16.msra.mxu0 %v11785_v54  ;;  %2674 = vmatpush1.bf16.msra.mxu1 %v11772_v37  ;;  %v12099_v23 = vpop.permute.xlu0 %1526  ;;  %v12101_v49 = vpop.permute.xlu1 %1530 }
 0x21e   : > { %2629 = vmatprep.subr.bf16.mxu0 %v15377_v18  ;;  %2675 = vmatprep.subr.bf16.mxu1 %v15377_v18  ;;  %v2141_v25 = vpop.f32.mrf.mxu1 }
 0x21f   : > { %8616 = vmatprep.mubr.msk.bf16.mxu0 %vm1656_vm0, %v11956_v62 }
 0x220   : > { %2616 = vmatmul.mubr.bf16.gmra.mxu1 %v10858_v50 }
 0x221   : > { %2630 = vmatpush1.bf16.msra.mxu0 %v11806_v56  ;;  %2676 = vmatpush1.bf16.msra.mxu1 %v11787_v58  ;;  %v12110_v54 = vpop.permute.xlu0 %1524  ;;  %v12112_v37 = vpop.permute.xlu1 %1528 }
 0x222   : > { %2631 = vmatprep.subr.bf16.mxu0 %v15377_v18  ;;  %2677 = vmatprep.subr.bf16.mxu1 %v15377_v18 }
 0x223   : > { %8618 = vmatprep.mubr.msk.bf16.mxu1 %vm1656_vm0, %v11956_v62 }
 0x225   : > { %2632 = vmatpush1.bf16.msra.mxu0 %v11826_v57  ;;  %2678 = vmatpush1.bf16.msra.mxu1 %v11808_v61  ;;  %v12120_v47 = vpop.permute.xlu0 %1342  ;;  %v12122_v56 = vpop.permute.xlu1 %1346  ;;  %v10472_v61 = vld [vmem:[%s10582_s15 + $0x148] sm:$0xff]  }
 0x226   : > { %2633 = vmatprep.subr.bf16.mxu0 %v15377_v18  ;;  %2679 = vmatprep.subr.bf16.mxu1 %v15377_v18 }
 0x229   : > { %2634 = vmatpush1.bf16.msra.mxu0 %v11838_v33  ;;  %2680 = vmatpush1.bf16.msra.mxu1 %v11828_v59  ;;  %v12128_v58 = vpop.permute.xlu0 %1340  ;;  %v12130_v20 = vpop.permute.xlu1 %1344  ;;  %v10473_v59 = vld [vmem:[%s10582_s15 + $0x140] sm:$0xff]   ;;  %v10474_v33 = vld [vmem:[%s10582_s15 + $0x158] sm:$0xff]  }
 0x22a   : > { %2635 = vmatprep.subr.bf16.mxu0 %v15377_v18  ;;  %2681 = vmatprep.subr.bf16.mxu1 %v15377_v18 }
 0x22d   : > { %2636 = vmatpush1.bf16.msra.mxu0 %v10472_v61  ;;  %2682 = vmatpush1.bf16.msra.mxu1 %v11840_v60  ;;  %v12136_v57 = vpop.permute.xlu0 %1150  ;;  %v12138_v29 = vpop.permute.xlu1 %1154  ;;  %v10475_v61 = vld [vmem:[%s10582_s15 + $0x150] sm:$0xff]  }
 0x22e   : > { %2637 = vmatprep.subr.bf16.mxu0 %v15377_v18  ;;  %2683 = vmatprep.subr.bf16.mxu1 %v15377_v18 }
 0x231   : > { %2638 = vmatpush1.bf16.msra.mxu0 %v10473_v59  ;;  %2684 = vmatpush1.bf16.msra.mxu1 %v10474_v33  ;;  %v12144_v25 = vpop.permute.xlu0 %1148  ;;  %v12146_v12 = vpop.permute.xlu1 %1152 }
 0x232   : > { %15380 = vst [vmem:[#allocation23_spill] sm:$0xff] %v12146_v12  ;;  %2651 = vmatprep.subr.bf16.mxu0 %v15377_v18  ;;  %2685 = vmatprep.subr.bf16.mxu1 %v15377_v18 }
 0x234   : > { %v12150_v60 = vpop.f32.mrf.mxu0 }
 0x235   : > { %15381 = vst [vmem:[#allocation24_spill] sm:$0xff] %v12150_v60  ;;  %2652 = vmatpush2.bf16.msra.mxu0 %v11853_v19  ;;  %2686 = vmatpush1.bf16.msra.mxu1 %v10475_v61  ;;  %v12154_v36 = vpop.permute.xlu0 %958  ;;  %v12156_v43 = vpop.permute.xlu1 %962 }
 0x236   : > { %15382 = vst [vmem:[#allocation25_spill] sm:$0xff] %v12154_v36  ;;  %v2179_v59 = vpop.f32.mrf.mxu0  ;;  %2653 = vmatprep.subr.bf16.mxu0 %v15377_v18  ;;  %2699 = vmatprep.subr.bf16.mxu1 %v15377_v18 }
 0x238   : > { %v12160_v33 = vpop.f32.mrf.mxu0  ;;  %v12162_v12 = vpop.f32.mrf.mxu1 }
 0x239   : > { %15383 = vst [vmem:[#allocation26_spill] sm:$0xff] %v12160_v33  ;;  %2654 = vmatpush2.bf16.msra.mxu0 %v11866_v5  ;;  %2700 = vmatpush2.bf16.msra.mxu1 %v11855_v46  ;;  %v12166_v19 = vpop.permute.xlu0 %956  ;;  %v12168_v61 = vpop.permute.xlu1 %960 }
 0x23a   : > { %v2182_v60 = vpop.f32.mrf.mxu0  ;;  %v2227_v36 = vpop.f32.mrf.mxu1  ;;  %2719 = vmatprep.subr.bf16.mxu0 %v15377_v18  ;;  %2701 = vmatprep.subr.bf16.mxu1 %v15377_v18 }
 0x23c   : > { %v12172_v59 = vpop.f32.mrf.mxu1  ;;  %2656 = vmatmul.mubr.bf16.vlgmr.msra.gmra.mxu0 %v11590_v1  ;;  %v12175_v33 = vpop.f32.mrf.mxu0 }
 0x23d   : > { %15384 = vst [vmem:[#allocation27_spill] sm:$0xff] %v12175_v33  ;;  %2702 = vmatpush2.bf16.msra.mxu1 %v11868_v13  ;;  %2720 = vmatpush1.bf16.msra.mxu0 %v11881_v10  ;;  %v12179_v46 = vpop.permute.xlu0 %1534  ;;  %v12181_v5 = vpop.permute.xlu1 %1538 }
 0x23e   : > { %15385 = vst [vmem:[#allocation28_spill] sm:$0xff] %v12181_v5  ;;  %v2230_v60 = vpop.f32.mrf.mxu1  ;;  %2721 = vmatprep.subr.bf16.mxu0 %v15377_v18  ;;  %2767 = vmatprep.subr.bf16.mxu1 %v15377_v18  ;;  %v2187_v36 = vpop.f32.mrf.mxu0 }
 0x23f   : > { %8617 = vmatprep.mubr.msk.bf16.mxu0 %vm1656_vm0, %v10841_v45 }
 0x240   : > { %2704 = vmatmul.mubr.bf16.vlgmr.msra.gmra.mxu1 %v11590_v1  ;;  %v12188_v33 = vpop.f32.mrf.mxu1  ;;  %v2188_v13 = vpop.f32.mrf.mxu0 }
 0x241   : > { %2722 = vmatpush1.bf16.msra.mxu0 %v11895_v30  ;;  %2768 = vmatpush1.bf16.msra.mxu1 %v11883_v51  ;;  %v12192_v10 = vpop.permute.xlu0 %1532  ;;  %v12194_v60 = vpop.permute.xlu1 %1536 }
 0x242   : > { %15386 = vst [vmem:[#allocation29_spill] sm:$0xff] %v12194_v60  ;;  %2723 = vmatprep.subr.bf16.mxu0 %v15377_v18  ;;  %2769 = vmatprep.subr.bf16.mxu1 %v15377_v18  ;;  %v2235_v36 = vpop.f32.mrf.mxu1  ;;  %v2189_v5 = vpop.f32.mrf.mxu0 }
 0x243   : > { %8619 = vmatprep.mubr.msk.bf16.mxu1 %vm1656_vm0, %v10841_v45  ;;  %v10478_v5 = vld [vmem:[%s10582_s15 + $0x178] sm:$0xff]  }
 0x244   : > { %2664 = vmatmul.mubr.bf16.gmra.mxu0 %v10858_v50  ;;  %v2236_v13 = vpop.f32.mrf.mxu1 }
 0x245   : > { %2724 = vmatpush1.bf16.msra.mxu0 %v11912_v40  ;;  %2770 = vmatpush1.bf16.msra.mxu1 %v11897_v16  ;;  %v12203_v51 = vpop.permute.xlu1 %1354  ;;  %v12207_v60 = vpop.permute.xlu0 %1350 }
 0x246   : > { %2725 = vmatprep.subr.bf16.mxu0 %v15377_v18  ;;  %2771 = vmatprep.subr.bf16.mxu1 %v15377_v18  ;;  %v2237_v30 = vpop.f32.mrf.mxu1 }
 0x247   : > { %8620 = vmatprep.mubr.msk.bf16.mxu0 %vm1656_vm0, %v11956_v62 }
 0x248   : > { %2712 = vmatmul.mubr.bf16.gmra.mxu1 %v10858_v50 }
 0x249   : > { %2726 = vmatpush1.bf16.msra.mxu0 %v11929_v24  ;;  %2772 = vmatpush1.bf16.msra.mxu1 %v11914_v28  ;;  %v12216_v16 = vpop.permute.xlu1 %1352  ;;  %v12222_v40 = vpop.permute.xlu0 %1348 }
 0x24a   : > { %2727 = vmatprep.subr.bf16.mxu0 %v15377_v18  ;;  %2773 = vmatprep.subr.bf16.mxu1 %v15377_v18  ;;  %15387 = vst [vmem:[#allocation30_spill] sm:$0xff] %v12216_v16 }
 0x24b   : > { %8622 = vmatprep.mubr.msk.bf16.mxu1 %vm1656_vm0, %v11956_v62 }
 0x24d   : > { %2728 = vmatpush1.bf16.msra.mxu0 %v11947_v34  ;;  %2774 = vmatpush1.bf16.msra.mxu1 %v11931_v8  ;;  %v12226_v28 = vpop.permute.xlu1 %1162  ;;  %v12232_v24 = vpop.permute.xlu0 %1158  ;;  %v10476_v8 = vld [vmem:[%s10582_s15 + $0x168] sm:$0xff]  }
 0x24e   : > { %2729 = vmatprep.subr.bf16.mxu0 %v15377_v18  ;;  %2775 = vmatprep.subr.bf16.mxu1 %v15377_v18  ;;  %15388 = vst [vmem:[#allocation31_spill] sm:$0xff] %v12226_v28  ;;  %15389 = vst [vmem:[#allocation32_spill] sm:$0xff] %v12232_v24 }
 0x251   : > { %2730 = vmatpush1.bf16.msra.mxu0 %v11973_v26  ;;  %2776 = vmatpush1.bf16.msra.mxu1 %v11949_v7  ;;  %v12238_v34 = vpop.permute.xlu1 %1156  ;;  %v10477_v7 = vld [vmem:[%s10582_s15 + $0x160] sm:$0xff]  }
 0x252   : > { %2731 = vmatprep.subr.bf16.mxu0 %v15377_v18  ;;  %2777 = vmatprep.subr.bf16.mxu1 %v15377_v18  ;;  %15390 = vst [vmem:[#allocation33_spill] sm:$0xff] %v12238_v34 }
 0x255   : > { %2732 = vmatpush1.bf16.msra.mxu0 %v10476_v8  ;;  %2778 = vmatpush1.bf16.msra.mxu1 %v11975_v9  ;;  %v12252_v30 = vpop.permute.xlu1 %1160 }
 0x256   : > { %2733 = vmatprep.subr.bf16.mxu0 %v15377_v18  ;;  %2779 = vmatprep.subr.bf16.mxu1 %v15377_v18  ;;  %15391 = vst [vmem:[#allocation34_spill] sm:$0xff] %v12252_v30 }
 0x259   : > { %v12240_v26 = vpop.permute.xlu0 %1638  ;;  %2734 = vmatpush1.bf16.msra.mxu0 %v10477_v7  ;;  %2780 = vmatpush1.bf16.msra.mxu1 %v10478_v5  ;;  %v10479_v7 = vld [vmem:[%s10582_s15 + $0x170] sm:$0xff]  }
 0x25a   : > { %2747 = vmatprep.subr.bf16.mxu0 %v15377_v18  ;;  %2781 = vmatprep.subr.bf16.mxu1 %v15377_v18  ;;  %v1706_v9 = vadd.f32 %v11432_v32, %v12240_v26  ;;  %v1754_v36 = vadd.f32 %v11447_v41, %v12240_v26 }
 0x25c   : > { %v12250_v13 = vpop.f32.mrf.mxu0  ;;  %v3201_v8 = vmax.f32 %v1706_v9, 0.0  ;;  %v3204_v28 = vmax.f32 %v1754_v36, 0.0 }
 0x25d   : > { %2748 = vmatpush2.bf16.msra.mxu0 %v11990_v21  ;;  %2782 = vmatpush1.bf16.msra.mxu1 %v10479_v7  ;;  %v12256_v5 = vpop.permute.xlu0 %1628 }
 0x25e   : > { %v2275_v34 = vpop.f32.mrf.mxu0  ;;  %2749 = vmatprep.subr.bf16.mxu0 %v15377_v18  ;;  %v12259_v16 = vpack.c.bf16 %v3201_v8, %v3201_v8  ;;  %v12261_v32 = vpack.c.bf16 %v3204_v28, %v3204_v28  ;;  %2795 = vmatprep.subr.bf16.mxu1 %v15377_v18  ;;  %v1746_v21 = vadd.f32 %v11409_v53, %v12256_v5 }
 0x25f   : > { %v1698_v28 = vadd.f32 %v11389_v14, %v12256_v5 }
 0x260   : > { %v12264_v41 = vpop.f32.mrf.mxu0  ;;  %3682 = vrot.lane.b32.xlu0 %v12259_v16, %s10510_s17  ;;  %v2321_v9 = vpop.f32.mrf.mxu1  ;;  %3686 = vrot.lane.b32.xlu1 %v12261_v32, %s10510_s17 }
 0x261   : > { %2750 = vmatpush2.bf16.msra.mxu0 %v12002_v6  ;;  %2796 = vmatpush2.bf16.msra.mxu1 %v11992_v22  ;;  %v2322_v6 = vadd.f32 %v2321_v9, %v12256_v5 }
 0x262   : > { %v12276_v34 = vpop.permute.xlu1 %1633  ;;  %v2278_v36 = vpop.f32.mrf.mxu0  ;;  %2797 = vmatprep.subr.bf16.mxu1 %v15377_v18  ;;  %2815 = vmatprep.subr.bf16.mxu0 %v15377_v18 }
 0x263   : > { %v2323_v8 = vpop.f32.mrf.mxu1  ;;  %v1749_v7 = vadd.f32 %v11429_v31, %v12276_v34  ;;  %v1701_v22 = vadd.f32 %v11407_v17, %v12276_v34  ;;  %v3202_v36 = vmax.f32 %v1746_v21, 0.0  ;;  %v12302_v21 = vld [vmem:[%s15327_s1] ss:$8 sps:$4 sm:$0xff]  }
 0x264   : > { %v12285_v53 = vpop.f32.mrf.mxu0  ;;  %2752 = vmatmul.mubr.bf16.vlgmr.msra.gmra.mxu0 %v11590_v1  ;;  %v3199_v8 = vmax.f32 %v1698_v28, 0.0 }
 0x265   : > { %15392 = vst [vmem:[#allocation35_spill] sm:$0xff] %v12285_v53  ;;  %v2324_v14 = vpop.f32.mrf.mxu1  ;;  %2798 = vmatpush2.bf16.msra.mxu1 %v12004_v35  ;;  %2816 = vmatpush1.bf16.msra.mxu0 %v12014_v44  ;;  %v3203_v30 = vmax.f32 %v1749_v7, 0.0  ;;  %v3200_v24 = vmax.f32 %v1701_v22, 0.0  ;;  %v3238_v35 = vmax.f32 %v2322_v6, 0.0  ;;  %v3425_v6 = vrot.slane %v12259_v16, 4 }
 0x266   : > { %v2325_v31 = vadd.f32 %v2324_v14, %v12276_v34  ;;  %2817 = vmatprep.subr.bf16.mxu0 %v15377_v18  ;;  %2863 = vmatprep.subr.bf16.mxu1 %v15377_v18  ;;  %v2283_v17 = vpop.f32.mrf.mxu0 }
 0x267   : > { %v2326_v9 = vpop.f32.mrf.mxu1  ;;  %v12293_v53 = vpack.c.bf16 %v3203_v30, %v3202_v36  ;;  %v12295_v1 = vpack.c.bf16 %v3200_v24, %v3199_v8  ;;  %8621 = vmatprep.mubr.msk.bf16.mxu0 %vm1656_vm0, %v10841_v45  ;;  %v3428_v30 = vrot.slane %v12261_v32, 4  ;;  %v1850_v36 = vadd.f32 %v11610_v3, %v12240_v26 }
 0x268   : > { %v3239_v44 = vmax.f32 %v2325_v31, 0.0  ;;  %2800 = vmatmul.mubr.bf16.vlgmr.msra.gmra.mxu1 %v12302_v21  ;;  %v2284_v28 = vpop.f32.mrf.mxu0  ;;  %v1802_v9 = vadd.f32 %v11593_v2, %v12240_v26  ;;  %v1845_v3 = vadd.f32 %v11585_v27, %v12276_v34  ;;  %v15394_v2 = vld [vmem:[#allocation16_spill] sm:$0xff] }
 0x269   : > { %v12305_v7 = vpop.f32.mrf.mxu1  ;;  %3684 = vrot.lane.b32.xlu1 %v12293_v53, %s10510_s17  ;;  %3680 = vrot.lane.b32.xlu0 %v12295_v1, %s10510_s17  ;;  %v3427_v24 = vrot.slane %v12293_v53, 4  ;;  %v3424_v22 = vrot.slane %v12295_v1, 4 }
 0x26a   : > { %v12315_v14 = vpack.c.bf16 %v3239_v44, %v3238_v35  ;;  %2818 = vmatpush1.bf16.msra.mxu0 %v12026_v11  ;;  %2864 = vmatpush1.bf16.msra.mxu1 %v12016_v38  ;;  %v2285_v8 = vpop.f32.mrf.mxu0  ;;  %v1797_v38 = vadd.f32 %v11569_v15, %v12276_v34  ;;  %v15395_v44 = vld [vmem:[#allocation3_spill] sm:$0xff]  ;;  %v3210_v15 = vmax.f32 %v1850_v36, 0.0  ;;  %v3207_v27 = vmax.f32 %v1802_v9, 0.0 }
 0x26b   : > { %2819 = vmatprep.subr.bf16.mxu0 %v15377_v18  ;;  %2865 = vmatprep.subr.bf16.mxu1 %v15377_v18  ;;  %v3429_v31 = vsel %vm3423_vm1, %v3427_v24, %v3428_v30  ;;  %v3426_v17 = vsel %vm3423_vm1, %v3424_v22, %v3425_v6  ;;  %v2331_v35 = vpop.f32.mrf.mxu1  ;;  %v1842_v28 = vadd.f32 %v15395_v44, %v12256_v5  ;;  %v15396_v30 = vld [vmem:[#allocation2_spill] sm:$0xff]  ;;  %v15398_v44 = vld [vmem:[#allocation9_spill] sm:$0xff] }
 0x26c   : > { %15393 = vst [vmem:[#allocation36_spill] sm:$0xff] %v12315_v14  ;;  %2760 = vmatmul.mubr.bf16.gmra.mxu0 %v10858_v50  ;;  %8623 = vmatprep.mubr.msk.bf16.mxu1 %vm1656_vm0, %v10841_v45  ;;  %v1794_v6 = vadd.f32 %v15396_v30, %v12256_v5  ;;  %v12353_v36 = vpack.c.bf16 %v3210_v15, %v3210_v15  ;;  %v15400_v15 = vld [vmem:[#allocation7_spill] sm:$0xff] }
 0x26d   : > { %3526 = vrot.lane.b32.xlu1 %v3429_v31, %s10511_s18  ;;  %3522 = vrot.lane.b32.xlu0 %v3426_v17, %s10511_s18  ;;  %v2332_v11 = vpop.f32.mrf.mxu1  ;;  %v3209_v31 = vmax.f32 %v1845_v3, 0.0  ;;  %v3206_v17 = vmax.f32 %v1797_v38, 0.0  ;;  %v3208_v35 = vmax.f32 %v1842_v28, 0.0  ;;  %v12355_v9 = vpack.c.bf16 %v3207_v27, %v3207_v27 }
 0x26e   : > { %2820 = vmatpush1.bf16.msra.mxu0 %v12040_v52  ;;  %2866 = vmatpush1.bf16.msra.mxu1 %v15394_v2  ;;  %v15397_v52 = vld [vmem:[#allocation18_spill] sm:$0xff]  ;;  %v3205_v11 = vmax.f32 %v1794_v6, 0.0  ;;  %v1946_v28 = vadd.f32 %v15398_v44, %v12240_v26  ;;  %v1941_v27 = vadd.f32 %v15400_v15, %v12276_v34 }
 0x26f   : > { %2821 = vmatprep.subr.bf16.mxu0 %v15377_v18  ;;  %2867 = vmatprep.subr.bf16.mxu1 %v15377_v18  ;;  %v2333_v8 = vpop.f32.mrf.mxu1  ;;  %v12357_v3 = vpack.c.bf16 %v3209_v31, %v3208_v35  ;;  %v3431_v2 = vrot.slane %v12355_v9, 4  ;;  %v2277_v35 = vadd.f32 %v12264_v41, %v12276_v34 }
 0x270   : > { %2808 = vmatmul.mubr.bf16.gmra.mxu1 %v10858_v50  ;;  %8624 = vmatprep.mubr.msk.bf16.mxu0 %vm1656_vm0, %v11956_v62  ;;  %v12359_v38 = vpack.c.bf16 %v3206_v17, %v3205_v11  ;;  %v15401_v8 = vld [vmem:[#allocation5_spill] sm:$0xff]  ;;  %v10481_v11 = vld [vmem:[%s10582_s15 + $0x188] sm:$0xff]  }
 0x271   : > { %3524 = vrot.lane.b32.xlu1 %v3427_v24, %s10511_s18  ;;  %3520 = vrot.lane.b32.xlu0 %v3424_v22, %s10511_s18  ;;  %v2226_v22 = vadd.f32 %v12162_v12, %v12256_v5  ;;  %v15399_v12 = vld [vmem:[#allocation8_spill] sm:$0xff]  ;;  %v1893_v31 = vadd.f32 %v15401_v8, %v12276_v34  ;;  %v3236_v41 = vmax.f32 %v2277_v35, 0.0 }
 0x272   : > { %2822 = vmatpush1.bf16.msra.mxu0 %v12056_v39  ;;  %2868 = vmatpush1.bf16.msra.mxu1 %v15397_v52  ;;  %v3433_v39 = vrot.slane %v12357_v3, 4  ;;  %v3430_v24 = vrot.slane %v12359_v38, 4  ;;  %v1898_v30 = vadd.f32 %v15399_v12, %v12240_v26  ;;  %v2274_v52 = vadd.f32 %v12250_v13, %v12256_v5  ;;  %v15404_v13 = vld [vmem:[#allocation4_spill] sm:$0xff] }
 0x273   : > { %2823 = vmatprep.subr.bf16.mxu0 %v15377_v18  ;;  %2869 = vmatprep.subr.bf16.mxu1 %v15377_v18  ;;  %v1890_v44 = vadd.f32 %v15404_v13, %v12256_v5 }
 0x274   : > { %8626 = vmatprep.mubr.msk.bf16.mxu1 %vm1656_vm0, %v11956_v62  ;;  %v3235_v12 = vmax.f32 %v2274_v52, 0.0  ;;  %v10484_v52 = vld [vmem:[%s10582_s15 + $0x190] sm:$0xff]  }
 0x275   : > { %3694 = vrot.lane.b32.xlu1 %v12353_v36, %s10510_s17  ;;  %3690 = vrot.lane.b32.xlu0 %v12355_v9, %s10510_s17 }
 0x276   : > { %2824 = vmatpush1.bf16.msra.mxu0 %v12073_v0  ;;  %2870 = vmatpush1.bf16.msra.mxu1 %v12058_v63  ;;  %v2229_v63 = vadd.f32 %v12172_v59, %v12276_v34  ;;  %v3434_v0 = vrot.slane %v12353_v36, 4  ;;  %v3232_v59 = vmax.f32 %v2226_v22, 0.0  ;;  %v3216_v22 = vmax.f32 %v1946_v28, 0.0 }
 0x277   : > { %2825 = vmatprep.subr.bf16.mxu0 %v15377_v18  ;;  %2871 = vmatprep.subr.bf16.mxu1 %v15377_v18  ;;  %v12415_v28 = vpack.c.bf16 %v3236_v41, %v3235_v12 }
 0x278   : > { %v3233_v6 = vmax.f32 %v2229_v63, 0.0  ;;  %v15403_v63 = vld [vmem:[#allocation6_spill] sm:$0xff] }
 0x279   : > { %3692 = vrot.lane.b32.xlu1 %v12357_v3, %s10510_s17  ;;  %3688 = vrot.lane.b32.xlu0 %v12359_v38, %s10510_s17  ;;  %15405 = vst [vmem:[#allocation3_spill] sm:$0xff] %v12415_v28 }
 0x27a   : > { %2826 = vmatpush1.bf16.msra.mxu0 %v12088_v48  ;;  %2872 = vmatpush1.bf16.msra.mxu1 %v12075_v42  ;;  %v3435_v48 = vsel %vm3423_vm1, %v3433_v39, %v3434_v0  ;;  %v3432_v42 = vsel %vm3423_vm1, %v3430_v24, %v3431_v2  ;;  %v12399_v17 = vpack.c.bf16 %v3233_v6, %v3232_v59  ;;  %v3213_v2 = vmax.f32 %v1898_v30, 0.0  ;;  %v10482_v6 = vld [vmem:[%s10582_s15 + $0x180] sm:$0xff]  }
 0x27b   : > { %2827 = vmatprep.subr.bf16.mxu0 %v15377_v18  ;;  %2873 = vmatprep.subr.bf16.mxu1 %v15377_v18  ;;  %v1938_v0 = vadd.f32 %v15403_v63, %v12256_v5  ;;  %v3215_v59 = vmax.f32 %v1941_v27, 0.0  ;;  %v12421_v30 = vpack.c.bf16 %v3216_v22, %v3216_v22 }
 0x27c   : > { %15402 = vst [vmem:[#allocation16_spill] sm:$0xff] %v12399_v17  ;;  %v12423_v15 = vpack.c.bf16 %v3213_v2, %v3213_v2 }
 0x27d   : > { %3534 = vrot.lane.b32.xlu1 %v3435_v48, %s10511_s18  ;;  %3530 = vrot.lane.b32.xlu0 %v3432_v42, %s10511_s18  ;;  %v10483_v48 = vld [vmem:[%s10582_s15 + $0x198] sm:$0xff]   ;;  %v3214_v42 = vmax.f32 %v1938_v0, 0.0  ;;  %v3440_v12 = vrot.slane %v12421_v30, 4 }
 0x27e   : > { %2828 = vmatpush1.bf16.msra.mxu0 %v10481_v11  ;;  %2874 = vmatpush1.bf16.msra.mxu1 %v12090_v55  ;;  %v3212_v55 = vmax.f32 %v1893_v31, 0.0 }
 0x27f   : > { %2829 = vmatprep.subr.bf16.mxu0 %v15377_v18  ;;  %2875 = vmatprep.subr.bf16.mxu1 %v15377_v18 }
 0x281   : > { %3532 = vrot.lane.b32.xlu1 %v3433_v39, %s10511_s18  ;;  %3528 = vrot.lane.b32.xlu0 %v3430_v24, %s10511_s18  ;;  %v3211_v39 = vmax.f32 %v1890_v44, 0.0  ;;  %v12425_v24 = vpack.c.bf16 %v3215_v59, %v3214_v42 }
 0x282   : > { %2830 = vmatpush1.bf16.msra.mxu0 %v10482_v6  ;;  %2876 = vmatpush1.bf16.msra.mxu1 %v10483_v48  ;;  %v15406_v6 = vld [vmem:[#allocation15_spill] sm:$0xff] }
 0x283   : > { %2843 = vmatprep.subr.bf16.mxu0 %v15377_v18  ;;  %2877 = vmatprep.subr.bf16.mxu1 %v15377_v18  ;;  %v12432_v31 = vpack.c.bf16 %v3212_v55, %v3211_v39  ;;  %v3439_v63 = vrot.slane %v12425_v24, 4  ;;  %v3437_v55 = vrot.slane %v12423_v15, 4  ;;  %v2042_v48 = vadd.f32 %v15406_v6, %v12240_v26  ;;  %v15407_v39 = vld [vmem:[#allocation14_spill] sm:$0xff] }
 0x284   : > { %v2369_v27 = vpop.f32.mrf.mxu0 }
 0x285   : > { %v2370_v8 = vadd.f32 %v2369_v27, %v12256_v5  ;;  %3702 = vrot.lane.b32.xlu1 %v12421_v30, %s10510_s17  ;;  %3698 = vrot.lane.b32.xlu0 %v12423_v15, %s10510_s17  ;;  %v1994_v27 = vadd.f32 %v15407_v39, %v12240_v26 }
 0x286   : > { %2844 = vmatpush2.bf16.msra.mxu0 %v12099_v23  ;;  %2878 = vmatpush1.bf16.msra.mxu1 %v10484_v52  ;;  %v2371_v35 = vpop.f32.mrf.mxu0  ;;  %v3436_v23 = vrot.slane %v12432_v31, 4 }
 0x287   : > { %2845 = vmatprep.subr.bf16.mxu0 %v15377_v18  ;;  %2891 = vmatprep.subr.bf16.mxu1 %v15377_v18  ;;  %v3241_v0 = vmax.f32 %v2370_v8, 0.0  ;;  %v15408_v8 = vld [vmem:[#allocation13_spill] sm:$0xff]  ;;  %v15409_v35 = vld [vmem:[#allocation11_spill] sm:$0xff] }
 0x288   : > { %v2372_v11 = vpop.f32.mrf.mxu0  ;;  %v2417_v22 = vpop.f32.mrf.mxu1  ;;  %v2037_v52 = vadd.f32 %v15408_v8, %v12276_v34 }
 0x289   : > { %v2373_v2 = vadd.f32 %v2372_v11, %v12276_v34  ;;  %3700 = vrot.lane.b32.xlu1 %v12425_v24, %s10510_s17  ;;  %3696 = vrot.lane.b32.xlu0 %v12432_v31, %s10510_s17  ;;  %v2418_v59 = vadd.f32 %v2417_v22, %v12256_v5  ;;  %v1989_v11 = vadd.f32 %v15409_v35, %v12276_v34  ;;  %v12479_v35 = vpop.permute.xlu1 %970 }
 0x28a   : > { %2846 = vmatpush2.bf16.msra.mxu0 %v12110_v54  ;;  %2892 = vmatpush2.bf16.msra.mxu1 %v12101_v49  ;;  %v2374_v13 = vpop.f32.mrf.mxu0  ;;  %v2419_v44 = vpop.f32.mrf.mxu1  ;;  %v3441_v49 = vsel %vm3423_vm1, %v3439_v63, %v3440_v12  ;;  %v15411_v12 = vld [vmem:[#allocation12_spill] sm:$0xff] }
 0x28b   : > { %v3242_v41 = vmax.f32 %v2373_v2, 0.0  ;;  %2893 = vmatprep.subr.bf16.mxu1 %v15377_v18  ;;  %2911 = vmatprep.subr.bf16.mxu0 %v15377_v18  ;;  %v3438_v13 = vsel %vm3423_vm1, %v3436_v23, %v3437_v55  ;;  %v2034_v6 = vadd.f32 %v15411_v12, %v12256_v5  ;;  %v3244_v8 = vmax.f32 %v2418_v59, 0.0  ;;  %v12477_v55 = vpop.permute.xlu0 %966 }
 0x28c   : > { %v12454_v42 = vpop.f32.mrf.mxu0  ;;  %v2420_v54 = vpop.f32.mrf.mxu1  ;;  %v3219_v59 = vmax.f32 %v1994_v27, 0.0 }
 0x28d   : > { %v12463_v22 = vpack.c.bf16 %v3242_v41, %v3241_v0  ;;  %v2421_v2 = vadd.f32 %v2420_v54, %v12276_v34  ;;  %2848 = vmatmul.mubr.bf16.vlgmr.msra.gmra.mxu0 %v12302_v21  ;;  %3542 = vrot.lane.b32.xlu1 %v3441_v49, %s10511_s18  ;;  %v3222_v41 = vmax.f32 %v2042_v48, 0.0  ;;  %v15412_v54 = vld [vmem:[#allocation10_spill] sm:$0xff]  ;;  %v3218_v48 = vmax.f32 %v1989_v11, 0.0  ;;  %v12510_v11 = vpop.permute.xlu1 %968 }
 0x28e   : > { %3538 = vrot.lane.b32.xlu0 %v3438_v13, %s10511_s18  ;;  %2894 = vmatpush2.bf16.msra.mxu1 %v12112_v37  ;;  %v2422_v44 = vpop.f32.mrf.mxu1  ;;  %v2379_v39 = vpop.f32.mrf.mxu0  ;;  %v1986_v49 = vadd.f32 %v15412_v54, %v12256_v5  ;;  %v2138_v54 = vadd.f32 %v12084_v4, %v12240_v26 }
 0x28f   : > { %15410 = vst [vmem:[#allocation2_spill] sm:$0xff] %v12463_v22  ;;  %v3245_v0 = vmax.f32 %v2421_v2, 0.0  ;;  %2912 = vmatpush1.bf16.msra.mxu0 %v12120_v47  ;;  %2959 = vmatprep.subr.bf16.mxu1 %v15377_v18  ;;  %v3221_v2 = vmax.f32 %v2037_v52, 0.0  ;;  %v3220_v44 = vmax.f32 %v2034_v6, 0.0  ;;  %v12494_v27 = vpack.c.bf16 %v3222_v41, %v3222_v41 }
 0x290   : > { %v12481_v37 = vpop.f32.mrf.mxu1  ;;  %2913 = vmatprep.subr.bf16.mxu0 %v15377_v18  ;;  %8625 = vmatprep.mubr.msk.bf16.mxu0 %vm1656_vm0, %v10841_v45  ;;  %v2380_v47 = vpop.f32.mrf.mxu0  ;;  %v3217_v52 = vmax.f32 %v1986_v49, 0.0 }
 0x291   : > { %v12486_v13 = vpack.c.bf16 %v3245_v0, %v3244_v8  ;;  %2896 = vmatmul.mubr.bf16.vlgmr.msra.gmra.mxu1 %v12302_v21  ;;  %3540 = vrot.lane.b32.xlu1 %v3439_v63, %s10511_s18  ;;  %15414 = vst [vmem:[#allocation9_spill] sm:$0xff] %v12494_v27  ;;  %v12497_v8 = vpack.c.bf16 %v3219_v59, %v3219_v59  ;;  %v12536_v59 = vpop.permute.xlu1 %1546 }
 0x292   : > { %3536 = vrot.lane.b32.xlu0 %v3436_v23, %s10511_s18  ;;  %2960 = vmatpush1.bf16.msra.mxu1 %v12122_v56  ;;  %v2427_v12 = vpop.f32.mrf.mxu1  ;;  %v2381_v39 = vpop.f32.mrf.mxu0  ;;  %v12501_v63 = vpack.c.bf16 %v3221_v2, %v3220_v44  ;;  %v15420_v44 = vld [vmem:[#allocation19_spill] sm:$0xff] }
 0x293   : > { %15413 = vst [vmem:[#allocation18_spill] sm:$0xff] %v12486_v13  ;;  %2914 = vmatpush1.bf16.msra.mxu0 %v12128_v58  ;;  %2961 = vmatprep.subr.bf16.mxu1 %v15377_v18  ;;  %15415 = vst [vmem:[#allocation8_spill] sm:$0xff] %v12497_v8  ;;  %v12506_v58 = vpack.c.bf16 %v3218_v48, %v3217_v52  ;;  %v12508_v23 = vpop.permute.xlu0 %964  ;;  %v2085_v12 = vadd.f32 %v15420_v44, %v12276_v34  ;;  %v15421_v39 = vld [vmem:[#allocation23_spill] sm:$0xff]  ;;  %v15422_v52 = vld [vmem:[#allocation20_spill] sm:$0xff] }
 0x294   : > { %2915 = vmatprep.subr.bf16.mxu0 %v15377_v18  ;;  %8627 = vmatprep.mubr.msk.bf16.mxu1 %vm1656_vm0, %v10841_v45  ;;  %15416 = vst [vmem:[#allocation7_spill] sm:$0xff] %v12501_v63  ;;  %v2428_v56 = vpop.f32.mrf.mxu1  ;;  %v3445_v0 = vrot.slane %v12501_v63, 4 }
 0x295   : > { %2856 = vmatmul.mubr.bf16.gmra.mxu0 %v10858_v50  ;;  %3710 = vrot.lane.b32.xlu1 %v12494_v27, %s10510_s17  ;;  %15417 = vst [vmem:[#allocation5_spill] sm:$0xff] %v12506_v58  ;;  %v3442_v41 = vrot.slane %v12506_v58, 4  ;;  %v2130_v56 = vadd.f32 %v15422_v52, %v12256_v5  ;;  %v12562_v44 = vpop.permute.xlu1 %1544 }
 0x296   : > { %3706 = vrot.lane.b32.xlu0 %v12497_v8, %s10510_s17  ;;  %2962 = vmatpush1.bf16.msra.mxu1 %v12130_v20  ;;  %v2429_v6 = vpop.f32.mrf.mxu1  ;;  %v3446_v20 = vrot.slane %v12494_v27, 4 }
 0x297   : > { %2916 = vmatpush1.bf16.msra.mxu0 %v12136_v57  ;;  %2963 = vmatprep.subr.bf16.mxu1 %v15377_v18  ;;  %v3443_v57 = vrot.slane %v12497_v8, 4  ;;  %v12534_v49 = vpop.permute.xlu0 %1542  ;;  %v15423_v6 = vld [vmem:[#allocation25_spill] sm:$0xff] }
 0x298   : > { %2917 = vmatprep.subr.bf16.mxu0 %v15377_v18  ;;  %8628 = vmatprep.mubr.msk.bf16.mxu0 %vm1656_vm0, %v11956_v62  ;;  %v3447_v2 = vsel %vm3423_vm1, %v3445_v0, %v3446_v20  ;;  %v3228_v20 = vmax.f32 %v2138_v54, 0.0  ;;  %v3226_v54 = vmax.f32 %v2130_v56, 0.0 }
 0x299   : > { %2904 = vmatmul.mubr.bf16.gmra.mxu1 %v10858_v50  ;;  %3708 = vrot.lane.b32.xlu1 %v12501_v63, %s10510_s17  ;;  %v3444_v4 = vsel %vm3423_vm1, %v3442_v41, %v3443_v57 }
 0x29a   : > { %3704 = vrot.lane.b32.xlu0 %v12506_v58, %s10510_s17  ;;  %2964 = vmatpush1.bf16.msra.mxu1 %v12138_v29  ;;  %v15418_v29 = vld [vmem:[#allocation22_spill] sm:$0xff] }
 0x29b   : > { %2918 = vmatpush1.bf16.msra.mxu0 %v12144_v25  ;;  %2965 = vmatprep.subr.bf16.mxu1 %v15377_v18  ;;  %v2090_v47 = vadd.f32 %v15418_v29, %v12240_v26  ;;  %v15419_v25 = vld [vmem:[#allocation21_spill] sm:$0xff] }
 0x29c   : > { %2919 = vmatprep.subr.bf16.mxu0 %v15377_v18  ;;  %v2133_v48 = vadd.f32 %v15419_v25, %v12276_v34  ;;  %8630 = vmatprep.mubr.msk.bf16.mxu1 %vm1656_vm0, %v11956_v62  ;;  %v15424_v62 = vld [vmem:[#allocation17_spill] sm:$0xff]  ;;  %v3224_v25 = vmax.f32 %v2085_v12, 0.0  ;;  %v12586_v12 = vpop.permute.xlu1 %1362 }
 0x29d   : > { %3550 = vrot.lane.b32.xlu1 %v3447_v2, %s10511_s18  ;;  %v2082_v2 = vadd.f32 %v15424_v62, %v12256_v5  ;;  %v3225_v57 = vmax.f32 %v2090_v47, 0.0 }
 0x29e   : > { %3546 = vrot.lane.b32.xlu0 %v3444_v4, %s10511_s18  ;;  %2966 = vmatpush1.bf16.msra.mxu1 %v15421_v39  ;;  %v3227_v29 = vmax.f32 %v2133_v48, 0.0  ;;  %v12560_v4 = vpop.permute.xlu0 %1540  ;;  %v12568_v39 = vpack.c.bf16 %v3228_v20, %v3228_v20  ;;  %v10487_v20 = vld [vmem:[%s10582_s15 + $0x1a0] sm:$0xff]  }
 0x29f   : > { %2920 = vmatpush1.bf16.msra.mxu0 %v15423_v6  ;;  %2967 = vmatprep.subr.bf16.mxu1 %v15377_v18  ;;  %v3223_v47 = vmax.f32 %v2082_v2, 0.0  ;;  %v2234_v2 = vadd.f32 %v12188_v33, %v12240_v26 }
 0x2a0   : > { %2921 = vmatprep.subr.bf16.mxu0 %v15377_v18  ;;  %15425 = vst [vmem:[#allocation6_spill] sm:$0xff] %v12568_v39  ;;  %v12573_v48 = vpack.c.bf16 %v3227_v29, %v3226_v54  ;;  %v3452_v6 = vrot.slane %v12568_v39, 4 }
 0x2a1   : > { %3548 = vrot.lane.b32.xlu1 %v3445_v0, %s10511_s18  ;;  %v12571_v0 = vpack.c.bf16 %v3225_v57, %v3225_v57 }
 0x2a2   : > { %3544 = vrot.lane.b32.xlu0 %v3442_v41, %s10511_s18  ;;  %2968 = vmatpush1.bf16.msra.mxu1 %v12156_v43  ;;  %15427 = vst [vmem:[#allocation15_spill] sm:$0xff] %v12573_v48  ;;  %v12577_v41 = vpack.c.bf16 %v3224_v25, %v3223_v47  ;;  %v10485_v43 = vld [vmem:[%s10582_s15 + $0x1a8] sm:$0xff]   ;;  %v3451_v52 = vrot.slane %v12573_v48, 4 }
 0x2a3   : > { %2922 = vmatpush1.bf16.msra.mxu0 %v12166_v19  ;;  %2969 = vmatprep.subr.bf16.mxu1 %v15377_v18  ;;  %15426 = vst [vmem:[#allocation4_spill] sm:$0xff] %v12571_v0  ;;  %v12584_v19 = vpop.permute.xlu0 %1358  ;;  %v3449_v62 = vrot.slane %v12571_v0, 4  ;;  %v15429_v25 = vld [vmem:[#allocation27_spill] sm:$0xff] }
 0x2a4   : > { %2923 = vmatprep.subr.bf16.mxu0 %v15377_v18  ;;  %15428 = vst [vmem:[#allocation14_spill] sm:$0xff] %v12577_v41  ;;  %v3448_v56 = vrot.slane %v12577_v41, 4  ;;  %v3453_v29 = vsel %vm3423_vm1, %v3451_v52, %v3452_v6  ;;  %v2186_v54 = vadd.f32 %v15429_v25, %v12240_v26  ;;  %v3234_v6 = vmax.f32 %v2234_v2, 0.0 }
 0x2a5   : > { %3718 = vrot.lane.b32.xlu1 %v12568_v39, %s10510_s17 }
 0x2a6   : > { %3714 = vrot.lane.b32.xlu0 %v12571_v0, %s10510_s17  ;;  %2970 = vmatpush1.bf16.msra.mxu1 %v12168_v61  ;;  %v10486_v61 = vld [vmem:[%s10582_s15 + $0x1b8] sm:$0xff]   ;;  %v3450_v47 = vsel %vm3423_vm1, %v3448_v56, %v3449_v62  ;;  %v12632_v2 = vpack.c.bf16 %v3234_v6, %v3234_v6 }
 0x2a7   : > { %2924 = vmatpush1.bf16.msra.mxu0 %v10485_v43  ;;  %2971 = vmatprep.subr.bf16.mxu1 %v15377_v18  ;;  %v12610_v43 = vpop.permute.xlu0 %1356 }
 0x2a8   : > { %2925 = vmatprep.subr.bf16.mxu0 %v15377_v18  ;;  %15433 = vst [vmem:[#allocation13_spill] sm:$0xff] %v12632_v2 }
 0x2a9   : > { %3716 = vrot.lane.b32.xlu1 %v12573_v48, %s10510_s17  ;;  %v10488_v48 = vld [vmem:[%s10582_s15 + $0x1b0] sm:$0xff]  }
 0x2aa   : > { %3712 = vrot.lane.b32.xlu0 %v12577_v41, %s10510_s17  ;;  %2972 = vmatpush1.bf16.msra.mxu1 %v10486_v61  ;;  %v12612_v61 = vpop.permute.xlu1 %1360 }
 0x2ab   : > { %2926 = vmatpush1.bf16.msra.mxu0 %v10487_v20  ;;  %2973 = vmatprep.subr.bf16.mxu1 %v15377_v18  ;;  %v15430_v20 = vld [vmem:[#allocation26_spill] sm:$0xff]  ;;  %v12634_v0 = vpop.permute.xlu0 %1166 }
 0x2ac   : > { %v12602_v57 = vpop.f32.mrf.mxu0  ;;  %2939 = vmatprep.subr.bf16.mxu0 %v15377_v18  ;;  %v2181_v33 = vadd.f32 %v15430_v20, %v12276_v34  ;;  %v3231_v20 = vmax.f32 %v2186_v54, 0.0 }
 0x2ad   : > { %3558 = vrot.lane.b32.xlu1 %v3453_v29, %s10511_s18  ;;  %v15431_v29 = vld [vmem:[#allocation24_spill] sm:$0xff] }
 0x2ae   : > { %3554 = vrot.lane.b32.xlu0 %v3450_v47, %s10511_s18  ;;  %2974 = vmatpush1.bf16.msra.mxu1 %v10488_v48  ;;  %v2467_v41 = vpop.f32.mrf.mxu0  ;;  %v2178_v62 = vadd.f32 %v15431_v29, %v12256_v5  ;;  %v3230_v47 = vmax.f32 %v2181_v33, 0.0  ;;  %v15432_v48 = vld [vmem:[#allocation28_spill] sm:$0xff]  ;;  %v12636_v63 = vpop.permute.xlu1 %1170 }
 0x2af   : > { %2940 = vmatpush2.bf16.msra.mxu0 %v12179_v46  ;;  %2987 = vmatprep.subr.bf16.mxu1 %v15377_v18 }
 0x2b0   : > { %v12622_v25 = vpop.f32.mrf.mxu0  ;;  %v12624_v39 = vpop.f32.mrf.mxu1  ;;  %2941 = vmatprep.subr.bf16.mxu0 %v15377_v18  ;;  %v3229_v29 = vmax.f32 %v2178_v62, 0.0  ;;  %v15436_v62 = vld [vmem:[#allocation29_spill] sm:$0xff] }
 0x2b1   : > { %3556 = vrot.lane.b32.xlu1 %v3451_v52, %s10511_s18 }
 0x2b2   : > { %3552 = vrot.lane.b32.xlu0 %v3448_v56, %s10511_s18  ;;  %2988 = vmatpush2.bf16.msra.mxu1 %v15432_v48  ;;  %v2470_v46 = vpop.f32.mrf.mxu0  ;;  %v2515_v41 = vpop.f32.mrf.mxu1  ;;  %v12643_v56 = vpack.c.bf16 %v3231_v20, %v3231_v20  ;;  %v3457_v20 = vrot.slane %v12399_v17, 4 }
 0x2b3   : > { %2942 = vmatpush2.bf16.msra.mxu0 %v12192_v10  ;;  %2989 = vmatprep.subr.bf16.mxu1 %v15377_v18  ;;  %v12647_v10 = vpack.c.bf16 %v3230_v47, %v3229_v29  ;;  %v12664_v41 = vpop.permute.xlu0 %1164  ;;  %v3458_v29 = vrot.slane %v12632_v2, 4 }
 0x2b4   : > { %v12638_v54 = vpop.f32.mrf.mxu0  ;;  %v12640_v52 = vpop.f32.mrf.mxu1  ;;  %3007 = vmatprep.subr.bf16.mxu0 %v15377_v18  ;;  %15434 = vst [vmem:[#allocation11_spill] sm:$0xff] %v12643_v56 }
 0x2b5   : > { %3726 = vrot.lane.b32.xlu1 %v12632_v2, %s10510_s17  ;;  %15435 = vst [vmem:[#allocation12_spill] sm:$0xff] %v12647_v10  ;;  %v3454_v46 = vrot.slane %v12647_v10, 4 }
 0x2b6   : > { %2944 = vmatmul.mubr.bf16.vlgmr.msra.gmra.mxu0 %v12302_v21  ;;  %3722 = vrot.lane.b32.xlu0 %v12643_v56, %s10510_s17  ;;  %v2518_v33 = vpop.f32.mrf.mxu1  ;;  %v2475_v6 = vpop.f32.mrf.mxu0 }
 0x2b7   : > { %2990 = vmatpush2.bf16.msra.mxu1 %v15436_v62  ;;  %3008 = vmatpush1.bf16.msra.mxu0 %v12207_v60  ;;  %v12666_v60 = vpop.permute.xlu1 %1168  ;;  %v2330_v62 = vadd.f32 %v12305_v7, %v12240_v26  ;;  %v12690_v2 = vpop.permute.xlu0 %974 }
 0x2b8   : > { %v12654_v48 = vpop.f32.mrf.mxu1  ;;  %3009 = vmatprep.subr.bf16.mxu0 %v15377_v18  ;;  %3055 = vmatprep.subr.bf16.mxu1 %v15377_v18  ;;  %v2476_v47 = vpop.f32.mrf.mxu0 }
 0x2b9   : > { %3724 = vrot.lane.b32.xlu1 %v12399_v17, %s10510_s17  ;;  %8629 = vmatprep.mubr.msk.bf16.mxu0 %vm1656_vm0, %v10841_v45  ;;  %v3455_v47 = vrot.slane %v12643_v56, 4  ;;  %v15437_v17 = vld [vmem:[#allocation35_spill] sm:$0xff] }
 0x2ba   : > { %2992 = vmatmul.mubr.bf16.vlgmr.msra.gmra.mxu1 %v12302_v21  ;;  %3720 = vrot.lane.b32.xlu0 %v12647_v10, %s10510_s17  ;;  %v2523_v33 = vpop.f32.mrf.mxu1  ;;  %v2477_v6 = vpop.f32.mrf.mxu0  ;;  %v2282_v58 = vadd.f32 %v15437_v17, %v12240_v26  ;;  %v3459_v10 = vsel %vm3423_vm1, %v3457_v20, %v3458_v29  ;;  %v15438_v17 = vld [vmem:[#allocation32_spill] sm:$0xff] }
 0x2bb   : > { %3010 = vmatpush1.bf16.msra.mxu0 %v12222_v40  ;;  %3056 = vmatpush1.bf16.msra.mxu1 %v12203_v51  ;;  %v3456_v7 = vsel %vm3423_vm1, %v3454_v46, %v3455_v47  ;;  %v3240_v40 = vmax.f32 %v2330_v62, 0.0  ;;  %v15439_v6 = vld [vmem:[#allocation30_spill] sm:$0xff]  ;;  %v12692_v29 = vpop.permute.xlu1 %978 }
 0x2bc   : > { %3011 = vmatprep.subr.bf16.mxu0 %v15377_v18  ;;  %3057 = vmatprep.subr.bf16.mxu1 %v15377_v18  ;;  %v2524_v33 = vpop.f32.mrf.mxu1  ;;  %v12700_v47 = vld [vmem:[%s15327_s1 + $0x4] ss:$8 sps:$4 sm:$0xff]  }
 0x2bd   : > { %3566 = vrot.lane.b32.xlu1 %v3459_v10, %s10511_s18  ;;  %8631 = vmatprep.mubr.msk.bf16.mxu1 %vm1656_vm0, %v10841_v45  ;;  %v3237_v10 = vmax.f32 %v2282_v58, 0.0  ;;  %v12706_v62 = vpack.c.bf16 %v3240_v40, %v3240_v40  ;;  %v15441_v58 = vld [vmem:[#allocation33_spill] sm:$0xff]  ;;  %v15442_v33 = vld [vmem:[#allocation31_spill] sm:$0xff] }
 0x2be   : > { %2952 = vmatmul.mubr.bf16.gmra.mxu0 %v10858_v50  ;;  %3562 = vrot.lane.b32.xlu0 %v3456_v7, %s10511_s18  ;;  %v2525_v51 = vpop.f32.mrf.mxu1 }
 0x2bf   : > { %3012 = vmatpush1.bf16.msra.mxu0 %v15438_v17  ;;  %3058 = vmatpush1.bf16.msra.mxu1 %v15439_v6  ;;  %15440 = vst [vmem:[#allocation10_spill] sm:$0xff] %v12706_v62  ;;  %v12710_v7 = vpack.c.bf16 %v3237_v10, %v3237_v10  ;;  %v12718_v51 = vpop.permute.xlu1 %976  ;;  %v3464_v40 = vrot.slane %v12706_v62, 4  ;;  %v3463_v6 = vrot.slane %v12315_v14, 4 }
 0x2c0   : > { %3013 = vmatprep.subr.bf16.mxu0 %v15377_v18  ;;  %3059 = vmatprep.subr.bf16.mxu1 %v15377_v18 }
 0x2c1   : > { %3564 = vrot.lane.b32.xlu1 %v3457_v20, %s10511_s18  ;;  %8632 = vmatprep.mubr.msk.bf16.mxu0 %vm1656_vm0, %v12700_v47  ;;  %15443 = vst [vmem:[#allocation22_spill] sm:$0xff] %v12710_v7  ;;  %v12716_v20 = vpop.permute.xlu0 %972  ;;  %v3461_v17 = vrot.slane %v12710_v7, 4 }
 0x2c2   : > { %3000 = vmatmul.mubr.bf16.gmra.mxu1 %v10858_v50  ;;  %3560 = vrot.lane.b32.xlu0 %v3454_v46, %s10511_s18  ;;  %v15444_v46 = vld [vmem:[#allocation34_spill] sm:$0xff] }
 0x2c3   : > { %3014 = vmatpush1.bf16.msra.mxu0 %v15441_v58  ;;  %3060 = vmatpush1.bf16.msra.mxu1 %v15442_v33  ;;  %v12741_v58 = vpop.permute.xlu1 %1554  ;;  %v3460_v33 = vrot.slane %v12415_v28, 4 }
 0x2c4   : > { %3015 = vmatprep.subr.bf16.mxu0 %v15377_v18  ;;  %3061 = vmatprep.subr.bf16.mxu1 %v15377_v18 }
 0x2c5   : > { %3734 = vrot.lane.b32.xlu1 %v12706_v62, %s10510_s17  ;;  %8634 = vmatprep.mubr.msk.bf16.mxu1 %vm1656_vm0, %v12700_v47  ;;  %v12739_v10 = vpop.permute.xlu0 %1550  ;;  %v2522_v62 = vadd.f32 %v12654_v48, %v12240_v26 }
 0x2c6   : > { %3730 = vrot.lane.b32.xlu0 %v12710_v7, %s10510_s17 }
 0x2c7   : > { %3016 = vmatpush1.bf16.msra.mxu0 %v12477_v55  ;;  %3062 = vmatpush1.bf16.msra.mxu1 %v15444_v46  ;;  %v2426_v55 = vadd.f32 %v12481_v37, %v12240_v26  ;;  %v2378_v46 = vadd.f32 %v12454_v42, %v12240_v26  ;;  %v3252_v27 = vmax.f32 %v2522_v62, 0.0 }
 0x2c8   : > { %3017 = vmatprep.subr.bf16.mxu0 %v15377_v18  ;;  %3063 = vmatprep.subr.bf16.mxu1 %v15377_v18 }
 0x2c9   : > { %3732 = vrot.lane.b32.xlu1 %v12315_v14, %s10510_s17  ;;  %v3465_v14 = vsel %vm3423_vm1, %v3463_v6, %v3464_v40  ;;  %v3246_v37 = vmax.f32 %v2426_v55, 0.0  ;;  %v3243_v42 = vmax.f32 %v2378_v46, 0.0  ;;  %v12756_v40 = vpop.permute.xlu0 %1548  ;;  %v10492_v55 = vld [vmem:[%s10582_s15 + $0x1d8] sm:$0xff]   ;;  %v12838_v62 = vpack.c.bf16 %v3252_v27, %v3252_v27 }
 0x2ca   : > { %3728 = vrot.lane.b32.xlu0 %v12415_v28, %s10510_s17  ;;  %v12758_v28 = vpop.permute.xlu1 %1552 }
 0x2cb   : > { %3018 = vmatpush1.bf16.msra.mxu0 %v12508_v23  ;;  %3064 = vmatpush1.bf16.msra.mxu1 %v12479_v35  ;;  %v3462_v35 = vsel %vm3423_vm1, %v3460_v33, %v3461_v17  ;;  %v10490_v23 = vld [vmem:[%s10582_s15 + $0x1c8] sm:$0xff]   ;;  %v10491_v17 = vld [vmem:[%s10582_s15 + $0x1c0] sm:$0xff]  }
 0x2cc   : > { %3019 = vmatprep.subr.bf16.mxu0 %v15377_v18  ;;  %3065 = vmatprep.subr.bf16.mxu1 %v15377_v18 }
 0x2cd   : > { %3574 = vrot.lane.b32.xlu1 %v3465_v14, %s10511_s18  ;;  %v12762_v14 = vpack.c.bf16 %v3246_v37, %v3246_v37  ;;  %v10493_v37 = vld [vmem:[%s10582_s15 + $0x1d0] sm:$0xff]  }
 0x2ce   : > { %3570 = vrot.lane.b32.xlu0 %v3462_v35, %s10511_s18 }
 0x2cf   : > { %3020 = vmatpush1.bf16.msra.mxu0 %v10490_v23  ;;  %3066 = vmatpush1.bf16.msra.mxu1 %v12510_v11  ;;  %15445 = vst [vmem:[#allocation21_spill] sm:$0xff] %v12762_v14  ;;  %v12766_v11 = vpack.c.bf16 %v3243_v42, %v3243_v42  ;;  %v3470_v23 = vrot.slane %v12762_v14, 4 }
 0x2d0   : > { %3021 = vmatprep.subr.bf16.mxu0 %v15377_v18  ;;  %3067 = vmatprep.subr.bf16.mxu1 %v15377_v18 }
 0x2d1   : > { %3572 = vrot.lane.b32.xlu1 %v3463_v6, %s10511_s18  ;;  %15446 = vst [vmem:[#allocation19_spill] sm:$0xff] %v12766_v11 }
 0x2d2   : > { %3568 = vrot.lane.b32.xlu0 %v3460_v33, %s10511_s18  ;;  %v12776_v33 = vpop.permute.xlu0 %3682  ;;  %v12778_v35 = vpop.permute.xlu1 %3686 }
 0x2d3   : > { %3022 = vmatpush1.bf16.msra.mxu0 %v10491_v17  ;;  %3068 = vmatpush1.bf16.msra.mxu1 %v10492_v55  ;;  %v3467_v55 = vrot.slane %v12766_v11, 4 }
 0x2d4   : > { %v12768_v46 = vpop.f32.mrf.mxu0  ;;  %3035 = vmatprep.subr.bf16.mxu0 %v15377_v18  ;;  %3069 = vmatprep.subr.bf16.mxu1 %v15377_v18 }
 0x2d5   : > { %3742 = vrot.lane.b32.xlu1 %v12762_v14, %s10510_s17  ;;  %v3466_v14 = vrot.slane %v12463_v22, 4 }
 0x2d6   : > { %3738 = vrot.lane.b32.xlu0 %v12766_v11, %s10510_s17  ;;  %v2563_v6 = vpop.f32.mrf.mxu0 }
 0x2d7   : > { %3036 = vmatpush2.bf16.msra.mxu0 %v12534_v49  ;;  %3070 = vmatpush1.bf16.msra.mxu1 %v10493_v37  ;;  %v3469_v6 = vrot.slane %v12486_v13, 4 }
 0x2d8   : > { %v12783_v42 = vpop.f32.mrf.mxu0  ;;  %v12785_v17 = vpop.f32.mrf.mxu1  ;;  %3037 = vmatprep.subr.bf16.mxu0 %v15377_v18  ;;  %3083 = vmatprep.subr.bf16.mxu1 %v15377_v18 }
 0x2d9   : > { %3740 = vrot.lane.b32.xlu1 %v12486_v13, %s10510_s17  ;;  %v2474_v13 = vadd.f32 %v12638_v54, %v12240_v26 }
 0x2da   : > { %3736 = vrot.lane.b32.xlu0 %v12463_v22, %s10510_s17  ;;  %v2566_v49 = vpop.f32.mrf.mxu0  ;;  %v2611_v37 = vpop.f32.mrf.mxu1  ;;  %v2469_v22 = vadd.f32 %v12622_v25, %v12276_v34  ;;  %v2466_v25 = vadd.f32 %v12602_v57, %v12256_v5 }
 0x2db   : > { %3038 = vmatpush2.bf16.msra.mxu0 %v12560_v4  ;;  %3084 = vmatpush2.bf16.msra.mxu1 %v12536_v59  ;;  %v12800_v11 = vpop.permute.xlu0 %3680  ;;  %v12802_v7 = vpop.permute.xlu1 %3684  ;;  %v3471_v37 = vsel %vm3423_vm1, %v3469_v6, %v3470_v23  ;;  %v3468_v59 = vsel %vm3423_vm1, %v3466_v14, %v3467_v55  ;;  %v2517_v4 = vadd.f32 %v12640_v52, %v12276_v34 }
 0x2dc   : > { %v12806_v56 = vpop.f32.mrf.mxu0  ;;  %v12808_v49 = vpop.f32.mrf.mxu1  ;;  %3103 = vmatprep.subr.bf16.mxu0 %v15377_v18  ;;  %3085 = vmatprep.subr.bf16.mxu1 %v15377_v18  ;;  %v2514_v52 = vadd.f32 %v12624_v39, %v12256_v5 }
 0x2dd   : > { %3582 = vrot.lane.b32.xlu1 %v3471_v37, %s10511_s18  ;;  %v3249_v37 = vmax.f32 %v2474_v13, 0.0 }
 0x2de   : > { %3040 = vmatmul.mubr.bf16.vlgmr.msra.gmra.mxu0 %v12302_v21  ;;  %3578 = vrot.lane.b32.xlu0 %v3468_v59, %s10511_s18  ;;  %v2614_v54 = vpop.f32.mrf.mxu1  ;;  %v2571_v48 = vpop.f32.mrf.mxu0 }
 0x2df   : > { %3086 = vmatpush2.bf16.msra.mxu1 %v12562_v44  ;;  %3104 = vmatpush1.bf16.msra.mxu0 %v12584_v19  ;;  %v12823_v23 = vpop.permute.xlu0 %3522  ;;  %v12825_v55 = vpop.permute.xlu1 %3526  ;;  %v3251_v44 = vmax.f32 %v2517_v4, 0.0  ;;  %v3248_v19 = vmax.f32 %v2469_v22, 0.0  ;;  %v12844_v54 = vpack.c.bf16 %v3249_v37, %v3249_v37  ;;  %v3476_v4 = vrot.slane %v12838_v62, 4 }
 0x2e0   : > { %v2617_v8 = vpop.f32.mrf.mxu1  ;;  %3105 = vmatprep.subr.bf16.mxu0 %v15377_v18  ;;  %3151 = vmatprep.subr.bf16.mxu1 %v15377_v18  ;;  %v2572_v59 = vpop.f32.mrf.mxu0 }
 0x2e1   : > { %3580 = vrot.lane.b32.xlu1 %v3469_v6, %s10511_s18  ;;  %8633 = vmatprep.mubr.msk.bf16.mxu0 %vm1656_vm0, %v10841_v45  ;;  %v3250_v6 = vmax.f32 %v2514_v52, 0.0  ;;  %v3473_v52 = vrot.slane %v12844_v54, 4  ;;  %v2618_v37 = vadd.f32 %v2617_v8, %v12240_v26  ;;  %v2570_v59 = vadd.f32 %v12806_v56, %v12240_v26 }
 0x2e2   : > { %3576 = vrot.lane.b32.xlu0 %v3466_v14, %s10511_s18  ;;  %3088 = vmatmul.mubr.bf16.vlgmr.msra.gmra.mxu1 %v12302_v21  ;;  %v2619_v13 = vpop.f32.mrf.mxu1  ;;  %v2573_v39 = vpop.f32.mrf.mxu0  ;;  %v3247_v21 = vmax.f32 %v2466_v25, 0.0  ;;  %v2613_v8 = vadd.f32 %v12808_v49, %v12276_v34  ;;  %v2565_v56 = vadd.f32 %v12783_v42, %v12276_v34 }
 0x2e3   : > { %3106 = vmatpush1.bf16.msra.mxu0 %v12610_v43  ;;  %3152 = vmatpush1.bf16.msra.mxu1 %v12586_v12  ;;  %v12842_v57 = vpop.permute.xlu0 %3520  ;;  %v12852_v22 = vpack.c.bf16 %v3251_v44, %v3250_v6  ;;  %v12854_v27 = vpop.permute.xlu1 %3524  ;;  %v2610_v39 = vadd.f32 %v12785_v17, %v12256_v5 }
 0x2e4   : > { %3107 = vmatprep.subr.bf16.mxu0 %v15377_v18  ;;  %3153 = vmatprep.subr.bf16.mxu1 %v15377_v18  ;;  %v2620_v14 = vpop.f32.mrf.mxu1  ;;  %v12859_v43 = vpack.c.bf16 %v3248_v19, %v3247_v21  ;;  %v3255_v19 = vmax.f32 %v2570_v59, 0.0  ;;  %v3257_v49 = vmax.f32 %v2613_v8, 0.0  ;;  %v10496_v59 = vld [vmem:[%s10582_s15 + $0x1f8] sm:$0xff]  }
 0x2e5   : > { %3750 = vrot.lane.b32.xlu1 %v12838_v62, %s10510_s17  ;;  %8635 = vmatprep.mubr.msk.bf16.mxu1 %vm1656_vm0, %v10841_v45  ;;  %v3256_v17 = vmax.f32 %v2610_v39, 0.0  ;;  %v10497_v39 = vld [vmem:[%s10582_s15 + $0x1f0] sm:$0xff]  }
 0x2e6   : > { %3048 = vmatmul.mubr.bf16.gmra.mxu0 %v10858_v50  ;;  %3746 = vrot.lane.b32.xlu0 %v12844_v54, %s10510_s17  ;;  %v2621_v12 = vpop.f32.mrf.mxu1  ;;  %v12915_v6 = vpack.c.bf16 %v3255_v19, %v3255_v19 }
 0x2e7   : > { %3108 = vmatpush1.bf16.msra.mxu0 %v12634_v0  ;;  %3154 = vmatpush1.bf16.msra.mxu1 %v12612_v61  ;;  %v12864_v48 = vpop.permute.xlu0 %3690  ;;  %v3475_v0 = vrot.slane %v12852_v22, 4  ;;  %v3472_v61 = vrot.slane %v12859_v43, 4  ;;  %v12883_v25 = vpop.permute.xlu1 %3694  ;;  %v12923_v21 = vpack.c.bf16 %v3257_v49, %v3256_v17 }
 0x2e8   : > { %3109 = vmatprep.subr.bf16.mxu0 %v15377_v18  ;;  %3155 = vmatprep.subr.bf16.mxu1 %v15377_v18 }
 0x2e9   : > { %3748 = vrot.lane.b32.xlu1 %v12852_v22, %s10510_s17  ;;  %8636 = vmatprep.mubr.msk.bf16.mxu0 %vm1656_vm0, %v12700_v47  ;;  %v3477_v44 = vsel %vm3423_vm1, %v3475_v0, %v3476_v4  ;;  %v3474_v13 = vsel %vm3423_vm1, %v3472_v61, %v3473_v52  ;;  %v3479_v52 = vrot.slane %v12915_v6, 4 }
 0x2ea   : > { %3744 = vrot.lane.b32.xlu0 %v12859_v43, %s10510_s17  ;;  %3096 = vmatmul.mubr.bf16.gmra.mxu1 %v10858_v50 }
 0x2eb   : > { %3110 = vmatpush1.bf16.msra.mxu0 %v12664_v41  ;;  %3156 = vmatpush1.bf16.msra.mxu1 %v12636_v63  ;;  %v12894_v63 = vpop.permute.xlu0 %3688  ;;  %v3258_v41 = vmax.f32 %v2618_v37, 0.0  ;;  %v12908_v42 = vpop.permute.xlu1 %3692  ;;  %v10495_v37 = vld [vmem:[%s10582_s15 + $0x1e0] sm:$0xff]  }
 0x2ec   : > { %3111 = vmatprep.subr.bf16.mxu0 %v15377_v18  ;;  %3157 = vmatprep.subr.bf16.mxu1 %v15377_v18 }
 0x2ed   : > { %3590 = vrot.lane.b32.xlu1 %v3477_v44, %s10511_s18  ;;  %8638 = vmatprep.mubr.msk.bf16.mxu1 %vm1656_vm0, %v12700_v47  ;;  %v2562_v47 = vadd.f32 %v12768_v46, %v12256_v5 }
 0x2ee   : > { %3586 = vrot.lane.b32.xlu0 %v3474_v13, %s10511_s18 }
 0x2ef   : > { %3112 = vmatpush1.bf16.msra.mxu0 %v12690_v2  ;;  %3158 = vmatpush1.bf16.msra.mxu1 %v12666_v60  ;;  %v3254_v2 = vmax.f32 %v2565_v56, 0.0  ;;  %v12911_v60 = vpack.c.bf16 %v3258_v41, %v3258_v41  ;;  %v12917_v14 = vpop.permute.xlu0 %3530  ;;  %v3253_v46 = vmax.f32 %v2562_v47, 0.0  ;;  %v12932_v4 = vpop.permute.xlu1 %3534 }
 0x2f0   : > { %3113 = vmatprep.subr.bf16.mxu0 %v15377_v18  ;;  %3159 = vmatprep.subr.bf16.mxu1 %v15377_v18 }
 0x2f1   : > { %3588 = vrot.lane.b32.xlu1 %v3475_v0, %s10511_s18  ;;  %v3482_v12 = vrot.slane %v12911_v60, 4  ;;  %v3481_v0 = vrot.slane %v12923_v21, 4 }
 0x2f2   : > { %3584 = vrot.lane.b32.xlu0 %v3472_v61, %s10511_s18 }
 0x2f3   : > { %3114 = vmatpush1.bf16.msra.mxu0 %v12716_v20  ;;  %3160 = vmatpush1.bf16.msra.mxu1 %v12692_v29  ;;  %v12927_v29 = vpack.c.bf16 %v3254_v2, %v3253_v46  ;;  %v10494_v20 = vld [vmem:[%s10582_s15 + $0x1e8] sm:$0xff]   ;;  %v12940_v61 = vpop.permute.xlu0 %3528  ;;  %v3483_v13 = vsel %vm3423_vm1, %v3481_v0, %v3482_v12  ;;  %v12952_v56 = vpop.permute.xlu1 %3532 }
 0x2f4   : > { %3115 = vmatprep.subr.bf16.mxu0 %v15377_v18  ;;  %3161 = vmatprep.subr.bf16.mxu1 %v15377_v18 }
 0x2f5   : > { %3758 = vrot.lane.b32.xlu1 %v12911_v60, %s10510_s17 }
 0x2f6   : > { %3754 = vrot.lane.b32.xlu0 %v12915_v6, %s10510_s17 }
 0x2f7   : > { %3116 = vmatpush1.bf16.msra.mxu0 %v10494_v20  ;;  %3162 = vmatpush1.bf16.msra.mxu1 %v12718_v51  ;;  %v3478_v51 = vrot.slane %v12927_v29, 4  ;;  %v12957_v19 = vpop.permute.xlu0 %3698  ;;  %v12965_v17 = vpop.permute.xlu1 %3702  ;;  %v10513_v20 = vmov 0.0  }
 0x2f8   : > { %3117 = vmatprep.subr.bf16.mxu0 %v15377_v18  ;;  %3163 = vmatprep.subr.bf16.mxu1 %v15377_v18 }
 0x2f9   : > { %3756 = vrot.lane.b32.xlu1 %v12923_v21, %s10510_s17  ;;  %v3480_v8 = vsel %vm3423_vm1, %v3478_v51, %v3479_v52 }
 0x2fa   : > { %3752 = vrot.lane.b32.xlu0 %v12927_v29, %s10510_s17 }
 0x2fb   : > { %3118 = vmatpush1.bf16.msra.mxu0 %v10495_v37  ;;  %3164 = vmatpush1.bf16.msra.mxu1 %v10496_v59 }
 0x2fc   : > { %v2657_v44 = vpop.f32.mrf.mxu0  ;;  %3131 = vmatprep.subr.bf16.mxu0 %v15377_v18  ;;  %3165 = vmatprep.subr.bf16.mxu1 %v15377_v18 }
 0x2fd   : > { %3598 = vrot.lane.b32.xlu1 %v3483_v13, %s10511_s18 }
 0x2fe   : > { %3594 = vrot.lane.b32.xlu0 %v3480_v8, %s10511_s18  ;;  %v2659_v41 = vpop.f32.mrf.mxu0 }
 0x2ff   : > { %3132 = vmatpush2.bf16.msra.mxu0 %v12739_v10  ;;  %3166 = vmatpush1.bf16.msra.mxu1 %v10497_v39 }
 0x300   : > { %v2660_v47 = vpop.f32.mrf.mxu0  ;;  %3133 = vmatprep.subr.bf16.mxu0 %v15377_v18  ;;  %3179 = vmatprep.subr.bf16.mxu1 %v15377_v18  ;;  %v2705_v49 = vpop.f32.mrf.mxu1 }
 0x301   : > { %3596 = vrot.lane.b32.xlu1 %v3481_v0, %s10511_s18  ;;  %v2661_v12 = vadd.f32 %v2660_v47, %v12276_v34 }
 0x302   : > { %3592 = vrot.lane.b32.xlu0 %v3478_v51, %s10511_s18  ;;  %v2662_v2 = vpop.f32.mrf.mxu0  ;;  %v2707_v10 = vpop.f32.mrf.mxu1  ;;  %v3993_v51 = vsel %vm3423_vm1, %v12776_v33, 0 }
 0x303   : > { %3134 = vmatpush2.bf16.msra.mxu0 %v12756_v40  ;;  %3180 = vmatpush2.bf16.msra.mxu1 %v12741_v58  ;;  %v12973_v40 = vpop.permute.xlu0 %3696  ;;  %v10498_v58 = vld [vmem:[%s15327_s1] ss:$8 sps:$4 sm:$0xff]   ;;  %v3260_v8 = vmax.f32 %v2661_v12, 0.0  ;;  %v2706_v12 = vadd.f32 %v2705_v49, %v12256_v5 }
 0x304   : > { %v2665_v46 = vpop.f32.mrf.mxu0  ;;  %3181 = vmatprep.subr.bf16.mxu1 %v15377_v18  ;;  %9318 = vmatprep.subr.bf16.mxu0 %v10513_v20  ;;  %v2708_v0 = vpop.f32.mrf.mxu1  ;;  %v2658_v18 = vadd.f32 %v2657_v44, %v12256_v5  ;;  %v4037_v44 = vsel %vm3423_vm1, %v12778_v35, 0 }
 0x305   : > { %v2666_v52 = vadd.f32 %v2665_v46, %v12240_v26  ;;  %v2709_v39 = vadd.f32 %v2708_v0, %v12276_v34 }
 0x306   : > { %3136 = vmatmul.mubr.bf16.vlgmr.msra.gmra.mxu0 %v10498_v58  ;;  %v2667_v37 = vpop.f32.mrf.mxu0  ;;  %v2710_v13 = vpop.f32.mrf.mxu1  ;;  %v3259_v46 = vmax.f32 %v2658_v18, 0.0 }
 0x307   : > { %v3261_v59 = vmax.f32 %v2666_v52, 0.0  ;;  %3182 = vmatpush2.bf16.msra.mxu1 %v12758_v28  ;;  %9319 = vmatpush3.bf16.msra.mxu0 %v3993_v51  ;;  %v12989_v28 = vpop.permute.xlu1 %3700  ;;  %v12994_v0 = vpop.permute.xlu0 %3538  ;;  %v3263_v37 = vmax.f32 %v2709_v39, 0.0 }
 0x308   : > { %9320 = vmatprep.subr.bf16.mxu0 %v10513_v20  ;;  %9332 = vmatprep.subr.bf16.mxu1 %v10513_v20  ;;  %v2668_v33 = vpop.f32.mrf.mxu0  ;;  %v2713_v47 = vpop.f32.mrf.mxu1  ;;  %v12999_v35 = vpack.c.bf16 %v3260_v8, %v3259_v46 }
 0x309   : > { %v12982_v41 = vpack.c.bf16 %v3261_v59, %v3261_v59  ;;  %8637 = vmatprep.mubr.msk.bf16.mxu0 %vm1656_vm0, %v10841_v45  ;;  %v2714_v2 = vadd.f32 %v2713_v47, %v12240_v26 }
 0x30a   : > { %3184 = vmatmul.mubr.bf16.vlgmr.msra.gmra.mxu1 %v10498_v58  ;;  %v2669_v10 = vpop.f32.mrf.mxu0  ;;  %v2715_v52 = vpop.f32.mrf.mxu1  ;;  %v3262_v58 = vmax.f32 %v2706_v12, 0.0  ;;  %v3855_v12 = vsel %vm3423_vm1, %v12353_v36, %v12952_v56  ;;  %v4169_v36 = vsel %vm3423_vm1, %v12957_v19, 0 }
 0x30b   : > { %9321 = vmatpush3.bf16.msra.mxu0 %v12800_v11  ;;  %9333 = vmatpush3.bf16.msra.mxu1 %v4037_v44  ;;  %v3264_v51 = vmax.f32 %v2714_v2, 0.0  ;;  %v3485_v18 = vrot.slane %v12982_v41, 4  ;;  %v13010_v13 = vpop.permute.xlu1 %3542 }
 0x30c   : > { %3762 = vrot.lane.b32.xlu0 %v12982_v41, %s10510_s17  ;;  %9322 = vmatprep.subr.bf16.mxu0 %v10513_v20  ;;  %v2716_v49 = vpop.f32.mrf.mxu1  ;;  %v13017_v33 = vpack.c.bf16 %v3263_v37, %v3262_v58 }
 0x30d   : > { %9334 = vmatprep.subr.bf16.mxu1 %v10513_v20  ;;  %8639 = vmatprep.mubr.msk.bf16.mxu1 %vm1656_vm0, %v10841_v45  ;;  %v13004_v11 = vpack.c.bf16 %v3264_v51, %v3264_v51  ;;  %v3484_v45 = vrot.slane %v12999_v35, 4 }
 0x30e   : > { %3144 = vmatmul.mubr.bf16.gmra.mxu0 %v10858_v50  ;;  %v2717_v59 = vpop.f32.mrf.mxu1 }
 0x30f   : > { %9323 = vmatpush3.bf16.msra.mxu0 %v12823_v23  ;;  %9335 = vmatpush3.bf16.msra.mxu1 %v12802_v7  ;;  %v3843_v7 = vsel %vm3423_vm1, %v12259_v16, %v12842_v57  ;;  %v13024_v23 = vpop.permute.xlu0 %3536  ;;  %v3488_v8 = vrot.slane %v13004_v11, 4  ;;  %v3486_v39 = vsel %vm3423_vm1, %v3484_v45, %v3485_v18  ;;  %v3487_v16 = vrot.slane %v13017_v33, 4  ;;  %v13041_v57 = vpop.permute.xlu1 %3540 }
 0x310   : > { %3760 = vrot.lane.b32.xlu0 %v12999_v35, %s10510_s17  ;;  %3766 = vrot.lane.b32.xlu1 %v13004_v11, %s10510_s17 }
 0x311   : > { %9324 = vmatprep.subr.bf16.mxu0 %v10513_v20  ;;  %9336 = vmatprep.subr.bf16.mxu1 %v10513_v20  ;;  %v3489_v47 = vsel %vm3423_vm1, %v3487_v16, %v3488_v8 }
 0x312   : > { %3192 = vmatmul.mubr.bf16.gmra.mxu1 %v10858_v50  ;;  %9328 = vmatprep.mubr.msk.bf16.mxu0 %vm10514_vm2, %v10513_v20  ;;  %v3847_v50 = vsel %vm3423_vm1, %v12261_v32, %v12854_v27  ;;  %v4081_v32 = vsel %vm3423_vm1, %v12864_v48, 0  ;;  %v4125_v27 = vsel %vm3423_vm1, %v12883_v25, 0 }
 0x313   : > { %9325 = vmatpush3.bf16.msra.mxu0 %v3843_v7  ;;  %9337 = vmatpush3.bf16.msra.mxu1 %v12825_v55  ;;  %v13046_v55 = vld [vmem:[%s15329_s3] sm:$0xff]   ;;  %v13052_v44 = vpop.permute.xlu0 %3706 }
 0x314   : > { %3602 = vrot.lane.b32.xlu0 %v3486_v39, %s10511_s18  ;;  %3764 = vrot.lane.b32.xlu1 %v13017_v33, %s10510_s17 }
 0x315   : > { %9326 = vmatprep.subr.bf16.mxu0 %v10513_v20  ;;  %9338 = vmatprep.subr.bf16.mxu1 %v10513_v20 }
 0x316   : > { %9342 = vmatprep.mubr.msk.bf16.mxu1 %vm10514_vm2, %v10513_v20 }
 0x317   : > { %9327 = vmatpush3.bf16.msra.mxu0 %v12295_v1  ;;  %9339 = vmatpush3.bf16.msra.mxu1 %v3847_v50  ;;  %v13063_v1 = vpop.permute.xlu1 %3710  ;;  %v13072_v48 = vpop.permute.xlu0 %3704 }
 0x318   : > { %3600 = vrot.lane.b32.xlu0 %v3484_v45, %s10511_s18  ;;  %3606 = vrot.lane.b32.xlu1 %v3489_v47, %s10511_s18 }
 0x319   : > { %9340 = vmatprep.subr.bf16.mxu1 %v10513_v20  ;;  %9346 = vmatprep.subr.bf16.mxu0 %v10513_v20 }
 0x31a   : > { %9329 = vmatmul.mubr.msk.bf16.vlgmr.msra.gmra.mxu0 %vm3988_vm3, %v13046_v55 }
 0x31b   : > { %9341 = vmatpush3.bf16.msra.mxu1 %v12293_v53  ;;  %9347 = vmatpush3.bf16.msra.mxu0 %v4081_v32  ;;  %v13081_v53 = vpop.permute.xlu1 %3708  ;;  %v13085_v25 = vpop.permute.xlu0 %3546 }
 0x31c   : > { %3604 = vrot.lane.b32.xlu1 %v3487_v16, %s10511_s18  ;;  %9348 = vmatprep.subr.bf16.mxu0 %v10513_v20 }
 0x31d   : > { %9360 = vmatprep.subr.bf16.mxu1 %v10513_v20  ;;  %9356 = vmatprep.mubr.msk.bf16.mxu0 %vm10514_vm2, %v10513_v20 }
 0x31e   : > { %9343 = vmatmul.mubr.msk.bf16.vlgmr.msra.gmra.mxu1 %vm3988_vm3, %v13046_v55 }
 0x31f   : > { %9349 = vmatpush3.bf16.msra.mxu0 %v12894_v63  ;;  %9361 = vmatpush3.bf16.msra.mxu1 %v4125_v27  ;;  %v3851_v63 = vsel %vm3423_vm1, %v12355_v9, %v12940_v61  ;;  %v13093_v46 = vpop.permute.xlu1 %3550  ;;  %v13100_v52 = vpop.permute.xlu0 %3544 }
 0x320   : > { %9350 = vmatprep.subr.bf16.mxu0 %v10513_v20  ;;  %9362 = vmatprep.subr.bf16.mxu1 %v10513_v20 }
 0x321   : > { %9370 = vmatprep.mubr.msk.bf16.mxu1 %vm10514_vm2, %v10513_v20 }
 0x323   : > { %9351 = vmatpush3.bf16.msra.mxu0 %v12917_v14  ;;  %9363 = vmatpush3.bf16.msra.mxu1 %v12908_v42  ;;  %v13109_v56 = vpop.permute.xlu1 %3548  ;;  %v13115_v45 = vpop.permute.xlu0 %3714 }
 0x324   : > { %v2753_v2 = vpop.f32.mrf.mxu0  ;;  %9352 = vmatprep.subr.bf16.mxu0 %v10513_v20  ;;  %9364 = vmatprep.subr.bf16.mxu1 %v10513_v20 }
 0x325   : > { %v2754_v58 = vadd.f32 %v2753_v2, %v12256_v5 }
 0x326   : > { %v2755_v10 = vpop.f32.mrf.mxu0 }
 0x327   : > { %9353 = vmatpush3.bf16.msra.mxu0 %v3851_v63  ;;  %9365 = vmatpush3.bf16.msra.mxu1 %v12932_v4  ;;  %v3265_v32 = vmax.f32 %v2754_v58, 0.0  ;;  %v13131_v63 = vpop.permute.xlu1 %3718 }
 0x328   : > { %v2756_v14 = vpop.f32.mrf.mxu0  ;;  %9354 = vmatprep.subr.bf16.mxu0 %v10513_v20  ;;  %9366 = vmatprep.subr.bf16.mxu1 %v10513_v20  ;;  %v2801_v42 = vpop.f32.mrf.mxu1 }
 0x329   : > { %v2757_v61 = vadd.f32 %v2756_v14, %v12276_v34  ;;  %v2802_v27 = vadd.f32 %v2801_v42, %v12256_v5 }
 0x32a   : > { %v2758_v51 = vpop.f32.mrf.mxu0  ;;  %v2803_v9 = vpop.f32.mrf.mxu1 }
 0x32b   : > { %9355 = vmatpush3.bf16.msra.mxu0 %v12359_v38  ;;  %9367 = vmatpush3.bf16.msra.mxu1 %v3855_v12  ;;  %v3266_v7 = vmax.f32 %v2757_v61, 0.0  ;;  %v3268_v51 = vmax.f32 %v2802_v27, 0.0 }
 0x32c   : > { %v2761_v4 = vpop.f32.mrf.mxu0  ;;  %9368 = vmatprep.subr.bf16.mxu1 %v10513_v20  ;;  %9374 = vmatprep.subr.bf16.mxu0 %v10513_v20  ;;  %v2804_v49 = vpop.f32.mrf.mxu1 }
 0x32d   : > { %v2762_v37 = vadd.f32 %v2761_v4, %v12240_v26  ;;  %v2805_v39 = vadd.f32 %v2804_v49, %v12276_v34 }
 0x32e   : > { %9357 = vmatmul.mubr.msk.bf16.vlgmr.msra.gmra.mxu0 %vm3988_vm3, %v13046_v55  ;;  %v2763_v38 = vpop.f32.mrf.mxu0  ;;  %v2806_v59 = vpop.f32.mrf.mxu1 }
 0x32f   : > { %v3267_v18 = vmax.f32 %v2762_v37, 0.0  ;;  %9369 = vmatpush3.bf16.msra.mxu1 %v12357_v3  ;;  %9375 = vmatpush3.bf16.msra.mxu0 %v4169_v36  ;;  %v4213_v3 = vsel %vm3423_vm1, %v12965_v17, 0  ;;  %v13136_v17 = vpack.c.bf16 %v3266_v7, %v3265_v32  ;;  %v3269_v14 = vmax.f32 %v2805_v39, 0.0  ;;  %v15448_v39 = vld [vmem:[#allocation9_spill] sm:$0xff] }
 0x330   : > { %9376 = vmatprep.subr.bf16.mxu0 %v10513_v20  ;;  %9388 = vmatprep.subr.bf16.mxu1 %v10513_v20  ;;  %v2764_v19 = vpop.f32.mrf.mxu0  ;;  %v2809_v16 = vpop.f32.mrf.mxu1 }
 0x331   : > { %v13119_v8 = vpack.c.bf16 %v3267_v18, %v3267_v18  ;;  %9384 = vmatprep.mubr.msk.bf16.mxu0 %vm10514_vm2, %v10513_v20  ;;  %v2810_v50 = vadd.f32 %v2809_v16, %v12240_v26  ;;  %v3490_v61 = vrot.slane %v13136_v17, 4  ;;  %v13153_v37 = vpack.c.bf16 %v3269_v14, %v3268_v51 }
 0x332   : > { %9371 = vmatmul.mubr.msk.bf16.vlgmr.msra.gmra.mxu1 %vm3988_vm3, %v13046_v55  ;;  %v2765_v47 = vpop.f32.mrf.mxu0  ;;  %v2811_v2 = vpop.f32.mrf.mxu1  ;;  %v4257_v18 = vsel %vm3423_vm1, %v13052_v44, 0  ;;  %v3871_v16 = vsel %vm3423_vm1, %v15448_v39, %v13109_v56  ;;  %v4345_v56 = vsel %vm3423_vm1, %v13115_v45, 0 }
 0x333   : > { %9377 = vmatpush3.bf16.msra.mxu0 %v12973_v40  ;;  %9389 = vmatpush3.bf16.msra.mxu1 %v4213_v3  ;;  %v3270_v10 = vmax.f32 %v2810_v50, 0.0  ;;  %v13141_v40 = vpop.permute.xlu0 %3712  ;;  %v3491_v9 = vrot.slane %v13119_v8, 4  ;;  %v3493_v58 = vrot.slane %v13153_v37, 4  ;;  %v15449_v50 = vld [vmem:[#allocation5_spill] sm:$0xff] }
 0x334   : > { %3770 = vrot.lane.b32.xlu0 %v13119_v8, %s10510_s17  ;;  %9378 = vmatprep.subr.bf16.mxu0 %v10513_v20  ;;  %v2812_v42 = vpop.f32.mrf.mxu1 }
 0x335   : > { %9390 = vmatprep.subr.bf16.mxu1 %v10513_v20  ;;  %9398 = vmatprep.mubr.msk.bf16.mxu1 %vm10514_vm2, %v10513_v20  ;;  %v13143_v12 = vpack.c.bf16 %v3270_v10, %v3270_v10  ;;  %v3492_v36 = vsel %vm3423_vm1, %v3490_v61, %v3491_v9  ;;  %v15450_v42 = vld [vmem:[#allocation7_spill] sm:$0xff] }
 0x336   : > { %v2813_v4 = vpop.f32.mrf.mxu1 }
 0x337   : > { %9379 = vmatpush3.bf16.msra.mxu0 %v12994_v0  ;;  %9391 = vmatpush3.bf16.msra.mxu1 %v12989_v28  ;;  %v3859_v0 = vsel %vm3423_vm1, %v12423_v15, %v13024_v23  ;;  %v13160_v28 = vpop.permute.xlu1 %3716  ;;  %v3494_v49 = vrot.slane %v13143_v12, 4  ;;  %v13165_v38 = vpop.permute.xlu0 %3554  ;;  %v3863_v15 = vsel %vm3423_vm1, %v12421_v30, %v13041_v57  ;;  %v4301_v30 = vsel %vm3423_vm1, %v13063_v1, 0  ;;  %v15447_v1 = vld [vmem:[#allocation8_spill] sm:$0xff] }
 0x338   : > { %3768 = vrot.lane.b32.xlu0 %v13136_v17, %s10510_s17  ;;  %3774 = vrot.lane.b32.xlu1 %v13143_v12, %s10510_s17 }
 0x339   : > { %9380 = vmatprep.subr.bf16.mxu0 %v10513_v20  ;;  %9392 = vmatprep.subr.bf16.mxu1 %v10513_v20 }
 0x33b   : > { %9381 = vmatpush3.bf16.msra.mxu0 %v3859_v0  ;;  %9393 = vmatpush3.bf16.msra.mxu1 %v13010_v13  ;;  %v3495_v13 = vsel %vm3423_vm1, %v3493_v58, %v3494_v49  ;;  %v13178_v23 = vpop.permute.xlu1 %3558  ;;  %v13186_v59 = vpop.permute.xlu0 %3552 }
 0x33c   : > { %3610 = vrot.lane.b32.xlu0 %v3492_v36, %s10511_s18  ;;  %3772 = vrot.lane.b32.xlu1 %v13153_v37, %s10510_s17 }
 0x33d   : > { %9382 = vmatprep.subr.bf16.mxu0 %v10513_v20  ;;  %9394 = vmatprep.subr.bf16.mxu1 %v10513_v20 }
 0x33f   : > { %9383 = vmatpush3.bf16.msra.mxu0 %v12432_v31  ;;  %9395 = vmatpush3.bf16.msra.mxu1 %v3863_v15  ;;  %v13198_v31 = vpop.permute.xlu1 %3556 }
 0x340   : > { %3608 = vrot.lane.b32.xlu0 %v3490_v61, %s10511_s18  ;;  %3614 = vrot.lane.b32.xlu1 %v3495_v13, %s10511_s18 }
 0x341   : > { %9396 = vmatprep.subr.bf16.mxu1 %v10513_v20  ;;  %9402 = vmatprep.subr.bf16.mxu0 %v10513_v20 }
 0x342   : > { %9385 = vmatmul.mubr.msk.bf16.vlgmr.msra.gmra.mxu0 %vm3988_vm3, %v13046_v55 }
 0x343   : > { %9397 = vmatpush3.bf16.msra.mxu1 %v12425_v24  ;;  %9403 = vmatpush3.bf16.msra.mxu0 %v4257_v18  ;;  %v13203_v24 = vpop.permute.xlu0 %3722  ;;  %v13211_v57 = vpop.permute.xlu1 %3726 }
 0x344   : > { %3612 = vrot.lane.b32.xlu1 %v3493_v58, %s10511_s18  ;;  %9404 = vmatprep.subr.bf16.mxu0 %v10513_v20  ;;  %v4389_v58 = vsel %vm3423_vm1, %v13131_v63, 0 }
 0x345   : > { %9416 = vmatprep.subr.bf16.mxu1 %v10513_v20  ;;  %9412 = vmatprep.mubr.msk.bf16.mxu0 %vm10514_vm2, %v10513_v20 }
 0x346   : > { %9399 = vmatmul.mubr.msk.bf16.vlgmr.msra.gmra.mxu1 %vm3988_vm3, %v13046_v55 }
 0x347   : > { %9405 = vmatpush3.bf16.msra.mxu0 %v13072_v48  ;;  %9417 = vmatpush3.bf16.msra.mxu1 %v4301_v30  ;;  %v3867_v48 = vsel %vm3423_vm1, %v15447_v1, %v13100_v52  ;;  %v13218_v19 = vpop.permute.xlu0 %3720  ;;  %v13226_v3 = vpop.permute.xlu1 %3724 }
 0x348   : > { %9406 = vmatprep.subr.bf16.mxu0 %v10513_v20  ;;  %9418 = vmatprep.subr.bf16.mxu1 %v10513_v20 }
 0x349   : > { %9426 = vmatprep.mubr.msk.bf16.mxu1 %vm10514_vm2, %v10513_v20 }
 0x34b   : > { %9407 = vmatpush3.bf16.msra.mxu0 %v13085_v25  ;;  %9419 = vmatpush3.bf16.msra.mxu1 %v13081_v53  ;;  %v13229_v32 = vpop.permute.xlu0 %3562  ;;  %v13241_v4 = vpop.permute.xlu1 %3566 }
 0x34c   : > { %9408 = vmatprep.subr.bf16.mxu0 %v10513_v20  ;;  %9420 = vmatprep.subr.bf16.mxu1 %v10513_v20 }
 0x34d   : > { %v2849_v44 = vpop.f32.mrf.mxu0 }
 0x34e   : > { %v2850_v14 = vadd.f32 %v2849_v44, %v12256_v5 }
 0x34f   : > { %9409 = vmatpush3.bf16.msra.mxu0 %v3867_v48  ;;  %9421 = vmatpush3.bf16.msra.mxu1 %v13093_v46  ;;  %v2851_v7 = vpop.f32.mrf.mxu0  ;;  %v13250_v15 = vpop.permute.xlu0 %3560 }
 0x350   : > { %9410 = vmatprep.subr.bf16.mxu0 %v10513_v20  ;;  %9422 = vmatprep.subr.bf16.mxu1 %v10513_v20  ;;  %v3271_v30 = vmax.f32 %v2850_v14, 0.0 }
 0x351   : > { %v2852_v53 = vpop.f32.mrf.mxu0  ;;  %v2897_v25 = vpop.f32.mrf.mxu1 }
 0x352   : > { %v2853_v46 = vadd.f32 %v2852_v53, %v12276_v34  ;;  %v2898_v44 = vadd.f32 %v2897_v25, %v12256_v5 }
 0x353   : > { %9411 = vmatpush3.bf16.msra.mxu0 %v15449_v50  ;;  %9423 = vmatpush3.bf16.msra.mxu1 %v3871_v16  ;;  %v2854_v52 = vpop.f32.mrf.mxu0  ;;  %v2899_v47 = vpop.f32.mrf.mxu1 }
 0x354   : > { %9424 = vmatprep.subr.bf16.mxu1 %v10513_v20  ;;  %9430 = vmatprep.subr.bf16.mxu0 %v10513_v20  ;;  %v3272_v45 = vmax.f32 %v2853_v46, 0.0  ;;  %v3274_v16 = vmax.f32 %v2898_v44, 0.0  ;;  %v13278_v47 = vpop.permute.xlu0 %3730 }
 0x355   : > { %v2857_v27 = vpop.f32.mrf.mxu0  ;;  %v2900_v2 = vpop.f32.mrf.mxu1 }
 0x356   : > { %v2858_v10 = vadd.f32 %v2857_v27, %v12240_v26  ;;  %9413 = vmatmul.mubr.msk.bf16.vlgmr.msra.gmra.mxu0 %vm3988_vm3, %v13046_v55  ;;  %v2901_v0 = vadd.f32 %v2900_v2, %v12276_v34  ;;  %v13262_v63 = vpack.c.bf16 %v3272_v45, %v3271_v30  ;;  %v15454_v45 = vld [vmem:[#allocation15_spill] sm:$0xff] }
 0x357   : > { %9425 = vmatpush3.bf16.msra.mxu1 %v15450_v42  ;;  %9431 = vmatpush3.bf16.msra.mxu0 %v4345_v56  ;;  %v2902_v51 = vpop.f32.mrf.mxu1  ;;  %v2859_v9 = vpop.f32.mrf.mxu0 }
 0x358   : > { %v3273_v61 = vmax.f32 %v2858_v10, 0.0  ;;  %9432 = vmatprep.subr.bf16.mxu0 %v10513_v20  ;;  %9444 = vmatprep.subr.bf16.mxu1 %v10513_v20  ;;  %v3275_v53 = vmax.f32 %v2901_v0, 0.0  ;;  %v3496_v46 = vrot.slane %v13262_v63, 4  ;;  %v15453_v51 = vld [vmem:[#allocation14_spill] sm:$0xff] }
 0x359   : > { %v2905_v49 = vpop.f32.mrf.mxu1  ;;  %9440 = vmatprep.mubr.msk.bf16.mxu0 %vm10514_vm2, %v10513_v20  ;;  %v2860_v36 = vpop.f32.mrf.mxu0 }
 0x35a   : > { %v13252_v13 = vpack.c.bf16 %v3273_v61, %v3273_v61  ;;  %v2906_v18 = vadd.f32 %v2905_v49, %v12240_v26  ;;  %9427 = vmatmul.mubr.msk.bf16.vlgmr.msra.gmra.mxu1 %vm3988_vm3, %v13046_v55  ;;  %v13281_v27 = vpack.c.bf16 %v3275_v53, %v3274_v16  ;;  %v4433_v61 = vsel %vm3423_vm1, %v13203_v24, 0 }
 0x35b   : > { %9433 = vmatpush3.bf16.msra.mxu0 %v13141_v40  ;;  %9445 = vmatpush3.bf16.msra.mxu1 %v4389_v58  ;;  %v2907_v1 = vpop.f32.mrf.mxu1  ;;  %v2861_v48 = vpop.f32.mrf.mxu0  ;;  %v4477_v24 = vsel %vm3423_vm1, %v13211_v57, 0  ;;  %v15455_v57 = vld [vmem:[#allocation11_spill] sm:$0xff] }
 0x35c   : > { %v3276_v7 = vmax.f32 %v2906_v18, 0.0  ;;  %3778 = vrot.lane.b32.xlu0 %v13252_v13, %s10510_s17  ;;  %9434 = vmatprep.subr.bf16.mxu0 %v10513_v20  ;;  %v13269_v40 = vpop.permute.xlu1 %3564  ;;  %v3497_v50 = vrot.slane %v13252_v13, 4  ;;  %v3499_v14 = vrot.slane %v13281_v27, 4 }
 0x35d   : > { %9446 = vmatprep.subr.bf16.mxu1 %v10513_v20  ;;  %9454 = vmatprep.mubr.msk.bf16.mxu1 %vm10514_vm2, %v10513_v20  ;;  %v2908_v25 = vpop.f32.mrf.mxu1 }
 0x35e   : > { %v13267_v39 = vpack.c.bf16 %v3276_v7, %v3276_v7  ;;  %v3498_v56 = vsel %vm3423_vm1, %v3496_v46, %v3497_v50  ;;  %v4521_v25 = vsel %vm3423_vm1, %v13278_v47, 0 }
 0x35f   : > { %9435 = vmatpush3.bf16.msra.mxu0 %v13165_v38  ;;  %9447 = vmatpush3.bf16.msra.mxu1 %v13160_v28  ;;  %v2909_v52 = vpop.f32.mrf.mxu1  ;;  %v15451_v38 = vld [vmem:[#allocation4_spill] sm:$0xff] }
 0x360   : > { %3776 = vrot.lane.b32.xlu0 %v13262_v63, %s10510_s17  ;;  %3782 = vrot.lane.b32.xlu1 %v13267_v39, %s10510_s17  ;;  %v3875_v28 = vsel %vm3423_vm1, %v15451_v38, %v13186_v59  ;;  %v3500_v2 = vrot.slane %v13267_v39, 4  ;;  %v13294_v10 = vpop.permute.xlu1 %3734  ;;  %v15452_v59 = vld [vmem:[#allocation6_spill] sm:$0xff]  ;;  %v15458_v38 = vld [vmem:[#allocation16_spill] sm:$0xff] }
 0x361   : > { %9436 = vmatprep.subr.bf16.mxu0 %v10513_v20  ;;  %9448 = vmatprep.subr.bf16.mxu1 %v10513_v20  ;;  %v3879_v42 = vsel %vm3423_vm1, %v15452_v59, %v13198_v31 }
 0x362   : > { %v3501_v9 = vsel %vm3423_vm1, %v3499_v14, %v3500_v2 }
 0x363   : > { %9437 = vmatpush3.bf16.msra.mxu0 %v3875_v28  ;;  %9449 = vmatpush3.bf16.msra.mxu1 %v13178_v23  ;;  %v13302_v23 = vpop.permute.xlu0 %3728 }
 0x364   : > { %3618 = vrot.lane.b32.xlu0 %v3498_v56, %s10511_s18  ;;  %3780 = vrot.lane.b32.xlu1 %v13281_v27, %s10510_s17  ;;  %v13314_v31 = vpop.permute.xlu1 %3732 }
 0x365   : > { %9438 = vmatprep.subr.bf16.mxu0 %v10513_v20  ;;  %9450 = vmatprep.subr.bf16.mxu1 %v10513_v20 }
 0x367   : > { %9439 = vmatpush3.bf16.msra.mxu0 %v15453_v51  ;;  %9451 = vmatpush3.bf16.msra.mxu1 %v3879_v42  ;;  %v13319_v0 = vpop.permute.xlu0 %3570 }
 0x368   : > { %3616 = vrot.lane.b32.xlu0 %v3496_v46, %s10511_s18  ;;  %3622 = vrot.lane.b32.xlu1 %v3501_v9, %s10511_s18  ;;  %v13331_v49 = vpop.permute.xlu1 %3574 }
 0x369   : > { %9452 = vmatprep.subr.bf16.mxu1 %v10513_v20  ;;  %9458 = vmatprep.subr.bf16.mxu0 %v10513_v20 }
 0x36a   : > { %9441 = vmatmul.mubr.msk.bf16.vlgmr.msra.gmra.mxu0 %vm3988_vm3, %v13046_v55 }
 0x36b   : > { %9453 = vmatpush3.bf16.msra.mxu1 %v15454_v45  ;;  %9459 = vmatpush3.bf16.msra.mxu0 %v4433_v61  ;;  %v13335_v36 = vpop.permute.xlu0 %3568 }
 0x36c   : > { %3620 = vrot.lane.b32.xlu1 %v3499_v14, %s10511_s18  ;;  %9460 = vmatprep.subr.bf16.mxu0 %v10513_v20  ;;  %v13344_v18 = vpop.permute.xlu1 %3572  ;;  %v4565_v14 = vsel %vm3423_vm1, %v13294_v10, 0 }
 0x36d   : > { %9472 = vmatprep.subr.bf16.mxu1 %v10513_v20  ;;  %9468 = vmatprep.mubr.msk.bf16.mxu0 %vm10514_vm2, %v10513_v20 }
 0x36e   : > { %9455 = vmatmul.mubr.msk.bf16.vlgmr.msra.gmra.mxu1 %vm3988_vm3, %v13046_v55 }
 0x36f   : > { %9461 = vmatpush3.bf16.msra.mxu0 %v13218_v19  ;;  %9473 = vmatpush3.bf16.msra.mxu1 %v4477_v24  ;;  %v3883_v19 = vsel %vm3423_vm1, %v15455_v57, %v13250_v15  ;;  %v15457_v15 = vld [vmem:[#allocation12_spill] sm:$0xff] }
 0x370   : > { %9462 = vmatprep.subr.bf16.mxu0 %v10513_v20  ;;  %9474 = vmatprep.subr.bf16.mxu1 %v10513_v20 }
 0x371   : > { %9482 = vmatprep.mubr.msk.bf16.mxu1 %vm10514_vm2, %v10513_v20 }
 0x373   : > { %9463 = vmatpush3.bf16.msra.mxu0 %v13229_v32  ;;  %9475 = vmatpush3.bf16.msra.mxu1 %v13226_v3  ;;  %v13349_v3 = vpop.permute.xlu0 %3738  ;;  %v15456_v32 = vld [vmem:[#allocation13_spill] sm:$0xff] }
 0x374   : > { %9464 = vmatprep.subr.bf16.mxu0 %v10513_v20  ;;  %9476 = vmatprep.subr.bf16.mxu1 %v10513_v20  ;;  %v3887_v44 = vsel %vm3423_vm1, %v15456_v32, %v13269_v40 }
 0x376   : > { %v2945_v58 = vpop.f32.mrf.mxu0 }
 0x377   : > { %9465 = vmatpush3.bf16.msra.mxu0 %v3883_v19  ;;  %9477 = vmatpush3.bf16.msra.mxu1 %v13241_v4  ;;  %v13357_v4 = vpop.permute.xlu1 %3742  ;;  %v13364_v52 = vpop.permute.xlu0 %3736  ;;  %v2946_v28 = vadd.f32 %v2945_v58, %v12256_v5 }
 0x378   : > { %v2947_v30 = vpop.f32.mrf.mxu0  ;;  %9466 = vmatprep.subr.bf16.mxu0 %v10513_v20  ;;  %9478 = vmatprep.subr.bf16.mxu1 %v10513_v20 }
 0x379   : > { %v3277_v57 = vmax.f32 %v2946_v28, 0.0 }
 0x37a   : > { %v2948_v1 = vpop.f32.mrf.mxu0  ;;  %v2993_v48 = vpop.f32.mrf.mxu1 }
 0x37b   : > { %9467 = vmatpush3.bf16.msra.mxu0 %v15457_v15  ;;  %9479 = vmatpush3.bf16.msra.mxu1 %v3887_v44  ;;  %v2949_v16 = vadd.f32 %v2948_v1, %v12276_v34  ;;  %v13378_v9 = vpop.permute.xlu1 %3740  ;;  %v2994_v10 = vadd.f32 %v2993_v48, %v12256_v5  ;;  %v3579_v58 = vpop.permute.xlu0 %3578 }
 0x37c   : > { %v2950_v7 = vpop.f32.mrf.mxu0  ;;  %v2995_v53 = vpop.f32.mrf.mxu1  ;;  %9480 = vmatprep.subr.bf16.mxu1 %v10513_v20  ;;  %9486 = vmatprep.subr.bf16.mxu0 %v10513_v20 }
 0x37d   : > { %v3278_v59 = vmax.f32 %v2949_v16, 0.0  ;;  %v3280_v48 = vmax.f32 %v2994_v10, 0.0  ;;  %v15459_v16 = vld [vmem:[#allocation22_spill] sm:$0xff] }
 0x37e   : > { %v2953_v50 = vpop.f32.mrf.mxu0  ;;  %v2996_v40 = vpop.f32.mrf.mxu1  ;;  %9469 = vmatmul.mubr.msk.bf16.vlgmr.msra.gmra.mxu0 %vm3988_vm3, %v13046_v55 }
 0x37f   : > { %v2954_v46 = vadd.f32 %v2953_v50, %v12240_v26  ;;  %9487 = vmatpush3.bf16.msra.mxu0 %v4521_v25  ;;  %9481 = vmatpush3.bf16.msra.mxu1 %v15458_v38  ;;  %v2997_v42 = vadd.f32 %v2996_v40, %v12276_v34  ;;  %v3583_v25 = vpop.permute.xlu1 %3582  ;;  %v3577_v40 = vpop.permute.xlu0 %3576 }
 0x380   : > { %v2998_v2 = vpop.f32.mrf.mxu1  ;;  %9488 = vmatprep.subr.bf16.mxu0 %v10513_v20  ;;  %9500 = vmatprep.subr.bf16.mxu1 %v10513_v20  ;;  %v2955_v47 = vpop.f32.mrf.mxu0 }
 0x381   : > { %v3279_v56 = vmax.f32 %v2954_v46, 0.0  ;;  %9496 = vmatprep.mubr.msk.bf16.mxu0 %vm10514_vm2, %v10513_v20  ;;  %v3281_v44 = vmax.f32 %v2997_v42, 0.0  ;;  %v15461_v47 = vld [vmem:[#allocation3_spill] sm:$0xff] }
 0x382   : > { %v3001_v51 = vpop.f32.mrf.mxu1  ;;  %9483 = vmatmul.mubr.msk.bf16.vlgmr.msra.gmra.mxu1 %vm3988_vm3, %v13046_v55  ;;  %v2956_v24 = vpop.f32.mrf.mxu0 }
 0x383   : > { %v13380_v61 = vpack.c.bf16 %v3279_v56, %v3279_v56  ;;  %v3002_v45 = vadd.f32 %v3001_v51, %v12240_v26  ;;  %9489 = vmatpush3.bf16.msra.mxu0 %v13302_v23  ;;  %9501 = vmatpush3.bf16.msra.mxu1 %v4565_v14  ;;  %v13391_v23 = vpack.c.bf16 %v3278_v59, %v3277_v57  ;;  %v3747_v14 = vpop.permute.xlu0 %3746  ;;  %v15462_v59 = vld [vmem:[#allocation36_spill] sm:$0xff]  ;;  %v4653_v51 = vsel %vm3423_vm1, %v13357_v4, 0  ;;  %v15463_v24 = vld [vmem:[#allocation19_spill] sm:$0xff] }
 0x384   : > { %9490 = vmatprep.subr.bf16.mxu0 %v10513_v20  ;;  %9502 = vmatprep.subr.bf16.mxu1 %v10513_v20  ;;  %v3003_v19 = vpop.f32.mrf.mxu1  ;;  %v2957_v32 = vpop.f32.mrf.mxu0  ;;  %v13408_v50 = vpack.c.bf16 %v3281_v44, %v3280_v48 }
 0x385   : > { %v3282_v30 = vmax.f32 %v3002_v45, 0.0  ;;  %3786 = vrot.lane.b32.xlu0 %v13380_v61, %s10510_s17  ;;  %9510 = vmatprep.mubr.msk.bf16.mxu1 %vm10514_vm2, %v10513_v20  ;;  %v3503_v7 = vrot.slane %v13380_v61, 4 }
 0x386   : > { %v3004_v1 = vpop.f32.mrf.mxu1  ;;  %v3505_v2 = vrot.slane %v13408_v50, 4 }
 0x387   : > { %v13393_v15 = vpack.c.bf16 %v3282_v30, %v3282_v30  ;;  %9491 = vmatpush3.bf16.msra.mxu0 %v13319_v0  ;;  %9503 = vmatpush3.bf16.msra.mxu1 %v13314_v31  ;;  %v3891_v0 = vsel %vm3423_vm1, %v15459_v16, %v13335_v36  ;;  %v3502_v31 = vrot.slane %v13391_v23, 4  ;;  %v15460_v36 = vld [vmem:[#allocation10_spill] sm:$0xff] }
 0x388   : > { %9492 = vmatprep.subr.bf16.mxu0 %v10513_v20  ;;  %9504 = vmatprep.subr.bf16.mxu1 %v10513_v20  ;;  %v3005_v53 = vpop.f32.mrf.mxu1  ;;  %v3895_v28 = vsel %vm3423_vm1, %v15460_v36, %v13344_v18  ;;  %v4609_v18 = vsel %vm3423_vm1, %v13349_v3, 0  ;;  %v3745_v3 = vpop.permute.xlu0 %3744  ;;  %v15465_v1 = vld [vmem:[#allocation2_spill] sm:$0xff] }
 0x389   : > { %3784 = vrot.lane.b32.xlu0 %v13391_v23, %s10510_s17  ;;  %3790 = vrot.lane.b32.xlu1 %v13393_v15, %s10510_s17  ;;  %v3506_v46 = vrot.slane %v13393_v15, 4  ;;  %v3504_v38 = vsel %vm3423_vm1, %v3502_v31, %v3503_v7  ;;  %v4697_v53 = vsel %vm3423_vm1, %v3747_v14, 0 }
 0x38b   : > { %9493 = vmatpush3.bf16.msra.mxu0 %v3891_v0  ;;  %9505 = vmatpush3.bf16.msra.mxu1 %v13331_v49  ;;  %v3581_v49 = vpop.permute.xlu1 %3580  ;;  %v3507_v56 = vsel %vm3423_vm1, %v3505_v2, %v3506_v46  ;;  %v15466_v46 = vld [vmem:[#allocation18_spill] sm:$0xff] }
 0x38c   : > { %9494 = vmatprep.subr.bf16.mxu0 %v10513_v20  ;;  %9506 = vmatprep.subr.bf16.mxu1 %v10513_v20  ;;  %v3587_v4 = vpop.permute.xlu0 %3586 }
 0x38d   : > { %3626 = vrot.lane.b32.xlu0 %v3504_v38, %s10511_s18  ;;  %3788 = vrot.lane.b32.xlu1 %v13408_v50, %s10510_s17 }
 0x38f   : > { %9495 = vmatpush3.bf16.msra.mxu0 %v15461_v47  ;;  %9507 = vmatpush3.bf16.msra.mxu1 %v3895_v28  ;;  %v3751_v42 = vpop.permute.xlu1 %3750 }
 0x390   : > { %9508 = vmatprep.subr.bf16.mxu1 %v10513_v20  ;;  %9514 = vmatprep.subr.bf16.mxu0 %v10513_v20  ;;  %v3585_v44 = vpop.permute.xlu0 %3584  ;;  %v4741_v47 = vsel %vm3423_vm1, %v3751_v42, 0 }
 0x391   : > { %3624 = vrot.lane.b32.xlu0 %v3502_v31, %s10511_s18  ;;  %3630 = vrot.lane.b32.xlu1 %v3507_v56, %s10511_s18 }
 0x392   : > { %9497 = vmatmul.mubr.msk.bf16.vlgmr.msra.gmra.mxu0 %vm3988_vm3, %v13046_v55 }
 0x393   : > { %9509 = vmatpush3.bf16.msra.mxu1 %v15462_v59  ;;  %9515 = vmatpush3.bf16.msra.mxu0 %v4609_v18  ;;  %v13447_v45 = vpop.permute.xlu1 %3748 }
 0x394   : > { %9516 = vmatprep.subr.bf16.mxu0 %v10513_v20  ;;  %9528 = vmatprep.subr.bf16.mxu1 %v10513_v20 }
 0x395   : > { %3628 = vrot.lane.b32.xlu1 %v3505_v2, %s10511_s18  ;;  %9524 = vmatprep.mubr.msk.bf16.mxu0 %vm10514_vm2, %v10513_v20  ;;  %v3755_v2 = vpop.permute.xlu0 %3754 }
 0x396   : > { %9511 = vmatmul.mubr.msk.bf16.vlgmr.msra.gmra.mxu1 %vm3988_vm3, %v13046_v55 }
 0x397   : > { %9517 = vmatpush3.bf16.msra.mxu0 %v13364_v52  ;;  %9529 = vmatpush3.bf16.msra.mxu1 %v4653_v51  ;;  %v3899_v52 = vsel %vm3423_vm1, %v15463_v24, %v3577_v40  ;;  %v13456_v19 = vpop.permute.xlu1 %3590 }
 0x398   : > { %9518 = vmatprep.subr.bf16.mxu0 %v10513_v20  ;;  %9530 = vmatprep.subr.bf16.mxu1 %v10513_v20 }
 0x399   : > { %9538 = vmatprep.mubr.msk.bf16.mxu1 %vm10514_vm2, %v10513_v20 }
 0x39b   : > { %9519 = vmatpush3.bf16.msra.mxu0 %v3579_v58  ;;  %9531 = vmatpush3.bf16.msra.mxu1 %v13378_v9  ;;  %v15464_v58 = vld [vmem:[#allocation21_spill] sm:$0xff]  ;;  %v3589_v31 = vpop.permute.xlu1 %3588 }
 0x39c   : > { %9520 = vmatprep.subr.bf16.mxu0 %v10513_v20  ;;  %9532 = vmatprep.subr.bf16.mxu1 %v10513_v20  ;;  %v3903_v9 = vsel %vm3423_vm1, %v15464_v58, %v3581_v49 }
 0x39e   : > { %v3041_v57 = vpop.f32.mrf.mxu0 }
 0x39f   : > { %9521 = vmatpush3.bf16.msra.mxu0 %v3899_v52  ;;  %9533 = vmatpush3.bf16.msra.mxu1 %v3583_v25  ;;  %v3042_v38 = vadd.f32 %v3041_v57, %v12256_v5 }
 0x3a0   : > { %v3043_v10 = vpop.f32.mrf.mxu0  ;;  %9522 = vmatprep.subr.bf16.mxu0 %v10513_v20  ;;  %9534 = vmatprep.subr.bf16.mxu1 %v10513_v20 }
 0x3a1   : > { %v3283_v52 = vmax.f32 %v3042_v38, 0.0  ;;  %v3759_v10 = vpop.permute.xlu1 %3758 }
 0x3a2   : > { %v3044_v30 = vpop.f32.mrf.mxu0  ;;  %v3089_v32 = vpop.f32.mrf.mxu1 }
 0x3a3   : > { %9523 = vmatpush3.bf16.msra.mxu0 %v15465_v1  ;;  %9535 = vmatpush3.bf16.msra.mxu1 %v3903_v9  ;;  %v3045_v25 = vadd.f32 %v3044_v30, %v12276_v34  ;;  %v3090_v57 = vadd.f32 %v3089_v32, %v12256_v5 }
 0x3a4   : > { %v3046_v48 = vpop.f32.mrf.mxu0  ;;  %v3091_v7 = vpop.f32.mrf.mxu1  ;;  %9536 = vmatprep.subr.bf16.mxu1 %v10513_v20  ;;  %9542 = vmatprep.subr.bf16.mxu0 %v10513_v20 }
 0x3a5   : > { %v3284_v56 = vmax.f32 %v3045_v25, 0.0  ;;  %v3753_v48 = vpop.permute.xlu0 %3752  ;;  %v3286_v7 = vmax.f32 %v3090_v57, 0.0 }
 0x3a6   : > { %v3049_v16 = vpop.f32.mrf.mxu0  ;;  %v3092_v0 = vpop.f32.mrf.mxu1  ;;  %9525 = vmatmul.mubr.msk.bf16.vlgmr.msra.gmra.mxu0 %vm3988_vm3, %v13046_v55 }
 0x3a7   : > { %v3050_v40 = vadd.f32 %v3049_v16, %v12240_v26  ;;  %9543 = vmatpush3.bf16.msra.mxu0 %v4697_v53  ;;  %9537 = vmatpush3.bf16.msra.mxu1 %v15466_v46  ;;  %v3093_v14 = vadd.f32 %v3092_v0, %v12276_v34  ;;  %v3907_v16 = vsel %vm3423_vm1, %v12844_v54, %v3585_v44  ;;  %v3757_v0 = vpop.permute.xlu1 %3756 }
 0x3a8   : > { %v3094_v36 = vpop.f32.mrf.mxu1  ;;  %9544 = vmatprep.subr.bf16.mxu0 %v10513_v20  ;;  %9556 = vmatprep.subr.bf16.mxu1 %v10513_v20  ;;  %v3051_v28 = vpop.f32.mrf.mxu0  ;;  %v3911_v54 = vsel %vm3423_vm1, %v12838_v62, %v3589_v31 }
 0x3a9   : > { %v3285_v49 = vmax.f32 %v3050_v40, 0.0  ;;  %9552 = vmatprep.mubr.msk.bf16.mxu0 %vm10514_vm2, %v10513_v20  ;;  %v3287_v30 = vmax.f32 %v3093_v14, 0.0  ;;  %v3595_v38 = vpop.permute.xlu0 %3594  ;;  %v4785_v28 = vsel %vm3423_vm1, %v3755_v2, 0 }
 0x3aa   : > { %v3097_v18 = vpop.f32.mrf.mxu1  ;;  %9539 = vmatmul.mubr.msk.bf16.vlgmr.msra.gmra.mxu1 %vm3988_vm3, %v13046_v55  ;;  %v3052_v24 = vpop.f32.mrf.mxu0 }
 0x3ab   : > { %v13478_v59 = vpack.c.bf16 %v3285_v49, %v3285_v49  ;;  %v3098_v51 = vadd.f32 %v3097_v18, %v12240_v26  ;;  %9545 = vmatpush3.bf16.msra.mxu0 %v3745_v3  ;;  %9557 = vmatpush3.bf16.msra.mxu1 %v4741_v47  ;;  %v13488_v3 = vpack.c.bf16 %v3284_v56, %v3283_v52  ;;  %v3599_v36 = vpop.permute.xlu1 %3598 }
 0x3ac   : > { %9546 = vmatprep.subr.bf16.mxu0 %v10513_v20  ;;  %9558 = vmatprep.subr.bf16.mxu1 %v10513_v20  ;;  %v3099_v42 = vpop.f32.mrf.mxu1  ;;  %v3053_v9 = vpop.f32.mrf.mxu0 }
 0x3ad   : > { %v3288_v58 = vmax.f32 %v3098_v51, 0.0  ;;  %3794 = vrot.lane.b32.xlu0 %v13478_v59, %s10510_s17  ;;  %9566 = vmatprep.mubr.msk.bf16.mxu1 %vm10514_vm2, %v10513_v20  ;;  %v3509_v53 = vrot.slane %v13478_v59, 4  ;;  %v3593_v62 = vpop.permute.xlu0 %3592 }
 0x3ae   : > { %v3100_v1 = vpop.f32.mrf.mxu1 }
 0x3af   : > { %v13490_v32 = vpack.c.bf16 %v3288_v58, %v3288_v58  ;;  %9547 = vmatpush3.bf16.msra.mxu0 %v3587_v4  ;;  %9559 = vmatpush3.bf16.msra.mxu1 %v13447_v45  ;;  %v3508_v4 = vrot.slane %v13488_v3, 4  ;;  %v13503_v45 = vpack.c.bf16 %v3287_v30, %v3286_v7  ;;  %v3597_v31 = vpop.permute.xlu1 %3596 }
 0x3b0   : > { %9548 = vmatprep.subr.bf16.mxu0 %v10513_v20  ;;  %9560 = vmatprep.subr.bf16.mxu1 %v10513_v20  ;;  %v3101_v25 = vpop.f32.mrf.mxu1  ;;  %v3919_v18 = vsel %vm3423_vm1, %v12911_v60, %v3597_v31  ;;  %v13554_v60 = vld [vmem:[%s15329_s3] sm:$0xff]  }
 0x3b1   : > { %3792 = vrot.lane.b32.xlu0 %v13488_v3, %s10510_s17  ;;  %3798 = vrot.lane.b32.xlu1 %v13490_v32, %s10510_s17  ;;  %v3512_v40 = vrot.slane %v13490_v32, 4  ;;  %v3510_v46 = vsel %vm3423_vm1, %v3508_v4, %v3509_v53  ;;  %v3511_v44 = vrot.slane %v13503_v45, 4  ;;  %v3763_v2 = vpop.permute.xlu0 %3762 }
 0x3b2   : > { %v4873_v42 = vsel %vm3423_vm1, %v3763_v2, 0 }
 0x3b3   : > { %9549 = vmatpush3.bf16.msra.mxu0 %v3907_v16  ;;  %9561 = vmatpush3.bf16.msra.mxu1 %v13456_v19  ;;  %v3513_v19 = vsel %vm3423_vm1, %v3511_v44, %v3512_v40 }
 0x3b4   : > { %9550 = vmatprep.subr.bf16.mxu0 %v10513_v20  ;;  %9562 = vmatprep.subr.bf16.mxu1 %v10513_v20 }
 0x3b5   : > { %3634 = vrot.lane.b32.xlu0 %v3510_v46, %s10511_s18  ;;  %3796 = vrot.lane.b32.xlu1 %v13503_v45, %s10510_s17  ;;  %v3761_v49 = vpop.permute.xlu0 %3760 }
 0x3b7   : > { %9551 = vmatpush3.bf16.msra.mxu0 %v12859_v43  ;;  %9563 = vmatpush3.bf16.msra.mxu1 %v3911_v54  ;;  %v4829_v43 = vsel %vm3423_vm1, %v3759_v10, 0 }
 0x3b8   : > { %9564 = vmatprep.subr.bf16.mxu1 %v10513_v20  ;;  %9570 = vmatprep.subr.bf16.mxu0 %v10513_v20 }
 0x3b9   : > { %3632 = vrot.lane.b32.xlu0 %v3508_v4, %s10511_s18  ;;  %3638 = vrot.lane.b32.xlu1 %v3513_v19, %s10511_s18  ;;  %v3603_v52 = vpop.permute.xlu0 %3602 }
 0x3ba   : > { %9553 = vmatmul.mubr.msk.bf16.vlgmr.msra.gmra.mxu0 %vm3988_vm3, %v13046_v55 }
 0x3bb   : > { %9565 = vmatpush3.bf16.msra.mxu1 %v12852_v22  ;;  %9571 = vmatpush3.bf16.msra.mxu0 %v4785_v28  ;;  %v3767_v22 = vpop.permute.xlu1 %3766 }
 0x3bc   : > { %9572 = vmatprep.subr.bf16.mxu0 %v10513_v20  ;;  %9584 = vmatprep.subr.bf16.mxu1 %v10513_v20  ;;  %v4917_v16 = vsel %vm3423_vm1, %v3767_v22, 0 }
 0x3bd   : > { %3636 = vrot.lane.b32.xlu1 %v3511_v44, %s10511_s18  ;;  %9580 = vmatprep.mubr.msk.bf16.mxu0 %vm10514_vm2, %v10513_v20  ;;  %v3601_v53 = vpop.permute.xlu0 %3600 }
 0x3be   : > { %9567 = vmatmul.mubr.msk.bf16.vlgmr.msra.gmra.mxu1 %vm3988_vm3, %v13046_v55  ;;  %v3915_v55 = vsel %vm3423_vm1, %v12915_v6, %v3593_v62 }
 0x3bf   : > { %9573 = vmatpush3.bf16.msra.mxu0 %v3753_v48  ;;  %9585 = vmatpush3.bf16.msra.mxu1 %v4829_v43  ;;  %v3765_v14 = vpop.permute.xlu1 %3764 }
 0x3c0   : > { %9574 = vmatprep.subr.bf16.mxu0 %v10513_v20  ;;  %9586 = vmatprep.subr.bf16.mxu1 %v10513_v20 }
 0x3c1   : > { %9594 = vmatprep.mubr.msk.bf16.mxu1 %vm10514_vm2, %v10513_v20  ;;  %v3771_v28 = vpop.permute.xlu0 %3770 }
 0x3c3   : > { %9575 = vmatpush3.bf16.msra.mxu0 %v3595_v38  ;;  %9587 = vmatpush3.bf16.msra.mxu1 %v3757_v0 }
 0x3c4   : > { %9576 = vmatprep.subr.bf16.mxu0 %v10513_v20  ;;  %9588 = vmatprep.subr.bf16.mxu1 %v10513_v20 }
 0x3c6   : > { %v3137_v47 = vpop.f32.mrf.mxu0 }
 0x3c7   : > { %9577 = vmatpush3.bf16.msra.mxu0 %v3915_v55  ;;  %9589 = vmatpush3.bf16.msra.mxu1 %v3599_v36  ;;  %v3138_v1 = vadd.f32 %v3137_v47, %v12256_v5  ;;  %v3923_v47 = vsel %vm3423_vm1, %v12982_v41, %v3601_v53 }
 0x3c8   : > { %v3139_v56 = vpop.f32.mrf.mxu0  ;;  %9578 = vmatprep.subr.bf16.mxu0 %v10513_v20  ;;  %9590 = vmatprep.subr.bf16.mxu1 %v10513_v20 }
 0x3c9   : > { %v3289_v54 = vmax.f32 %v3138_v1, 0.0 }
 0x3ca   : > { %v3140_v51 = vpop.f32.mrf.mxu0  ;;  %v3185_v24 = vpop.f32.mrf.mxu1 }
 0x3cb   : > { %9579 = vmatpush3.bf16.msra.mxu0 %v12927_v29  ;;  %9591 = vmatpush3.bf16.msra.mxu1 %v3919_v18  ;;  %v3141_v10 = vadd.f32 %v3140_v51, %v12276_v34  ;;  %v3607_v29 = vpop.permute.xlu1 %3606  ;;  %v3186_v44 = vadd.f32 %v3185_v24, %v12256_v5  ;;  %v3769_v51 = vpop.permute.xlu0 %3768 }
 0x3cc   : > { %v3142_v57 = vpop.f32.mrf.mxu0  ;;  %v3187_v6 = vpop.f32.mrf.mxu1  ;;  %9592 = vmatprep.subr.bf16.mxu1 %v10513_v20  ;;  %9598 = vmatprep.subr.bf16.mxu0 %v10513_v20 }
 0x3cd   : > { %v3290_v4 = vmax.f32 %v3141_v10, 0.0  ;;  %v3292_v2 = vmax.f32 %v3186_v44, 0.0 }
 0x3ce   : > { %v3145_v58 = vpop.f32.mrf.mxu0  ;;  %v3188_v9 = vpop.f32.mrf.mxu1  ;;  %9581 = vmatmul.mubr.msk.bf16.vlgmr.msra.gmra.mxu0 %vm3988_vm3, %v13554_v60 }
 0x3cf   : > { %v3146_v30 = vadd.f32 %v3145_v58, %v12240_v26  ;;  %9599 = vmatpush3.bf16.msra.mxu0 %v4873_v42  ;;  %9593 = vmatpush3.bf16.msra.mxu1 %v12923_v21  ;;  %v3189_v0 = vadd.f32 %v3188_v9, %v12276_v34  ;;  %v3605_v34 = vpop.permute.xlu1 %3604  ;;  %v3611_v1 = vpop.permute.xlu0 %3610 }
 0x3d0   : > { %v3147_v48 = vpop.f32.mrf.mxu0  ;;  %v3190_v7 = vpop.f32.mrf.mxu1  ;;  %9600 = vmatprep.subr.bf16.mxu0 %v10513_v20  ;;  %9612 = vmatprep.subr.bf16.mxu1 %v10513_v20  ;;  %v3927_v41 = vsel %vm3423_vm1, %v13004_v11, %v3605_v34  ;;  %v4961_v11 = vsel %vm3423_vm1, %v3771_v28, 0 }
 0x3d1   : > { %v3291_v25 = vmax.f32 %v3146_v30, 0.0  ;;  %9608 = vmatprep.mubr.msk.bf16.mxu0 %vm10514_vm2, %v10513_v20  ;;  %v3293_v43 = vmax.f32 %v3189_v0, 0.0 }
 0x3d2   : > { %v3148_v40 = vpop.f32.mrf.mxu0  ;;  %v3193_v21 = vpop.f32.mrf.mxu1  ;;  %9595 = vmatmul.mubr.msk.bf16.vlgmr.msra.gmra.mxu1 %vm3988_vm3, %v13554_v60 }
 0x3d3   : > { %v13569_v46 = vpack.c.bf16 %v3291_v25, %v3291_v25  ;;  %v3194_v38 = vadd.f32 %v3193_v21, %v12240_v26  ;;  %9601 = vmatpush3.bf16.msra.mxu0 %v3761_v49  ;;  %9613 = vmatpush3.bf16.msra.mxu1 %v4917_v16  ;;  %v13579_v26 = vpack.c.bf16 %v3290_v4, %v3289_v54  ;;  %v3775_v55 = vpop.permute.xlu1 %3774  ;;  %v3972_v16 = vld [vmem:[%s15330_s4 + $0x8] sm:$0xff] }
 0x3d4   : > { %v3149_v19 = vpop.f32.mrf.mxu0  ;;  %v3195_v36 = vpop.f32.mrf.mxu1  ;;  %9602 = vmatprep.subr.bf16.mxu0 %v10513_v20  ;;  %9614 = vmatprep.subr.bf16.mxu1 %v10513_v20  ;;  %v5005_v25 = vsel %vm3423_vm1, %v3775_v55, 0 }
 0x3d5   : > { %v3294_v62 = vmax.f32 %v3194_v38, 0.0  ;;  %3802 = vrot.lane.b32.xlu0 %v13569_v46, %s10510_s17  ;;  %9622 = vmatprep.mubr.msk.bf16.mxu1 %vm10514_vm2, %v10513_v20  ;;  %v3515_v22 = vrot.slane %v13569_v46, 4  ;;  %v3514_v56 = vrot.slane %v13579_v26, 4 }
 0x3d6   : > { %v3196_v31 = vpop.f32.mrf.mxu1 }
 0x3d7   : > { %v13581_v5 = vpack.c.bf16 %v3294_v62, %v3294_v62  ;;  %9603 = vmatpush3.bf16.msra.mxu0 %v3603_v52  ;;  %9615 = vmatpush3.bf16.msra.mxu1 %v3765_v14  ;;  %v13593_v14 = vpack.c.bf16 %v3293_v43, %v3292_v2  ;;  %v3516_v52 = vsel %vm3423_vm1, %v3514_v56, %v3515_v22  ;;  %v3773_v58 = vpop.permute.xlu1 %3772 }
 0x3d8   : > { %v3197_v49 = vpop.f32.mrf.mxu1  ;;  %9604 = vmatprep.subr.bf16.mxu0 %v10513_v20  ;;  %9616 = vmatprep.subr.bf16.mxu1 %v10513_v20 }
 0x3d9   : > { %3800 = vrot.lane.b32.xlu0 %v13579_v26, %s10510_s17  ;;  %3806 = vrot.lane.b32.xlu1 %v13581_v5, %s10510_s17  ;;  %v3518_v24 = vrot.slane %v13581_v5, 4  ;;  %v3517_v6 = vrot.slane %v13593_v14, 4 }
 0x3da   : > { %v13595_v18 = vpop.f32.mrf.mxu0 }
 0x3db   : > { %9605 = vmatpush3.bf16.msra.mxu0 %v3923_v47  ;;  %9617 = vmatpush3.bf16.msra.mxu1 %v3607_v29  ;;  %v3519_v9 = vsel %vm3423_vm1, %v3517_v6, %v3518_v24  ;;  %v3615_v53 = vpop.permute.xlu1 %3614 }
 0x3dc   : > { %9606 = vmatprep.subr.bf16.mxu0 %v10513_v20  ;;  %9618 = vmatprep.subr.bf16.mxu1 %v10513_v20  ;;  %v9330_v57 = vpop.f32.mrf.mxu0 }
 0x3dd   : > { %3642 = vrot.lane.b32.xlu0 %v3516_v52, %s10511_s18  ;;  %3804 = vrot.lane.b32.xlu1 %v13593_v14, %s10510_s17 }
 0x3de   : > { %v13607_v42 = vpop.f32.mrf.mxu1  ;;  %v13609_v10 = vpop.f32.mrf.mxu0 }
 0x3df   : > { %9607 = vmatpush3.bf16.msra.mxu0 %v12999_v35  ;;  %9619 = vmatpush3.bf16.msra.mxu1 %v3927_v41  ;;  %v3971_v35 = vld [vmem:[%s15330_s4] sm:$0xff]  ;;  %v3613_v4 = vpop.permute.xlu1 %3612 }
 0x3e0   : > { %9620 = vmatprep.subr.bf16.mxu1 %v10513_v20  ;;  %9626 = vmatprep.subr.bf16.mxu0 %v10513_v20  ;;  %v9344_v29 = vpop.f32.mrf.mxu1  ;;  %v9331_v30 = vpop.f32.mrf.mxu0  ;;  %v3935_v19 = vsel %vm3423_vm1, %v13143_v12, %v3613_v4 }
 0x3e1   : > { %3640 = vrot.lane.b32.xlu0 %v3514_v56, %s10511_s18  ;;  %3646 = vrot.lane.b32.xlu1 %v3519_v9, %s10511_s18 }
 0x3e2   : > { %9609 = vmatmul.mubr.msk.bf16.vlgmr.msra.gmra.mxu0 %vm3988_vm3, %v13554_v60  ;;  %v13623_v48 = vpop.f32.mrf.mxu1 }
 0x3e3   : > { %9621 = vmatpush3.bf16.msra.mxu1 %v13017_v33  ;;  %9627 = vmatpush3.bf16.msra.mxu0 %v4961_v11  ;;  %v3609_v33 = vpop.permute.xlu0 %3608  ;;  %v3783_v38 = vpop.permute.xlu1 %3782 }
 0x3e4   : > { %9628 = vmatprep.subr.bf16.mxu0 %v10513_v20  ;;  %9640 = vmatprep.subr.bf16.mxu1 %v10513_v20  ;;  %v9345_v7 = vpop.f32.mrf.mxu1  ;;  %v3931_v40 = vsel %vm3423_vm1, %v13119_v8, %v3609_v33  ;;  %v5093_v2 = vsel %vm3423_vm1, %v3783_v38, 0 }
 0x3e5   : > { %3975 = vperm.xlu0 %10389, %v3971_v35   ;;  %3644 = vrot.lane.b32.xlu1 %v3517_v6, %s10511_s18 }
 0x3e6   : > { %9623 = vmatmul.mubr.msk.bf16.vlgmr.msra.gmra.mxu1 %vm3988_vm3, %v13554_v60  ;;  %9636 = vmatprep.mubr.msk.bf16.mxu0 %vm10514_vm2, %v10513_v20 }
 0x3e7   : > { %9629 = vmatpush3.bf16.msra.mxu0 %v3769_v51  ;;  %9641 = vmatpush3.bf16.msra.mxu1 %v5005_v25  ;;  %v3779_v0 = vpop.permute.xlu0 %3778  ;;  %v3781_v62 = vpop.permute.xlu1 %3780 }
 0x3e8   : > { %9630 = vmatprep.subr.bf16.mxu0 %v10513_v20  ;;  %9642 = vmatprep.subr.bf16.mxu1 %v10513_v20  ;;  %v5049_v43 = vsel %vm3423_vm1, %v3779_v0, 0 }
 0x3e9   : > { %3980 = vperm.xlu1 %10390, %v3972_v16   ;;  %9650 = vmatprep.mubr.msk.bf16.mxu1 %vm10514_vm2, %v10513_v20 }
 0x3eb   : > { %9631 = vmatpush3.bf16.msra.mxu0 %v3611_v1  ;;  %9643 = vmatpush3.bf16.msra.mxu1 %v3773_v58  ;;  %v3777_v44 = vpop.permute.xlu0 %3776  ;;  %v3623_v22 = vpop.permute.xlu1 %3622 }
 0x3ec   : > { %9632 = vmatprep.subr.bf16.mxu0 %v10513_v20  ;;  %9644 = vmatprep.subr.bf16.mxu1 %v10513_v20 }
 0x3ee   : > { %v13645_v21 = vpop.f32.mrf.mxu0 }
 0x3ef   : > { %9633 = vmatpush3.bf16.msra.mxu0 %v3931_v40  ;;  %9645 = vmatpush3.bf16.msra.mxu1 %v3615_v53  ;;  %v3619_v31 = vpop.permute.xlu0 %3618  ;;  %v3621_v49 = vpop.permute.xlu1 %3620 }
 0x3f0   : > { %9634 = vmatprep.subr.bf16.mxu0 %v10513_v20  ;;  %9646 = vmatprep.subr.bf16.mxu1 %v10513_v20  ;;  %v9358_v54 = vpop.f32.mrf.mxu0  ;;  %v3943_v52 = vsel %vm3423_vm1, %v13267_v39, %v3621_v49 }
 0x3f2   : > { %v13651_v36 = vpop.f32.mrf.mxu1  ;;  %v13653_v34 = vpop.f32.mrf.mxu0 }
 0x3f3   : > { %9635 = vmatpush3.bf16.msra.mxu0 %v13136_v17  ;;  %9647 = vmatpush3.bf16.msra.mxu1 %v3935_v19 }
 0x3f4   : > { %9648 = vmatprep.subr.bf16.mxu1 %v10513_v20  ;;  %9654 = vmatprep.subr.bf16.mxu0 %v10513_v20  ;;  %v9372_v8 = vpop.f32.mrf.mxu1  ;;  %v9359_v28 = vpop.f32.mrf.mxu0 }
 0x3f6   : > { %9637 = vmatmul.mubr.msk.bf16.vlgmr.msra.gmra.mxu0 %vm3988_vm3, %v13554_v60  ;;  %v13661_v12 = vpop.f32.mrf.mxu1 }
 0x3f7   : > { %9655 = vmatpush3.bf16.msra.mxu0 %v5049_v43  ;;  %9649 = vmatpush3.bf16.msra.mxu1 %v13153_v37  ;;  %v3617_v37 = vpop.permute.xlu0 %3616 }
 0x3f8   : > { %9656 = vmatprep.subr.bf16.mxu0 %v10513_v20  ;;  %9668 = vmatprep.subr.bf16.mxu1 %v10513_v20  ;;  %v9373_v17 = vpop.f32.mrf.mxu1  ;;  %v3939_v47 = vsel %vm3423_vm1, %v13252_v13, %v3617_v37 }
 0x3f9   : > { %9664 = vmatprep.mubr.msk.bf16.mxu0 %vm10514_vm2, %v10513_v20 }
 0x3fa   : > { %9651 = vmatmul.mubr.msk.bf16.vlgmr.msra.gmra.mxu1 %vm3988_vm3, %v13554_v60 }
 0x3fb   : > { %9657 = vmatpush3.bf16.msra.mxu0 %v3777_v44  ;;  %9669 = vmatpush3.bf16.msra.mxu1 %v5093_v2  ;;  %v3787_v55 = vpop.permute.xlu0 %3786  ;;  %v3791_v24 = vpop.permute.xlu1 %3790 }
 0x3fc   : > { %9658 = vmatprep.subr.bf16.mxu0 %v10513_v20  ;;  %9670 = vmatprep.subr.bf16.mxu1 %v10513_v20  ;;  %v5137_v9 = vsel %vm3423_vm1, %v3787_v55, 0  ;;  %v5181_v1 = vsel %vm3423_vm1, %v3791_v24, 0 }
 0x3fd   : > { %9678 = vmatprep.mubr.msk.bf16.mxu1 %vm10514_vm2, %v10513_v20 }
 0x3ff   : > { %9659 = vmatpush3.bf16.msra.mxu0 %v3619_v31  ;;  %9671 = vmatpush3.bf16.msra.mxu1 %v3781_v62  ;;  %v3785_v6 = vpop.permute.xlu0 %3784  ;;  %v3789_v29 = vpop.permute.xlu1 %3788 }
 0x400   : > { %9660 = vmatprep.subr.bf16.mxu0 %v10513_v20  ;;  %9672 = vmatprep.subr.bf16.mxu1 %v10513_v20 }
 0x402   : > { %v13679_v56 = vpop.f32.mrf.mxu0 }
 0x403   : > { %9661 = vmatpush3.bf16.msra.mxu0 %v3939_v47  ;;  %9673 = vmatpush3.bf16.msra.mxu1 %v3623_v22  ;;  %v3627_v30 = vpop.permute.xlu0 %3626 }
 0x404   : > { %9662 = vmatprep.subr.bf16.mxu0 %v10513_v20  ;;  %9674 = vmatprep.subr.bf16.mxu1 %v10513_v20  ;;  %v9386_v51 = vpop.f32.mrf.mxu0 }
 0x406   : > { %v13685_v57 = vpop.f32.mrf.mxu1  ;;  %v13687_v41 = vpop.f32.mrf.mxu0 }
 0x407   : > { %9663 = vmatpush3.bf16.msra.mxu0 %v13262_v63  ;;  %9675 = vmatpush3.bf16.msra.mxu1 %v3943_v52  ;;  %v3625_v11 = vpop.permute.xlu0 %3624 }
 0x408   : > { %9676 = vmatprep.subr.bf16.mxu1 %v10513_v20  ;;  %9682 = vmatprep.subr.bf16.mxu0 %v10513_v20  ;;  %v9400_v13 = vpop.f32.mrf.mxu1  ;;  %v9387_v58 = vpop.f32.mrf.mxu0  ;;  %v3947_v35 = vsel %vm3423_vm1, %v13380_v61, %v3625_v11 }
 0x40a   : > { %9665 = vmatmul.mubr.msk.bf16.vlgmr.msra.gmra.mxu0 %vm3988_vm3, %v13554_v60  ;;  %v13695_v39 = vpop.f32.mrf.mxu1 }
 0x40b   : > { %9677 = vmatpush3.bf16.msra.mxu1 %v13281_v27  ;;  %9683 = vmatpush3.bf16.msra.mxu0 %v5137_v9  ;;  %v3631_v27 = vpop.permute.xlu1 %3630 }
 0x40c   : > { %9684 = vmatprep.subr.bf16.mxu0 %v10513_v20  ;;  %9696 = vmatprep.subr.bf16.mxu1 %v10513_v20  ;;  %v9401_v63 = vpop.f32.mrf.mxu1 }
 0x40d   : > { %9692 = vmatprep.mubr.msk.bf16.mxu0 %vm10514_vm2, %v10513_v20 }
 0x40e   : > { %9679 = vmatmul.mubr.msk.bf16.vlgmr.msra.gmra.mxu1 %vm3988_vm3, %v13554_v60 }
 0x40f   : > { %9685 = vmatpush3.bf16.msra.mxu0 %v3785_v6  ;;  %9697 = vmatpush3.bf16.msra.mxu1 %v5181_v1  ;;  %v3629_v53 = vpop.permute.xlu1 %3628 }
 0x410   : > { %9686 = vmatprep.subr.bf16.mxu0 %v10513_v20  ;;  %9698 = vmatprep.subr.bf16.mxu1 %v10513_v20  ;;  %v3951_v16 = vsel %vm3423_vm1, %v13393_v15, %v3629_v53 }
 0x411   : > { %9706 = vmatprep.mubr.msk.bf16.mxu1 %vm10514_vm2, %v10513_v20 }
 0x413   : > { %9687 = vmatpush3.bf16.msra.mxu0 %v3627_v30  ;;  %9699 = vmatpush3.bf16.msra.mxu1 %v3789_v29 }
 0x414   : > { %9688 = vmatprep.subr.bf16.mxu0 %v10513_v20  ;;  %9700 = vmatprep.subr.bf16.mxu1 %v10513_v20 }
 0x416   : > { %v13713_v7 = vpop.f32.mrf.mxu0 }
 0x417   : > { %9689 = vmatpush3.bf16.msra.mxu0 %v3947_v35  ;;  %9701 = vmatpush3.bf16.msra.mxu1 %v3631_v27 }
 0x418   : > { %9690 = vmatprep.subr.bf16.mxu0 %v10513_v20  ;;  %9702 = vmatprep.subr.bf16.mxu1 %v10513_v20  ;;  %v9414_v25 = vpop.f32.mrf.mxu0 }
 0x41a   : > { %v13719_v33 = vpop.f32.mrf.mxu1  ;;  %v13721_v4 = vpop.f32.mrf.mxu0 }
 0x41b   : > { %9691 = vmatpush3.bf16.msra.mxu0 %v13391_v23  ;;  %9703 = vmatpush3.bf16.msra.mxu1 %v3951_v16 }
 0x41c   : > { %9704 = vmatprep.subr.bf16.mxu1 %v10513_v20  ;;  %9710 = vmatprep.subr.bf16.mxu0 %v10513_v20  ;;  %v9428_v61 = vpop.f32.mrf.mxu1  ;;  %v9415_v0 = vpop.f32.mrf.mxu0 }
 0x41e   : > { %9693 = vmatmul.mubr.msk.bf16.vlgmr.msra.gmra.mxu0 %vm3988_vm3, %v13554_v60  ;;  %v13728_v40 = vpop.f32.mrf.mxu1 }
 0x41f   : > { %v3795_v38 = vpop.permute.xlu0 %3794  ;;  %9705 = vmatpush3.bf16.msra.mxu1 %v13408_v50  ;;  %9720 = vmatprep.mubr.msk.bf16.mxu0 %vm10514_vm2, %v10513_v20 }
 0x420   : > { %v5225_v23 = vsel %vm3423_vm1, %v3795_v38, 0  ;;  %9724 = vmatprep.subr.bf16.mxu1 %v10513_v20  ;;  %v9429_v15 = vpop.f32.mrf.mxu1 }
 0x421   : > { %9711 = vmatpush3.bf16.msra.mxu0 %v5225_v23 }
 0x422   : > { %9707 = vmatmul.mubr.msk.bf16.vlgmr.msra.gmra.mxu1 %vm3988_vm3, %v13554_v60  ;;  %9712 = vmatprep.subr.bf16.mxu0 %v10513_v20 }
 0x423   : > { %v3793_v54 = vpop.permute.xlu0 %3792  ;;  %v3799_v44 = vpop.permute.xlu1 %3798  ;;  %9734 = vmatprep.mubr.msk.bf16.mxu1 %vm10514_vm2, %v10513_v20 }
 0x424   : > { %v5269_v50 = vsel %vm3423_vm1, %v3799_v44, 0 }
 0x425   : > { %9713 = vmatpush3.bf16.msra.mxu0 %v3793_v54  ;;  %9725 = vmatpush3.bf16.msra.mxu1 %v5269_v50 }
 0x426   : > { %9714 = vmatprep.subr.bf16.mxu0 %v10513_v20  ;;  %9726 = vmatprep.subr.bf16.mxu1 %v10513_v20 }
 0x427   : > { %v3635_v19 = vpop.permute.xlu0 %3634  ;;  %v3797_v8 = vpop.permute.xlu1 %3796 }
 0x429   : > { %9715 = vmatpush3.bf16.msra.mxu0 %v3635_v19  ;;  %9727 = vmatpush3.bf16.msra.mxu1 %v3797_v8 }
 0x42a   : > { %9716 = vmatprep.subr.bf16.mxu0 %v10513_v20  ;;  %9728 = vmatprep.subr.bf16.mxu1 %v10513_v20  ;;  %v13745_v28 = vpop.f32.mrf.mxu0 }
 0x42b   : > { %v3633_v62 = vpop.permute.xlu0 %3632  ;;  %v3639_v43 = vpop.permute.xlu1 %3638 }
 0x42c   : > { %v3955_v31 = vsel %vm3423_vm1, %v13478_v59, %v3633_v62  ;;  %v9442_v17 = vpop.f32.mrf.mxu0 }
 0x42d   : > { %9717 = vmatpush3.bf16.msra.mxu0 %v3955_v31  ;;  %9729 = vmatpush3.bf16.msra.mxu1 %v3639_v43 }
 0x42e   : > { %9718 = vmatprep.subr.bf16.mxu0 %v10513_v20  ;;  %9730 = vmatprep.subr.bf16.mxu1 %v10513_v20  ;;  %v13751_v2 = vpop.f32.mrf.mxu1  ;;  %v13753_v22 = vpop.f32.mrf.mxu0 }
 0x42f   : > { %v3637_v37 = vpop.permute.xlu1 %3636 }
 0x430   : > { %v3959_v49 = vsel %vm3423_vm1, %v13490_v32, %v3637_v37  ;;  %v9456_v55 = vpop.f32.mrf.mxu1  ;;  %v9443_v47 = vpop.f32.mrf.mxu0 }
 0x431   : > { %9719 = vmatpush3.bf16.msra.mxu0 %v13488_v3  ;;  %9731 = vmatpush3.bf16.msra.mxu1 %v3959_v49 }
 0x432   : > { %9732 = vmatprep.subr.bf16.mxu1 %v10513_v20  ;;  %v13759_v59 = vpop.f32.mrf.mxu1  ;;  %9738 = vmatprep.subr.bf16.mxu0 %v10513_v20 }
 0x434   : > { %9721 = vmatmul.mubr.msk.bf16.vlgmr.msra.gmra.mxu0 %vm3988_vm3, %v13554_v60  ;;  %v9457_v51 = vpop.f32.mrf.mxu1 }
 0x435   : > { %9733 = vmatpush3.bf16.msra.mxu1 %v13503_v45  ;;  %9748 = vmatprep.mubr.msk.bf16.mxu0 %vm10514_vm2, %v10513_v20 }
 0x436   : > { %9752 = vmatprep.subr.bf16.mxu1 %v10513_v20 }
 0x438   : > { %9735 = vmatmul.mubr.msk.bf16.vlgmr.msra.gmra.mxu1 %vm3988_vm3, %v13554_v60 }
 0x439   : > { %9762 = vmatprep.mubr.msk.bf16.mxu1 %vm10514_vm2, %v10513_v20 }
 0x43e   : > { %v13772_v3 = vpop.f32.mrf.mxu0 }
 0x440   : > { %v9470_v32 = vpop.f32.mrf.mxu0 }
 0x442   : > { %v13774_v24 = vpop.f32.mrf.mxu1  ;;  %v13776_v52 = vpop.f32.mrf.mxu0 }
 0x444   : > { %v9484_v6 = vpop.f32.mrf.mxu1  ;;  %v9471_v45 = vpop.f32.mrf.mxu0 }
 0x446   : > { %v13778_v13 = vpop.f32.mrf.mxu1 }
 0x447   : > { %v3803_v58 = vpop.permute.xlu0 %3802 }
 0x448   : > { %v5313_v9 = vsel %vm3423_vm1, %v3803_v58, 0  ;;  %v9485_v29 = vpop.f32.mrf.mxu1 }
 0x449   : > { %9739 = vmatpush3.bf16.msra.mxu0 %v5313_v9 }
 0x44a   : > { %9740 = vmatprep.subr.bf16.mxu0 %v10513_v20 }
 0x44b   : > { %v3801_v63 = vpop.permute.xlu0 %3800  ;;  %v3807_v30 = vpop.permute.xlu1 %3806 }
 0x44c   : > { %v5357_v1 = vsel %vm3423_vm1, %v3807_v30, 0 }
 0x44d   : > { %9741 = vmatpush3.bf16.msra.mxu0 %v3801_v63  ;;  %9753 = vmatpush3.bf16.msra.mxu1 %v5357_v1 }
 0x44e   : > { %9742 = vmatprep.subr.bf16.mxu0 %v10513_v20  ;;  %9754 = vmatprep.subr.bf16.mxu1 %v10513_v20 }
 0x44f   : > { %v3643_v27 = vpop.permute.xlu0 %3642  ;;  %v3805_v11 = vpop.permute.xlu1 %3804 }
 0x451   : > { %9743 = vmatpush3.bf16.msra.mxu0 %v3643_v27  ;;  %9755 = vmatpush3.bf16.msra.mxu1 %v3805_v11 }
 0x452   : > { %9744 = vmatprep.subr.bf16.mxu0 %v10513_v20  ;;  %9756 = vmatprep.subr.bf16.mxu1 %v10513_v20  ;;  %v13787_v35 = vpop.f32.mrf.mxu0 }
 0x453   : > { %v3641_v53 = vpop.permute.xlu0 %3640  ;;  %v3647_v25 = vpop.permute.xlu1 %3646 }
 0x454   : > { %v3963_v16 = vsel %vm3423_vm1, %v13569_v46, %v3641_v53  ;;  %v9498_v61 = vpop.f32.mrf.mxu0 }
 0x455   : > { %9745 = vmatpush3.bf16.msra.mxu0 %v3963_v16  ;;  %9757 = vmatpush3.bf16.msra.mxu1 %v3647_v25 }
 0x456   : > { %9746 = vmatprep.subr.bf16.mxu0 %v10513_v20  ;;  %9758 = vmatprep.subr.bf16.mxu1 %v10513_v20  ;;  %v13793_v0 = vpop.f32.mrf.mxu1  ;;  %v13795_v38 = vpop.f32.mrf.mxu0 }
 0x457   : > { %v3645_v23 = vpop.permute.xlu1 %3644 }
 0x458   : > { %v3967_v15 = vsel %vm3423_vm1, %v13581_v5, %v3645_v23  ;;  %v9512_v54 = vpop.f32.mrf.mxu1  ;;  %v9499_v44 = vpop.f32.mrf.mxu0 }
 0x459   : > { %9747 = vmatpush3.bf16.msra.mxu0 %v13579_v26  ;;  %9759 = vmatpush3.bf16.msra.mxu1 %v3967_v15 }
 0x45a   : > { %9760 = vmatprep.subr.bf16.mxu1 %v10513_v20  ;;  %v13801_v46 = vpop.f32.mrf.mxu1  ;;  %9766 = vmatprep.subr.bf16.mxu0 %v10513_v20 }
 0x45c   : > { %9749 = vmatmul.mubr.msk.bf16.vlgmr.msra.gmra.mxu0 %vm3988_vm3, %v13554_v60  ;;  %v9513_v50 = vpop.f32.mrf.mxu1 }
 0x45d   : > { %9761 = vmatpush3.bf16.msra.mxu1 %v13593_v14  ;;  %9772 = vmatprep.mubr.msk.bf16.mxu0 %vm10514_vm2, %v10513_v20 }
 0x45e   : > { %9776 = vmatprep.subr.bf16.mxu1 %v10513_v20 }
 0x460   : > { %v13810_v5 = vpop.permute.xlu0 %3975  ;;  %9763 = vmatmul.mubr.msk.bf16.vlgmr.msra.gmra.mxu1 %vm3988_vm3, %v13554_v60 }
 0x461   : > { %9782 = vmatprep.mubr.msk.bf16.mxu1 %vm10514_vm2, %v10513_v20  ;;  %v4074_v26 = vadd.f32 %v13607_v42, %v13810_v5  ;;  %v4030_v19 = vadd.f32 %v13595_v18, %v13810_v5  ;;  %v4162_v51 = vadd.f32 %v13651_v36, %v13810_v5  ;;  %v4118_v32 = vadd.f32 %v13645_v21, %v13810_v5 }
 0x462   : > { %v4382_v58 = vadd.f32 %v13745_v28, %v13810_v5  ;;  %v4514_v36 = vadd.f32 %v13774_v24, %v13810_v5  ;;  %v4470_v16 = vadd.f32 %v13772_v3, %v13810_v5  ;;  %v4250_v3 = vadd.f32 %v13685_v57, %v13810_v5 }
 0x463   : > { %v5402_v60 = vmax.f32 %v4074_v26, 0.0  ;;  %v5400_v17 = vmax.f32 %v4030_v19, 0.0  ;;  %v5406_v28 = vmax.f32 %v4162_v51, 0.0 }
 0x464   : > { %v13820_v14 = vpop.permute.xlu1 %3980  ;;  %v5416_v27 = vmax.f32 %v4382_v58, 0.0  ;;  %v5422_v54 = vmax.f32 %v4514_v36, 0.0  ;;  %v5420_v50 = vmax.f32 %v4470_v16, 0.0 }
 0x465   : > { %v4077_v8 = vadd.f32 %v13623_v48, %v13820_v14  ;;  %v4033_v62 = vadd.f32 %v13609_v10, %v13820_v14  ;;  %v4165_v18 = vadd.f32 %v13661_v12, %v13820_v14  ;;  %v4121_v48 = vadd.f32 %v13653_v34, %v13820_v14 }
 0x466   : > { %v13826_v43 = vpop.f32.mrf.mxu0  ;;  %v4426_v34 = vadd.f32 %v13751_v2, %v13810_v5  ;;  %v4429_v45 = vadd.f32 %v13759_v59, %v13820_v14  ;;  %v4385_v9 = vadd.f32 %v13753_v22, %v13820_v14  ;;  %v5404_v59 = vmax.f32 %v4118_v32, 0.0 }
 0x467   : > { %v5403_v31 = vmax.f32 %v4077_v8, 0.0  ;;  %v5401_v37 = vmax.f32 %v4033_v62, 0.0  ;;  %v5407_v29 = vmax.f32 %v4165_v18, 0.0  ;;  %v5405_v63 = vmax.f32 %v4121_v48, 0.0 }
 0x468   : > { %v9526_v49 = vpop.f32.mrf.mxu0  ;;  %v5418_v30 = vmax.f32 %v4426_v34, 0.0  ;;  %v5419_v1 = vmax.f32 %v4429_v45, 0.0  ;;  %v5417_v2 = vmax.f32 %v4385_v9, 0.0  ;;  %v4253_v22 = vadd.f32 %v13695_v39, %v13820_v14 }
 0x469   : > { %v13828_v55 = vpack.c.bf16 %v5403_v31, %v5402_v60  ;;  %v13830_v42 = vpack.c.bf16 %v5401_v37, %v5400_v17  ;;  %v4517_v25 = vadd.f32 %v13778_v13, %v13820_v14  ;;  %v13874_v61 = vpack.c.bf16 %v5407_v29, %v5406_v28 }
 0x46a   : > { %v13836_v47 = vpop.f32.mrf.mxu0  ;;  %v13838_v10 = vpop.f32.mrf.mxu1  ;;  %v13866_v53 = vpack.c.bf16 %v5419_v1, %v5418_v30  ;;  %v13868_v24 = vpack.c.bf16 %v5417_v2, %v5416_v27  ;;  %v13876_v23 = vpack.c.bf16 %v5405_v63, %v5404_v59  ;;  %v4209_v15 = vadd.f32 %v13687_v41, %v13820_v14 }
 0x46b   : > { %5626 = vrot.lane.b32.xlu1 %v13828_v55, %s10510_s17  ;;  %5624 = vrot.lane.b32.xlu0 %v13830_v42, %s10510_s17  ;;  %v4473_v39 = vadd.f32 %v13776_v52, %v13820_v14  ;;  %v5423_v44 = vmax.f32 %v4517_v25, 0.0  ;;  %v4206_v13 = vadd.f32 %v13679_v56, %v13810_v5  ;;  %v5411_v19 = vmax.f32 %v4253_v22, 0.0 }
 0x46c   : > { %v9540_v12 = vpop.f32.mrf.mxu1  ;;  %v9527_v6 = vpop.f32.mrf.mxu0  ;;  %v5409_v52 = vmax.f32 %v4209_v15, 0.0  ;;  %v5410_v62 = vmax.f32 %v4250_v3, 0.0  ;;  %v4341_v56 = vadd.f32 %v13728_v40, %v13820_v14  ;;  %v4297_v17 = vadd.f32 %v13721_v4, %v13820_v14 }
 0x46d   : > { %v5421_v26 = vmax.f32 %v4473_v39, 0.0  ;;  %v13890_v41 = vpack.c.bf16 %v5423_v44, %v5422_v54  ;;  %v5408_v60 = vmax.f32 %v4206_v13, 0.0  ;;  %v4338_v49 = vadd.f32 %v13719_v33, %v13810_v5 }
 0x46e   : > { %v13858_v21 = vpop.f32.mrf.mxu1  ;;  %v13898_v57 = vpack.c.bf16 %v5411_v19, %v5410_v62  ;;  %v4294_v18 = vadd.f32 %v13713_v7, %v13810_v5  ;;  %v5415_v51 = vmax.f32 %v4341_v56, 0.0  ;;  %v5413_v40 = vmax.f32 %v4297_v17, 0.0 }
 0x46f   : > { %5530 = vrot.lane.b32.xlu1 %v13828_v55, %s10511_s18  ;;  %5528 = vrot.lane.b32.xlu0 %v13830_v42, %s10511_s18  ;;  %v13892_v8 = vpack.c.bf16 %v5421_v26, %v5420_v50  ;;  %v13900_v31 = vpack.c.bf16 %v5409_v52, %v5408_v60  ;;  %v5414_v4 = vmax.f32 %v4338_v49, 0.0  ;;  %v4605_v36 = vadd.f32 %v13801_v46, %v13820_v14 }
 0x470   : > { %v9541_v11 = vpop.f32.mrf.mxu1  ;;  %v5412_v6 = vmax.f32 %v4294_v18, 0.0  ;;  %v4561_v30 = vadd.f32 %v13795_v38, %v13820_v14  ;;  %v4602_v2 = vadd.f32 %v13793_v0, %v13810_v5  ;;  %v4558_v28 = vadd.f32 %v13787_v35, %v13810_v5 }
 0x471   : > { %v13920_v58 = vpack.c.bf16 %v5415_v51, %v5414_v4  ;;  %v5427_v46 = vmax.f32 %v4605_v36, 0.0  ;;  %v4649_v15 = vadd.f32 %v13836_v47, %v13820_v14  ;;  %v4693_v35 = vadd.f32 %v13858_v21, %v13820_v14 }
 0x472   : > { %v13922_v33 = vpack.c.bf16 %v5413_v40, %v5412_v6  ;;  %v5425_v11 = vmax.f32 %v4561_v30, 0.0  ;;  %v5426_v38 = vmax.f32 %v4602_v2, 0.0  ;;  %v5424_v0 = vmax.f32 %v4558_v28, 0.0 }
 0x473   : > { %5630 = vrot.lane.b32.xlu1 %v13874_v61, %s10510_s17  ;;  %5628 = vrot.lane.b32.xlu0 %v13876_v23, %s10510_s17  ;;  %v4646_v44 = vadd.f32 %v13826_v43, %v13810_v5  ;;  %v4690_v3 = vadd.f32 %v13838_v10, %v13810_v5  ;;  %v5429_v47 = vmax.f32 %v4649_v15, 0.0  ;;  %v5431_v13 = vmax.f32 %v4693_v35, 0.0 }
 0x474   : > { %v13960_v39 = vpack.c.bf16 %v5427_v46, %v5426_v38  ;;  %v13962_v54 = vpack.c.bf16 %v5425_v11, %v5424_v0 }
 0x475   : > { %v5428_v50 = vmax.f32 %v4646_v44, 0.0  ;;  %v5430_v21 = vmax.f32 %v4690_v3, 0.0 }
 0x477   : > { %5534 = vrot.lane.b32.xlu1 %v13874_v61, %s10511_s18  ;;  %5532 = vrot.lane.b32.xlu0 %v13876_v23, %s10511_s18  ;;  %v13976_v43 = vpack.c.bf16 %v5429_v47, %v5428_v50  ;;  %v13978_v26 = vpack.c.bf16 %v5431_v13, %v5430_v21 }
 0x47a   : > { %v13906_v37 = vpop.f32.mrf.mxu0 }
 0x47b   : > { %5634 = vrot.lane.b32.xlu1 %v13898_v57, %s10510_s17  ;;  %5632 = vrot.lane.b32.xlu0 %v13900_v31, %s10510_s17  ;;  %v4734_v62 = vadd.f32 %v13906_v37, %v13810_v5 }
 0x47c   : > { %v9554_v48 = vpop.f32.mrf.mxu0 }
 0x47d   : > { %v5432_v51 = vmax.f32 %v4734_v62, 0.0 }
 0x47e   : > { %v4736_v32 = vpop.f32.mrf.mxu0  ;;  %v4777_v12 = vpop.f32.mrf.mxu1 }
 0x47f   : > { %5538 = vrot.lane.b32.xlu1 %v13898_v57, %s10511_s18  ;;  %5536 = vrot.lane.b32.xlu0 %v13900_v31, %s10511_s18  ;;  %v4737_v10 = vadd.f32 %v4736_v32, %v13820_v14  ;;  %v4778_v60 = vadd.f32 %v4777_v12, %v13810_v5 }
 0x480   : > { %v9568_v34 = vpop.f32.mrf.mxu1  ;;  %v9555_v45 = vpop.f32.mrf.mxu0 }
 0x481   : > { %v5433_v17 = vmax.f32 %v4737_v10, 0.0  ;;  %v5434_v40 = vmax.f32 %v4778_v60, 0.0 }
 0x482   : > { %v4780_v7 = vpop.f32.mrf.mxu1 }
 0x483   : > { %5638 = vrot.lane.b32.xlu1 %v13920_v58, %s10510_s17  ;;  %5636 = vrot.lane.b32.xlu0 %v13922_v33, %s10510_s17  ;;  %v4781_v19 = vadd.f32 %v4780_v7, %v13820_v14  ;;  %v13993_v12 = vpack.c.bf16 %v5433_v17, %v5432_v51 }
 0x484   : > { %v9569_v9 = vpop.f32.mrf.mxu1 }
 0x485   : > { %v5435_v49 = vmax.f32 %v4781_v19, 0.0 }
 0x487   : > { %5542 = vrot.lane.b32.xlu1 %v13920_v58, %s10511_s18  ;;  %5540 = vrot.lane.b32.xlu0 %v13922_v33, %s10511_s18  ;;  %v13995_v4 = vpack.c.bf16 %v5435_v49, %v5434_v40 }
 0x48b   : > { %5642 = vrot.lane.b32.xlu1 %v13866_v53, %s10510_s17  ;;  %5640 = vrot.lane.b32.xlu0 %v13868_v24, %s10510_s17 }
 0x48e   : > { %v4821_v29 = vpop.f32.mrf.mxu0 }
 0x48f   : > { %5546 = vrot.lane.b32.xlu1 %v13866_v53, %s10511_s18  ;;  %5544 = vrot.lane.b32.xlu0 %v13868_v24, %s10511_s18  ;;  %v4822_v7 = vadd.f32 %v4821_v29, %v13810_v5 }
 0x490   : > { %v9582_v63 = vpop.f32.mrf.mxu0 }
 0x491   : > { %v5436_v2 = vmax.f32 %v4822_v7, 0.0 }
 0x492   : > { %v4824_v1 = vpop.f32.mrf.mxu0  ;;  %v4865_v27 = vpop.f32.mrf.mxu1 }
 0x493   : > { %5646 = vrot.lane.b32.xlu1 %v13890_v41, %s10510_s17  ;;  %5644 = vrot.lane.b32.xlu0 %v13892_v8, %s10510_s17  ;;  %v4825_v6 = vadd.f32 %v4824_v1, %v13820_v14  ;;  %v4866_v9 = vadd.f32 %v4865_v27, %v13810_v5 }
 0x494   : > { %v9596_v59 = vpop.f32.mrf.mxu1  ;;  %v9583_v22 = vpop.f32.mrf.mxu0 }
 0x495   : > { %v5437_v36 = vmax.f32 %v4825_v6, 0.0  ;;  %v5438_v28 = vmax.f32 %v4866_v9, 0.0 }
 0x496   : > { %v4868_v25 = vpop.f32.mrf.mxu1 }
 0x497   : > { %5550 = vrot.lane.b32.xlu1 %v13890_v41, %s10511_s18  ;;  %5548 = vrot.lane.b32.xlu0 %v13892_v8, %s10511_s18  ;;  %v4869_v34 = vadd.f32 %v4868_v25, %v13820_v14  ;;  %v14009_v29 = vpack.c.bf16 %v5437_v36, %v5436_v2 }
 0x498   : > { %v9597_v16 = vpop.f32.mrf.mxu1 }
 0x499   : > { %v5439_v30 = vmax.f32 %v4869_v34, 0.0 }
 0x49b   : > { %5650 = vrot.lane.b32.xlu1 %v13960_v39, %s10510_s17  ;;  %5648 = vrot.lane.b32.xlu0 %v13962_v54, %s10510_s17  ;;  %v14011_v1 = vpack.c.bf16 %v5439_v30, %v5438_v28 }
 0x49f   : > { %5554 = vrot.lane.b32.xlu1 %v13960_v39, %s10511_s18  ;;  %5552 = vrot.lane.b32.xlu0 %v13962_v54, %s10511_s18 }
 0x4a2   : > { %v4909_v52 = vpop.f32.mrf.mxu0 }
 0x4a3   : > { %5654 = vrot.lane.b32.xlu1 %v13978_v26, %s10510_s17  ;;  %5652 = vrot.lane.b32.xlu0 %v13976_v43, %s10510_s17  ;;  %v4910_v22 = vadd.f32 %v4909_v52, %v13810_v5 }
 0x4a4   : > { %v9610_v56 = vpop.f32.mrf.mxu0 }
 0x4a5   : > { %v5440_v0 = vmax.f32 %v4910_v22, 0.0 }
 0x4a6   : > { %v4912_v18 = vpop.f32.mrf.mxu0  ;;  %v4953_v48 = vpop.f32.mrf.mxu1 }
 0x4a7   : > { %5558 = vrot.lane.b32.xlu1 %v13978_v26, %s10511_s18  ;;  %5556 = vrot.lane.b32.xlu0 %v13976_v43, %s10511_s18  ;;  %v4913_v27 = vadd.f32 %v4912_v18, %v13820_v14  ;;  %v4954_v46 = vadd.f32 %v4953_v48, %v13810_v5 }
 0x4a8   : > { %v9624_v37 = vpop.f32.mrf.mxu1  ;;  %v9611_v32 = vpop.f32.mrf.mxu0 }
 0x4a9   : > { %v5441_v11 = vmax.f32 %v4913_v27, 0.0  ;;  %v5442_v16 = vmax.f32 %v4954_v46, 0.0 }
 0x4aa   : > { %v4956_v45 = vpop.f32.mrf.mxu1 }
 0x4ab   : > { %5658 = vrot.lane.b32.xlu1 %v13995_v4, %s10510_s17  ;;  %5656 = vrot.lane.b32.xlu0 %v13993_v12, %s10510_s17  ;;  %v4957_v59 = vadd.f32 %v4956_v45, %v13820_v14  ;;  %v14025_v35 = vpack.c.bf16 %v5441_v11, %v5440_v0 }
 0x4ac   : > { %v9625_v63 = vpop.f32.mrf.mxu1 }
 0x4ad   : > { %v5443_v25 = vmax.f32 %v4957_v59, 0.0 }
 0x4af   : > { %5562 = vrot.lane.b32.xlu1 %v13995_v4, %s10511_s18  ;;  %5560 = vrot.lane.b32.xlu0 %v13993_v12, %s10511_s18  ;;  %v14027_v44 = vpack.c.bf16 %v5443_v25, %v5442_v16 }
 0x4b3   : > { %5662 = vrot.lane.b32.xlu1 %v14011_v1, %s10510_s17  ;;  %5660 = vrot.lane.b32.xlu0 %v14009_v29, %s10510_s17 }
 0x4b6   : > { %v4997_v38 = vpop.f32.mrf.mxu0 }
 0x4b7   : > { %5566 = vrot.lane.b32.xlu1 %v14011_v1, %s10511_s18  ;;  %5564 = vrot.lane.b32.xlu0 %v14009_v29, %s10511_s18  ;;  %v4998_v13 = vadd.f32 %v4997_v38, %v13810_v5 }
 0x4b8   : > { %v9638_v15 = vpop.f32.mrf.mxu0 }
 0x4b9   : > { %v5444_v60 = vmax.f32 %v4998_v13, 0.0 }
 0x4ba   : > { %v5000_v3 = vpop.f32.mrf.mxu0  ;;  %v5041_v47 = vpop.f32.mrf.mxu1 }
 0x4bb   : > { %v5001_v50 = vadd.f32 %v5000_v3, %v13820_v14  ;;  %5666 = vrot.lane.b32.xlu1 %v14027_v44, %s10510_s17  ;;  %5664 = vrot.lane.b32.xlu0 %v14025_v35, %s10510_s17  ;;  %v5042_v52 = vadd.f32 %v5041_v47, %v13810_v5 }
 0x4bc   : > { %v9652_v21 = vpop.f32.mrf.mxu1  ;;  %v9639_v10 = vpop.f32.mrf.mxu0 }
 0x4bd   : > { %v5445_v19 = vmax.f32 %v5001_v50, 0.0  ;;  %v5446_v18 = vmax.f32 %v5042_v52, 0.0 }
 0x4be   : > { %v5044_v62 = vpop.f32.mrf.mxu1 }
 0x4bf   : > { %v5045_v56 = vadd.f32 %v5044_v62, %v13820_v14  ;;  %5570 = vrot.lane.b32.xlu1 %v14027_v44, %s10511_s18  ;;  %5568 = vrot.lane.b32.xlu0 %v14025_v35, %s10511_s18  ;;  %v14041_v49 = vpack.c.bf16 %v5445_v19, %v5444_v60 }
 0x4c0   : > { %v9653_v17 = vpop.f32.mrf.mxu1 }
 0x4c1   : > { %v5447_v48 = vmax.f32 %v5045_v56, 0.0  ;;  %v14081_v17 = vld [vmem:[%s15331_s5] sm:$0xf] }
 0x4c3   : > { %v14043_v51 = vpack.c.bf16 %v5447_v48, %v5446_v18  ;;  %5668 = vrot.lane.b32.xlu0 %v14041_v49, %s10510_s17 }
 0x4c5   : > { %5670 = vrot.lane.b32.xlu1 %v14043_v51, %s10510_s17 }
 0x4c7   : > { %5572 = vrot.lane.b32.xlu0 %v14041_v49, %s10511_s18 }
 0x4c9   : > { %5574 = vrot.lane.b32.xlu1 %v14043_v51, %s10511_s18 }
 0x4ca   : > { %v5085_v40 = vpop.f32.mrf.mxu0 }
 0x4cb   : > { %v5086_v32 = vadd.f32 %v5085_v40, %v13810_v5 }
 0x4cc   : > { %v9666_v37 = vpop.f32.mrf.mxu0 }
 0x4cd   : > { %v5448_v63 = vmax.f32 %v5086_v32, 0.0 }
 0x4ce   : > { %v5088_v6 = vpop.f32.mrf.mxu0  ;;  %v5129_v34 = vpop.f32.mrf.mxu1 }
 0x4cf   : > { %v5089_v45 = vadd.f32 %v5088_v6, %v13820_v14  ;;  %v5130_v30 = vadd.f32 %v5129_v34, %v13810_v5 }
 0x4d0   : > { %v9680_v7 = vpop.f32.mrf.mxu1  ;;  %v9667_v9 = vpop.f32.mrf.mxu0 }
 0x4d1   : > { %v5449_v36 = vmax.f32 %v5089_v45, 0.0  ;;  %v5450_v22 = vmax.f32 %v5130_v30, 0.0 }
 0x4d2   : > { %v5132_v2 = vpop.f32.mrf.mxu1 }
 0x4d3   : > { %v14056_v28 = vpack.c.bf16 %v5449_v36, %v5448_v63  ;;  %v5133_v27 = vadd.f32 %v5132_v2, %v13820_v14 }
 0x4d4   : > { %v9681_v59 = vpop.f32.mrf.mxu1 }
 0x4d5   : > { %v5451_v46 = vmax.f32 %v5133_v27, 0.0  ;;  %5672 = vrot.lane.b32.xlu0 %v14056_v28, %s10510_s17 }
 0x4d7   : > { %v14061_v11 = vpack.c.bf16 %v5451_v46, %v5450_v22 }
 0x4d9   : > { %5674 = vrot.lane.b32.xlu1 %v14061_v11, %s10510_s17  ;;  %5576 = vrot.lane.b32.xlu0 %v14056_v28, %s10511_s18 }
 0x4dd   : > { %5578 = vrot.lane.b32.xlu1 %v14061_v11, %s10511_s18  ;;  %v5627_v25 = vpop.permute.xlu1 %5626  ;;  %v5625_v38 = vpop.permute.xlu0 %5624 }
 0x4de   : > { %v5173_v0 = vpop.f32.mrf.mxu0  ;;  %9767 = vmatpush3.bf16.msra.mxu0 %v5625_v38  ;;  %9777 = vmatpush3.bf16.msra.mxu1 %v5627_v25 }
 0x4df   : > { %9778 = vmatprep.subr.bf16.mxu1 %v10513_v20  ;;  %9768 = vmatprep.subr.bf16.mxu0 %v10513_v20  ;;  %v5174_v15 = vadd.f32 %v5173_v0, %v13810_v5 }
 0x4e0   : > { %v9694_v16 = vpop.f32.mrf.mxu0 }
 0x4e1   : > { %v5531_v3 = vpop.permute.xlu1 %5530  ;;  %v5529_v47 = vpop.permute.xlu0 %5528  ;;  %v5452_v52 = vmax.f32 %v5174_v15, 0.0 }
 0x4e2   : > { %v5176_v13 = vpop.f32.mrf.mxu0  ;;  %v5217_v50 = vpop.f32.mrf.mxu1  ;;  %9769 = vmatpush3.bf16.msra.mxu0 %v5529_v47  ;;  %9779 = vmatpush3.bf16.msra.mxu1 %v5531_v3 }
 0x4e3   : > { %v5177_v21 = vadd.f32 %v5176_v13, %v13820_v14  ;;  %9780 = vmatprep.subr.bf16.mxu1 %v10513_v20  ;;  %9770 = vmatprep.subr.bf16.mxu0 %v10513_v20  ;;  %v5218_v60 = vadd.f32 %v5217_v50, %v13810_v5 }
 0x4e4   : > { %v9708_v10 = vpop.f32.mrf.mxu1  ;;  %v9695_v19 = vpop.f32.mrf.mxu0 }
 0x4e5   : > { %v5453_v62 = vmax.f32 %v5177_v21, 0.0  ;;  %v5631_v48 = vpop.permute.xlu1 %5630  ;;  %v5629_v40 = vpop.permute.xlu0 %5628 }
 0x4e6   : > { %v5220_v56 = vpop.f32.mrf.mxu1  ;;  %9771 = vmatpush3.bf16.msra.mxu0 %v13830_v42  ;;  %9781 = vmatpush3.bf16.msra.mxu1 %v13828_v55  ;;  %v5454_v42 = vmax.f32 %v5218_v60, 0.0 }
 0x4e7   : > { %v14083_v18 = vpack.c.bf16 %v5453_v62, %v5452_v52  ;;  %v5221_v37 = vadd.f32 %v5220_v56, %v13820_v14  ;;  %9796 = vmatprep.subr.bf16.mxu1 %v10513_v20  ;;  %9786 = vmatprep.subr.bf16.mxu0 %v10513_v20 }
 0x4e8   : > { %v9709_v32 = vpop.f32.mrf.mxu1 }
 0x4e9   : > { %v5455_v6 = vmax.f32 %v5221_v37, 0.0  ;;  %5676 = vrot.lane.b32.xlu0 %v14083_v18, %s10510_s17  ;;  %9773 = vmatmul.mubr.msk.bf16.vlgmr.msra.gmra.mxu0 %vm5727_vm4, %v14081_v17  ;;  %v5535_v34 = vpop.permute.xlu1 %5534  ;;  %v5533_v45 = vpop.permute.xlu0 %5532 }
 0x4ea   : > { %9783 = vmatmul.mubr.msk.bf16.vlgmr.msra.gmra.mxu1 %vm5727_vm4, %v14081_v17  ;;  %9787 = vmatpush3.bf16.msra.mxu0 %v5629_v40 }
 0x4eb   : > { %v14094_v55 = vpack.c.bf16 %v5455_v6, %v5454_v42  ;;  %9797 = vmatpush3.bf16.msra.mxu1 %v5631_v48  ;;  %9788 = vmatprep.subr.bf16.mxu0 %v10513_v20 }
 0x4ec   : > { %9798 = vmatprep.subr.bf16.mxu1 %v10513_v20  ;;  %9792 = vmatprep.mubr.msk.bf16.mxu0 %vm10514_vm2, %v10513_v20 }
 0x4ed   : > { %5678 = vrot.lane.b32.xlu1 %v14094_v55, %s10510_s17  ;;  %5580 = vrot.lane.b32.xlu0 %v14083_v18, %s10511_s18  ;;  %v5635_v7 = vpop.permute.xlu1 %5634  ;;  %v5633_v9 = vpop.permute.xlu0 %5632 }
 0x4ee   : > { %9789 = vmatpush3.bf16.msra.mxu0 %v5533_v45  ;;  %9802 = vmatprep.mubr.msk.bf16.mxu1 %vm10514_vm2, %v10513_v20 }
 0x4ef   : > { %9799 = vmatpush3.bf16.msra.mxu1 %v5535_v34  ;;  %9790 = vmatprep.subr.bf16.mxu0 %v10513_v20 }
 0x4f0   : > { %9800 = vmatprep.subr.bf16.mxu1 %v10513_v20 }
 0x4f1   : > { %5582 = vrot.lane.b32.xlu1 %v14094_v55, %s10511_s18  ;;  %v5539_v2 = vpop.permute.xlu1 %5538  ;;  %v5537_v27 = vpop.permute.xlu0 %5536 }
 0x4f2   : > { %9791 = vmatpush3.bf16.msra.mxu0 %v13876_v23 }
 0x4f3   : > { %9801 = vmatpush3.bf16.msra.mxu1 %v13874_v61  ;;  %9806 = vmatprep.subr.bf16.mxu0 %v10513_v20 }
 0x4f4   : > { %v5261_v63 = vpop.f32.mrf.mxu0  ;;  %9816 = vmatprep.subr.bf16.mxu1 %v10513_v20 }
 0x4f5   : > { %9793 = vmatmul.mubr.msk.bf16.vlgmr.msra.gmra.mxu0 %vm5727_vm4, %v14081_v17  ;;  %v5262_v30 = vadd.f32 %v5261_v63, %v13810_v5  ;;  %v5637_v13 = vpop.permute.xlu0 %5636  ;;  %v5639_v10 = vpop.permute.xlu1 %5638 }
 0x4f6   : > { %9803 = vmatmul.mubr.msk.bf16.vlgmr.msra.gmra.mxu1 %vm5727_vm4, %v14081_v17  ;;  %v9722_v36 = vpop.f32.mrf.mxu0  ;;  %9807 = vmatpush3.bf16.msra.mxu0 %v5633_v9 }
 0x4f7   : > { %9817 = vmatpush3.bf16.msra.mxu1 %v5635_v7  ;;  %9808 = vmatprep.subr.bf16.mxu0 %v10513_v20  ;;  %v5456_v25 = vmax.f32 %v5262_v30, 0.0 }
 0x4f8   : > { %v5264_v23 = vpop.f32.mrf.mxu0  ;;  %v5305_v61 = vpop.f32.mrf.mxu1  ;;  %9818 = vmatprep.subr.bf16.mxu1 %v10513_v20  ;;  %9812 = vmatprep.mubr.msk.bf16.mxu0 %vm10514_vm2, %v10513_v20 }
 0x4f9   : > { %v5265_v59 = vadd.f32 %v5264_v23, %v13820_v14  ;;  %9822 = vmatprep.mubr.msk.bf16.mxu1 %vm10514_vm2, %v10513_v20  ;;  %v5306_v0 = vadd.f32 %v5305_v61, %v13810_v5 }
 0x4fa   : > { %v9736_v22 = vpop.f32.mrf.mxu1  ;;  %9809 = vmatpush3.bf16.msra.mxu0 %v5537_v27  ;;  %v9723_v46 = vpop.f32.mrf.mxu0 }
 0x4fb   : > { %v5457_v38 = vmax.f32 %v5265_v59, 0.0  ;;  %9819 = vmatpush3.bf16.msra.mxu1 %v5539_v2  ;;  %9810 = vmatprep.subr.bf16.mxu0 %v10513_v20  ;;  %v5458_v50 = vmax.f32 %v5306_v0, 0.0  ;;  %v5721_v22 = vld [vmem:[%s15332_s6] sm:$0xff] }
 0x4fc   : > { %v5308_v16 = vpop.f32.mrf.mxu1  ;;  %9820 = vmatprep.subr.bf16.mxu1 %v10513_v20 }
 0x4fd   : > { %v14129_v15 = vpack.c.bf16 %v5457_v38, %v5456_v25  ;;  %v5309_v3 = vadd.f32 %v5308_v16, %v13820_v14 }
 0x4fe   : > { %9811 = vmatpush3.bf16.msra.mxu0 %v13900_v31  ;;  %v9737_v47 = vpop.f32.mrf.mxu1  ;;  %v5543_v31 = vpop.permute.xlu1 %5542 }
 0x4ff   : > { %v5459_v21 = vmax.f32 %v5309_v3, 0.0  ;;  %9821 = vmatpush3.bf16.msra.mxu1 %v13898_v57  ;;  %5680 = vrot.lane.b32.xlu0 %v14129_v15, %s10510_s17  ;;  %v5541_v57 = vpop.permute.xlu0 %5540 }
 0x500   : > { %9836 = vmatprep.subr.bf16.mxu1 %v10513_v20  ;;  %9826 = vmatprep.subr.bf16.mxu0 %v10513_v20 }
 0x501   : > { %v14138_v19 = vpack.c.bf16 %v5459_v21, %v5458_v50  ;;  %9813 = vmatmul.mubr.msk.bf16.vlgmr.msra.gmra.mxu0 %vm5727_vm4, %v14081_v17 }
 0x502   : > { %9823 = vmatmul.mubr.msk.bf16.vlgmr.msra.gmra.mxu1 %vm5727_vm4, %v14081_v17  ;;  %9827 = vmatpush3.bf16.msra.mxu0 %v5637_v13  ;;  %v5643_v62 = vpop.permute.xlu1 %5642 }
 0x503   : > { %9837 = vmatpush3.bf16.msra.mxu1 %v5639_v10  ;;  %5682 = vrot.lane.b32.xlu1 %v14138_v19, %s10510_s17  ;;  %v5641_v52 = vpop.permute.xlu0 %5640 }
 0x504   : > { %5584 = vrot.lane.b32.xlu0 %v14129_v15, %s10511_s18  ;;  %9838 = vmatprep.subr.bf16.mxu1 %v10513_v20 }
 0x505   : > { %9828 = vmatprep.subr.bf16.mxu0 %v10513_v20  ;;  %9832 = vmatprep.mubr.msk.bf16.mxu0 %vm10514_vm2, %v10513_v20 }
 0x506   : > { %9829 = vmatpush3.bf16.msra.mxu0 %v5541_v57  ;;  %9842 = vmatprep.mubr.msk.bf16.mxu1 %vm10514_vm2, %v10513_v20 }
 0x507   : > { %9839 = vmatpush3.bf16.msra.mxu1 %v5543_v31  ;;  %5586 = vrot.lane.b32.xlu1 %v14138_v19, %s10511_s18 }
 0x508   : > { %9840 = vmatprep.subr.bf16.mxu1 %v10513_v20  ;;  %9830 = vmatprep.subr.bf16.mxu0 %v10513_v20 }
 0x50a   : > { %9831 = vmatpush3.bf16.msra.mxu0 %v13922_v33  ;;  %v5547_v33 = vpop.permute.xlu1 %5546 }
 0x50b   : > { %9841 = vmatpush3.bf16.msra.mxu1 %v13920_v58  ;;  %9846 = vmatprep.subr.bf16.mxu0 %v10513_v20  ;;  %v5545_v58 = vpop.permute.xlu0 %5544 }
 0x50c   : > { %9856 = vmatprep.subr.bf16.mxu1 %v10513_v20 }
 0x50d   : > { %9833 = vmatmul.mubr.msk.bf16.vlgmr.msra.gmra.mxu0 %vm5727_vm4, %v14081_v17 }
 0x50e   : > { %9843 = vmatmul.mubr.msk.bf16.vlgmr.msra.gmra.mxu1 %vm5727_vm4, %v14081_v17  ;;  %9847 = vmatpush3.bf16.msra.mxu0 %v5641_v52  ;;  %v5647_v56 = vpop.permute.xlu1 %5646 }
 0x50f   : > { %9857 = vmatpush3.bf16.msra.mxu1 %v5643_v62  ;;  %9848 = vmatprep.subr.bf16.mxu0 %v10513_v20  ;;  %v5645_v60 = vpop.permute.xlu0 %5644 }
 0x510   : > { %9858 = vmatprep.subr.bf16.mxu1 %v10513_v20  ;;  %9852 = vmatprep.mubr.msk.bf16.mxu0 %vm10514_vm2, %v10513_v20 }
 0x511   : > { %9862 = vmatprep.mubr.msk.bf16.mxu1 %vm10514_vm2, %v10513_v20 }
 0x512   : > { %9849 = vmatpush3.bf16.msra.mxu0 %v5545_v58 }
 0x513   : > { %9859 = vmatpush3.bf16.msra.mxu1 %v5547_v33  ;;  %9850 = vmatprep.subr.bf16.mxu0 %v10513_v20 }
 0x514   : > { %9860 = vmatprep.subr.bf16.mxu1 %v10513_v20 }
 0x516   : > { %9851 = vmatpush3.bf16.msra.mxu0 %v13868_v24  ;;  %v5551_v24 = vpop.permute.xlu1 %5550 }
 0x517   : > { %9861 = vmatpush3.bf16.msra.mxu1 %v13866_v53  ;;  %9866 = vmatprep.subr.bf16.mxu0 %v10513_v20  ;;  %v5549_v53 = vpop.permute.xlu0 %5548 }
 0x518   : > { %9876 = vmatprep.subr.bf16.mxu1 %v10513_v20 }
 0x519   : > { %9853 = vmatmul.mubr.msk.bf16.vlgmr.msra.gmra.mxu0 %vm5727_vm4, %v14081_v17 }
 0x51a   : > { %9863 = vmatmul.mubr.msk.bf16.vlgmr.msra.gmra.mxu1 %vm5727_vm4, %v14081_v17  ;;  %9867 = vmatpush3.bf16.msra.mxu0 %v5645_v60  ;;  %v5651_v30 = vpop.permute.xlu1 %5650 }
 0x51b   : > { %9877 = vmatpush3.bf16.msra.mxu1 %v5647_v56  ;;  %9868 = vmatprep.subr.bf16.mxu0 %v10513_v20  ;;  %v5649_v7 = vpop.permute.xlu0 %5648  ;;  %v8719_v56 = vld [vmem:[%s15333_s7 + $0xe8] sm:$0xff] }
 0x51c   : > { %v5349_v48 = vpop.f32.mrf.mxu0  ;;  %9878 = vmatprep.subr.bf16.mxu1 %v10513_v20  ;;  %9872 = vmatprep.mubr.msk.bf16.mxu0 %vm10514_vm2, %v10513_v20 }
 0x51d   : > { %9882 = vmatprep.mubr.msk.bf16.mxu1 %vm10514_vm2, %v10513_v20  ;;  %v5350_v37 = vadd.f32 %v5349_v48, %v13810_v5  ;;  %v7057_v48 = vld [vmem:[%s15333_s7 + $0x70] sm:$0xff] }
 0x51e   : > { %v9750_v40 = vpop.f32.mrf.mxu0  ;;  %9869 = vmatpush3.bf16.msra.mxu0 %v5549_v53  ;;  %v5555_v59 = vpop.permute.xlu1 %5554  ;;  %v8718_v53 = vld [vmem:[%s15333_s7 + $0xe0] sm:$0xff] }
 0x51f   : > { %9879 = vmatpush3.bf16.msra.mxu1 %v5551_v24  ;;  %9870 = vmatprep.subr.bf16.mxu0 %v10513_v20  ;;  %v5460_v9 = vmax.f32 %v5350_v37, 0.0  ;;  %v5553_v27 = vpop.permute.xlu0 %5552  ;;  %v7056_v24 = vld [vmem:[%s15333_s7 + $0x68] sm:$0xff]  ;;  %v8716_v37 = vld [vmem:[%s15333_s7 + $0xd0] sm:$0xff] }
 0x520   : > { %v5352_v32 = vpop.f32.mrf.mxu0  ;;  %v5393_v42 = vpop.f32.mrf.mxu1  ;;  %9880 = vmatprep.subr.bf16.mxu1 %v10513_v20 }
 0x521   : > { %v5353_v6 = vadd.f32 %v5352_v32, %v13820_v14  ;;  %v5394_v36 = vadd.f32 %v5393_v42, %v13810_v5  ;;  %v7055_v42 = vld [vmem:[%s15333_s7 + $0x60] sm:$0xff] }
 0x522   : > { %v9751_v34 = vpop.f32.mrf.mxu0  ;;  %v9764_v45 = vpop.f32.mrf.mxu1  ;;  %9871 = vmatpush3.bf16.msra.mxu0 %v13892_v8 }
 0x523   : > { %v5461_v63 = vmax.f32 %v5353_v6, 0.0  ;;  %9881 = vmatpush3.bf16.msra.mxu1 %v13890_v41  ;;  %9886 = vmatprep.subr.bf16.mxu0 %v10513_v20  ;;  %v5462_v5 = vmax.f32 %v5394_v36, 0.0  ;;  %v5653_v46 = vpop.permute.xlu0 %5652  ;;  %v5655_v25 = vpop.permute.xlu1 %5654 }
 0x524   : > { %v5396_v23 = vpop.f32.mrf.mxu1  ;;  %9896 = vmatprep.subr.bf16.mxu1 %v10513_v20 }
 0x525   : > { %v14197_v61 = vpack.c.bf16 %v5461_v63, %v5460_v9  ;;  %v5397_v2 = vadd.f32 %v5396_v23, %v13820_v14  ;;  %9873 = vmatmul.mubr.msk.bf16.vlgmr.msra.gmra.mxu0 %vm5727_vm4, %v14081_v17  ;;  %v7054_v63 = vld [vmem:[%s15333_s7 + $0x58] sm:$0xff] }
 0x526   : > { %9883 = vmatmul.mubr.msk.bf16.vlgmr.msra.gmra.mxu1 %vm5727_vm4, %v14081_v17  ;;  %v9765_v8 = vpop.f32.mrf.mxu1  ;;  %9887 = vmatpush3.bf16.msra.mxu0 %v5649_v7 }
 0x527   : > { %v5463_v41 = vmax.f32 %v5397_v2, 0.0  ;;  %9897 = vmatpush3.bf16.msra.mxu1 %v5651_v30  ;;  %5684 = vrot.lane.b32.xlu0 %v14197_v61, %s10510_s17  ;;  %v8714_v30 = vld [vmem:[%s15333_s7 + $0xc0] sm:$0xff]  ;;  %v7053_v8 = vld [vmem:[%s15333_s7 + $0x50] sm:$0xff] }
 0x528   : > { %9898 = vmatprep.subr.bf16.mxu1 %v10513_v20  ;;  %9888 = vmatprep.subr.bf16.mxu0 %v10513_v20 }
 0x529   : > { %v14208_v14 = vpack.c.bf16 %v5463_v41, %v5462_v5  ;;  %9892 = vmatprep.mubr.msk.bf16.mxu0 %vm10514_vm2, %v10513_v20  ;;  %9902 = vmatprep.mubr.msk.bf16.mxu1 %vm10514_vm2, %v10513_v20  ;;  %v8713_v41 = vld [vmem:[%s15333_s7 + $0xb8] sm:$0xff] }
 0x52a   : > { %9889 = vmatpush3.bf16.msra.mxu0 %v5553_v27 }
 0x52b   : > { %9899 = vmatpush3.bf16.msra.mxu1 %v5555_v59  ;;  %5686 = vrot.lane.b32.xlu1 %v14208_v14, %s10510_s17 }
 0x52c   : > { %5588 = vrot.lane.b32.xlu0 %v14197_v61, %s10511_s18  ;;  %9900 = vmatprep.subr.bf16.mxu1 %v10513_v20 }
 0x52d   : > { %9890 = vmatprep.subr.bf16.mxu0 %v10513_v20 }
 0x52e   : > { %9891 = vmatpush3.bf16.msra.mxu0 %v13962_v54  ;;  %v5559_v54 = vpop.permute.xlu1 %5558 }
 0x52f   : > { %9901 = vmatpush3.bf16.msra.mxu1 %v13960_v39  ;;  %5590 = vrot.lane.b32.xlu1 %v14208_v14, %s10511_s18  ;;  %v5557_v39 = vpop.permute.xlu0 %5556 }
 0x530   : > { %5724 = vperm.xlu0 %10389, %v5721_v22   ;;  %9916 = vmatprep.subr.bf16.mxu1 %v10513_v20 }
 0x531   : > { %9893 = vmatmul.mubr.msk.bf16.vlgmr.msra.gmra.mxu0 %vm5727_vm4, %v14081_v17  ;;  %9906 = vmatprep.subr.bf16.mxu0 %v10513_v20 }
 0x532   : > { %9903 = vmatmul.mubr.msk.bf16.vlgmr.msra.gmra.mxu1 %vm5727_vm4, %v14081_v17  ;;  %9907 = vmatpush3.bf16.msra.mxu0 %v5653_v46  ;;  %v5659_v0 = vpop.permute.xlu1 %5658  ;;  %v8712_v46 = vld [vmem:[%s15333_s7 + $0xb0] sm:$0xff] }
 0x533   : > { %9917 = vmatpush3.bf16.msra.mxu1 %v5655_v25  ;;  %9908 = vmatprep.subr.bf16.mxu0 %v10513_v20  ;;  %v5657_v38 = vpop.permute.xlu0 %5656 }
 0x534   : > { %9918 = vmatprep.subr.bf16.mxu1 %v10513_v20  ;;  %9912 = vmatprep.mubr.msk.bf16.mxu0 %vm10514_vm2, %v10513_v20 }
 0x535   : > { %9922 = vmatprep.mubr.msk.bf16.mxu1 %vm10514_vm2, %v10513_v20 }
 0x536   : > { %9909 = vmatpush3.bf16.msra.mxu0 %v5557_v39 }
 0x537   : > { %9919 = vmatpush3.bf16.msra.mxu1 %v5559_v54  ;;  %9910 = vmatprep.subr.bf16.mxu0 %v10513_v20 }
 0x538   : > { %9920 = vmatprep.subr.bf16.mxu1 %v10513_v20 }
 0x53a   : > { %9911 = vmatpush3.bf16.msra.mxu0 %v13976_v43  ;;  %v5561_v43 = vpop.permute.xlu0 %5560 }
 0x53b   : > { %9921 = vmatpush3.bf16.msra.mxu1 %v13978_v26  ;;  %9926 = vmatprep.subr.bf16.mxu0 %v10513_v20  ;;  %v5563_v26 = vpop.permute.xlu1 %5562 }
 0x53c   : > { %9936 = vmatprep.subr.bf16.mxu1 %v10513_v20 }
 0x53d   : > { %9913 = vmatmul.mubr.msk.bf16.vlgmr.msra.gmra.mxu0 %vm5727_vm4, %v14081_v17 }
 0x53e   : > { %9923 = vmatmul.mubr.msk.bf16.vlgmr.msra.gmra.mxu1 %vm5727_vm4, %v14081_v17  ;;  %9927 = vmatpush3.bf16.msra.mxu0 %v5657_v38  ;;  %v5661_v16 = vpop.permute.xlu0 %5660 }
 0x53f   : > { %9937 = vmatpush3.bf16.msra.mxu1 %v5659_v0  ;;  %9928 = vmatprep.subr.bf16.mxu0 %v10513_v20  ;;  %v5663_v3 = vpop.permute.xlu1 %5662  ;;  %v7051_v0 = vld [vmem:[%s15333_s7 + $0x40] sm:$0xff] }
 0x540   : > { %9938 = vmatprep.subr.bf16.mxu1 %v10513_v20  ;;  %9932 = vmatprep.mubr.msk.bf16.mxu0 %vm10514_vm2, %v10513_v20 }
 0x541   : > { %9942 = vmatprep.mubr.msk.bf16.mxu1 %vm10514_vm2, %v10513_v20 }
 0x542   : > { %9929 = vmatpush3.bf16.msra.mxu0 %v5561_v43 }
 0x543   : > { %9939 = vmatpush3.bf16.msra.mxu1 %v5563_v26  ;;  %9930 = vmatprep.subr.bf16.mxu0 %v10513_v20 }
 0x544   : > { %9940 = vmatprep.subr.bf16.mxu1 %v10513_v20 }
 0x546   : > { %9931 = vmatpush3.bf16.msra.mxu0 %v13993_v12  ;;  %v5565_v12 = vpop.permute.xlu0 %5564 }
 0x547   : > { %9941 = vmatpush3.bf16.msra.mxu1 %v13995_v4  ;;  %9946 = vmatprep.subr.bf16.mxu0 %v10513_v20  ;;  %v5567_v4 = vpop.permute.xlu1 %5566 }
 0x548   : > { %9956 = vmatprep.subr.bf16.mxu1 %v10513_v20 }
 0x549   : > { %9933 = vmatmul.mubr.msk.bf16.vlgmr.msra.gmra.mxu0 %vm5727_vm4, %v14081_v17 }
 0x54a   : > { %9943 = vmatmul.mubr.msk.bf16.vlgmr.msra.gmra.mxu1 %vm5727_vm4, %v14081_v17  ;;  %9947 = vmatpush3.bf16.msra.mxu0 %v5661_v16  ;;  %v5665_v47 = vpop.permute.xlu0 %5664  ;;  %v8711_v16 = vld [vmem:[%s15333_s7 + $0xa8] sm:$0xff] }
 0x54b   : > { %9957 = vmatpush3.bf16.msra.mxu1 %v5663_v3  ;;  %9948 = vmatprep.subr.bf16.mxu0 %v10513_v20  ;;  %v5667_v13 = vpop.permute.xlu1 %5666 }
 0x54c   : > { %9958 = vmatprep.subr.bf16.mxu1 %v10513_v20  ;;  %9952 = vmatprep.mubr.msk.bf16.mxu0 %vm10514_vm2, %v10513_v20 }
 0x54d   : > { %9962 = vmatprep.mubr.msk.bf16.mxu1 %vm10514_vm2, %v10513_v20 }
 0x54e   : > { %9949 = vmatpush3.bf16.msra.mxu0 %v5565_v12 }
 0x54f   : > { %9959 = vmatpush3.bf16.msra.mxu1 %v5567_v4  ;;  %9950 = vmatprep.subr.bf16.mxu0 %v10513_v20 }
 0x550   : > { %9960 = vmatprep.subr.bf16.mxu1 %v10513_v20 }
 0x552   : > { %9951 = vmatpush3.bf16.msra.mxu0 %v14009_v29  ;;  %v5569_v29 = vpop.permute.xlu0 %5568 }
 0x553   : > { %9961 = vmatpush3.bf16.msra.mxu1 %v14011_v1  ;;  %9966 = vmatprep.subr.bf16.mxu0 %v10513_v20  ;;  %v5571_v1 = vpop.permute.xlu1 %5570 }
 0x554   : > { %9976 = vmatprep.subr.bf16.mxu1 %v10513_v20 }
 0x555   : > { %9953 = vmatmul.mubr.msk.bf16.vlgmr.msra.gmra.mxu0 %vm5727_vm4, %v14081_v17 }
 0x556   : > { %9963 = vmatmul.mubr.msk.bf16.vlgmr.msra.gmra.mxu1 %vm5727_vm4, %v14081_v17  ;;  %9967 = vmatpush3.bf16.msra.mxu0 %v5665_v47  ;;  %v5669_v50 = vpop.permute.xlu0 %5668 }
 0x557   : > { %9977 = vmatpush3.bf16.msra.mxu1 %v5667_v13  ;;  %9968 = vmatprep.subr.bf16.mxu0 %v10513_v20  ;;  %v5671_v21 = vpop.permute.xlu1 %5670  ;;  %v7050_v13 = vld [vmem:[%s15333_s7 + $0x38] sm:$0xff] }
 0x558   : > { %9978 = vmatprep.subr.bf16.mxu1 %v10513_v20  ;;  %9972 = vmatprep.mubr.msk.bf16.mxu0 %vm10514_vm2, %v10513_v20 }
 0x559   : > { %9982 = vmatprep.mubr.msk.bf16.mxu1 %vm10514_vm2, %v10513_v20 }
 0x55a   : > { %9969 = vmatpush3.bf16.msra.mxu0 %v5569_v29 }
 0x55b   : > { %9979 = vmatpush3.bf16.msra.mxu1 %v5571_v1  ;;  %9970 = vmatprep.subr.bf16.mxu0 %v10513_v20 }
 0x55c   : > { %9980 = vmatprep.subr.bf16.mxu1 %v10513_v20 }
 0x55e   : > { %9971 = vmatpush3.bf16.msra.mxu0 %v14025_v35  ;;  %v5573_v35 = vpop.permute.xlu0 %5572 }
 0x55f   : > { %9981 = vmatpush3.bf16.msra.mxu1 %v14027_v44  ;;  %9986 = vmatprep.subr.bf16.mxu0 %v10513_v20  ;;  %v5575_v44 = vpop.permute.xlu1 %5574 }
 0x560   : > { %9996 = vmatprep.subr.bf16.mxu1 %v10513_v20 }
 0x561   : > { %9973 = vmatmul.mubr.msk.bf16.vlgmr.msra.gmra.mxu0 %vm5727_vm4, %v14081_v17 }
 0x562   : > { %9983 = vmatmul.mubr.msk.bf16.vlgmr.msra.gmra.mxu1 %vm5727_vm4, %v14081_v17  ;;  %9987 = vmatpush3.bf16.msra.mxu0 %v5669_v50  ;;  %v5673_v10 = vpop.permute.xlu0 %5672 }
 0x563   : > { %9997 = vmatpush3.bf16.msra.mxu1 %v5671_v21  ;;  %9988 = vmatprep.subr.bf16.mxu0 %v10513_v20  ;;  %v5675_v57 = vpop.permute.xlu1 %5674 }
 0x564   : > { %9998 = vmatprep.subr.bf16.mxu1 %v10513_v20  ;;  %9992 = vmatprep.mubr.msk.bf16.mxu0 %vm10514_vm2, %v10513_v20 }
 0x565   : > { %10002 = vmatprep.mubr.msk.bf16.mxu1 %vm10514_vm2, %v10513_v20 }
 0x566   : > { %9989 = vmatpush3.bf16.msra.mxu0 %v5573_v35  ;;  %v8710_v35 = vld [vmem:[%s15333_s7 + $0xa0] sm:$0xff] }
 0x567   : > { %9999 = vmatpush3.bf16.msra.mxu1 %v5575_v44  ;;  %9990 = vmatprep.subr.bf16.mxu0 %v10513_v20 }
 0x568   : > { %10000 = vmatprep.subr.bf16.mxu1 %v10513_v20 }
 0x56a   : > { %9991 = vmatpush3.bf16.msra.mxu0 %v14041_v49  ;;  %v5577_v49 = vpop.permute.xlu0 %5576 }
 0x56b   : > { %10001 = vmatpush3.bf16.msra.mxu1 %v14043_v51  ;;  %10006 = vmatprep.subr.bf16.mxu0 %v10513_v20  ;;  %v5579_v51 = vpop.permute.xlu1 %5578 }
 0x56c   : > { %10016 = vmatprep.subr.bf16.mxu1 %v10513_v20 }
 0x56d   : > { %9993 = vmatmul.mubr.msk.bf16.vlgmr.msra.gmra.mxu0 %vm5727_vm4, %v14081_v17 }
 0x56e   : > { %10003 = vmatmul.mubr.msk.bf16.vlgmr.msra.gmra.mxu1 %vm5727_vm4, %v14081_v17  ;;  %10007 = vmatpush3.bf16.msra.mxu0 %v5673_v10  ;;  %v5677_v31 = vpop.permute.xlu0 %5676 }
 0x56f   : > { %10017 = vmatpush3.bf16.msra.mxu1 %v5675_v57  ;;  %10008 = vmatprep.subr.bf16.mxu0 %v10513_v20  ;;  %v5679_v52 = vpop.permute.xlu1 %5678 }
 0x570   : > { %10018 = vmatprep.subr.bf16.mxu1 %v10513_v20  ;;  %10012 = vmatprep.mubr.msk.bf16.mxu0 %vm10514_vm2, %v10513_v20 }
 0x571   : > { %10022 = vmatprep.mubr.msk.bf16.mxu1 %vm10514_vm2, %v10513_v20 }
 0x572   : > { %10009 = vmatpush3.bf16.msra.mxu0 %v5577_v49  ;;  %v7049_v49 = vld [vmem:[%s15333_s7 + $0x30] sm:$0xff] }
 0x573   : > { %10019 = vmatpush3.bf16.msra.mxu1 %v5579_v51  ;;  %10010 = vmatprep.subr.bf16.mxu0 %v10513_v20 }
 0x574   : > { %10020 = vmatprep.subr.bf16.mxu1 %v10513_v20 }
 0x576   : > { %10011 = vmatpush3.bf16.msra.mxu0 %v14056_v28  ;;  %v5581_v28 = vpop.permute.xlu0 %5580 }
 0x577   : > { %10021 = vmatpush3.bf16.msra.mxu1 %v14061_v11  ;;  %10026 = vmatprep.subr.bf16.mxu0 %v10513_v20  ;;  %v5583_v11 = vpop.permute.xlu1 %5582 }
 0x578   : > { %10036 = vmatprep.subr.bf16.mxu1 %v10513_v20 }
 0x579   : > { %10013 = vmatmul.mubr.msk.bf16.vlgmr.msra.gmra.mxu0 %vm5727_vm4, %v14081_v17 }
 0x57a   : > { %10023 = vmatmul.mubr.msk.bf16.vlgmr.msra.gmra.mxu1 %vm5727_vm4, %v14081_v17  ;;  %10027 = vmatpush3.bf16.msra.mxu0 %v5677_v31  ;;  %v5681_v62 = vpop.permute.xlu0 %5680 }
 0x57b   : > { %10037 = vmatpush3.bf16.msra.mxu1 %v5679_v52  ;;  %10028 = vmatprep.subr.bf16.mxu0 %v10513_v20  ;;  %v5683_v58 = vpop.permute.xlu1 %5682 }
 0x57c   : > { %10038 = vmatprep.subr.bf16.mxu1 %v10513_v20  ;;  %10032 = vmatprep.mubr.msk.bf16.mxu0 %vm10514_vm2, %v10513_v20 }
 0x57d   : > { %10042 = vmatprep.mubr.msk.bf16.mxu1 %vm10514_vm2, %v10513_v20 }
 0x57e   : > { %10029 = vmatpush3.bf16.msra.mxu0 %v5581_v28 }
 0x57f   : > { %10039 = vmatpush3.bf16.msra.mxu1 %v5583_v11  ;;  %10030 = vmatprep.subr.bf16.mxu0 %v10513_v20  ;;  %v8709_v11 = vld [vmem:[%s15333_s7 + $0x98] sm:$0xff] }
 0x580   : > { %10040 = vmatprep.subr.bf16.mxu1 %v10513_v20 }
 0x582   : > { %10031 = vmatpush3.bf16.msra.mxu0 %v14083_v18  ;;  %v5585_v18 = vpop.permute.xlu0 %5584 }
 0x583   : > { %10041 = vmatpush3.bf16.msra.mxu1 %v14094_v55  ;;  %10046 = vmatprep.subr.bf16.mxu0 %v10513_v20  ;;  %v5587_v55 = vpop.permute.xlu1 %5586 }
 0x584   : > { %10056 = vmatprep.subr.bf16.mxu1 %v10513_v20 }
 0x585   : > { %10033 = vmatmul.mubr.msk.bf16.vlgmr.msra.gmra.mxu0 %vm5727_vm4, %v14081_v17 }
 0x586   : > { %10043 = vmatmul.mubr.msk.bf16.vlgmr.msra.gmra.mxu1 %vm5727_vm4, %v14081_v17  ;;  %10047 = vmatpush3.bf16.msra.mxu0 %v5681_v62 }
 0x587   : > { %10057 = vmatpush3.bf16.msra.mxu1 %v5683_v58  ;;  %10048 = vmatprep.subr.bf16.mxu0 %v10513_v20 }
 0x588   : > { %10058 = vmatprep.subr.bf16.mxu1 %v10513_v20  ;;  %10052 = vmatprep.mubr.msk.bf16.mxu0 %vm10514_vm2, %v10513_v20 }
 0x589   : > { %10062 = vmatprep.mubr.msk.bf16.mxu1 %vm10514_vm2, %v10513_v20 }
 0x58a   : > { %10049 = vmatpush3.bf16.msra.mxu0 %v5585_v18  ;;  %v7048_v18 = vld [vmem:[%s15333_s7 + $0x28] sm:$0xff] }
 0x58b   : > { %10059 = vmatpush3.bf16.msra.mxu1 %v5587_v55  ;;  %10050 = vmatprep.subr.bf16.mxu0 %v10513_v20 }
 0x58c   : > { %10060 = vmatprep.subr.bf16.mxu1 %v10513_v20 }
 0x58e   : > { %10051 = vmatpush3.bf16.msra.mxu0 %v14129_v15 }
 0x58f   : > { %10061 = vmatpush3.bf16.msra.mxu1 %v14138_v19  ;;  %10066 = vmatprep.subr.bf16.mxu0 %v10513_v20 }
 0x590   : > { %10076 = vmatprep.subr.bf16.mxu1 %v10513_v20 }
 0x591   : > { %10053 = vmatmul.mubr.msk.bf16.vlgmr.msra.gmra.mxu0 %vm5727_vm4, %v14081_v17 }
 0x592   : > { %10063 = vmatmul.mubr.msk.bf16.vlgmr.msra.gmra.mxu1 %vm5727_vm4, %v14081_v17  ;;  %10072 = vmatprep.mubr.msk.bf16.mxu0 %vm10514_vm2, %v10513_v20 }
 0x593   : > { %10082 = vmatprep.mubr.msk.bf16.mxu1 %vm10514_vm2, %v10513_v20 }
 0x599   : > { %v5685_v33 = vpop.permute.xlu0 %5684 }
 0x59a   : > { %10067 = vmatpush3.bf16.msra.mxu0 %v5685_v33 }
 0x59b   : > { %10068 = vmatprep.subr.bf16.mxu0 %v10513_v20 }
 0x59d   : > { %v5687_v15 = vpop.permute.xlu1 %5686 }
 0x59e   : > { %v5589_v19 = vpop.permute.xlu0 %5588  ;;  %10077 = vmatpush3.bf16.msra.mxu1 %v5687_v15  ;;  %v8708_v15 = vld [vmem:[%s15333_s7 + $0x90] sm:$0xff] }
 0x59f   : > { %10069 = vmatpush3.bf16.msra.mxu0 %v5589_v19  ;;  %10078 = vmatprep.subr.bf16.mxu1 %v10513_v20 }
 0x5a0   : > { %10070 = vmatprep.subr.bf16.mxu0 %v10513_v20 }
 0x5a1   : > { %v5591_v60 = vpop.permute.xlu1 %5590 }
 0x5a2   : > { %10079 = vmatpush3.bf16.msra.mxu1 %v5591_v60  ;;  %v7047_v60 = vld [vmem:[%s15333_s7 + $0x20] sm:$0xff] }
 0x5a3   : > { %10071 = vmatpush3.bf16.msra.mxu0 %v14197_v61  ;;  %10080 = vmatprep.subr.bf16.mxu1 %v10513_v20  ;;  %v8717_v20 = vld [vmem:[%s15333_s7 + $0xd8] sm:$0xff] }
 0x5a4   : > { %10086 = vmatprep.subr.mxu0 %v8719_v56 }
 0x5a6   : > { %10073 = vmatmul.mubr.msk.bf16.vlgmr.msra.gmra.mxu0 %vm5727_vm4, %v14081_v17  ;;  %10081 = vmatpush3.bf16.msra.mxu1 %v14208_v14  ;;  %v7052_v14 = vld [vmem:[%s15333_s7 + $0x48] sm:$0xff] }
 0x5a7   : > { %10122 = vmatprep.subr.mxu1 %v7057_v48  ;;  %10087 = vmatpush3.msra.mxu0 %v8719_v56 }
 0x5a8   : > { %10088 = vmatprep.subr.mxu0 %v8718_v53 }
 0x5a9   : > { %10083 = vmatmul.mubr.msk.bf16.vlgmr.msra.gmra.mxu1 %vm5727_vm4, %v14081_v17  ;;  %v5765_v40 = vpop.f32.mrf.mxu0  ;;  %10089 = vmatpush3.msra.mxu0 %v8718_v53  ;;  %v8715_v17 = vld [vmem:[%s15333_s7 + $0xc8] sm:$0xff] }
 0x5aa   : > { %v5805_v32 = vpop.f32.mrf.mxu1  ;;  %10123 = vmatpush3.msra.mxu1 %v7057_v48  ;;  %10090 = vmatprep.subr.mxu0 %v8717_v20 }
 0x5ab   : > { %v14396_v6 = vpop.permute.xlu0 %5724  ;;  %v9774_v34 = vpop.f32.mrf.mxu0  ;;  %10124 = vmatprep.subr.mxu1 %v7056_v24  ;;  %10091 = vmatpush3.msra.mxu0 %v8717_v20  ;;  %v8707_v20 = vld [vmem:[%s15333_s7 + $0x88] sm:$0xff] }
 0x5ac   : > { %v9784_v45 = vpop.f32.mrf.mxu1  ;;  %v5766_v7 = vadd.f32 %v5765_v40, %v14396_v6  ;;  %v5806_v9 = vadd.f32 %v5805_v32, %v14396_v6  ;;  %10125 = vmatpush3.msra.mxu1 %v7056_v24  ;;  %10092 = vmatprep.subr.mxu0 %v8716_v37  ;;  %v7046_v32 = vld [vmem:[%s15333_s7 + $0x18] sm:$0xff] }
 0x5ad   : > { %v5768_v36 = vpop.f32.mrf.mxu0  ;;  %10126 = vmatprep.subr.mxu1 %v7055_v42  ;;  %10093 = vmatpush3.msra.mxu0 %v8716_v37 }
 0x5ae   : > { %v5808_v23 = vpop.f32.mrf.mxu1  ;;  %v14409_v61 = vmax.f32 %v5766_v7, 0.0  ;;  %v14411_v2 = vmax.f32 %v5806_v9, 0.0  ;;  %10127 = vmatpush3.msra.mxu1 %v7055_v42  ;;  %10094 = vmatprep.subr.mxu0 %v8715_v17  ;;  %v7045_v9 = vld [vmem:[%s15333_s7 + $0x10] sm:$0xff] }
 0x5af   : > { %v9775_v5 = vpop.f32.mrf.mxu0  ;;  %10128 = vmatprep.subr.mxu1 %v7054_v63  ;;  %10095 = vmatpush3.msra.mxu0 %v8715_v17  ;;  %v8706_v17 = vld [vmem:[%s15333_s7 + $0x80] sm:$0xff] }
 0x5b0   : > { %v9785_v27 = vpop.f32.mrf.mxu1  ;;  %10129 = vmatpush3.msra.mxu1 %v7054_v63  ;;  %10096 = vmatprep.subr.mxu0 %v8714_v30  ;;  %v7428_v59 = vrot.slane %v14409_v61, 2  ;;  %v7429_v22 = vrot.slane %v14411_v2, 1  ;;  %v7597_v25 = vrot.slane %v14409_v61, 3  ;;  %v7598_v39 = vrot.slane %v14411_v2, 2 }
 0x5b1   : > { %10130 = vmatprep.subr.mxu1 %v7053_v8  ;;  %10097 = vmatpush3.msra.mxu0 %v8714_v30  ;;  %v7766_v54 = vrot.slane %v14409_v61, 4  ;;  %v7767_v38 = vrot.slane %v14411_v2, 3  ;;  %v7935_v26 = vrot.slane %v14409_v61, 5  ;;  %v7936_v4 = vrot.slane %v14411_v2, 4 }
 0x5b2   : > { %10131 = vmatpush3.msra.mxu1 %v7053_v8  ;;  %10098 = vmatprep.subr.mxu0 %v8713_v41  ;;  %v7430_v43 = vsel %vm7107_vm5, %v7429_v22, %v7428_v59  ;;  %v7599_v3 = vsel %vm7107_vm5, %v7598_v39, %v7597_v25  ;;  %v8104_v47 = vrot.slane %v14409_v61, 6  ;;  %v8105_v29 = vrot.slane %v14411_v2, 5  ;;  %v8705_v8 = vld [vmem:[%s15333_s7 + $0x78] sm:$0xff]  ;;  %v7044_v22 = vld [vmem:[%s15333_s7 + $0x8] sm:$0xff] }
 0x5b3   : > { %10132 = vmatprep.subr.mxu1 %v7052_v14  ;;  %10099 = vmatpush3.msra.mxu0 %v8713_v41  ;;  %v14441_v12 = vsel %vm7107_vm5, %v7767_v38, %v7766_v54  ;;  %v8273_v1 = vrot.slane %v14409_v61, 7  ;;  %v8274_v50 = vrot.slane %v14411_v2, 6  ;;  %v7937_v44 = vsel %vm7107_vm5, %v7936_v4, %v7935_v26 }
 0x5b4   : > { %10133 = vmatpush3.msra.mxu1 %v7052_v14  ;;  %10100 = vmatprep.subr.mxu0 %v8712_v46  ;;  %v8106_v51 = vsel %vm7107_vm5, %v8105_v29, %v8104_v47  ;;  %v7106_v59 = vrot.slane %v14409_v61, 1 }
 0x5b5   : > { %v5845_v21 = vpop.f32.mrf.mxu0  ;;  %10134 = vmatprep.subr.mxu1 %v7051_v0  ;;  %10101 = vmatpush3.msra.mxu0 %v8712_v46  ;;  %v14461_v31 = vsel %vm7107_vm5, %v8274_v50, %v8273_v1 }
 0x5b6   : > { %v5846_v10 = vadd.f32 %v5845_v21, %v14396_v6  ;;  %v5885_v57 = vpop.f32.mrf.mxu1  ;;  %10135 = vmatpush3.msra.mxu1 %v7051_v0  ;;  %10102 = vmatprep.subr.mxu0 %v8711_v16  ;;  %v7108_v50 = vsel %vm7107_vm5, %v14411_v2, %v7106_v59 }
 0x5b7   : > { %v5886_v52 = vadd.f32 %v5885_v57, %v14396_v6  ;;  %v9794_v28 = vpop.f32.mrf.mxu0  ;;  %10136 = vmatprep.subr.mxu1 %v7050_v13  ;;  %10103 = vmatpush3.msra.mxu0 %v8711_v16 }
 0x5b8   : > { %v14467_v62 = vmax.f32 %v5846_v10, 0.0  ;;  %v9804_v58 = vpop.f32.mrf.mxu1  ;;  %10137 = vmatpush3.msra.mxu1 %v7050_v13  ;;  %10104 = vmatprep.subr.mxu0 %v8710_v35  ;;  %v7263_v13 = vrot.slane %v14411_v2, 7 }
 0x5b9   : > { %v14472_v55 = vmax.f32 %v5886_v52, 0.0  ;;  %v5848_v33 = vpop.f32.mrf.mxu0  ;;  %10138 = vmatprep.subr.mxu1 %v7049_v49  ;;  %10105 = vmatpush3.msra.mxu0 %v8710_v35 }
 0x5ba   : > { %v5888_v19 = vpop.f32.mrf.mxu1  ;;  %10139 = vmatpush3.msra.mxu1 %v7049_v49  ;;  %10106 = vmatprep.subr.mxu0 %v8709_v11  ;;  %v7431_v56 = vsel %vm7110_vm6, %v14467_v62, %v7430_v43  ;;  %v7600_v48 = vrot.slane %v14467_v62, 1  ;;  %v7769_v40 = vrot.slane %v14467_v62, 2  ;;  %v7938_v7 = vrot.slane %v14467_v62, 3 }
 0x5bb   : > { %v9795_v53 = vpop.f32.mrf.mxu0  ;;  %10140 = vmatprep.subr.mxu1 %v7048_v18  ;;  %10107 = vmatpush3.msra.mxu0 %v8709_v11  ;;  %v7432_v24 = vrot.slane %v14472_v55, 7  ;;  %v7771_v34 = vrot.slane %v14472_v55, 1  ;;  %v7940_v30 = vrot.slane %v14472_v55, 2  ;;  %v8107_v23 = vrot.slane %v14467_v62, 4 }
 0x5bc   : > { %v9805_v37 = vpop.f32.mrf.mxu1  ;;  %10141 = vmatpush3.msra.mxu1 %v7048_v18  ;;  %10108 = vmatprep.subr.mxu0 %v8708_v15  ;;  %v7601_v42 = vsel %vm7110_vm6, %v7600_v48, %v7599_v3  ;;  %v7770_v36 = vsel %vm7110_vm6, %v7769_v40, %v14441_v12  ;;  %v7939_v41 = vsel %vm7110_vm6, %v7938_v7, %v7937_v44  ;;  %v8109_v27 = vrot.slane %v14472_v55, 3  ;;  %v7043_v3 = vld [vmem:[%s15333_s7] sm:$0xff] }
 0x5bd   : > { %10142 = vmatprep.subr.mxu1 %v7047_v60  ;;  %10109 = vmatpush3.msra.mxu0 %v8708_v15  ;;  %v14497_v45 = vsel %vm7113_vm7, %v7432_v24, %v7431_v56  ;;  %v7602_v63 = vsel %vm7113_vm7, %v14472_v55, %v7601_v42  ;;  %v7772_v5 = vsel %vm7113_vm7, %v7771_v34, %v7770_v36  ;;  %v8276_v14 = vrot.slane %v14467_v62, 5 }
 0x5be   : > { %10143 = vmatpush3.msra.mxu1 %v7047_v60  ;;  %10110 = vmatprep.subr.mxu0 %v8707_v20  ;;  %v7941_v46 = vsel %vm7113_vm7, %v7940_v30, %v7939_v41  ;;  %v8108_v25 = vsel %vm7110_vm6, %v8107_v23, %v8106_v51  ;;  %v8278_v39 = vrot.slane %v14472_v55, 4  ;;  %v7109_v38 = vrot.slane %v14467_v62, 7 }
 0x5bf   : > { %10144 = vmatprep.subr.mxu1 %v7046_v32  ;;  %10111 = vmatpush3.msra.mxu0 %v8707_v20  ;;  %v8110_v0 = vsel %vm7113_vm7, %v8109_v27, %v8108_v25  ;;  %v8277_v43 = vsel %vm7110_vm6, %v8276_v14, %v14461_v31  ;;  %v7112_v21 = vrot.slane %v14472_v55, 6  ;;  %v7265_v35 = vrot.slane %v14467_v62, 6 }
 0x5c0   : > { %10145 = vmatpush3.msra.mxu1 %v7046_v32  ;;  %10112 = vmatprep.subr.mxu0 %v8706_v17  ;;  %v8279_v12 = vsel %vm7113_vm7, %v8278_v39, %v8277_v43  ;;  %v7111_v57 = vsel %vm7110_vm6, %v7109_v38, %v7108_v50  ;;  %v7264_v2 = vsel %vm7107_vm5, %v7263_v13, %v14409_v61  ;;  %v7267_v28 = vrot.slane %v14472_v55, 5 }
 0x5c1   : > { %v5925_v54 = vpop.f32.mrf.mxu0  ;;  %10146 = vmatprep.subr.mxu1 %v7045_v9  ;;  %10113 = vmatpush3.msra.mxu0 %v8706_v17  ;;  %v7114_v18 = vsel %vm7113_vm7, %v7112_v21, %v7111_v57  ;;  %v7266_v33 = vsel %vm7110_vm6, %v7265_v35, %v7264_v2 }
 0x5c2   : > { %v5926_v26 = vadd.f32 %v5925_v54, %v14396_v6  ;;  %v5965_v16 = vpop.f32.mrf.mxu1  ;;  %10147 = vmatpush3.msra.mxu1 %v7045_v9  ;;  %10114 = vmatprep.subr.mxu0 %v8705_v8  ;;  %v7268_v40 = vsel %vm7113_vm7, %v7267_v28, %v7266_v33 }
 0x5c3   : > { %v5966_v4 = vadd.f32 %v5965_v16, %v14396_v6  ;;  %v9814_v47 = vpop.f32.mrf.mxu0  ;;  %10148 = vmatprep.subr.mxu1 %v7044_v22  ;;  %10115 = vmatpush3.msra.mxu0 %v8705_v8 }
 0x5c4   : > { %v7015_v29 = vmax.f32 %v5926_v26, 0.0  ;;  %v9824_v1 = vpop.f32.mrf.mxu1  ;;  %10149 = vmatpush3.msra.mxu1 %v7044_v22 }
 0x5c5   : > { %v7016_v44 = vmax.f32 %v5966_v4, 0.0  ;;  %v5928_v10 = vpop.f32.mrf.mxu0  ;;  %10150 = vmatprep.subr.mxu1 %v7043_v3 }
 0x5c6   : > { %v5968_v49 = vpop.f32.mrf.mxu1  ;;  %10151 = vmatpush3.msra.mxu1 %v7043_v3  ;;  %v7434_v51 = vrot.slane %v7015_v29, 6  ;;  %v7603_v31 = vrot.slane %v7015_v29, 7  ;;  %v7115_v60 = vrot.slane %v7015_v29, 5  ;;  %v7269_v56 = vrot.slane %v7015_v29, 4 }
 0x5c7   : > { %v9815_v52 = vpop.f32.mrf.mxu0  ;;  %v7436_v11 = vrot.slane %v7016_v44, 5  ;;  %v7605_v62 = vrot.slane %v7016_v44, 6  ;;  %v7773_v55 = vsel %vm7116_vm8, %v7015_v29, %v7772_v5  ;;  %v7774_v53 = vrot.slane %v7016_v44, 7 }
 0x5c8   : > { %v9825_v58 = vpop.f32.mrf.mxu1  ;;  %v7435_v15 = vsel %vm7116_vm8, %v7434_v51, %v14497_v45  ;;  %v7604_v19 = vsel %vm7116_vm8, %v7603_v31, %v7602_v63  ;;  %v7942_v20 = vrot.slane %v7015_v29, 1  ;;  %v8111_v24 = vrot.slane %v7015_v29, 2  ;;  %v14573_v51 = vld [vmem:[%s15333_s7 + $0x160] sm:$0xff]  ;;  %v14578_v31 = vld [vmem:[%s15333_s7 + $0x1d8] sm:$0xff] }
 0x5c9   : > { %v7437_v48 = vsel %vm7119_vm9, %v7436_v11, %v7435_v15  ;;  %v7606_v61 = vsel %vm7119_vm9, %v7605_v62, %v7604_v19  ;;  %v8113_v37 = vrot.slane %v7016_v44, 1  ;;  %v8280_v32 = vrot.slane %v7015_v29, 3  ;;  %10158 = vmatprep.subr.mxu0 %v14573_v51  ;;  %10194 = vmatprep.subr.mxu1 %v14578_v31 }
 0x5ca   : > { %v8282_v42 = vrot.slane %v7016_v44, 2  ;;  %v7118_v34 = vrot.slane %v7016_v44, 4  ;;  %v7775_v17 = vsel %vm7119_vm9, %v7774_v53, %v7773_v55  ;;  %v7943_v45 = vsel %vm7116_vm8, %v7942_v20, %v7941_v46 }
 0x5cb   : > { %v8112_v7 = vsel %vm7116_vm8, %v8111_v24, %v8110_v0  ;;  %v7271_v63 = vrot.slane %v7016_v44, 3  ;;  %v7944_v36 = vsel %vm7119_vm9, %v7016_v44, %v7943_v45  ;;  %v8281_v23 = vsel %vm7116_vm8, %v8280_v32, %v8279_v12 }
 0x5cc   : > { %v8114_v30 = vsel %vm7119_vm9, %v8113_v37, %v8112_v7  ;;  %v7117_v41 = vsel %vm7116_vm8, %v7115_v60, %v7114_v18  ;;  %v7270_v27 = vsel %vm7116_vm8, %v7269_v56, %v7268_v40  ;;  %v8283_v14 = vsel %vm7119_vm9, %v8282_v42, %v8281_v23 }
 0x5cd   : > { %v6005_v9 = vpop.f32.mrf.mxu0  ;;  %v7120_v38 = vsel %vm7119_vm9, %v7118_v34, %v7117_v41  ;;  %v7272_v0 = vsel %vm7119_vm9, %v7271_v63, %v7270_v27 }
 0x5ce   : > { %v6006_v8 = vadd.f32 %v6005_v9, %v14396_v6  ;;  %v6045_v5 = vpop.f32.mrf.mxu1 }
 0x5cf   : > { %v6046_v59 = vadd.f32 %v6045_v5, %v14396_v6  ;;  %v9834_v22 = vpop.f32.mrf.mxu0 }
 0x5d0   : > { %v7017_v46 = vmax.f32 %v6006_v8, 0.0  ;;  %v9844_v25 = vpop.f32.mrf.mxu1 }
 0x5d1   : > { %v7018_v39 = vmax.f32 %v6046_v59, 0.0  ;;  %v6008_v54 = vpop.f32.mrf.mxu0 }
 0x5d2   : > { %v6048_v43 = vpop.f32.mrf.mxu1  ;;  %v7121_v26 = vrot.slane %v7017_v46, 3  ;;  %v7273_v16 = vrot.slane %v7017_v46, 2  ;;  %v7438_v3 = vrot.slane %v7017_v46, 4  ;;  %v7607_v12 = vrot.slane %v7017_v46, 5 }
 0x5d3   : > { %v7124_v4 = vrot.slane %v7018_v39, 2  ;;  %v7275_v47 = vrot.slane %v7018_v39, 1  ;;  %v9835_v13 = vpop.f32.mrf.mxu0  ;;  %v7440_v29 = vrot.slane %v7018_v39, 3  ;;  %v7609_v1 = vrot.slane %v7018_v39, 4 }
 0x5d4   : > { %v7123_v50 = vsel %vm7122_vm10, %v7121_v26, %v7120_v38  ;;  %v7274_v21 = vsel %vm7122_vm10, %v7273_v16, %v7272_v0  ;;  %v9845_v35 = vpop.f32.mrf.mxu1  ;;  %v7439_v44 = vsel %vm7122_vm10, %v7438_v3, %v7437_v48  ;;  %v7608_v10 = vsel %vm7122_vm10, %v7607_v12, %v7606_v61 }
 0x5d5   : > { %v7126_v57 = vsel %vm7125_vm11, %v7124_v4, %v7123_v50  ;;  %v7276_v49 = vsel %vm7125_vm11, %v7275_v47, %v7274_v21  ;;  %v14581_v52 = vsel %vm7125_vm11, %v7440_v29, %v7439_v44  ;;  %v14584_v2 = vsel %vm7125_vm11, %v7609_v1, %v7608_v10 }
 0x5d6   : > { %10116 = vmatprep.mubr.msk.f32.mxu0 %vm7169_vm12, %v7126_v57  ;;  %10152 = vmatprep.mubr.msk.f32.mxu1 %vm7169_vm12, %v7276_v49  ;;  %v7776_v28 = vrot.slane %v7017_v46, 6  ;;  %v7778_v11 = vrot.slane %v7018_v39, 5  ;;  %v7945_v62 = vrot.slane %v7017_v46, 7  ;;  %v8115_v58 = vsel %vm7122_vm10, %v7017_v46, %v8114_v30 }
 0x5d7   : > { %v7947_v18 = vrot.slane %v7018_v39, 6  ;;  %v8116_v33 = vrot.slane %v7018_v39, 7  ;;  %v8284_v15 = vrot.slane %v7017_v46, 1 }
 0x5d8   : > { %v7777_v19 = vsel %vm7122_vm10, %v7776_v28, %v7775_v17  ;;  %v7946_v60 = vsel %vm7122_vm10, %v7945_v62, %v7944_v36 }
 0x5d9   : > { %v6085_v56 = vpop.f32.mrf.mxu0  ;;  %v14594_v48 = vsel %vm7125_vm11, %v7778_v11, %v7777_v19  ;;  %v14597_v61 = vsel %vm7125_vm11, %v7947_v18, %v7946_v60  ;;  %v14600_v55 = vsel %vm7125_vm11, %v8116_v33, %v8115_v58  ;;  %v8285_v53 = vsel %vm7122_vm10, %v8284_v15, %v8283_v14 }
 0x5da   : > { %v6086_v20 = vadd.f32 %v6085_v56, %v14396_v6  ;;  %v6125_v24 = vpop.f32.mrf.mxu1  ;;  %v14605_v40 = vsel %vm7125_vm11, %v7018_v39, %v8285_v53 }
 0x5db   : > { %v6126_v37 = vadd.f32 %v6125_v24, %v14396_v6  ;;  %v9854_v32 = vpop.f32.mrf.mxu0 }
 0x5dc   : > { %v14608_v42 = vmax.f32 %v6086_v20, 0.0  ;;  %v9864_v34 = vpop.f32.mrf.mxu1 }
 0x5dd   : > { %v14610_v17 = vmax.f32 %v6126_v37, 0.0  ;;  %v6088_v45 = vpop.f32.mrf.mxu0 }
 0x5de   : > { %v6128_v7 = vpop.f32.mrf.mxu1  ;;  %v7442_v9 = vrot.slane %v14608_v42, 2  ;;  %v7611_v63 = vrot.slane %v14608_v42, 3  ;;  %v7780_v36 = vrot.slane %v14608_v42, 4  ;;  %v7949_v27 = vrot.slane %v14608_v42, 5 }
 0x5df   : > { %v9855_v30 = vpop.f32.mrf.mxu0  ;;  %v7443_v23 = vrot.slane %v14610_v17, 1  ;;  %v7612_v8 = vrot.slane %v14610_v17, 2  ;;  %v7781_v5 = vrot.slane %v14610_v17, 3  ;;  %v7950_v14 = vrot.slane %v14610_v17, 4 }
 0x5e0   : > { %v9865_v41 = vpop.f32.mrf.mxu1  ;;  %v8118_v59 = vrot.slane %v14608_v42, 6  ;;  %v8119_v54 = vrot.slane %v14610_v17, 5  ;;  %v8287_v38 = vrot.slane %v14608_v42, 7  ;;  %v8288_v0 = vrot.slane %v14610_v17, 6 }
 0x5e1   : > { %v7444_v22 = vsel %vm7107_vm5, %v7443_v23, %v7442_v9  ;;  %v7613_v46 = vsel %vm7107_vm5, %v7612_v8, %v7611_v63  ;;  %v7782_v25 = vsel %vm7107_vm5, %v7781_v5, %v7780_v36  ;;  %v7951_v39 = vsel %vm7107_vm5, %v7950_v14, %v7949_v27 }
 0x5e2   : > { %v8120_v43 = vsel %vm7107_vm5, %v8119_v54, %v8118_v59  ;;  %v8289_v26 = vsel %vm7107_vm5, %v8288_v0, %v8287_v38  ;;  %v7127_v37 = vrot.slane %v14608_v42, 1  ;;  %v7277_v27 = vrot.slane %v14610_v17, 7 }
 0x5e5   : > { %v6165_v16 = vpop.f32.mrf.mxu0 }
 0x5e6   : > { %v6166_v3 = vadd.f32 %v6165_v16, %v14396_v6  ;;  %v6205_v12 = vpop.f32.mrf.mxu1 }
 0x5e7   : > { %v6206_v4 = vadd.f32 %v6205_v12, %v14396_v6  ;;  %v9874_v47 = vpop.f32.mrf.mxu0 }
 0x5e8   : > { %v7021_v13 = vmax.f32 %v6166_v3, 0.0  ;;  %v9884_v29 = vpop.f32.mrf.mxu1  ;;  %v7278_v3 = vsel %vm7107_vm5, %v7277_v27, %v14608_v42 }
 0x5e9   : > { %v14632_v1 = vmax.f32 %v6206_v4, 0.0  ;;  %v6168_v50 = vpop.f32.mrf.mxu0 }
 0x5ea   : > { %v6208_v21 = vpop.f32.mrf.mxu1  ;;  %v7445_v35 = vsel %vm7110_vm6, %v7021_v13, %v7444_v22  ;;  %v7614_v44 = vrot.slane %v7021_v13, 1  ;;  %v7783_v49 = vrot.slane %v7021_v13, 2  ;;  %v7952_v15 = vrot.slane %v7021_v13, 3 }
 0x5eb   : > { %v9875_v10 = vpop.f32.mrf.mxu0  ;;  %v7446_v57 = vrot.slane %v14632_v1, 7  ;;  %v7785_v62 = vrot.slane %v14632_v1, 1  ;;  %v7954_v19 = vrot.slane %v14632_v1, 2  ;;  %v8121_v60 = vrot.slane %v7021_v13, 4 }
 0x5ec   : > { %v9885_v28 = vpop.f32.mrf.mxu1  ;;  %v7615_v11 = vsel %vm7110_vm6, %v7614_v44, %v7613_v46  ;;  %v7784_v33 = vsel %vm7110_vm6, %v7783_v49, %v7782_v25  ;;  %v8123_v53 = vrot.slane %v14632_v1, 3  ;;  %v8290_v20 = vrot.slane %v7021_v13, 5 }
 0x5ed   : > { %v7447_v58 = vsel %vm7113_vm7, %v7446_v57, %v7445_v35  ;;  %v7616_v18 = vsel %vm7113_vm7, %v14632_v1, %v7615_v11  ;;  %v7786_v56 = vsel %vm7113_vm7, %v7785_v62, %v7784_v33  ;;  %v8292_v24 = vrot.slane %v14632_v1, 4 }
 0x5ee   : > { %v7953_v32 = vsel %vm7110_vm6, %v7952_v15, %v7951_v39  ;;  %v8122_v34 = vsel %vm7110_vm6, %v8121_v60, %v8120_v43  ;;  %v7129_v7 = vrot.slane %v7021_v13, 7  ;;  %v8291_v36 = vsel %vm7110_vm6, %v8290_v20, %v8289_v26 }
 0x5ef   : > { %v7955_v9 = vsel %vm7113_vm7, %v7954_v19, %v7953_v32  ;;  %v8124_v63 = vsel %vm7113_vm7, %v8123_v53, %v8122_v34  ;;  %v8293_v8 = vsel %vm7113_vm7, %v8292_v24, %v8291_v36  ;;  %v7128_v22 = vsel %vm7107_vm5, %v14610_v17, %v7127_v37 }
 0x5f0   : > { %v7131_v46 = vrot.slane %v14632_v1, 6  ;;  %v7279_v25 = vrot.slane %v7021_v13, 6  ;;  %v7130_v38 = vsel %vm7110_vm6, %v7129_v7, %v7128_v22  ;;  %v7281_v12 = vrot.slane %v14632_v1, 5 }
 0x5f1   : > { %v6245_v45 = vpop.f32.mrf.mxu0 }
 0x5f2   : > { %v6246_v30 = vadd.f32 %v6245_v45, %v14396_v6  ;;  %v6285_v23 = vpop.f32.mrf.mxu1  ;;  %v7132_v17 = vsel %vm7113_vm7, %v7131_v46, %v7130_v38  ;;  %v7280_v13 = vsel %vm7110_vm6, %v7279_v25, %v7278_v3 }
 0x5f3   : > { %v6286_v5 = vadd.f32 %v6285_v23, %v14396_v6  ;;  %v9894_v41 = vpop.f32.mrf.mxu0  ;;  %v7282_v11 = vsel %vm7113_vm7, %v7281_v12, %v7280_v13  ;;  %v8760_v13 = vld [vmem:[%s15333_s7 + $0x1d0] sm:$0xff] }
 0x5f4   : > { %v7023_v14 = vmax.f32 %v6246_v30, 0.0  ;;  %v9904_v59 = vpop.f32.mrf.mxu1 }
 0x5f5   : > { %v7024_v39 = vmax.f32 %v6286_v5, 0.0  ;;  %v6248_v54 = vpop.f32.mrf.mxu0 }
 0x5f6   : > { %v6288_v0 = vpop.f32.mrf.mxu1  ;;  %v7448_v43 = vrot.slane %v7023_v14, 6  ;;  %v7617_v26 = vrot.slane %v7023_v14, 7  ;;  %v7133_v35 = vrot.slane %v7023_v14, 5  ;;  %v7283_v44 = vrot.slane %v7023_v14, 4 }
 0x5f7   : > { %v9895_v16 = vpop.f32.mrf.mxu0  ;;  %v7450_v4 = vrot.slane %v7024_v39, 5  ;;  %v7619_v47 = vrot.slane %v7024_v39, 6  ;;  %v7787_v42 = vsel %vm7116_vm8, %v7023_v14, %v7786_v56  ;;  %v7788_v1 = vrot.slane %v7024_v39, 7 }
 0x5f8   : > { %v9905_v29 = vpop.f32.mrf.mxu1  ;;  %v7449_v50 = vsel %vm7116_vm8, %v7448_v43, %v7447_v58  ;;  %v7618_v21 = vsel %vm7116_vm8, %v7617_v26, %v7616_v18  ;;  %v7956_v49 = vrot.slane %v7023_v14, 1  ;;  %v8125_v28 = vrot.slane %v7023_v14, 2 }
 0x5f9   : > { %v7451_v10 = vsel %vm7119_vm9, %v7450_v4, %v7449_v50  ;;  %v7620_v57 = vsel %vm7119_vm9, %v7619_v47, %v7618_v21  ;;  %v8127_v62 = vrot.slane %v7024_v39, 1  ;;  %v8294_v33 = vrot.slane %v7023_v14, 3 }
 0x5fa   : > { %v8296_v15 = vrot.slane %v7024_v39, 2  ;;  %v7135_v19 = vrot.slane %v7024_v39, 4  ;;  %v7789_v58 = vsel %vm7119_vm9, %v7788_v1, %v7787_v42  ;;  %v7957_v18 = vsel %vm7116_vm8, %v7956_v49, %v7955_v9  ;;  %v8740_v42 = vld [vmem:[%s15333_s7 + $0x150] sm:$0xff]  ;;  %v8759_v1 = vld [vmem:[%s15333_s7 + $0x1c8] sm:$0xff] }
 0x5fb   : > { %v8126_v60 = vsel %vm7116_vm8, %v8125_v28, %v8124_v63  ;;  %v7285_v20 = vrot.slane %v7024_v39, 3  ;;  %v7958_v24 = vsel %vm7119_vm9, %v7024_v39, %v7957_v18  ;;  %v8295_v37 = vsel %vm7116_vm8, %v8294_v33, %v8293_v8 }
 0x5fc   : > { %v8128_v56 = vsel %vm7119_vm9, %v8127_v62, %v8126_v60  ;;  %v7134_v45 = vsel %vm7116_vm8, %v7133_v35, %v7132_v17  ;;  %v7284_v7 = vsel %vm7116_vm8, %v7283_v44, %v7282_v11  ;;  %v8297_v36 = vsel %vm7119_vm9, %v8296_v15, %v8295_v37  ;;  %v8741_v17 = vld [vmem:[%s15333_s7 + $0x158] sm:$0xff]  ;;  %v8758_v15 = vld [vmem:[%s15333_s7 + $0x1c0] sm:$0xff] }
 0x5fd   : > { %v6325_v53 = vpop.f32.mrf.mxu0  ;;  %v7136_v27 = vsel %vm7119_vm9, %v7135_v19, %v7134_v45  ;;  %v7286_v8 = vsel %vm7119_vm9, %v7285_v20, %v7284_v7  ;;  %v8738_v37 = vld [vmem:[%s15333_s7 + $0x140] sm:$0xff] }
 0x5fe   : > { %v6326_v32 = vadd.f32 %v6325_v53, %v14396_v6  ;;  %v6365_v34 = vpop.f32.mrf.mxu1 }
 0x5ff   : > { %v6366_v9 = vadd.f32 %v6365_v34, %v14396_v6  ;;  %v9914_v63 = vpop.f32.mrf.mxu0 }
 0x600   : > { %v7025_v30 = vmax.f32 %v6326_v32, 0.0  ;;  %v9924_v23 = vpop.f32.mrf.mxu1  ;;  %v8757_v32 = vld [vmem:[%s15333_s7 + $0x1b8] sm:$0xff] }
 0x601   : > { %v7026_v5 = vmax.f32 %v6366_v9, 0.0  ;;  %v6328_v41 = vpop.f32.mrf.mxu0  ;;  %v8737_v63 = vld [vmem:[%s15333_s7 + $0x138] sm:$0xff] }
 0x602   : > { %v6368_v14 = vpop.f32.mrf.mxu1  ;;  %v7137_v59 = vrot.slane %v7025_v30, 3  ;;  %v7287_v22 = vrot.slane %v7025_v30, 2  ;;  %v7452_v46 = vrot.slane %v7025_v30, 4  ;;  %v7621_v25 = vrot.slane %v7025_v30, 5 }
 0x603   : > { %v7139_v39 = vrot.slane %v7026_v5, 2  ;;  %v7289_v54 = vrot.slane %v7026_v5, 1  ;;  %v9915_v38 = vpop.f32.mrf.mxu0  ;;  %v7454_v0 = vrot.slane %v7026_v5, 3  ;;  %v7623_v43 = vrot.slane %v7026_v5, 4  ;;  %v8736_v14 = vld [vmem:[%s15333_s7 + $0x130] sm:$0xff] }
 0x604   : > { %v7138_v26 = vsel %vm7122_vm10, %v7137_v59, %v7136_v27  ;;  %v7288_v16 = vsel %vm7122_vm10, %v7287_v22, %v7286_v8  ;;  %v9925_v3 = vpop.f32.mrf.mxu1  ;;  %v7453_v12 = vsel %vm7122_vm10, %v7452_v46, %v7451_v10  ;;  %v7622_v4 = vsel %vm7122_vm10, %v7621_v25, %v7620_v57  ;;  %v8755_v59 = vld [vmem:[%s15333_s7 + $0x1a8] sm:$0xff] }
 0x605   : > { %v7140_v47 = vsel %vm7125_vm11, %v7139_v39, %v7138_v26  ;;  %v7290_v29 = vsel %vm7125_vm11, %v7289_v54, %v7288_v16  ;;  %v14697_v50 = vsel %vm7125_vm11, %v7454_v0, %v7453_v12  ;;  %v14700_v21 = vsel %vm7125_vm11, %v7623_v43, %v7622_v4  ;;  %v8735_v43 = vld [vmem:[%s15333_s7 + $0x128] sm:$0xff]  ;;  %v8754_v26 = vld [vmem:[%s15333_s7 + $0x1a0] sm:$0xff] }
 0x606   : > { %10117 = vmatmul.mubr.msk.f32.vlgmr.msra.gmra.mxu0 %vm7169_vm12, %v7140_v47  ;;  %10153 = vmatmul.mubr.msk.f32.vlgmr.msra.gmra.mxu1 %vm7169_vm12, %v7290_v29  ;;  %v7790_v35 = vrot.slane %v7025_v30, 6  ;;  %v7792_v44 = vrot.slane %v7026_v5, 5  ;;  %v7959_v10 = vrot.slane %v7025_v30, 7  ;;  %v7961_v57 = vrot.slane %v7026_v5, 6 }
 0x607   : > { %10159 = vmatpush3.msra.mxu0 %v14573_v51  ;;  %10195 = vmatpush3.msra.mxu1 %v14578_v31  ;;  %v8129_v49 = vsel %vm7122_vm10, %v7025_v30, %v8128_v56  ;;  %v8130_v28 = vrot.slane %v7026_v5, 7  ;;  %v8298_v11 = vrot.slane %v7025_v30, 1  ;;  %v8739_v31 = vld [vmem:[%s15333_s7 + $0x148] sm:$0xff]  ;;  %v8756_v30 = vld [vmem:[%s15333_s7 + $0x1b0] sm:$0xff] }
 0x608   : > { %10160 = vmatprep.subr.mxu0 %v8741_v17  ;;  %10196 = vmatprep.subr.mxu1 %v8760_v13  ;;  %v7791_v62 = vsel %vm7122_vm10, %v7790_v35, %v7789_v58  ;;  %v7960_v51 = vsel %vm7122_vm10, %v7959_v10, %v7958_v24  ;;  %v8753_v35 = vld [vmem:[%s15333_s7 + $0x198] sm:$0xff] }
 0x609   : > { %v6405_v33 = vpop.f32.mrf.mxu0  ;;  %10161 = vmatpush3.msra.mxu0 %v8741_v17  ;;  %10197 = vmatpush3.msra.mxu1 %v8760_v13  ;;  %v14722_v19 = vsel %vm7125_vm11, %v7792_v44, %v7791_v62  ;;  %v14725_v18 = vsel %vm7125_vm11, %v7961_v57, %v7960_v51  ;;  %v14728_v58 = vsel %vm7125_vm11, %v8130_v28, %v8129_v49  ;;  %v8734_v13 = vld [vmem:[%s15333_s7 + $0x120] sm:$0xff]  ;;  %v8732_v51 = vld [vmem:[%s15333_s7 + $0x110] sm:$0xff] }
 0x60a   : > { %v6406_v60 = vadd.f32 %v6405_v33, %v14396_v6  ;;  %v6445_v53 = vpop.f32.mrf.mxu1  ;;  %10162 = vmatprep.subr.mxu0 %v8740_v42  ;;  %10198 = vmatprep.subr.mxu1 %v8759_v1  ;;  %v8299_v20 = vsel %vm7122_vm10, %v8298_v11, %v8297_v36  ;;  %v8751_v33 = vld [vmem:[%s15333_s7 + $0x188] sm:$0xff] }
 0x60b   : > { %v6446_v24 = vadd.f32 %v6445_v53, %v14396_v6  ;;  %v9934_v56 = vpop.f32.mrf.mxu0  ;;  %10163 = vmatpush3.msra.mxu0 %v8740_v42  ;;  %10199 = vmatpush3.msra.mxu1 %v8759_v1  ;;  %v14740_v34 = vsel %vm7125_vm11, %v7026_v5, %v8299_v20  ;;  %v8733_v42 = vld [vmem:[%s15333_s7 + $0x118] sm:$0xff]  ;;  %v8752_v1 = vld [vmem:[%s15333_s7 + $0x190] sm:$0xff]  ;;  %v8731_v20 = vld [vmem:[%s15333_s7 + $0x108] sm:$0xff] }
 0x60c   : > { %v14742_v45 = vmax.f32 %v6406_v60, 0.0  ;;  %v9944_v7 = vpop.f32.mrf.mxu1  ;;  %10164 = vmatprep.subr.mxu0 %v8739_v31  ;;  %10200 = vmatprep.subr.mxu1 %v8758_v15 }
 0x60d   : > { %v14744_v36 = vmax.f32 %v6446_v24, 0.0  ;;  %v6408_v9 = vpop.f32.mrf.mxu0  ;;  %10165 = vmatpush3.msra.mxu0 %v8739_v31  ;;  %10201 = vmatpush3.msra.mxu1 %v8758_v15  ;;  %v8750_v24 = vld [vmem:[%s15333_s7 + $0x180] sm:$0xff] }
 0x60e   : > { %v6448_v23 = vpop.f32.mrf.mxu1  ;;  %10166 = vmatprep.subr.mxu0 %v8738_v37  ;;  %10202 = vmatprep.subr.mxu1 %v8757_v32  ;;  %v7456_v5 = vrot.slane %v14742_v45, 2  ;;  %v7625_v41 = vrot.slane %v14742_v45, 3  ;;  %v7794_v27 = vrot.slane %v14742_v45, 4  ;;  %v7963_v54 = vrot.slane %v14742_v45, 5  ;;  %v8730_v9 = vld [vmem:[%s15333_s7 + $0x100] sm:$0xff] }
 0x60f   : > { %v9935_v8 = vpop.f32.mrf.mxu0  ;;  %10167 = vmatpush3.msra.mxu0 %v8738_v37  ;;  %10203 = vmatpush3.msra.mxu1 %v8757_v32  ;;  %v7457_v22 = vrot.slane %v14744_v36, 1  ;;  %v7626_v46 = vrot.slane %v14744_v36, 2  ;;  %v7795_v25 = vrot.slane %v14744_v36, 3  ;;  %v7964_v38 = vrot.slane %v14744_v36, 4 }
 0x610   : > { %v9945_v39 = vpop.f32.mrf.mxu1  ;;  %10168 = vmatprep.subr.mxu0 %v8737_v63  ;;  %10204 = vmatprep.subr.mxu1 %v8756_v30  ;;  %v8132_v0 = vrot.slane %v14742_v45, 6  ;;  %v8133_v12 = vrot.slane %v14744_v36, 5  ;;  %v8301_v29 = vrot.slane %v14742_v45, 7  ;;  %v8302_v17 = vrot.slane %v14744_v36, 6  ;;  %v8729_v8 = vld [vmem:[%s15333_s7 + $0xf8] sm:$0xff] }
 0x611   : > { %10169 = vmatpush3.msra.mxu0 %v8737_v63  ;;  %10205 = vmatpush3.msra.mxu1 %v8756_v30  ;;  %v7458_v16 = vsel %vm7107_vm5, %v7457_v22, %v7456_v5  ;;  %v7627_v3 = vsel %vm7107_vm5, %v7626_v46, %v7625_v41  ;;  %v14777_v4 = vsel %vm7107_vm5, %v7795_v25, %v7794_v27  ;;  %v8749_v63 = vld [vmem:[%s15333_s7 + $0x178] sm:$0xff] }
 0x612   : > { %10170 = vmatprep.subr.mxu0 %v8736_v14  ;;  %10206 = vmatprep.subr.mxu1 %v8755_v59  ;;  %v14780_v47 = vsel %vm7107_vm5, %v7964_v38, %v7963_v54  ;;  %v14791_v44 = vsel %vm7107_vm5, %v8133_v12, %v8132_v0  ;;  %v14794_v10 = vsel %vm7107_vm5, %v8302_v17, %v8301_v29  ;;  %v8728_v38 = vld [vmem:[%s15333_s7 + $0xf0] sm:$0xff]  ;;  %v8747_v0 = vld [vmem:[%s15333_s7 + $0x168] sm:$0xff]  ;;  %v7141_v12 = vrot.slane %v14742_v45, 1 }
 0x613   : > { %10171 = vmatpush3.msra.mxu0 %v8736_v14  ;;  %10207 = vmatpush3.msra.mxu1 %v8755_v59  ;;  %v8748_v14 = vld [vmem:[%s15333_s7 + $0x170] sm:$0xff] }
 0x614   : > { %10172 = vmatprep.subr.mxu0 %v8735_v43  ;;  %10208 = vmatprep.subr.mxu1 %v8754_v26 }
 0x615   : > { %v6485_v57 = vpop.f32.mrf.mxu0  ;;  %10173 = vmatpush3.msra.mxu0 %v8735_v43  ;;  %10209 = vmatpush3.msra.mxu1 %v8754_v26 }
 0x616   : > { %v6486_v49 = vadd.f32 %v6485_v57, %v14396_v6  ;;  %v6525_v28 = vpop.f32.mrf.mxu1  ;;  %10174 = vmatprep.subr.mxu0 %v8734_v13  ;;  %10210 = vmatprep.subr.mxu1 %v8753_v35  ;;  %v14872_v57 = vld [vmem:[%s15333_s7 + $0x2c8] sm:$0xff] }
 0x617   : > { %v6526_v11 = vadd.f32 %v6525_v28, %v14396_v6  ;;  %v9954_v62 = vpop.f32.mrf.mxu0  ;;  %10175 = vmatpush3.msra.mxu0 %v8734_v13  ;;  %10211 = vmatpush3.msra.mxu1 %v8753_v35 }
 0x618   : > { %v14810_v31 = vmax.f32 %v6486_v49, 0.0  ;;  %v9964_v15 = vpop.f32.mrf.mxu1  ;;  %10176 = vmatprep.subr.mxu0 %v8733_v42  ;;  %10212 = vmatprep.subr.mxu1 %v8752_v1 }
 0x619   : > { %v14812_v60 = vmax.f32 %v6526_v11, 0.0  ;;  %v6488_v53 = vpop.f32.mrf.mxu0  ;;  %10177 = vmatpush3.msra.mxu0 %v8733_v42  ;;  %10213 = vmatpush3.msra.mxu1 %v8752_v1 }
 0x61a   : > { %v6528_v56 = vpop.f32.mrf.mxu1  ;;  %10178 = vmatprep.subr.mxu0 %v8732_v51  ;;  %10214 = vmatprep.subr.mxu1 %v8751_v33  ;;  %v7459_v37 = vsel %vm7110_vm6, %v14810_v31, %v7458_v16  ;;  %v7628_v32 = vrot.slane %v14810_v31, 1  ;;  %v7797_v23 = vrot.slane %v14810_v31, 2  ;;  %v7966_v22 = vrot.slane %v14810_v31, 3 }
 0x61b   : > { %v9955_v7 = vpop.f32.mrf.mxu0  ;;  %10179 = vmatpush3.msra.mxu0 %v8732_v51  ;;  %10215 = vmatpush3.msra.mxu1 %v8751_v33  ;;  %v7460_v30 = vrot.slane %v14812_v60, 7  ;;  %v7799_v27 = vrot.slane %v14812_v60, 1  ;;  %v7968_v39 = vrot.slane %v14812_v60, 2  ;;  %v8135_v54 = vrot.slane %v14810_v31, 4 }
 0x61c   : > { %v9965_v5 = vpop.f32.mrf.mxu1  ;;  %10180 = vmatprep.subr.mxu0 %v8731_v20  ;;  %10216 = vmatprep.subr.mxu1 %v8750_v24  ;;  %v7629_v41 = vsel %vm7110_vm6, %v7628_v32, %v7627_v3  ;;  %v7798_v25 = vsel %vm7110_vm6, %v7797_v23, %v14777_v4  ;;  %v7967_v26 = vsel %vm7110_vm6, %v7966_v22, %v14780_v47  ;;  %v8137_v16 = vrot.slane %v14812_v60, 3  ;;  %v14867_v47 = vld [vmem:[%s15333_s7 + $0x250] sm:$0xff] }
 0x61d   : > { %10181 = vmatpush3.msra.mxu0 %v8731_v20  ;;  %10217 = vmatpush3.msra.mxu1 %v8750_v24  ;;  %v7461_v59 = vsel %vm7113_vm7, %v7460_v30, %v7459_v37  ;;  %v7630_v46 = vsel %vm7113_vm7, %v14812_v60, %v7629_v41  ;;  %v7800_v43 = vsel %vm7113_vm7, %v7799_v27, %v7798_v25  ;;  %v8304_v3 = vrot.slane %v14810_v31, 5 }
 0x61e   : > { %10182 = vmatprep.subr.mxu0 %v8730_v9  ;;  %10218 = vmatprep.subr.mxu1 %v8749_v63  ;;  %v7969_v4 = vsel %vm7113_vm7, %v7968_v39, %v7967_v26  ;;  %v8136_v29 = vsel %vm7110_vm6, %v8135_v54, %v14791_v44  ;;  %v8306_v17 = vrot.slane %v14812_v60, 4  ;;  %v7143_v35 = vrot.slane %v14810_v31, 7 }
 0x61f   : > { %10183 = vmatpush3.msra.mxu0 %v8730_v9  ;;  %10219 = vmatpush3.msra.mxu1 %v8749_v63  ;;  %v8138_v42 = vsel %vm7113_vm7, %v8137_v16, %v8136_v29  ;;  %v8305_v44 = vsel %vm7110_vm6, %v8304_v3, %v14794_v10  ;;  %v7291_v51 = vrot.slane %v14744_v36, 7  ;;  %v7142_v53 = vsel %vm7107_vm5, %v14744_v36, %v7141_v12 }
 0x620   : > { %10184 = vmatprep.subr.mxu0 %v8729_v8  ;;  %10220 = vmatprep.subr.mxu1 %v8748_v14  ;;  %v8307_v28 = vsel %vm7113_vm7, %v8306_v17, %v8305_v44  ;;  %v7145_v10 = vrot.slane %v14812_v60, 6  ;;  %v7293_v20 = vrot.slane %v14810_v31, 6  ;;  %v7144_v37 = vsel %vm7110_vm6, %v7143_v35, %v7142_v53 }
 0x621   : > { %v6565_v13 = vpop.f32.mrf.mxu0  ;;  %10185 = vmatpush3.msra.mxu0 %v8729_v8  ;;  %10221 = vmatpush3.msra.mxu1 %v8748_v14  ;;  %v7292_v30 = vsel %vm7107_vm5, %v7291_v51, %v14742_v45  ;;  %v7295_v36 = vrot.slane %v14812_v60, 5 }
 0x622   : > { %v6566_v1 = vadd.f32 %v6565_v13, %v14396_v6  ;;  %v6605_v49 = vpop.f32.mrf.mxu1  ;;  %10186 = vmatprep.subr.mxu0 %v8728_v38  ;;  %10222 = vmatprep.subr.mxu1 %v8747_v0  ;;  %v7146_v41 = vsel %vm7113_vm7, %v7145_v10, %v7144_v37  ;;  %v7294_v27 = vsel %vm7110_vm6, %v7293_v20, %v7292_v30 }
 0x623   : > { %v6606_v11 = vadd.f32 %v6605_v49, %v14396_v6  ;;  %v9974_v62 = vpop.f32.mrf.mxu0  ;;  %10187 = vmatpush3.msra.mxu0 %v8728_v38  ;;  %10223 = vmatpush3.msra.mxu1 %v8747_v0  ;;  %v7296_v26 = vsel %vm7113_vm7, %v7295_v36, %v7294_v27 }
 0x624   : > { %v7031_v33 = vmax.f32 %v6566_v1, 0.0  ;;  %v9984_v15 = vpop.f32.mrf.mxu1  ;;  %10230 = vmatprep.subr.mxu0 %v14867_v47  ;;  %10266 = vmatprep.subr.mxu1 %v14872_v57 }
 0x625   : > { %v7032_v24 = vmax.f32 %v6606_v11, 0.0  ;;  %v6568_v56 = vpop.f32.mrf.mxu0 }
 0x626   : > { %v6608_v32 = vpop.f32.mrf.mxu1  ;;  %v7462_v7 = vrot.slane %v7031_v33, 6  ;;  %v7631_v9 = vrot.slane %v7031_v33, 7  ;;  %v7147_v22 = vrot.slane %v7031_v33, 5  ;;  %v7297_v25 = vrot.slane %v7031_v33, 4 }
 0x627   : > { %v9975_v63 = vpop.f32.mrf.mxu0  ;;  %v7464_v23 = vrot.slane %v7032_v24, 5  ;;  %v7633_v5 = vrot.slane %v7032_v24, 6  ;;  %v7801_v45 = vsel %vm7116_vm8, %v7031_v33, %v7800_v43  ;;  %v7802_v60 = vrot.slane %v7032_v24, 7 }
 0x628   : > { %v9985_v31 = vpop.f32.mrf.mxu1  ;;  %v7463_v8 = vsel %vm7116_vm8, %v7462_v7, %v7461_v59  ;;  %v7632_v14 = vsel %vm7116_vm8, %v7631_v9, %v7630_v46  ;;  %v7970_v38 = vrot.slane %v7031_v33, 1  ;;  %v8139_v0 = vrot.slane %v7031_v33, 2 }
 0x629   : > { %v7465_v39 = vsel %vm7119_vm9, %v7464_v23, %v7463_v8  ;;  %v7634_v54 = vsel %vm7119_vm9, %v7633_v5, %v7632_v14  ;;  %v8141_v16 = vrot.slane %v7032_v24, 1  ;;  %v8308_v3 = vrot.slane %v7031_v33, 3 }
 0x62a   : > { %v8310_v12 = vrot.slane %v7032_v24, 2  ;;  %v7149_v29 = vrot.slane %v7032_v24, 4  ;;  %v7803_v59 = vsel %vm7119_vm9, %v7802_v60, %v7801_v45  ;;  %v7971_v46 = vsel %vm7116_vm8, %v7970_v38, %v7969_v4 }
 0x62b   : > { %v8140_v17 = vsel %vm7116_vm8, %v8139_v0, %v8138_v42  ;;  %v7299_v35 = vrot.slane %v7032_v24, 3  ;;  %v7972_v44 = vsel %vm7119_vm9, %v7032_v24, %v7971_v46  ;;  %v8309_v1 = vsel %vm7116_vm8, %v8308_v3, %v8307_v28 }
 0x62c   : > { %v8142_v43 = vsel %vm7119_vm9, %v8141_v16, %v8140_v17  ;;  %v7148_v62 = vsel %vm7116_vm8, %v7147_v22, %v7146_v41  ;;  %v7298_v51 = vsel %vm7116_vm8, %v7297_v25, %v7296_v26  ;;  %v8311_v33 = vsel %vm7119_vm9, %v8310_v12, %v8309_v1 }
 0x62d   : > { %v6645_v13 = vpop.f32.mrf.mxu0  ;;  %v7150_v24 = vsel %vm7119_vm9, %v7149_v29, %v7148_v62  ;;  %v7300_v28 = vsel %vm7119_vm9, %v7299_v35, %v7298_v51 }
 0x62e   : > { %v6646_v49 = vadd.f32 %v6645_v13, %v14396_v6  ;;  %v6685_v11 = vpop.f32.mrf.mxu1 }
 0x62f   : > { %v6686_v4 = vadd.f32 %v6685_v11, %v14396_v6  ;;  %v9994_v42 = vpop.f32.mrf.mxu0 }
 0x630   : > { %v7033_v15 = vmax.f32 %v6646_v49, 0.0  ;;  %v10004_v53 = vpop.f32.mrf.mxu1 }
 0x631   : > { %v7034_v10 = vmax.f32 %v6686_v4, 0.0  ;;  %v6648_v20 = vpop.f32.mrf.mxu0 }
 0x632   : > { %v6688_v56 = vpop.f32.mrf.mxu1  ;;  %v7151_v37 = vrot.slane %v7033_v15, 3  ;;  %v7301_v32 = vrot.slane %v7033_v15, 2  ;;  %v7466_v7 = vrot.slane %v7033_v15, 4  ;;  %v7635_v9 = vrot.slane %v7033_v15, 5 }
 0x633   : > { %v7153_v63 = vrot.slane %v7034_v10, 2  ;;  %v7303_v30 = vrot.slane %v7034_v10, 1  ;;  %v9995_v36 = vpop.f32.mrf.mxu0  ;;  %v7468_v23 = vrot.slane %v7034_v10, 3  ;;  %v7637_v5 = vrot.slane %v7034_v10, 4 }
 0x634   : > { %v7152_v31 = vsel %vm7122_vm10, %v7151_v37, %v7150_v24  ;;  %v7302_v41 = vsel %vm7122_vm10, %v7301_v32, %v7300_v28  ;;  %v10005_v27 = vpop.f32.mrf.mxu1  ;;  %v7467_v8 = vsel %vm7122_vm10, %v7466_v7, %v7465_v39  ;;  %v7636_v14 = vsel %vm7122_vm10, %v7635_v9, %v7634_v54 }
 0x635   : > { %v7154_v22 = vsel %vm7125_vm11, %v7153_v63, %v7152_v31  ;;  %v7304_v25 = vsel %vm7125_vm11, %v7303_v30, %v7302_v41  ;;  %v14919_v45 = vsel %vm7125_vm11, %v7468_v23, %v7467_v8  ;;  %v14922_v60 = vsel %vm7125_vm11, %v7637_v5, %v7636_v14 }
 0x636   : > { %10119 = vmatprep.mubr.msk.f32.mxu0 %vm7169_vm12, %v7154_v22  ;;  %10155 = vmatprep.mubr.msk.f32.mxu1 %vm7169_vm12, %v7304_v25  ;;  %v7804_v38 = vrot.slane %v7033_v15, 6  ;;  %v7806_v0 = vrot.slane %v7034_v10, 5  ;;  %v7973_v26 = vrot.slane %v7033_v15, 7  ;;  %v7975_v39 = vrot.slane %v7034_v10, 6 }
 0x637   : > { %v8143_v54 = vsel %vm7122_vm10, %v7033_v15, %v8142_v43  ;;  %v8144_v16 = vrot.slane %v7034_v10, 7  ;;  %v8312_v3 = vrot.slane %v7033_v15, 1 }
 0x638   : > { %v7805_v12 = vsel %vm7122_vm10, %v7804_v38, %v7803_v59  ;;  %v7974_v29 = vsel %vm7122_vm10, %v7973_v26, %v7972_v44 }
 0x639   : > { %v6725_v46 = vpop.f32.mrf.mxu0  ;;  %v14930_v17 = vsel %vm7125_vm11, %v7806_v0, %v7805_v12  ;;  %v14933_v13 = vsel %vm7125_vm11, %v7975_v39, %v7974_v29  ;;  %v14936_v35 = vsel %vm7125_vm11, %v8144_v16, %v8143_v54  ;;  %v8313_v1 = vsel %vm7122_vm10, %v8312_v3, %v8311_v33 }
 0x63a   : > { %v6726_v43 = vadd.f32 %v6725_v46, %v14396_v6  ;;  %v6765_v49 = vpop.f32.mrf.mxu1  ;;  %v14941_v11 = vsel %vm7125_vm11, %v7034_v10, %v8313_v1 }
 0x63b   : > { %v6766_v59 = vadd.f32 %v6765_v49, %v14396_v6  ;;  %v10014_v44 = vpop.f32.mrf.mxu0 }
 0x63c   : > { %v14944_v62 = vmax.f32 %v6726_v43, 0.0  ;;  %v10024_v51 = vpop.f32.mrf.mxu1 }
 0x63d   : > { %v6728_v4 = vpop.f32.mrf.mxu0  ;;  %v14946_v42 = vmax.f32 %v6766_v59, 0.0 }
 0x63e   : > { %v6768_v15 = vpop.f32.mrf.mxu1  ;;  %v8146_v33 = vrot.slane %v14944_v62, 6  ;;  %v8315_v28 = vrot.slane %v14944_v62, 7 }
 0x63f   : > { %v10015_v53 = vpop.f32.mrf.mxu0  ;;  %v8147_v24 = vrot.slane %v14946_v42, 5  ;;  %v8316_v10 = vrot.slane %v14946_v42, 6 }
 0x640   : > { %v10025_v20 = vpop.f32.mrf.mxu1 }
 0x641   : > { %v8148_v56 = vsel %vm7107_vm5, %v8147_v24, %v8146_v33  ;;  %v8317_v37 = vsel %vm7107_vm5, %v8316_v10, %v8315_v28 }
 0x645   : > { %v6805_v32 = vpop.f32.mrf.mxu0 }
 0x646   : > { %v6806_v7 = vadd.f32 %v6805_v32, %v14396_v6  ;;  %v6845_v9 = vpop.f32.mrf.mxu1 }
 0x647   : > { %v6846_v63 = vadd.f32 %v6845_v9, %v14396_v6  ;;  %v10034_v30 = vpop.f32.mrf.mxu0 }
 0x648   : > { %v10044_v36 = vpop.f32.mrf.mxu1  ;;  %v14956_v5 = vmax.f32 %v6806_v7, 0.0  ;;  %v7305_v7 = vrot.slane %v14946_v42, 7 }
 0x649   : > { %v6808_v23 = vpop.f32.mrf.mxu0  ;;  %v14958_v41 = vmax.f32 %v6846_v63, 0.0 }
 0x64a   : > { %v6848_v31 = vpop.f32.mrf.mxu1  ;;  %v8149_v14 = vrot.slane %v14956_v5, 4  ;;  %v8318_v25 = vrot.slane %v14956_v5, 5  ;;  %v7157_v32 = vrot.slane %v14956_v5, 7  ;;  %v7307_v9 = vrot.slane %v14956_v5, 6 }
 0x64b   : > { %v10035_v27 = vpop.f32.mrf.mxu0  ;;  %v8151_v22 = vrot.slane %v14958_v41, 3  ;;  %v8320_v38 = vrot.slane %v14958_v41, 4  ;;  %v7159_v30 = vrot.slane %v14958_v41, 6  ;;  %v7306_v31 = vsel %vm7107_vm5, %v7305_v7, %v14944_v62 }
 0x64c   : > { %v10045_v8 = vpop.f32.mrf.mxu1  ;;  %v8150_v0 = vsel %vm7110_vm6, %v8149_v14, %v8148_v56  ;;  %v8319_v54 = vsel %vm7110_vm6, %v8318_v25, %v8317_v37  ;;  %v7155_v37 = vrot.slane %v14944_v62, 1  ;;  %v7309_v27 = vrot.slane %v14958_v41, 5 }
 0x64d   : > { %v8152_v39 = vsel %vm7113_vm7, %v8151_v22, %v8150_v0  ;;  %v8321_v12 = vsel %vm7113_vm7, %v8320_v38, %v8319_v54  ;;  %v7308_v22 = vsel %vm7110_vm6, %v7307_v9, %v7306_v31  ;;  %v7470_v0 = vrot.slane %v14944_v62, 2 }
 0x64e   : > { %v7156_v63 = vsel %vm7107_vm5, %v14946_v42, %v7155_v37 }
 0x64f   : > { %v7158_v23 = vsel %vm7110_vm6, %v7157_v32, %v7156_v63 }
 0x651   : > { %v6885_v26 = vpop.f32.mrf.mxu0 }
 0x652   : > { %v6886_v16 = vadd.f32 %v6885_v26, %v14396_v6  ;;  %v6925_v3 = vpop.f32.mrf.mxu1  ;;  %v7639_v26 = vrot.slane %v14944_v62, 3 }
 0x653   : > { %v6926_v29 = vadd.f32 %v6925_v3, %v14396_v6  ;;  %v10054_v46 = vpop.f32.mrf.mxu0  ;;  %v7471_v3 = vrot.slane %v14946_v42, 1 }
 0x654   : > { %v10064_v1 = vpop.f32.mrf.mxu1  ;;  %v14970_v49 = vmax.f32 %v6886_v16, 0.0  ;;  %v7160_v16 = vsel %vm7113_vm7, %v7159_v30, %v7158_v23 }
 0x655   : > { %v6888_v43 = vpop.f32.mrf.mxu0  ;;  %v14972_v44 = vmax.f32 %v6926_v29, 0.0  ;;  %v7472_v32 = vsel %vm7107_vm5, %v7471_v3, %v7470_v0 }
 0x656   : > { %v6928_v59 = vpop.f32.mrf.mxu1  ;;  %v8153_v15 = vrot.slane %v14970_v49, 2  ;;  %v8322_v20 = vrot.slane %v14970_v49, 3  ;;  %v7161_v14 = vrot.slane %v14970_v49, 5  ;;  %v7311_v25 = vrot.slane %v14970_v49, 4 }
 0x657   : > { %v10055_v51 = vpop.f32.mrf.mxu0  ;;  %v8155_v53 = vrot.slane %v14972_v44, 1  ;;  %v8324_v33 = vrot.slane %v14972_v44, 2  ;;  %v7163_v1 = vrot.slane %v14972_v44, 4  ;;  %v7310_v43 = vsel %vm7113_vm7, %v7309_v27, %v7308_v22 }
 0x658   : > { %v10065_v4 = vpop.f32.mrf.mxu1  ;;  %v8154_v24 = vsel %vm7116_vm8, %v8153_v15, %v8152_v39  ;;  %v8323_v10 = vsel %vm7116_vm8, %v8322_v20, %v8321_v12  ;;  %v7640_v12 = vrot.slane %v14946_v42, 2  ;;  %v7313_v59 = vrot.slane %v14972_v44, 3 }
 0x659   : > { %v8156_v28 = vsel %vm7119_vm9, %v8155_v53, %v8154_v24  ;;  %v14982_v56 = vsel %vm7119_vm9, %v8324_v33, %v8323_v10  ;;  %v7162_v4 = vsel %vm7116_vm8, %v7161_v14, %v7160_v16  ;;  %v7312_v53 = vsel %vm7116_vm8, %v7311_v25, %v7310_v43 }
 0x65a   : > { %v7164_v7 = vsel %vm7119_vm9, %v7163_v1, %v7162_v4  ;;  %v7314_v63 = vsel %vm7119_vm9, %v7313_v59, %v7312_v53  ;;  %v7474_v27 = vrot.slane %v14958_v41, 7  ;;  %v7473_v22 = vsel %vm7110_vm6, %v14956_v5, %v7472_v32  ;;  %v8795_v32 = vld [vmem:[%s15333_s7 + $0x2a8] sm:$0xff] }
 0x65b   : > { %v7645_v0 = vrot.slane %v14970_v49, 7  ;;  %v7647_v1 = vrot.slane %v14972_v44, 6 }
 0x65c   : > { %v7475_v16 = vsel %vm7113_vm7, %v7474_v27, %v7473_v22  ;;  %v8790_v27 = vld [vmem:[%s15333_s7 + $0x280] sm:$0xff]  ;;  %v8788_v22 = vld [vmem:[%s15333_s7 + $0x270] sm:$0xff] }
 0x666   : > { %v6965_v36 = vpop.f32.mrf.mxu0 }
 0x667   : > { %v6966_v8 = vadd.f32 %v6965_v36, %v14396_v6 }
 0x668   : > { %v10074_v38 = vpop.f32.mrf.mxu0 }
 0x669   : > { %v15001_v39 = vmax.f32 %v6966_v8, 0.0  ;;  %v7005_v54 = vpop.f32.mrf.mxu1  ;;  %v7476_v38 = vrot.slane %v14970_v49, 6 }
 0x66a   : > { %v6968_v29 = vpop.f32.mrf.mxu0  ;;  %v7006_v46 = vadd.f32 %v7005_v54, %v14396_v6  ;;  %v7642_v6 = vrot.slane %v14956_v5, 1 }
 0x66b   : > { %v10084_v51 = vpop.f32.mrf.mxu1  ;;  %v7165_v15 = vrot.slane %v15001_v39, 3  ;;  %v7315_v20 = vrot.slane %v15001_v39, 2  ;;  %v8157_v10 = vsel %vm7122_vm10, %v15001_v39, %v8156_v28  ;;  %v7641_v28 = vsel %vm7107_vm5, %v7640_v12, %v7639_v26 }
 0x66c   : > { %v15014_v33 = vmax.f32 %v7006_v46, 0.0  ;;  %v10075_v24 = vpop.f32.mrf.mxu0  ;;  %v7643_v25 = vsel %vm7110_vm6, %v7642_v6, %v7641_v28  ;;  %v8326_v26 = vrot.slane %v15001_v39, 1  ;;  %v7478_v29 = vrot.slane %v14972_v44, 5  ;;  %v8777_v6 = vld [vmem:[%s15333_s7 + $0x238] sm:$0xff]  ;;  %v8770_v28 = vld [vmem:[%s15333_s7 + $0x200] sm:$0xff] }
 0x66d   : > { %v7008_v37 = vpop.f32.mrf.mxu1  ;;  %v7166_v23 = vsel %vm7122_vm10, %v7165_v15, %v7164_v7  ;;  %v7316_v31 = vsel %vm7122_vm10, %v7315_v20, %v7314_v63  ;;  %v7644_v46 = vsel %vm7113_vm7, %v14958_v41, %v7643_v25  ;;  %v7477_v43 = vsel %vm7116_vm8, %v7476_v38, %v7475_v16  ;;  %v8778_v15 = vld [vmem:[%s15333_s7 + $0x240] sm:$0xff]  ;;  %v8775_v7 = vld [vmem:[%s15333_s7 + $0x228] sm:$0xff]  ;;  %v8773_v63 = vld [vmem:[%s15333_s7 + $0x218] sm:$0xff] }
 0x66e   : > { %v7167_v9 = vrot.slane %v15014_v33, 2  ;;  %v7317_v30 = vrot.slane %v15014_v33, 1  ;;  %v8158_v54 = vrot.slane %v15014_v33, 7  ;;  %v8327_v12 = vsel %vm7122_vm10, %v8326_v26, %v14982_v56  ;;  %v8798_v56 = vld [vmem:[%s15333_s7 + $0x2c0] sm:$0xff]  ;;  %v8776_v37 = vld [vmem:[%s15333_s7 + $0x230] sm:$0xff]  ;;  %v8787_v38 = vld [vmem:[%s15333_s7 + $0x268] sm:$0xff] }
 0x66f   : > { %v10085_v36 = vpop.f32.mrf.mxu1  ;;  %v7480_v59 = vrot.slane %v15001_v39, 4  ;;  %v7646_v51 = vsel %vm7116_vm8, %v7645_v0, %v7644_v46  ;;  %v7649_v4 = vrot.slane %v15001_v39, 5  ;;  %v8768_v25 = vld [vmem:[%s15333_s7 + $0x1f0] sm:$0xff]  ;;  %v7808_v0 = vrot.slane %v14944_v62, 4  ;;  %v8767_v46 = vld [vmem:[%s15333_s7 + $0x1e8] sm:$0xff] }
 0x670   : > { %v7168_v8 = vsel %vm7125_vm11, %v7167_v9, %v7166_v23  ;;  %v7318_v14 = vsel %vm7125_vm11, %v7317_v30, %v7316_v31  ;;  %v15045_v3 = vsel %vm7125_vm11, %v8158_v54, %v8157_v10  ;;  %v7648_v53 = vsel %vm7119_vm9, %v7647_v1, %v7646_v51  ;;  %v8796_v10 = vld [vmem:[%s15333_s7 + $0x2b0] sm:$0xff]  ;;  %v8774_v9 = vld [vmem:[%s15333_s7 + $0x220] sm:$0xff]  ;;  %v8791_v23 = vld [vmem:[%s15333_s7 + $0x288] sm:$0xff] }
 0x671   : > { %10120 = vmatmul.mubr.msk.f32.gmra.mxu0 %vm7169_vm12, %v7168_v8  ;;  %10156 = vmatmul.mubr.msk.f32.gmra.mxu1 %vm7169_vm12, %v7318_v14  ;;  %v8792_v30 = vld [vmem:[%s15333_s7 + $0x290] sm:$0xff]  ;;  %v8771_v31 = vld [vmem:[%s15333_s7 + $0x208] sm:$0xff]  ;;  %v8789_v8 = vld [vmem:[%s15333_s7 + $0x278] sm:$0xff]  ;;  %v7809_v54 = vrot.slane %v14946_v42, 3  ;;  %v7977_v26 = vrot.slane %v14944_v62, 5  ;;  %v7978_v16 = vrot.slane %v14946_v42, 4 }
 0x672   : > { %10188 = vmatprep.mubr.msk.f32.mxu0 %vm7169_vm12, %v14581_v52  ;;  %10224 = vmatprep.mubr.msk.f32.mxu1 %vm7169_vm12, %v14584_v2  ;;  %v15055_v52 = vsel %vm7125_vm11, %v15014_v33, %v8327_v12  ;;  %v8779_v2 = vld [vmem:[%s15333_s7 + $0x248] sm:$0xff]  ;;  %v8772_v36 = vld [vmem:[%s15333_s7 + $0x210] sm:$0xff]  ;;  %v8769_v14 = vld [vmem:[%s15333_s7 + $0x1f8] sm:$0xff]  ;;  %v7811_v12 = vrot.slane %v14956_v5, 2 }
 0x673   : > { %v8786_v1 = vld [vmem:[%s15333_s7 + $0x260] sm:$0xff]  ;;  %v8785_v42 = vld [vmem:[%s15333_s7 + $0x258] sm:$0xff] }
 0x674   : > { %v8766_v62 = vld [vmem:[%s15333_s7 + $0x1e0] sm:$0xff] }
 0x675   : > { %10189 = vmatmul.mubr.msk.f32.vlgmr.msra.gmra.mxu0 %vm7169_vm12, %v14697_v50  ;;  %10225 = vmatmul.mubr.msk.f32.vlgmr.msra.gmra.mxu1 %vm7169_vm12, %v14700_v21  ;;  %v7482_v50 = vrot.slane %v15014_v33, 3  ;;  %v7651_v21 = vrot.slane %v15014_v33, 4 }
 0x676   : > { %10231 = vmatpush3.msra.mxu0 %v14867_v47  ;;  %10267 = vmatpush3.msra.mxu1 %v14872_v57  ;;  %v8797_v47 = vld [vmem:[%s15333_s7 + $0x2b8] sm:$0xff]  ;;  %v7479_v57 = vsel %vm7119_vm9, %v7478_v29, %v7477_v43  ;;  %v7980_v29 = vrot.slane %v14956_v5, 3  ;;  %v7810_v5 = vsel %vm7107_vm5, %v7809_v54, %v7808_v0  ;;  %v7982_v43 = vrot.slane %v14958_v41, 2  ;;  %v8824_v54 = vld [vmem:[%s15333_s7 + $0x350] sm:$0xff] }
 0x677   : > { %10191 = vmatprep.mubr.msk.f32.mxu0 %vm7169_vm12, %v14919_v45  ;;  %10227 = vmatprep.mubr.msk.f32.mxu1 %vm7169_vm12, %v14922_v60  ;;  %v7481_v45 = vsel %vm7122_vm10, %v7480_v59, %v7479_v57  ;;  %v7650_v60 = vsel %vm7122_vm10, %v7649_v4, %v7648_v53  ;;  %v7812_v59 = vsel %vm7110_vm6, %v7811_v12, %v7810_v5  ;;  %v7984_v4 = vrot.slane %v14970_v49, 1  ;;  %v8805_v0 = vld [vmem:[%s15333_s7 + $0x2d8] sm:$0xff] }
 0x678   : > { %10232 = vmatprep.subr.mxu0 %v8779_v2  ;;  %10268 = vmatprep.subr.mxu1 %v8798_v56  ;;  %v7483_v20 = vsel %vm7125_vm11, %v7482_v50, %v7481_v45  ;;  %v7652_v24 = vsel %vm7125_vm11, %v7651_v21, %v7650_v60  ;;  %v8818_v50 = vld [vmem:[%s15333_s7 + $0x340] sm:$0xff]  ;;  %v7818_v53 = vrot.slane %v15001_v39, 6  ;;  %v7987_v60 = vrot.slane %v15001_v39, 7 }
 0x679   : > { %10233 = vmatpush3.msra.mxu0 %v8779_v2  ;;  %10269 = vmatpush3.msra.mxu1 %v8798_v56  ;;  %v7813_v2 = vrot.slane %v14958_v41, 1  ;;  %v7979_v56 = vsel %vm7107_vm5, %v7978_v16, %v7977_v26  ;;  %v8837_v41 = vld [vmem:[%s15333_s7 + $0x3b8] sm:$0xff]  ;;  %v8804_v26 = vld [vmem:[%s15333_s7 + $0x2d0] sm:$0xff]  ;;  %v8823_v16 = vld [vmem:[%s15333_s7 + $0x348] sm:$0xff] }
 0x67a   : > { %10234 = vmatprep.subr.mxu0 %v8778_v15  ;;  %10270 = vmatprep.subr.mxu1 %v8797_v47  ;;  %v7981_v51 = vsel %vm7110_vm6, %v7980_v29, %v7979_v56 }
 0x67b   : > { %10192 = vmatmul.mubr.msk.f32.gmra.mxu0 %vm7169_vm12, %v7483_v20  ;;  %10228 = vmatmul.mubr.msk.f32.gmra.mxu1 %vm7169_vm12, %v7652_v24  ;;  %v7814_v21 = vsel %vm7113_vm7, %v7813_v2, %v7812_v59  ;;  %v8817_v20 = vld [vmem:[%s15333_s7 + $0x338] sm:$0xff] }
 0x67c   : > { %10235 = vmatpush3.msra.mxu0 %v8778_v15  ;;  %10271 = vmatpush3.msra.mxu1 %v8797_v47  ;;  %v7816_v15 = vrot.slane %v14972_v44, 7  ;;  %v7983_v47 = vsel %vm7113_vm7, %v7982_v43, %v7981_v51  ;;  %v7815_v57 = vsel %vm7116_vm8, %v14970_v49, %v7814_v21  ;;  %v7989_v49 = vrot.slane %v15014_v33, 6 }
 0x67d   : > { %10236 = vmatprep.subr.mxu0 %v8777_v6  ;;  %10260 = vmatprep.mubr.msk.f32.mxu0 %vm7169_vm12, %v14594_v48  ;;  %v8794_v48 = vld [vmem:[%s15333_s7 + $0x2a0] sm:$0xff]  ;;  %v7985_v45 = vsel %vm7116_vm8, %v7984_v4, %v7983_v47 }
 0x67e   : > { %10272 = vmatprep.subr.mxu1 %v8796_v10  ;;  %10296 = vmatprep.mubr.msk.f32.mxu1 %vm7169_vm12, %v14597_v61  ;;  %v8793_v61 = vld [vmem:[%s15333_s7 + $0x298] sm:$0xff]  ;;  %v7817_v39 = vsel %vm7119_vm9, %v7816_v15, %v7815_v57  ;;  %v7986_v24 = vsel %vm7119_vm9, %v14972_v44, %v7985_v45 }
 0x67f   : > { %10237 = vmatpush3.msra.mxu0 %v8777_v6  ;;  %10273 = vmatpush3.msra.mxu1 %v8796_v10  ;;  %v7819_v6 = vsel %vm7122_vm10, %v7818_v53, %v7817_v39  ;;  %v7988_v10 = vsel %vm7122_vm10, %v7987_v60, %v7986_v24 }
 0x680   : > { %10238 = vmatprep.subr.mxu0 %v8776_v37  ;;  %10274 = vmatprep.subr.mxu1 %v8795_v32  ;;  %v7990_v44 = vsel %vm7125_vm11, %v7989_v49, %v7988_v10 }
 0x681   : > { %10239 = vmatpush3.msra.mxu0 %v8776_v37  ;;  %10275 = vmatpush3.msra.mxu1 %v8795_v32  ;;  %v8815_v37 = vld [vmem:[%s15333_s7 + $0x328] sm:$0xff]  ;;  %v8834_v32 = vld [vmem:[%s15333_s7 + $0x3a0] sm:$0xff] }
 0x682   : > { %10240 = vmatprep.subr.mxu0 %v8775_v7  ;;  %10276 = vmatprep.subr.mxu1 %v8794_v48 }
 0x683   : > { %10241 = vmatpush3.msra.mxu0 %v8775_v7  ;;  %10277 = vmatpush3.msra.mxu1 %v8794_v48  ;;  %v8814_v7 = vld [vmem:[%s15333_s7 + $0x320] sm:$0xff]  ;;  %v8833_v48 = vld [vmem:[%s15333_s7 + $0x398] sm:$0xff] }
 0x684   : > { %10242 = vmatprep.subr.mxu0 %v8774_v9  ;;  %10278 = vmatprep.subr.mxu1 %v8793_v61 }
 0x685   : > { %10243 = vmatpush3.msra.mxu0 %v8774_v9  ;;  %10279 = vmatpush3.msra.mxu1 %v8793_v61  ;;  %v8812_v9 = vld [vmem:[%s15333_s7 + $0x310] sm:$0xff]  ;;  %v8831_v61 = vld [vmem:[%s15333_s7 + $0x388] sm:$0xff] }
 0x686   : > { %10244 = vmatprep.subr.mxu0 %v8773_v63  ;;  %10280 = vmatprep.subr.mxu1 %v8792_v30 }
 0x687   : > { %10245 = vmatpush3.msra.mxu0 %v8773_v63  ;;  %10281 = vmatpush3.msra.mxu1 %v8792_v30  ;;  %v8811_v63 = vld [vmem:[%s15333_s7 + $0x308] sm:$0xff]  ;;  %v8830_v30 = vld [vmem:[%s15333_s7 + $0x380] sm:$0xff] }
 0x688   : > { %10246 = vmatprep.subr.mxu0 %v8772_v36  ;;  %10282 = vmatprep.subr.mxu1 %v8791_v23 }
 0x689   : > { %10247 = vmatpush3.msra.mxu0 %v8772_v36  ;;  %10283 = vmatpush3.msra.mxu1 %v8791_v23  ;;  %v8810_v36 = vld [vmem:[%s15333_s7 + $0x300] sm:$0xff]  ;;  %v8829_v23 = vld [vmem:[%s15333_s7 + $0x378] sm:$0xff] }
 0x68a   : > { %10248 = vmatprep.subr.mxu0 %v8771_v31  ;;  %10284 = vmatprep.subr.mxu1 %v8790_v27 }
 0x68b   : > { %10249 = vmatpush3.msra.mxu0 %v8771_v31  ;;  %10285 = vmatpush3.msra.mxu1 %v8790_v27  ;;  %v8809_v31 = vld [vmem:[%s15333_s7 + $0x2f8] sm:$0xff]  ;;  %v8828_v27 = vld [vmem:[%s15333_s7 + $0x370] sm:$0xff] }
 0x68c   : > { %10250 = vmatprep.subr.mxu0 %v8770_v28  ;;  %10286 = vmatprep.subr.mxu1 %v8789_v8 }
 0x68d   : > { %10251 = vmatpush3.msra.mxu0 %v8770_v28  ;;  %10287 = vmatpush3.msra.mxu1 %v8789_v8  ;;  %v8808_v28 = vld [vmem:[%s15333_s7 + $0x2f0] sm:$0xff]  ;;  %v8827_v8 = vld [vmem:[%s15333_s7 + $0x368] sm:$0xff] }
 0x68e   : > { %10252 = vmatprep.subr.mxu0 %v8769_v14  ;;  %10288 = vmatprep.subr.mxu1 %v8788_v22 }
 0x68f   : > { %10253 = vmatpush3.msra.mxu0 %v8769_v14  ;;  %10289 = vmatpush3.msra.mxu1 %v8788_v22  ;;  %v8807_v14 = vld [vmem:[%s15333_s7 + $0x2e8] sm:$0xff]  ;;  %v8826_v22 = vld [vmem:[%s15333_s7 + $0x360] sm:$0xff] }
 0x690   : > { %10254 = vmatprep.subr.mxu0 %v8768_v25  ;;  %10290 = vmatprep.subr.mxu1 %v8787_v38 }
 0x691   : > { %10255 = vmatpush3.msra.mxu0 %v8768_v25  ;;  %10291 = vmatpush3.msra.mxu1 %v8787_v38  ;;  %v8806_v25 = vld [vmem:[%s15333_s7 + $0x2e0] sm:$0xff]  ;;  %v8825_v38 = vld [vmem:[%s15333_s7 + $0x358] sm:$0xff] }
 0x692   : > { %10256 = vmatprep.subr.mxu0 %v8767_v46  ;;  %10292 = vmatprep.subr.mxu1 %v8786_v1 }
 0x693   : > { %10257 = vmatpush3.msra.mxu0 %v8767_v46  ;;  %10293 = vmatpush3.msra.mxu1 %v8786_v1 }
 0x694   : > { %10258 = vmatprep.subr.mxu0 %v8766_v62  ;;  %10294 = vmatprep.subr.mxu1 %v8785_v42 }
 0x695   : > { %10259 = vmatpush3.msra.mxu0 %v8766_v62  ;;  %10295 = vmatpush3.msra.mxu1 %v8785_v42 }
 0x696   : > { %10261 = vmatmul.mubr.msk.f32.vlgmr.msra.gmra.mxu0 %vm7169_vm12, %v14722_v19  ;;  %10297 = vmatmul.mubr.msk.f32.vlgmr.msra.gmra.mxu1 %vm7169_vm12, %v14725_v18  ;;  %v8836_v19 = vld [vmem:[%s15333_s7 + $0x3b0] sm:$0xff]  ;;  %v7820_v18 = vrot.slane %v15014_v33, 5 }
 0x697   : > { %10302 = vmatprep.subr.mxu0 %v8818_v50  ;;  %10338 = vmatprep.subr.mxu1 %v8837_v41 }
 0x698   : > { %10263 = vmatprep.mubr.msk.f32.mxu0 %vm7169_vm12, %v14930_v17  ;;  %10299 = vmatprep.mubr.msk.f32.mxu1 %vm7169_vm12, %v14933_v13  ;;  %v8816_v17 = vld [vmem:[%s15333_s7 + $0x330] sm:$0xff]  ;;  %v8835_v13 = vld [vmem:[%s15333_s7 + $0x3a8] sm:$0xff]  ;;  %v7821_v33 = vsel %vm7125_vm11, %v7820_v18, %v7819_v6 }
 0x699   : > { %10303 = vmatpush3.msra.mxu0 %v8818_v50  ;;  %10339 = vmatpush3.msra.mxu1 %v8837_v41 }
 0x69a   : > { %10304 = vmatprep.subr.mxu0 %v8817_v20  ;;  %10340 = vmatprep.subr.mxu1 %v8836_v19 }
 0x69b   : > { %10305 = vmatpush3.msra.mxu0 %v8817_v20  ;;  %10341 = vmatpush3.msra.mxu1 %v8836_v19 }
 0x69c   : > { %10264 = vmatmul.mubr.msk.f32.gmra.mxu0 %vm7169_vm12, %v7821_v33  ;;  %10300 = vmatmul.mubr.msk.f32.gmra.mxu1 %vm7169_vm12, %v7990_v44 }
 0x69d   : > { %10306 = vmatprep.subr.mxu0 %v8816_v17  ;;  %10342 = vmatprep.subr.mxu1 %v8835_v13 }
 0x69e   : > { %10307 = vmatpush3.msra.mxu0 %v8816_v17  ;;  %10332 = vmatprep.mubr.msk.f32.mxu0 %vm7169_vm12, %v14600_v55  ;;  %v8813_v55 = vld [vmem:[%s15333_s7 + $0x318] sm:$0xff] }
 0x69f   : > { %10343 = vmatpush3.msra.mxu1 %v8835_v13  ;;  %10368 = vmatprep.mubr.msk.f32.mxu1 %vm7169_vm12, %v14605_v40  ;;  %v8832_v40 = vld [vmem:[%s15333_s7 + $0x390] sm:$0xff] }
 0x6a0   : > { %10308 = vmatprep.subr.mxu0 %v8815_v37  ;;  %10344 = vmatprep.subr.mxu1 %v8834_v32 }
 0x6a1   : > { %10309 = vmatpush3.msra.mxu0 %v8815_v37  ;;  %10345 = vmatpush3.msra.mxu1 %v8834_v32 }
 0x6a2   : > { %10310 = vmatprep.subr.mxu0 %v8814_v7  ;;  %10346 = vmatprep.subr.mxu1 %v8833_v48 }
 0x6a3   : > { %10311 = vmatpush3.msra.mxu0 %v8814_v7  ;;  %10347 = vmatpush3.msra.mxu1 %v8833_v48 }
 0x6a4   : > { %10312 = vmatprep.subr.mxu0 %v8813_v55  ;;  %10348 = vmatprep.subr.mxu1 %v8832_v40 }
 0x6a5   : > { %10313 = vmatpush3.msra.mxu0 %v8813_v55  ;;  %10349 = vmatpush3.msra.mxu1 %v8832_v40 }
 0x6a6   : > { %10314 = vmatprep.subr.mxu0 %v8812_v9  ;;  %10350 = vmatprep.subr.mxu1 %v8831_v61 }
 0x6a7   : > { %10315 = vmatpush3.msra.mxu0 %v8812_v9  ;;  %10351 = vmatpush3.msra.mxu1 %v8831_v61 }
 0x6a8   : > { %10316 = vmatprep.subr.mxu0 %v8811_v63  ;;  %10352 = vmatprep.subr.mxu1 %v8830_v30 }
 0x6a9   : > { %10317 = vmatpush3.msra.mxu0 %v8811_v63  ;;  %10353 = vmatpush3.msra.mxu1 %v8830_v30 }
 0x6aa   : > { %10318 = vmatprep.subr.mxu0 %v8810_v36  ;;  %10354 = vmatprep.subr.mxu1 %v8829_v23 }
 0x6ab   : > { %10319 = vmatpush3.msra.mxu0 %v8810_v36  ;;  %10355 = vmatpush3.msra.mxu1 %v8829_v23 }
 0x6ac   : > { %10320 = vmatprep.subr.mxu0 %v8809_v31  ;;  %10356 = vmatprep.subr.mxu1 %v8828_v27 }
 0x6ad   : > { %10321 = vmatpush3.msra.mxu0 %v8809_v31  ;;  %10357 = vmatpush3.msra.mxu1 %v8828_v27  ;;  %v8842_v27 = vld [vmem:[%s15334_s8] ss:$0 sm:$0xff] }
 0x6ae   : > { %10322 = vmatprep.subr.mxu0 %v8808_v28  ;;  %10358 = vmatprep.subr.mxu1 %v8827_v8 }
 0x6af   : > { %10323 = vmatpush3.msra.mxu0 %v8808_v28  ;;  %10359 = vmatpush3.msra.mxu1 %v8827_v8 }
 0x6b0   : > { %10324 = vmatprep.subr.mxu0 %v8807_v14  ;;  %10360 = vmatprep.subr.mxu1 %v8826_v22 }
 0x6b1   : > { %10325 = vmatpush3.msra.mxu0 %v8807_v14  ;;  %10361 = vmatpush3.msra.mxu1 %v8826_v22 }
 0x6b2   : > { %10326 = vmatprep.subr.mxu0 %v8806_v25  ;;  %10362 = vmatprep.subr.mxu1 %v8825_v38 }
 0x6b3   : > { %10327 = vmatpush3.msra.mxu0 %v8806_v25  ;;  %10363 = vmatpush3.msra.mxu1 %v8825_v38 }
 0x6b4   : > { %10328 = vmatprep.subr.mxu0 %v8805_v0  ;;  %10364 = vmatprep.subr.mxu1 %v8824_v54 }
 0x6b5   : > { %10329 = vmatpush3.msra.mxu0 %v8805_v0  ;;  %10365 = vmatpush3.msra.mxu1 %v8824_v54 }
 0x6b6   : > { %10330 = vmatprep.subr.mxu0 %v8804_v26  ;;  %10366 = vmatprep.subr.mxu1 %v8823_v16 }
 0x6b7   : > { %10331 = vmatpush3.msra.mxu0 %v8804_v26  ;;  %10367 = vmatpush3.msra.mxu1 %v8823_v16 }
 0x6b8   : > { %10333 = vmatmul.mubr.msk.f32.vlgmr.msra.gmra.mxu0 %vm7169_vm12, %v14728_v58  ;;  %10369 = vmatmul.mubr.msk.f32.vlgmr.msra.gmra.mxu1 %vm7169_vm12, %v14740_v34 }
 0x6b9   : > { %10335 = vmatprep.mubr.msk.f32.mxu0 %vm7169_vm12, %v14936_v35  ;;  %10371 = vmatprep.mubr.msk.f32.mxu1 %vm7169_vm12, %v14941_v11 }
 0x6bc   : > { %10336 = vmatmul.mubr.msk.f32.gmra.mxu0 %vm7169_vm12, %v15045_v3  ;;  %10372 = vmatmul.mubr.msk.f32.gmra.mxu1 %vm7169_vm12, %v15055_v52 }
 0x6c6   : > { %v10118_v12 = vpop.f32.mrf.mxu0  ;;  %v10154_v29 = vpop.f32.mrf.mxu1 }
 0x6c7   : > { %v7399_v52 = vadd.f32 %v10154_v29, %v10118_v12 }
 0x6c8   : > { %v7244_v46 = vpop.f32.mrf.mxu0  ;;  %v7393_v1 = vpop.f32.mrf.mxu1 }
 0x6c9   : > { %v7394_v50 = vadd.f32 %v7393_v1, %v7244_v46 }
 0x731   : > { %v10121_v58 = vpop.f32.mrf.mxu0  ;;  %v10157_v62 = vpop.f32.mrf.mxu1 }
 0x732   : > { %v7409_v47 = vadd.f32 %v10157_v62, %v10121_v58 }
 0x733   : > { %v7254_v42 = vpop.f32.mrf.mxu0  ;;  %v7403_v34 = vpop.f32.mrf.mxu1 }
 0x734   : > { %v7404_v53 = vadd.f32 %v7403_v34, %v7254_v42 }
 0x735   : > { %v10190_v5 = vpop.f32.mrf.mxu0  ;;  %v10226_v2 = vpop.f32.mrf.mxu1 }
 0x736   : > { %v7578_v41 = vadd.f32 %v10190_v5, %v7399_v52 }
 0x737   : > { %v7558_v35 = vpop.f32.mrf.mxu0  ;;  %v7727_v56 = vpop.f32.mrf.mxu1 }
 0x738   : > { %v7577_v57 = vadd.f32 %v7558_v35, %v7394_v50  ;;  %v7747_v45 = vadd.f32 %v10226_v2, %v7578_v41 }
 0x73a   : > { %v7746_v18 = vadd.f32 %v7727_v56, %v7577_v57 }
 0x73b   : > { %v10193_v11 = vpop.f32.mrf.mxu0  ;;  %v10229_v43 = vpop.f32.mrf.mxu1 }
 0x73c   : > { %v7580_v60 = vadd.f32 %v10193_v11, %v7409_v47 }
 0x73d   : > { %v7568_v59 = vpop.f32.mrf.mxu0  ;;  %v7737_v3 = vpop.f32.mrf.mxu1 }
 0x73e   : > { %v7579_v49 = vadd.f32 %v7568_v59, %v7404_v53  ;;  %v7749_v24 = vadd.f32 %v10229_v43, %v7580_v60 }
 0x740   : > { %v7748_v13 = vadd.f32 %v7737_v3, %v7579_v49 }
 0x756   : > { %v10262_v51 = vpop.f32.mrf.mxu0  ;;  %v10298_v4 = vpop.f32.mrf.mxu1 }
 0x757   : > { %v7916_v39 = vadd.f32 %v10262_v51, %v7747_v45 }
 0x758   : > { %v7896_v21 = vpop.f32.mrf.mxu0  ;;  %v8065_v15 = vpop.f32.mrf.mxu1 }
 0x759   : > { %v7915_v6 = vadd.f32 %v7896_v21, %v7746_v18  ;;  %v8085_v33 = vadd.f32 %v10298_v4, %v7916_v39 }
 0x75b   : > { %v8084_v7 = vadd.f32 %v8065_v15, %v7915_v6 }
 0x75c   : > { %v10265_v20 = vpop.f32.mrf.mxu0  ;;  %v10301_v19 = vpop.f32.mrf.mxu1 }
 0x75d   : > { %v7918_v44 = vadd.f32 %v10265_v20, %v7749_v24 }
 0x75e   : > { %v7906_v10 = vpop.f32.mrf.mxu0  ;;  %v8075_v17 = vpop.f32.mrf.mxu1 }
 0x75f   : > { %v7917_v48 = vadd.f32 %v7906_v10, %v7748_v13  ;;  %v8087_v61 = vadd.f32 %v10301_v19, %v7918_v44 }
 0x761   : > { %v8086_v31 = vadd.f32 %v8075_v17, %v7917_v48 }
 0x778   : > { %v10334_v37 = vpop.f32.mrf.mxu0  ;;  %v10370_v32 = vpop.f32.mrf.mxu1 }
 0x779   : > { %v8254_v55 = vadd.f32 %v10334_v37, %v8085_v33 }
 0x77a   : > { %v8234_v40 = vpop.f32.mrf.mxu0  ;;  %v8403_v9 = vpop.f32.mrf.mxu1 }
 0x77b   : > { %v8253_v63 = vadd.f32 %v8234_v40, %v8084_v7  ;;  %v8423_v30 = vadd.f32 %v10370_v32, %v8254_v55 }
 0x77c   : > { %v10337_v36 = vpop.f32.mrf.mxu0  ;;  %v10373_v23 = vpop.f32.mrf.mxu1 }
 0x77d   : > { %v8422_v28 = vadd.f32 %v8403_v9, %v8253_v63  ;;  %v8256_v8 = vadd.f32 %v10337_v36, %v8087_v61  ;;  %v8434_v38 = vadd.f32 %v8842_v27, %v8423_v30 }
 0x77e   : > { %v8244_v14 = vpop.f32.mrf.mxu0  ;;  %v8413_v54 = vpop.f32.mrf.mxu1 }
 0x77f   : > { %v8433_v22 = vadd.f32 %v8842_v27, %v8422_v28  ;;  %v8255_v25 = vadd.f32 %v8244_v14, %v8086_v31  ;;  %v8425_v0 = vadd.f32 %v10373_v23, %v8256_v8  ;;  %8439 = vst.msk [vmem:[%s337_s23 + $0x8] sm:$0xff] %vm8437_vm13, %v8434_v38 }
 0x781   : > { %8438 = vst.msk [vmem:[%s337_s23] sm:$0xff] %vm8437_vm13, %v8433_v22  ;;  %v8424_v26 = vadd.f32 %v8413_v54, %v8255_v25  ;;  %v8436_v12 = vadd.f32 %v8842_v27, %v8425_v0 }
 0x783   : > { %v8435_v16 = vadd.f32 %v8842_v27, %v8424_v26  ;;  %8441 = vst.msk [vmem:[%s337_s23 + $0x18] sm:$0xff] %vm8437_vm13, %v8436_v12 }
 0x785   : > { %8440 = vst.msk [vmem:[%s337_s23 + $0x10] sm:$0xff] %vm8437_vm13, %v8435_v16 }
 0x786 PF: > { %s19_s30 = sadd.s32 1, %s10506_s30  }
 0x787   : > { %p16_p5 = scmp.ge.s32.totalorder %s19_s30, 4  }
 0x789   :  { %18 = sbr.rel (!%p16_p5) target bundleno = 1 (0x1), region = 93 }

</bundles_post_ra>
